<compile_context>
chip_gen: v6e
topology: v6e:2x2x1
jax: 0.10.0
libtpu: 0.0.40
codegen_flags: <defaults>
</compile_context>

<pallas_src>
import jax
import jax.numpy as jnp
from jax.experimental import pallas as pl
from jax.experimental.pallas import tpu as pltpu

LATENT_DIM = 100
HIDDEN_DIMS = [1024, 512]          # as in the PyTorch script (reversed inside __init__)
OUTPUT_DIM = 1
DROPOUT_PROB = 0.1                 # unused at inference

_K_PAD = 128                       # latent contraction dim padded 100 -> 128
_W3_ROWS = 8                       # output-layer M padded 1 -> 8 (sublane granule)
_MIN_TILE = 256                    # one 256-wide MXU N pass (v6e/v7x); fine on v5e too
_MAX_TILE = 2048                   # keep f32 intermediates under v7x's 64 MiB VMEM


def _round_up(n, m):
    return ((n + m - 1) // m) * m


def disc_kernel(x_ref, w1_ref, b1_ref, w2_ref, b2_ref, w3_ref, b3_ref, o_ref):
    # ---- layer 1: Linear(100pad -> 512) + ReLU (Dropout: identity in eval) ----
    # bf16 x bf16 MXU matmul, f32 accumulation.  Shapes: (512,128)@(128,T)->(512,T)
    h1 = jnp.dot(w1_ref[...], x_ref[...], preferred_element_type=jnp.float32)
    h1 = jnp.maximum(h1 + b1_ref[...], 0.0)

    # ---- layer 2: Linear(512 -> 1024) + Sigmoid (Dropout: identity) ----
    # (1024,512)@(512,T)->(1024,T); sigmoid = 1/(1+exp(-x)) rides the EUP slot.
    h2 = jnp.dot(w2_ref[...], h1.astype(jnp.bfloat16),
                 preferred_element_type=jnp.float32)
    h2 = pl.reciprocal(1.0 + jnp.exp(-(h2 + b2_ref[...])), approx=True)

    # ---- output layer: Linear(1024 -> 1) + Sigmoid, on the MXU ----
    # W3^T is padded to 8 sublanes; (8,1024)@(1024,T)->(8,T), row 0 is the real
    # output and is already lane-major, so the store below is a full-width vst.
    y8 = jnp.dot(w3_ref[...], h2.astype(jnp.bfloat16),
                 preferred_element_type=jnp.float32)
    y = y8[0:1, :] + b3_ref[...]                     # (1, T)
    o_ref[...] = pl.reciprocal(1.0 + jnp.exp(-y), approx=True)


def prepare_params(params):
    """One-time repack of f32 master params into kernel layout (hoisted out of
    the per-call path per the review).

    Returns (w1t, b1c, w2t, b2c, w3p, b3):
      w1t : (512, 128)  bf16  W1^T, latent dim zero-padded 100 -> 128
      b1c : (512, 1)    f32
      w2t : (1024, 512) bf16  W2^T
      b2c : (1024, 1)   f32
      w3p : (8, 1024)   bf16  W3^T in row 0, rows 1..7 zero (MXU sublane pad)
      b3  : (1, 1)      f32
    """
    w1, b1, w2, b2, w3, b3 = params
    d0, d1 = w1.shape
    d2 = w2.shape[1]
    w1t = jnp.zeros((d1, _K_PAD), jnp.bfloat16).at[:, :d0].set(
        jnp.transpose(w1).astype(jnp.bfloat16))
    b1c = b1.reshape(d1, 1).astype(jnp.float32)
    w2t = jnp.transpose(w2).astype(jnp.bfloat16)
    b2c = b2.reshape(d2, 1).astype(jnp.float32)
    w3p = jnp.zeros((_W3_ROWS, d2), jnp.bfloat16).at[0, :].set(
        w3[:, 0].astype(jnp.bfloat16))
    b3c = b3.reshape(1, 1).astype(jnp.float32)
    return (w1t, b1c, w2t, b2c, w3p, b3c)


def _pick_batch_tile(B, batch_tile):
    """Adaptive tile: big enough to amortize the ~0.35us/step overhead, capped
    for v7x VMEM, and >=2 grid steps when possible (v7x has 2 TCs to feed)."""
    bt = int(min(batch_tile, _MAX_TILE))
    bt = min(bt, _round_up(B, _MIN_TILE))
    bt = max(_MIN_TILE, (bt // _MIN_TILE) * _MIN_TILE)
    n_min_tiles = _round_up(B, _MIN_TILE) // _MIN_TILE
    if _round_up(B, bt) // bt < 2 and n_min_tiles >= 2:
        bt = max(_MIN_TILE, ((n_min_tiles + 1) // 2) * _MIN_TILE)
    return bt


def discriminator_forward(x, prepared, *, batch_tile=1024):
    """x: [B, latent_dim] float32. Returns [B, 1] float32."""
    w1t, b1c, w2t, b2c, w3p, b3 = prepared
    B, D0 = x.shape
    D1, K = w1t.shape          # 512, 128
    D2 = w2t.shape[0]          # 1024
    assert D0 <= K

    bt = _pick_batch_tile(B, batch_tile)
    Bp = _round_up(B, bt)
    grid = (Bp // bt,)

    # Per-call input prep only: pad latent 100 -> 128, batch B -> Bp, and lay the
    # input out feature-major (K, Bp) so batch rides the lane axis in the kernel.
    x_t = jnp.zeros((K, Bp), jnp.bfloat16).at[:D0, :B].set(
        jnp.transpose(x).astype(jnp.bfloat16))

    resident = lambda i: (0, 0)    # constant index_map: weights stay pinned in VMEM

    out = pl.pallas_call(
        disc_kernel,
        out_shape=jax.ShapeDtypeStruct((1, Bp), jnp.float32),
        grid=grid,
        in_specs=[
            pl.BlockSpec((K, bt), lambda i: (0, i)),   # x tile (feature-major)
            pl.BlockSpec((D1, K), resident),           # W1^T  bf16, resident
            pl.BlockSpec((D1, 1), resident),           # b1    f32
            pl.BlockSpec((D2, D1), resident),          # W2^T  bf16, resident
            pl.BlockSpec((D2, 1), resident),           # b2    f32
            pl.BlockSpec((_W3_ROWS, D2), resident),    # W3^T (8-row pad) bf16
            pl.BlockSpec((1, 1), resident),            # b3    f32
        ],
        out_specs=pl.BlockSpec((1, bt), lambda i: (0, i)),   # lane-dense output row
        compiler_params=pltpu.CompilerParams(
            dimension_semantics=("parallel",),         # batch tiles shard across TCs
            vmem_limit_bytes=32 * 1024 * 1024,         # v5e default is 16 MiB; raise
        ),
    )(x_t, w1t, b1c, w2t, b2c, w3p, b3)

    return out[0, :B].reshape(B, OUTPUT_DIM)


def init_params(key):
    """Deterministic init mimicking nn.Linear (uniform +-1/sqrt(fan_in)), f32 masters."""
    dims = [LATENT_DIM] + list(reversed(HIDDEN_DIMS)) + [OUTPUT_DIM]  # 100,512,1024,1
    params = []
    keys = jax.random.split(key, len(dims) - 1)
    for k, (d_in, d_out) in zip(keys, zip(dims[:-1], dims[1:])):
        kw, kb = jax.random.split(k)
        bound = 1.0 / jnp.sqrt(float(d_in))
        w = jax.random.uniform(kw, (d_in, d_out), jnp.float32, -bound, bound)
        b = jax.random.uniform(kb, (1, d_out), jnp.float32, -bound, bound)
        params.extend([w, b])
    return tuple(params)


def reference_forward(x, params):
    """Pure-f32 JAX reference of the PyTorch module (eval mode)."""
    w1, b1, w2, b2, w3, b3 = params
    h = jnp.maximum(x @ w1 + b1, 0.0)
    h = jax.nn.sigmoid(h @ w2 + b2)
    return jax.nn.sigmoid(h @ w3 + b3)


if __name__ == "__main__":
    key = jax.random.PRNGKey(0)
    k_params, k_x = jax.random.split(key)

    params = init_params(k_params)
    prepared = prepare_params(params)      # one-time weight cast/pad/transpose

    B = 8
    x = jax.random.normal(k_x, (B, LATENT_DIM), dtype=jnp.float32)

    out = discriminator_forward(x, prepared)
    out = jax.block_until_ready(out)

    ref = reference_forward(x, params)
    assert out.shape == (B, OUTPUT_DIM)
    # bf16 weights/activations + approx reciprocal vs f32 reference: outputs are
    # sigmoids in [0, 1], so a 2e-2 absolute tolerance is comfortably sufficient.
    max_err = float(jnp.max(jnp.abs(out - ref)))
    assert max_err < 2e-2, f"max abs err {max_err}"

    print("KERNEL_OK")
</pallas_src>

<mosaic_0001>
module attributes {stable_mosaic.version = 11 : i64} {
  func.func @disc_kernel(%arg0: i32, %arg1: memref<128x256xbf16, #tpu.memory_space<vmem>>, %arg2: memref<512x128xbf16, #tpu.memory_space<vmem>>, %arg3: memref<512x1xf32, #tpu.memory_space<vmem>>, %arg4: memref<1024x512xbf16, #tpu.memory_space<vmem>>, %arg5: memref<1024x1xf32, #tpu.memory_space<vmem>>, %arg6: memref<8x1024xbf16, #tpu.memory_space<vmem>>, %arg7: memref<1x1xf32, #tpu.memory_space<vmem>>, %arg8: memref<1x256xf32, #tpu.memory_space<vmem>>) attributes {dimension_semantics = [#tpu.dimension_semantics<parallel>], iteration_bounds = array<i64: 1>, scalar_prefetch = 0 : i64, scratch_operands = 0 : i64, tpu.core_type = #tpu.core_type<tc>, window_params = [{transform_indices = @transform_0, window_bounds = array<i64: 128, 256>}, {pipeline_mode = #tpu.pipeline_mode<synchronous>, transform_indices = @transform_1, window_bounds = array<i64: 512, 128>}, {pipeline_mode = #tpu.pipeline_mode<synchronous>, transform_indices = @transform_2, window_bounds = array<i64: 512, 1>}, {pipeline_mode = #tpu.pipeline_mode<synchronous>, transform_indices = @transform_3, window_bounds = array<i64: 1024, 512>}, {pipeline_mode = #tpu.pipeline_mode<synchronous>, transform_indices = @transform_4, window_bounds = array<i64: 1024, 1>}, {pipeline_mode = #tpu.pipeline_mode<synchronous>, transform_indices = @transform_5, window_bounds = array<i64: 8, 1024>}, {pipeline_mode = #tpu.pipeline_mode<synchronous>, transform_indices = @transform_6, window_bounds = array<i64: 1, 1>}, {transform_indices = @transform_7, window_bounds = array<i64: 1, 256>}]} {
    %c0 = arith.constant 0 : index
    %c0_0 = arith.constant 0 : index
    %0 = vector.load %arg2[%c0, %c0_0] : memref<512x128xbf16, #tpu.memory_space<vmem>>, vector<512x128xbf16>
    %c0_1 = arith.constant 0 : index
    %c0_2 = arith.constant 0 : index
    %1 = vector.load %arg1[%c0_1, %c0_2] : memref<128x256xbf16, #tpu.memory_space<vmem>>, vector<128x256xbf16>
    %cst = arith.constant dense<0.000000e+00> : vector<512x256xf32>
    %2 = tpu.matmul %0, %1, %cst {dimension_numbers = #tpu.dot_dimension_numbers<[1], [0], [0], [1], [0, 0, 1, 1], [], []>} : vector<512x128xbf16>, vector<128x256xbf16>, vector<512x256xf32> -> vector<512x256xf32>
    %c0_3 = arith.constant 0 : index
    %c0_4 = arith.constant 0 : index
    %3 = vector.load %arg3[%c0_3, %c0_4] : memref<512x1xf32, #tpu.memory_space<vmem>>, vector<512x1xf32>
    %4 = vector.broadcast %3 : vector<512x1xf32> to vector<512x256xf32>
    %5 = arith.addf %2, %4 : vector<512x256xf32>
    %cst_5 = arith.constant 0.000000e+00 : f32
    %6 = vector.broadcast %cst_5 : f32 to vector<512x256xf32>
    %7 = arith.maximumf %5, %6 : vector<512x256xf32>
    %c0_6 = arith.constant 0 : index
    %c0_7 = arith.constant 0 : index
    %8 = vector.load %arg4[%c0_6, %c0_7] : memref<1024x512xbf16, #tpu.memory_space<vmem>>, vector<1024x512xbf16>
    %9 = arith.truncf %7 : vector<512x256xf32> to vector<512x256xbf16>
    %cst_8 = arith.constant dense<0.000000e+00> : vector<1024x256xf32>
    %10 = tpu.matmul %8, %9, %cst_8 {dimension_numbers = #tpu.dot_dimension_numbers<[1], [0], [0], [1], [0, 0, 1, 1], [], []>} : vector<1024x512xbf16>, vector<512x256xbf16>, vector<1024x256xf32> -> vector<1024x256xf32>
    %c0_9 = arith.constant 0 : index
    %c0_10 = arith.constant 0 : index
    %11 = vector.load %arg5[%c0_9, %c0_10] : memref<1024x1xf32, #tpu.memory_space<vmem>>, vector<1024x1xf32>
    %12 = vector.broadcast %11 : vector<1024x1xf32> to vector<1024x256xf32>
    %13 = arith.addf %10, %12 : vector<1024x256xf32>
    %cst_11 = arith.constant 0.000000e+00 : f32
    %14 = vector.broadcast %cst_11 : f32 to vector<1024x256xf32>
    %15 = arith.subf %14, %13 : vector<1024x256xf32>
    %16 = math.exp %15 : vector<1024x256xf32>
    %cst_12 = arith.constant 1.000000e+00 : f32
    %17 = vector.broadcast %cst_12 : f32 to vector<1024x256xf32>
    %18 = arith.addf %17, %16 : vector<1024x256xf32>
    %19 = tpu.reciprocal %18 {approx = true} : vector<1024x256xf32> -> vector<1024x256xf32>
    %c0_13 = arith.constant 0 : index
    %c0_14 = arith.constant 0 : index
    %20 = vector.load %arg6[%c0_13, %c0_14] : memref<8x1024xbf16, #tpu.memory_space<vmem>>, vector<8x1024xbf16>
    %21 = arith.truncf %19 : vector<1024x256xf32> to vector<1024x256xbf16>
    %cst_15 = arith.constant dense<0.000000e+00> : vector<8x256xf32>
    %22 = tpu.matmul %20, %21, %cst_15 {dimension_numbers = #tpu.dot_dimension_numbers<[1], [0], [0], [1], [0, 0, 1, 1], [], []>} : vector<8x1024xbf16>, vector<1024x256xbf16>, vector<8x256xf32> -> vector<8x256xf32>
    %23 = vector.extract_strided_slice %22 {offsets = [0, 0], sizes = [1, 256], strides = [1, 1]} : vector<8x256xf32> to vector<1x256xf32>
    %c0_16 = arith.constant 0 : index
    %c0_17 = arith.constant 0 : index
    %24 = vector.load %arg7[%c0_16, %c0_17] : memref<1x1xf32, #tpu.memory_space<vmem>>, vector<1x1xf32>
    %25 = vector.broadcast %24 : vector<1x1xf32> to vector<1x256xf32>
    %26 = arith.addf %23, %25 : vector<1x256xf32>
    %cst_18 = arith.constant 0.000000e+00 : f32
    %27 = vector.broadcast %cst_18 : f32 to vector<1x256xf32>
    %28 = arith.subf %27, %26 : vector<1x256xf32>
    %29 = math.exp %28 : vector<1x256xf32>
    %cst_19 = arith.constant 1.000000e+00 : f32
    %30 = vector.broadcast %cst_19 : f32 to vector<1x256xf32>
    %31 = arith.addf %30, %29 : vector<1x256xf32>
    %32 = tpu.reciprocal %31 {approx = true} : vector<1x256xf32> -> vector<1x256xf32>
    %c0_20 = arith.constant 0 : index
    %c0_21 = arith.constant 0 : index
    %33 = vector.load %arg8[%c0_20, %c0_21] : memref<1x256xf32, #tpu.memory_space<vmem>>, vector<1x256xf32>
    tpu.vector_store %arg8[%c0_20, %c0_21], %32 {strides = array<i32>} : memref<1x256xf32, #tpu.memory_space<vmem>>, vector<1x256xf32>,
    return
  }
  func.func @transform_0(%arg0: i32) -> (i32, i32) {
    %c0_i32 = arith.constant 0 : i32
    %c0_i32_0 = arith.constant 0 : i32
    return %c0_i32, %arg0 : i32, i32
  }
  func.func @transform_1(%arg0: i32) -> (i32, i32) {
    %c0_i32 = arith.constant 0 : i32
    %c0_i32_0 = arith.constant 0 : i32
    %c0_i32_1 = arith.constant 0 : i32
    return %c0_i32, %c0_i32_0 : i32, i32
  }
  func.func @transform_2(%arg0: i32) -> (i32, i32) {
    %c0_i32 = arith.constant 0 : i32
    %c0_i32_0 = arith.constant 0 : i32
    %c0_i32_1 = arith.constant 0 : i32
    return %c0_i32, %c0_i32_0 : i32, i32
  }
  func.func @transform_3(%arg0: i32) -> (i32, i32) {
    %c0_i32 = arith.constant 0 : i32
    %c0_i32_0 = arith.constant 0 : i32
    %c0_i32_1 = arith.constant 0 : i32
    return %c0_i32, %c0_i32_0 : i32, i32
  }
  func.func @transform_4(%arg0: i32) -> (i32, i32) {
    %c0_i32 = arith.constant 0 : i32
    %c0_i32_0 = arith.constant 0 : i32
    %c0_i32_1 = arith.constant 0 : i32
    return %c0_i32, %c0_i32_0 : i32, i32
  }
  func.func @transform_5(%arg0: i32) -> (i32, i32) {
    %c0_i32 = arith.constant 0 : i32
    %c0_i32_0 = arith.constant 0 : i32
    %c0_i32_1 = arith.constant 0 : i32
    return %c0_i32, %c0_i32_0 : i32, i32
  }
  func.func @transform_6(%arg0: i32) -> (i32, i32) {
    %c0_i32 = arith.constant 0 : i32
    %c0_i32_0 = arith.constant 0 : i32
    %c0_i32_1 = arith.constant 0 : i32
    return %c0_i32, %c0_i32_0 : i32, i32
  }
  func.func @transform_7(%arg0: i32) -> (i32, i32) {
    %c0_i32 = arith.constant 0 : i32
    %c0_i32_0 = arith.constant 0 : i32
    return %c0_i32, %arg0 : i32, i32
  }
}

</mosaic_0001>

<bundles_post_ra>
// kernel: tpu_custom_call.1
= control target key start
LH: loop header
LB: loop body
LE: loop exit
PB: predicated region body
PF: predicated region fallthrough
CT: control target
= control target key end

     0   :  { %s11996_s0 = inlined_call_operand.vmem [shape: bf16[128,256], index: 0, kind: input, shape index: {}]   ;;  %s11997_s1 = inlined_call_operand.vmem [shape: bf16[512,128], index: 1, kind: input, shape index: {}]   ;;  %s11998_s2 = inlined_call_operand.vmem [shape: f32[512,1], index: 2, kind: input, shape index: {}]   ;;  %s11999_s3 = inlined_call_operand.hbm [shape: bf16[1024,512], index: 3, kind: input, shape index: {}]   ;;  %s12000_s4 = inlined_call_operand.vmem [shape: f32[1024,1], index: 4, kind: input, shape index: {}]   ;;  %s12001_s5 = inlined_call_operand.vmem [shape: bf16[8,1024], index: 5, kind: input, shape index: {}]   ;;  %s12002_s6 = inlined_call_operand.<no memory space> [shape: f32[1,1], index: 6, kind: input, shape index: {}]   ;;  %s12003_s7 = inlined_call_operand.hbm [shape: f32[1,256], index: 7, kind: output, shape index: {}]  }
   0x1   :  { %v12_v0 = vstv %s12002_s6 }
   0x2   :  { %13 = vst [vmem:[#allocation2] sm:$0x1] %v12_v0 }
   0x3   :  { %14 = vsyncpa [#allocation4], 0 }
   0x4   :  { %15 = vsyncpa [#allocation5], 0  ;;  %s8485_s26 = smov [#allocation3]  }
   0x5   :  { %s27_s27 = sshll.u32 %s8485_s26, 4  ;;  %s28_s27 = int_to_ptr.vmem [resolvable:$true] %s27_s27 }
   0x6   :  { %s8449_s28 = scalar_lea.vmem %s28_s27, 32768  ;;  %p8454_p1 = scmp.lt.s32.totalorder %s28_s27, %s28_s27 }
   0x7   :  { %p8450_p0 = scmp.ne.s32.totalorder %s28_s27, %s8449_s28  ;;  %p8455_p2 = scmp.lt.s32.totalorder %s8449_s28, %s8449_s28 }
   0x9   :  { %p8456_p3 = por %p8455_p2, %p8454_p1 }
   0xb   :  { %p8457_p4 = pnand %p8456_p3, %p8450_p0 }
   0xd   :  { %8460 = shalt.err (!%p8457_p4)
}
   0xe   :  { %s8486_s29 = smov 256   ;;  %s8487_s30 = smov 16  }
   0xf   :  { %33 = dma.hbm_to_vmem [thread:$0]  %s11999_s3, 32768, %s28_s27, [#allocation4], %s8486_s29, %s8486_s29, %s8487_s30  }
  0x10   :  { %8481 = dma.done.wait [#allocation4], 32768  }
  0x11   :  { %8482 = vsyncadd [#allocation4], 4294934528  ;;  %v12005_v1 = vmov 0   ;;  %v170_v2 = vld [vmem:[%s11998_s2 + $0x170] sm:$0xff]  ;;  %v171_v6 = vld [vmem:[%s11998_s2 + $0x178] sm:$0xff] }
  0x12   :  { %6958 = vset.pattern.permute.xlu1 %v12005_v1  ;;  %6957 = vset.pattern.permute.xlu0 %v12005_v1  ;;  %v138_v3 = vld [vmem:[%s11998_s2 + $0x70] sm:$0xff]  ;;  %v139_v7 = vld [vmem:[%s11998_s2 + $0x78] sm:$0xff]  ;;  %v6962_v8 = vld [vmem:[%s11996_s0 + $0x64] ss:$8 sps:$4 sm:$0xff]  }
  0x13   :  { %812 = vmatprep.mubr.bf16.mxu0 %v12005_v1  ;;  %420 = vperm.xlu1 %6958, %v170_v2   ;;  %v6959_v4 = vld [vmem:[%s11996_s0 + $0x74] ss:$8 sps:$4 sm:$0xff]   ;;  %v6961_v5 = vld [vmem:[%s11996_s0 + $0x70] ss:$8 sps:$4 sm:$0xff]   ;;  %v6964_v9 = vld [vmem:[%s11996_s0 + $0x60] ss:$8 sps:$4 sm:$0xff]  }
  0x14   :  { %260 = vperm.xlu0 %6957, %v138_v3   ;;  %780 = vmatprep.subr.bf16.mxu0 %v6959_v4  ;;  %v137_v10 = vld [vmem:[%s11998_s2 + $0x68] sm:$0xff]  ;;  %v136_v11 = vld [vmem:[%s11998_s2 + $0x60] sm:$0xff]  ;;  %v6965_v12 = vld [vmem:[%s11996_s0 + $0x54] ss:$8 sps:$4 sm:$0xff]  }
  0x15   :  { %781 = vmatpush1.bf16.msra.mxu0 %v6961_v5  ;;  %v6967_v13 = vld [vmem:[%s11996_s0 + $0x50] ss:$8 sps:$4 sm:$0xff]   ;;  %v169_v14 = vld [vmem:[%s11998_s2 + $0x168] sm:$0xff]  ;;  %v168_v15 = vld [vmem:[%s11998_s2 + $0x160] sm:$0xff] }
  0x16   :  { %782 = vmatprep.subr.bf16.mxu0 %v6962_v8  ;;  %v6968_v16 = vld [vmem:[%s11996_s0 + $0x44] ss:$8 sps:$4 sm:$0xff]   ;;  %v6970_v17 = vld [vmem:[%s11996_s0 + $0x40] ss:$8 sps:$4 sm:$0xff]   ;;  %v135_v18 = vld [vmem:[%s11998_s2 + $0x58] sm:$0xff] }
  0x17   :  { %425 = vperm.xlu1 %6958, %v171_v6   ;;  %v134_v19 = vld [vmem:[%s11998_s2 + $0x50] sm:$0xff]  ;;  %v167_v22 = vld [vmem:[%s11998_s2 + $0x158] sm:$0xff]  ;;  %v6974_v24 = vld [vmem:[%s11996_s0 + $0x24] ss:$8 sps:$4 sm:$0xff]  }
  0x18   :  { %265 = vperm.xlu0 %6957, %v139_v7   ;;  %v6971_v20 = vld [vmem:[%s11996_s0 + $0x34] ss:$8 sps:$4 sm:$0xff]   ;;  %v6973_v21 = vld [vmem:[%s11996_s0 + $0x30] ss:$8 sps:$4 sm:$0xff]   ;;  %v6976_v25 = vld [vmem:[%s11996_s0 + $0x20] ss:$8 sps:$4 sm:$0xff]  }
  0x19   :  { %783 = vmatpush1.bf16.msra.mxu0 %v6964_v9  ;;  %v166_v23 = vld [vmem:[%s11998_s2 + $0x150] sm:$0xff]  ;;  %v133_v26 = vld [vmem:[%s11998_s2 + $0x48] sm:$0xff]  ;;  %v132_v27 = vld [vmem:[%s11998_s2 + $0x40] sm:$0xff] }
  0x1a   :  { %784 = vmatprep.subr.bf16.mxu0 %v6965_v12  ;;  %v6977_v28 = vld [vmem:[%s11996_s0 + $0x14] ss:$8 sps:$4 sm:$0xff]   ;;  %v6979_v29 = vld [vmem:[%s11996_s0 + $0x10] ss:$8 sps:$4 sm:$0xff]   ;;  %v165_v30 = vld [vmem:[%s11998_s2 + $0x148] sm:$0xff] }
  0x1b   :  { %255 = vperm.xlu1 %6958, %v137_v10   ;;  %v164_v31 = vld [vmem:[%s11998_s2 + $0x140] sm:$0xff]  ;;  %v131_v34 = vld [vmem:[%s11998_s2 + $0x38] sm:$0xff]  ;;  %v130_v35 = vld [vmem:[%s11998_s2 + $0x30] sm:$0xff] }
  0x1c   :  { %250 = vperm.xlu0 %6957, %v136_v11   ;;  %v6980_v32 = vld [vmem:[%s11996_s0 + $0x4] ss:$8 sps:$4 sm:$0xff]   ;;  %v6982_v33 = vld [vmem:[%s11996_s0] ss:$8 sps:$4 sm:$0xff]   ;;  %v163_v37 = vld [vmem:[%s11998_s2 + $0x138] sm:$0xff] }
  0x1d   :  { %785 = vmatpush1.bf16.msra.mxu0 %v6967_v13  ;;  %v6983_v36 = vld [vmem:[%s11997_s1] sm:$0xff]   ;;  %v162_v38 = vld [vmem:[%s11998_s2 + $0x130] sm:$0xff]  ;;  %v129_v39 = vld [vmem:[%s11998_s2 + $0x28] sm:$0xff] }
  0x1e   :  { %786 = vmatprep.subr.bf16.mxu0 %v6968_v16  ;;  %v128_v40 = vld [vmem:[%s11998_s2 + $0x20] sm:$0xff]  ;;  %v6984_v41 = vld [vmem:[%s11997_s1 + $0x8] sm:$0xff]   ;;  %v127_v44 = vld [vmem:[%s11998_s2 + $0x18] sm:$0xff] }
  0x1f   :  { %415 = vperm.xlu1 %6958, %v169_v14   ;;  %v161_v42 = vld [vmem:[%s11998_s2 + $0x128] sm:$0xff]  ;;  %v160_v43 = vld [vmem:[%s11998_s2 + $0x120] sm:$0xff]  ;;  %v126_v45 = vld [vmem:[%s11998_s2 + $0x10] sm:$0xff] }
  0x20   :  { %410 = vperm.xlu0 %6957, %v168_v15   ;;  %v6985_v46 = vld [vmem:[%s11997_s1 + $0x10] sm:$0xff]   ;;  %v159_v47 = vld [vmem:[%s11998_s2 + $0x118] sm:$0xff]  ;;  %v125_v49 = vld [vmem:[%s11998_s2 + $0x8] sm:$0xff] }
  0x21   :  { %787 = vmatpush1.bf16.msra.mxu0 %v6970_v17  ;;  %v158_v48 = vld [vmem:[%s11998_s2 + $0x110] sm:$0xff]  ;;  %v124_v50 = vld [vmem:[%s11998_s2] sm:$0xff]  ;;  %v6986_v51 = vld [vmem:[%s11997_s1 + $0x18] sm:$0xff]  }
  0x22   :  { %788 = vmatprep.subr.bf16.mxu0 %v6971_v20  ;;  %v157_v52 = vld [vmem:[%s11998_s2 + $0x108] sm:$0xff]  ;;  %v156_v53 = vld [vmem:[%s11998_s2 + $0x100] sm:$0xff]  ;;  %v155_v54 = vld [vmem:[%s11998_s2 + $0xf8] sm:$0xff] }
  0x23   :  { %245 = vperm.xlu1 %6958, %v135_v18   ;;  %v154_v55 = vld [vmem:[%s11998_s2 + $0xf0] sm:$0xff]  ;;  %v6987_v56 = vld [vmem:[%s11997_s1 + $0x20] sm:$0xff]   ;;  %v187_v57 = vld [vmem:[%s11998_s2 + $0x1f8] sm:$0xff] }
  0x24   :  { %240 = vperm.xlu0 %6957, %v134_v19   ;;  %v186_v58 = vld [vmem:[%s11998_s2 + $0x1f0] sm:$0xff]  ;;  %v153_v59 = vld [vmem:[%s11998_s2 + $0xe8] sm:$0xff]  ;;  %v152_v60 = vld [vmem:[%s11998_s2 + $0xe0] sm:$0xff] }
  0x25   :  { %789 = vmatpush1.bf16.msra.mxu0 %v6973_v21  ;;  %v6988_v61 = vld [vmem:[%s11997_s1 + $0x28] sm:$0xff]   ;;  %v184_v63 = vld [vmem:[%s11998_s2 + $0x1e0] sm:$0xff]  ;;  %v151_v0 = vld [vmem:[%s11998_s2 + $0xd8] sm:$0xff] }
  0x26   :  { %790 = vmatprep.subr.bf16.mxu0 %v6974_v24  ;;  %v185_v62 = vld [vmem:[%s11998_s2 + $0x1e8] sm:$0xff]  ;;  %v150_v2 = vld [vmem:[%s11998_s2 + $0xd0] sm:$0xff]  ;;  %v183_v4 = vld [vmem:[%s11998_s2 + $0x1d8] sm:$0xff] }
  0x27   :  { %405 = vperm.xlu1 %6958, %v167_v22   ;;  %v6989_v3 = vld [vmem:[%s11997_s1 + $0x30] sm:$0xff]   ;;  %v149_v6 = vld [vmem:[%s11998_s2 + $0xc8] sm:$0xff]  ;;  %v148_v7 = vld [vmem:[%s11998_s2 + $0xc0] sm:$0xff] }
  0x28   :  { %400 = vperm.xlu0 %6957, %v166_v23   ;;  %v182_v5 = vld [vmem:[%s11998_s2 + $0x1d0] sm:$0xff]  ;;  %v6990_v8 = vld [vmem:[%s11997_s1 + $0x38] sm:$0xff]   ;;  %v181_v9 = vld [vmem:[%s11998_s2 + $0x1c8] sm:$0xff] }
  0x29   :  { %791 = vmatpush1.bf16.msra.mxu0 %v6976_v25  ;;  %v180_v10 = vld [vmem:[%s11998_s2 + $0x1c0] sm:$0xff]  ;;  %v147_v11 = vld [vmem:[%s11998_s2 + $0xb8] sm:$0xff]  ;;  %v146_v12 = vld [vmem:[%s11998_s2 + $0xb0] sm:$0xff] }
  0x2a   :  { %792 = vmatprep.subr.bf16.mxu0 %v6977_v28  ;;  %v6991_v13 = vld [vmem:[%s11997_s1 + $0x40] sm:$0xff]   ;;  %v179_v14 = vld [vmem:[%s11998_s2 + $0x1b8] sm:$0xff]  ;;  %v178_v15 = vld [vmem:[%s11998_s2 + $0x1b0] sm:$0xff] }
  0x2b   :  { %235 = vperm.xlu1 %6958, %v133_v26   ;;  %v145_v16 = vld [vmem:[%s11998_s2 + $0xa8] sm:$0xff]  ;;  %v144_v17 = vld [vmem:[%s11998_s2 + $0xa0] sm:$0xff]  ;;  %v143_v21 = vld [vmem:[%s11998_s2 + $0x98] sm:$0xff] }
  0x2c   :  { %230 = vperm.xlu0 %6957, %v132_v27   ;;  %v6992_v18 = vld [vmem:[%s11997_s1 + $0x48] sm:$0xff]   ;;  %v176_v20 = vld [vmem:[%s11998_s2 + $0x1a0] sm:$0xff]  ;;  %v142_v22 = vld [vmem:[%s11998_s2 + $0x90] sm:$0xff] }
  0x2d   :  { %793 = vmatpush1.bf16.msra.mxu0 %v6979_v29  ;;  %v177_v19 = vld [vmem:[%s11998_s2 + $0x1a8] sm:$0xff]  ;;  %v6993_v23 = vld [vmem:[%s11997_s1 + $0x50] sm:$0xff]   ;;  %v175_v24 = vld [vmem:[%s11998_s2 + $0x198] sm:$0xff] }
  0x2e   :  { %794 = vmatprep.subr.bf16.mxu0 %v6980_v32  ;;  %v174_v25 = vld [vmem:[%s11998_s2 + $0x190] sm:$0xff]  ;;  %v141_v26 = vld [vmem:[%s11998_s2 + $0x88] sm:$0xff]  ;;  %v140_v27 = vld [vmem:[%s11998_s2 + $0x80] sm:$0xff] }
  0x2f   :  { %395 = vperm.xlu1 %6958, %v165_v30   ;;  %v6994_v28 = vld [vmem:[%s11997_s1 + $0x58] sm:$0xff]   ;;  %v173_v29 = vld [vmem:[%s11998_s2 + $0x188] sm:$0xff]  ;;  %v172_v30 = vld [vmem:[%s11998_s2 + $0x180] sm:$0xff] }
  0x30   :  { %390 = vperm.xlu0 %6957, %v164_v31  }
  0x31   :  { %795 = vmatpush1.bf16.msra.mxu0 %v6982_v33  ;;  %v1596_v33 = vld [vmem:[%s12000_s4 + $0x78] sm:$0xff] }
  0x33   :  { %225 = vperm.xlu1 %6958, %v131_v34   ;;  %v1595_v34 = vld [vmem:[%s12000_s4 + $0x70] sm:$0xff] }
  0x34   :  { %220 = vperm.xlu0 %6957, %v130_v35   ;;  %813 = vmatmul.mubr.bf16.vlgmr.msra.gmra.mxu0 %v6983_v36  ;;  %v6995_v35 = vld [vmem:[%s11997_s1 + $0x60] sm:$0xff]  }
  0x35   :  { %822 = vmatprep.mubr.bf16.mxu0 %v12005_v1 }
  0x37   :  { %385 = vperm.xlu1 %6958, %v163_v37  }
  0x38   :  { %380 = vperm.xlu0 %6957, %v162_v38   ;;  %v1594_v38 = vld [vmem:[%s12000_s4 + $0x68] sm:$0xff] }
  0x3b   :  { %215 = vperm.xlu1 %6958, %v129_v39   ;;  %v1593_v39 = vld [vmem:[%s12000_s4 + $0x60] sm:$0xff] }
  0x3c   :  { %210 = vperm.xlu0 %6957, %v128_v40   ;;  %823 = vmatmul.mubr.bf16.gmra.mxu0 %v6984_v41 }
  0x3d   :  { %832 = vmatprep.mubr.bf16.mxu0 %v12005_v1 }
  0x3f   :  { %375 = vperm.xlu1 %6958, %v161_v42   ;;  %v1592_v42 = vld [vmem:[%s12000_s4 + $0x58] sm:$0xff] }
  0x40   :  { %370 = vperm.xlu0 %6957, %v160_v43   ;;  %v1591_v43 = vld [vmem:[%s12000_s4 + $0x50] sm:$0xff] }
  0x43   :  { %205 = vperm.xlu1 %6958, %v127_v44   ;;  %v6996_v44 = vld [vmem:[%s11997_s1 + $0x68] sm:$0xff]  }
  0x44   :  { %200 = vperm.xlu0 %6957, %v126_v45   ;;  %833 = vmatmul.mubr.bf16.gmra.mxu0 %v6985_v46 }
  0x45   :  { %842 = vmatprep.mubr.bf16.mxu0 %v12005_v1 }
  0x47   :  { %365 = vperm.xlu1 %6958, %v159_v47   ;;  %v1590_v47 = vld [vmem:[%s12000_s4 + $0x48] sm:$0xff] }
  0x48   :  { %360 = vperm.xlu0 %6957, %v158_v48   ;;  %v1589_v48 = vld [vmem:[%s12000_s4 + $0x40] sm:$0xff] }
  0x4b   :  { %195 = vperm.xlu1 %6958, %v125_v49  }
  0x4c   :  { %190 = vperm.xlu0 %6957, %v124_v50   ;;  %843 = vmatmul.mubr.bf16.gmra.mxu0 %v6986_v51  ;;  %v1588_v51 = vld [vmem:[%s12000_s4 + $0x38] sm:$0xff] }
  0x4d   :  { %852 = vmatprep.mubr.bf16.mxu0 %v12005_v1 }
  0x4f   :  { %355 = vperm.xlu1 %6958, %v157_v52   ;;  %v1587_v52 = vld [vmem:[%s12000_s4 + $0x30] sm:$0xff] }
  0x50   :  { %350 = vperm.xlu0 %6957, %v156_v53   ;;  %v6997_v53 = vld [vmem:[%s11997_s1 + $0x70] sm:$0xff]  }
  0x53   :  { %345 = vperm.xlu1 %6958, %v155_v54  }
  0x54   :  { %340 = vperm.xlu0 %6957, %v154_v55   ;;  %853 = vmatmul.mubr.bf16.gmra.mxu0 %v6987_v56  ;;  %v1586_v56 = vld [vmem:[%s12000_s4 + $0x28] sm:$0xff] }
  0x55   :  { %862 = vmatprep.mubr.bf16.mxu0 %v12005_v1 }
  0x57   :  { %505 = vperm.xlu1 %6958, %v187_v57   ;;  %v1585_v57 = vld [vmem:[%s12000_s4 + $0x20] sm:$0xff] }
  0x58   :  { %500 = vperm.xlu0 %6957, %v186_v58  }
  0x5b   :  { %335 = vperm.xlu1 %6958, %v153_v59  }
  0x5c   :  { %330 = vperm.xlu0 %6957, %v152_v60   ;;  %863 = vmatmul.mubr.bf16.gmra.mxu0 %v6988_v61  ;;  %v1584_v60 = vld [vmem:[%s12000_s4 + $0x18] sm:$0xff]  ;;  %v1583_v61 = vld [vmem:[%s12000_s4 + $0x10] sm:$0xff] }
  0x5d   :  { %872 = vmatprep.mubr.bf16.mxu0 %v12005_v1 }
  0x5f   :  { %495 = vperm.xlu1 %6958, %v185_v62   ;;  %v6998_v62 = vld [vmem:[%s11997_s1 + $0x78] sm:$0xff]  }
  0x60   :  { %490 = vperm.xlu0 %6957, %v184_v63  }
  0x63   :  { %325 = vperm.xlu1 %6958, %v151_v0  }
  0x64   :  { %320 = vperm.xlu0 %6957, %v150_v2   ;;  %873 = vmatmul.mubr.bf16.gmra.mxu0 %v6989_v3  ;;  %v1582_v2 = vld [vmem:[%s12000_s4 + $0x8] sm:$0xff]  ;;  %v1581_v3 = vld [vmem:[%s12000_s4] sm:$0xff] }
  0x65   :  { %882 = vmatprep.mubr.bf16.mxu0 %v12005_v1 }
  0x67   :  { %485 = vperm.xlu1 %6958, %v183_v4  }
  0x68   :  { %480 = vperm.xlu0 %6957, %v182_v5  }
  0x6b   :  { %315 = vperm.xlu1 %6958, %v149_v6   ;;  %v1612_v6 = vld [vmem:[%s12000_s4 + $0xf8] sm:$0xff] }
  0x6c   :  { %310 = vperm.xlu0 %6957, %v148_v7   ;;  %883 = vmatmul.mubr.bf16.gmra.mxu0 %v6990_v8  ;;  %v1611_v7 = vld [vmem:[%s12000_s4 + $0xf0] sm:$0xff]  ;;  %v6999_v8 = vld [vmem:[%s11997_s1 + $0x80] sm:$0xff]  }
  0x6d   :  { %892 = vmatprep.mubr.bf16.mxu0 %v12005_v1 }
  0x6f   :  { %475 = vperm.xlu1 %6958, %v181_v9  }
  0x70   :  { %470 = vperm.xlu0 %6957, %v180_v10  }
  0x73   :  { %305 = vperm.xlu1 %6958, %v147_v11   ;;  %v1610_v11 = vld [vmem:[%s12000_s4 + $0xe8] sm:$0xff] }
  0x74   :  { %300 = vperm.xlu0 %6957, %v146_v12   ;;  %893 = vmatmul.mubr.bf16.gmra.mxu0 %v6991_v13  ;;  %v1609_v12 = vld [vmem:[%s12000_s4 + $0xe0] sm:$0xff] }
  0x75   :  { %902 = vmatprep.mubr.bf16.mxu0 %v12005_v1 }
  0x77   :  { %465 = vperm.xlu1 %6958, %v179_v14   ;;  %v1608_v14 = vld [vmem:[%s12000_s4 + $0xd8] sm:$0xff] }
  0x78   :  { %460 = vperm.xlu0 %6957, %v178_v15  }
  0x7b   :  { %295 = vperm.xlu1 %6958, %v145_v16   ;;  %v1607_v16 = vld [vmem:[%s12000_s4 + $0xd0] sm:$0xff] }
  0x7c   :  { %290 = vperm.xlu0 %6957, %v144_v17   ;;  %903 = vmatmul.mubr.bf16.gmra.mxu0 %v6992_v18  ;;  %v7000_v17 = vld [vmem:[%s11997_s1 + $0x88] sm:$0xff]  }
  0x7d   :  { %912 = vmatprep.mubr.bf16.mxu0 %v12005_v1 }
  0x7f   :  { %455 = vperm.xlu1 %6958, %v177_v19   ;;  %v1606_v19 = vld [vmem:[%s12000_s4 + $0xc8] sm:$0xff] }
  0x80   :  { %450 = vperm.xlu0 %6957, %v176_v20   ;;  %v1605_v20 = vld [vmem:[%s12000_s4 + $0xc0] sm:$0xff] }
  0x83   :  { %285 = vperm.xlu1 %6958, %v143_v21  }
  0x84   :  { %280 = vperm.xlu0 %6957, %v142_v22   ;;  %913 = vmatmul.mubr.bf16.gmra.mxu0 %v6993_v23  ;;  %v1604_v22 = vld [vmem:[%s12000_s4 + $0xb8] sm:$0xff]  ;;  %v1603_v23 = vld [vmem:[%s12000_s4 + $0xb0] sm:$0xff] }
  0x85   :  { %922 = vmatprep.mubr.bf16.mxu0 %v12005_v1 }
  0x87   :  { %445 = vperm.xlu1 %6958, %v175_v24   ;;  %v7001_v24 = vld [vmem:[%s11997_s1 + $0x90] sm:$0xff]  }
  0x88   :  { %440 = vperm.xlu0 %6957, %v174_v25  }
  0x8b   :  { %275 = vperm.xlu1 %6958, %v141_v26  }
  0x8c   :  { %270 = vperm.xlu0 %6957, %v140_v27   ;;  %923 = vmatmul.mubr.bf16.gmra.mxu0 %v6994_v28  ;;  %v1602_v27 = vld [vmem:[%s12000_s4 + $0xa8] sm:$0xff]  ;;  %v1601_v28 = vld [vmem:[%s12000_s4 + $0xa0] sm:$0xff] }
  0x8d   :  { %932 = vmatprep.mubr.bf16.mxu0 %v12005_v1 }
  0x8e   :  { %v8827_v31 = vpop.permute.xlu1 %420 }
  0x8f   :  { %12090 = vst [vmem:[#allocation9_spill] sm:$0xff] %v8827_v31  ;;  %v8829_v32 = vpop.permute.xlu0 %260  ;;  %435 = vperm.xlu1 %6958, %v173_v29  }
  0x90   :  { %430 = vperm.xlu0 %6957, %v172_v30   ;;  %v1600_v30 = vld [vmem:[%s12000_s4 + $0x98] sm:$0xff] }
  0x92   :  { %v8841_v36 = vpop.permute.xlu1 %425 }
  0x93   :  { %12091 = vst [vmem:[#allocation10_spill] sm:$0xff] %v8841_v36  ;;  %v8843_v37 = vpop.permute.xlu0 %265  ;;  %1786 = vperm.xlu1 %6958, %v1596_v33   ;;  %v1599_v33 = vld [vmem:[%s12000_s4 + $0x90] sm:$0xff] }
  0x94   :  { %1781 = vperm.xlu0 %6957, %v1595_v34   ;;  %933 = vmatmul.mubr.bf16.gmra.mxu0 %v6995_v35  ;;  %v7002_v35 = vld [vmem:[%s11997_s1 + $0x98] sm:$0xff]  }
  0x95   :  { %942 = vmatprep.mubr.bf16.mxu0 %v12005_v1 }
  0x96   :  { %v8851_v40 = vpop.permute.xlu1 %255 }
  0x97   :  { %v8853_v41 = vpop.permute.xlu0 %250  ;;  %1776 = vperm.xlu1 %6958, %v1594_v38   ;;  %v1598_v38 = vld [vmem:[%s12000_s4 + $0x88] sm:$0xff] }
  0x98   :  { %1771 = vperm.xlu0 %6957, %v1593_v39   ;;  %v1597_v39 = vld [vmem:[%s12000_s4 + $0x80] sm:$0xff] }
  0x9a   :  { %v8865_v45 = vpop.permute.xlu1 %415 }
  0x9b   :  { %12092 = vst [vmem:[#allocation11_spill] sm:$0xff] %v8865_v45  ;;  %v8867_v46 = vpop.permute.xlu0 %410  ;;  %1766 = vperm.xlu1 %6958, %v1592_v42  }
  0x9c   :  { %12093 = vst [vmem:[#allocation12_spill] sm:$0xff] %v8867_v46  ;;  %1761 = vperm.xlu0 %6957, %v1591_v43   ;;  %943 = vmatmul.mubr.bf16.gmra.mxu0 %v6996_v44  ;;  %v1628_v44 = vld [vmem:[%s12000_s4 + $0x178] sm:$0xff] }
  0x9d   :  { %952 = vmatprep.mubr.bf16.mxu0 %v12005_v1 }
  0x9e   :  { %v8875_v49 = vpop.permute.xlu1 %245 }
  0x9f   :  { %v8877_v50 = vpop.permute.xlu0 %240  ;;  %1756 = vperm.xlu1 %6958, %v1590_v47   ;;  %v1627_v47 = vld [vmem:[%s12000_s4 + $0x170] sm:$0xff] }
  0xa0   :  { %1751 = vperm.xlu0 %6957, %v1589_v48   ;;  %v7003_v48 = vld [vmem:[%s11997_s1 + $0xa0] sm:$0xff]  }
  0xa2   :  { %v8889_v54 = vpop.permute.xlu1 %405 }
  0xa3   :  { %12094 = vst [vmem:[#allocation13_spill] sm:$0xff] %v8889_v54  ;;  %v8891_v55 = vpop.permute.xlu0 %400  ;;  %1746 = vperm.xlu1 %6958, %v1588_v51  }
  0xa4   :  { %12095 = vst [vmem:[#allocation14_spill] sm:$0xff] %v8891_v55  ;;  %1741 = vperm.xlu0 %6957, %v1587_v52   ;;  %953 = vmatmul.mubr.bf16.gmra.mxu0 %v6997_v53  ;;  %v1626_v52 = vld [vmem:[%s12000_s4 + $0x168] sm:$0xff]  ;;  %v1625_v53 = vld [vmem:[%s12000_s4 + $0x160] sm:$0xff] }
  0xa5   :  { %962 = vmatprep.mubr.bf16.mxu0 %v12005_v1 }
  0xa6   :  { %v8899_v58 = vpop.permute.xlu1 %235 }
  0xa7   :  { %v8901_v59 = vpop.permute.xlu0 %230  ;;  %1736 = vperm.xlu1 %6958, %v1586_v56  }
  0xa8   :  { %1731 = vperm.xlu0 %6957, %v1585_v57   ;;  %v1624_v57 = vld [vmem:[%s12000_s4 + $0x158] sm:$0xff] }
  0xaa   :  { %v8913_v63 = vpop.permute.xlu1 %395 }
  0xab   :  { %12096 = vst [vmem:[#allocation15_spill] sm:$0xff] %v8913_v63  ;;  %v8915_v0 = vpop.permute.xlu0 %390  ;;  %1726 = vperm.xlu1 %6958, %v1584_v60   ;;  %v1623_v60 = vld [vmem:[%s12000_s4 + $0x150] sm:$0xff] }
  0xac   :  { %12097 = vst [vmem:[#allocation16_spill] sm:$0xff] %v8915_v0  ;;  %1721 = vperm.xlu0 %6957, %v1583_v61   ;;  %963 = vmatmul.mubr.bf16.gmra.mxu0 %v6998_v62  ;;  %v7004_v62 = vld [vmem:[%s11997_s1 + $0xa8] sm:$0xff]  }
  0xad   :  { %972 = vmatprep.mubr.bf16.mxu0 %v12005_v1 }
  0xae   :  { %v8923_v4 = vpop.permute.xlu1 %225 }
  0xaf   :  { %v8925_v5 = vpop.permute.xlu0 %220  ;;  %1716 = vperm.xlu1 %6958, %v1582_v2  }
  0xb0   :  { %1711 = vperm.xlu0 %6957, %v1581_v3   ;;  %v1622_v3 = vld [vmem:[%s12000_s4 + $0x148] sm:$0xff] }
  0xb2   :  { %v8937_v9 = vpop.permute.xlu1 %385 }
  0xb3   :  { %12098 = vst [vmem:[#allocation17_spill] sm:$0xff] %v8937_v9  ;;  %v8939_v10 = vpop.permute.xlu0 %380  ;;  %1866 = vperm.xlu1 %6958, %v1612_v6   ;;  %v1621_v6 = vld [vmem:[%s12000_s4 + $0x140] sm:$0xff] }
  0xb4   :  { %12099 = vst [vmem:[#allocation18_spill] sm:$0xff] %v8939_v10  ;;  %1861 = vperm.xlu0 %6957, %v1611_v7   ;;  %973 = vmatmul.mubr.bf16.gmra.mxu0 %v6999_v8  ;;  %v1620_v8 = vld [vmem:[%s12000_s4 + $0x138] sm:$0xff]  ;;  %v1649_v10 = vld [vmem:[%s12000_s4 + $0x220] sm:$0xff] }
  0xb5   :  { %982 = vmatprep.mubr.bf16.mxu0 %v12005_v1 }
  0xb6   :  { %v8953_v15 = vpop.permute.xlu1 %215 }
  0xb7   :  { %v8947_v13 = vpop.permute.xlu0 %210  ;;  %1856 = vperm.xlu1 %6958, %v1610_v11   ;;  %v1619_v11 = vld [vmem:[%s12000_s4 + $0x130] sm:$0xff] }
  0xb8   :  { %1851 = vperm.xlu0 %6957, %v1609_v12  }
  0xba   :  { %v8969_v21 = vpop.permute.xlu1 %375 }
  0xbb   :  { %v8961_v18 = vpop.permute.xlu0 %370  ;;  %1846 = vperm.xlu1 %6958, %v1608_v14   ;;  %12101 = vst [vmem:[#allocation20_spill] sm:$0xff] %v8969_v21  ;;  %v7005_v14 = vld [vmem:[%s11997_s1 + $0xb0] sm:$0xff]   ;;  %v1650_v21 = vld [vmem:[%s12000_s4 + $0x228] sm:$0xff] }
  0xbc   :  { %12100 = vst [vmem:[#allocation19_spill] sm:$0xff] %v8961_v18  ;;  %1841 = vperm.xlu0 %6957, %v1607_v16   ;;  %983 = vmatmul.mubr.bf16.gmra.mxu0 %v7000_v17  ;;  %v1618_v16 = vld [vmem:[%s12000_s4 + $0x128] sm:$0xff]  ;;  %v1617_v17 = vld [vmem:[%s12000_s4 + $0x120] sm:$0xff] }
  0xbd   :  { %992 = vmatprep.mubr.bf16.mxu0 %v12005_v1 }
  0xbe   :  { %v8983_v26 = vpop.permute.xlu1 %205 }
  0xbf   :  { %1836 = vperm.xlu1 %6958, %v1606_v19   ;;  %v8981_v25 = vpop.permute.xlu0 %200 }
  0xc0   :  { %1831 = vperm.xlu0 %6957, %v1605_v20  }
  0xc2   :  { %v9000_v34 = vpop.permute.xlu1 %365 }
  0xc3   :  { %1826 = vperm.xlu1 %6958, %v1604_v22   ;;  %v8992_v29 = vpop.permute.xlu0 %360  ;;  %12103 = vst [vmem:[#allocation22_spill] sm:$0xff] %v9000_v34  ;;  %v1616_v22 = vld [vmem:[%s12000_s4 + $0x118] sm:$0xff] }
  0xc4   :  { %1821 = vperm.xlu0 %6957, %v1603_v23   ;;  %993 = vmatmul.mubr.bf16.gmra.mxu0 %v7001_v24  ;;  %12102 = vst [vmem:[#allocation21_spill] sm:$0xff] %v8992_v29  ;;  %v1615_v23 = vld [vmem:[%s12000_s4 + $0x110] sm:$0xff]  ;;  %v7006_v24 = vld [vmem:[%s11997_s1 + $0xb8] sm:$0xff]  }
  0xc5   :  { %1002 = vmatprep.mubr.bf16.mxu0 %v12005_v1 }
  0xc6   :  { %v9014_v43 = vpop.permute.xlu1 %195 }
  0xc7   :  { %1816 = vperm.xlu1 %6958, %v1602_v27   ;;  %v9011_v42 = vpop.permute.xlu0 %190 }
  0xc8   :  { %1811 = vperm.xlu0 %6957, %v1601_v28   ;;  %v1614_v28 = vld [vmem:[%s12000_s4 + $0x108] sm:$0xff] }
  0xca   :  { %v9033_v56 = vpop.permute.xlu1 %355 }
  0xcb   :  { %1806 = vperm.xlu1 %6958, %v1600_v30   ;;  %v9025_v51 = vpop.permute.xlu0 %350  ;;  %12104 = vst [vmem:[#allocation23_spill] sm:$0xff] %v9033_v56  ;;  %v1613_v30 = vld [vmem:[%s12000_s4 + $0x100] sm:$0xff] }
  0xcc   :  { %1801 = vperm.xlu0 %6957, %v1599_v33   ;;  %1003 = vmatmul.mubr.bf16.gmra.mxu0 %v7002_v35  ;;  %v1644_v35 = vld [vmem:[%s12000_s4 + $0x1f8] sm:$0xff] }
  0xcd   :  { %1012 = vmatprep.mubr.bf16.mxu0 %v12005_v1 }
  0xce   :  { %v9047_v2 = vpop.permute.xlu1 %345 }
  0xcf   :  { %1796 = vperm.xlu1 %6958, %v1598_v38   ;;  %v9042_v61 = vpop.permute.xlu0 %340  ;;  %v1643_v38 = vld [vmem:[%s12000_s4 + $0x1f0] sm:$0xff] }
  0xd0   :  { %1791 = vperm.xlu0 %6957, %v1597_v39  }
  0xd2   :  { %v9064_v12 = vpop.permute.xlu1 %505 }
  0xd3   :  { %1946 = vperm.xlu1 %6958, %v1628_v44   ;;  %v9056_v7 = vpop.permute.xlu0 %500  ;;  %12106 = vst [vmem:[#allocation25_spill] sm:$0xff] %v9064_v12  ;;  %v7007_v44 = vld [vmem:[%s11997_s1 + $0xc0] sm:$0xff]   ;;  %v1654_v12 = vld [vmem:[%s12000_s4 + $0x248] sm:$0xff] }
  0xd4   :  { %1941 = vperm.xlu0 %6957, %v1627_v47   ;;  %1013 = vmatmul.mubr.bf16.gmra.mxu0 %v7003_v48  ;;  %12105 = vst [vmem:[#allocation24_spill] sm:$0xff] %v9056_v7  ;;  %v1642_v48 = vld [vmem:[%s12000_s4 + $0x1e8] sm:$0xff]  ;;  %v1653_v7 = vld [vmem:[%s12000_s4 + $0x240] sm:$0xff] }
  0xd5   :  { %1022 = vmatprep.mubr.bf16.mxu0 %v12005_v1 }
  0xd6   :  { %v9078_v20 = vpop.permute.xlu1 %335 }
  0xd7   :  { %1936 = vperm.xlu1 %6958, %v1626_v52   ;;  %v9075_v19 = vpop.permute.xlu0 %330  ;;  %v1641_v52 = vld [vmem:[%s12000_s4 + $0x1e0] sm:$0xff] }
  0xd8   :  { %1931 = vperm.xlu0 %6957, %v1625_v53  }
  0xda   :  { %v9097_v33 = vpop.permute.xlu1 %495 }
  0xdb   :  { %1926 = vperm.xlu1 %6958, %v1624_v57   ;;  %v9089_v27 = vpop.permute.xlu0 %490  ;;  %12108 = vst [vmem:[#allocation27_spill] sm:$0xff] %v9097_v33 }
  0xdc   :  { %1921 = vperm.xlu0 %6957, %v1623_v60   ;;  %1023 = vmatmul.mubr.bf16.gmra.mxu0 %v7004_v62  ;;  %12107 = vst [vmem:[#allocation26_spill] sm:$0xff] %v9089_v27 }
  0xdd   :  { %1032 = vmatprep.mubr.bf16.mxu0 %v12005_v1 }
  0xde   :  { %v9111_v47 = vpop.permute.xlu1 %325 }
  0xdf   :  { %1916 = vperm.xlu1 %6958, %v1622_v3   ;;  %v9106_v39 = vpop.permute.xlu0 %320  ;;  %v1640_v3 = vld [vmem:[%s12000_s4 + $0x1d8] sm:$0xff] }
  0xe0   :  { %1911 = vperm.xlu0 %6957, %v1621_v6   ;;  %12109 = vst [vmem:[#allocation28_spill] sm:$0xff] %v9106_v39  ;;  %v1639_v6 = vld [vmem:[%s12000_s4 + $0x1d0] sm:$0xff] }
  0xe3   :  { %1906 = vperm.xlu1 %6958, %v1620_v8   ;;  %v9120_v57 = vpop.permute.xlu0 %480  ;;  %v9129_v8 = vpop.permute.xlu1 %485 }
  0xe4   :  { %1901 = vperm.xlu0 %6957, %v1619_v11   ;;  %1033 = vmatmul.mubr.bf16.gmra.mxu0 %v7005_v14  ;;  %12110 = vst [vmem:[#allocation29_spill] sm:$0xff] %v9120_v57  ;;  %12111 = vst [vmem:[#allocation30_spill] sm:$0xff] %v9129_v8  ;;  %v7008_v14 = vld [vmem:[%s11997_s1 + $0xc8] sm:$0xff]   ;;  %v1655_v57 = vld [vmem:[%s12000_s4 + $0x250] sm:$0xff] }
  0xe5   :  { %1042 = vmatprep.mubr.bf16.mxu0 %v12005_v1  ;;  %v7017_v8 = vld [vmem:[#allocation3 + $0x4] ss:$16 sps:$4 sm:$0xff]  }
  0xe6   :  { %3661 = vmatprep.mubr.bf16.mxu1 %v7017_v8  ;;  %v1652_v8 = vld [vmem:[%s12000_s4 + $0x238] sm:$0xff] }
  0xe7   :  { %1896 = vperm.xlu1 %6958, %v1618_v16  }
  0xe8   :  { %1891 = vperm.xlu0 %6957, %v1617_v17  }
  0xeb   :  { %1886 = vperm.xlu1 %6958, %v1616_v22  }
  0xec   :  { %1881 = vperm.xlu0 %6957, %v1615_v23   ;;  %1043 = vmatmul.mubr.bf16.gmra.mxu0 %v7006_v24 }
  0xed   :  { %1052 = vmatprep.mubr.bf16.mxu0 %v12005_v1 }
  0xef   :  { %1876 = vperm.xlu1 %6958, %v1614_v28  }
  0xf0   :  { %1871 = vperm.xlu0 %6957, %v1613_v30   ;;  %v1638_v30 = vld [vmem:[%s12000_s4 + $0x1c8] sm:$0xff] }
  0xf3   :  { %2026 = vperm.xlu1 %6958, %v1644_v35   ;;  %v1637_v35 = vld [vmem:[%s12000_s4 + $0x1c0] sm:$0xff] }
  0xf4   :  { %2021 = vperm.xlu0 %6957, %v1643_v38   ;;  %v814_v53 = vpop.f32.mrf.mxu0  ;;  %1053 = vmatmul.mubr.bf16.gmra.mxu0 %v7007_v44  ;;  %v9143_v38 = vpop.permute.xlu0 %310 }
  0xf5   :  { %1062 = vmatprep.mubr.bf16.mxu0 %v12005_v1  ;;  %v815_v62 = vadd.f32 %v814_v53, %v9011_v42  ;;  %12112 = vst [vmem:[#allocation31_spill] sm:$0xff] %v9143_v38  ;;  %v9148_v53 = vpop.permute.xlu1 %315 }
  0xf6   :  { %v816_v60 = vpop.f32.mrf.mxu0  ;;  %12113 = vst [vmem:[#allocation32_spill] sm:$0xff] %v9148_v53 }
  0xf7   :  { %2016 = vperm.xlu1 %6958, %v1642_v48   ;;  %v817_v16 = vadd.f32 %v816_v60, %v9011_v42  ;;  %v1133_v23 = vmax.f32 %v815_v62, 0.0  ;;  %v1636_v62 = vld [vmem:[%s12000_s4 + $0x1b8] sm:$0xff] }
  0xf8   :  { %2011 = vperm.xlu0 %6957, %v1641_v52   ;;  %v818_v11 = vpop.f32.mrf.mxu0 }
  0xf9   :  { %v819_v17 = vadd.f32 %v818_v11, %v9014_v43  ;;  %v1134_v44 = vmax.f32 %v817_v16, 0.0 }
  0xfa   :  { %v820_v22 = vpop.f32.mrf.mxu0 }
  0xfb   :  { %2006 = vperm.xlu1 %6958, %v1640_v3   ;;  %v1135_v24 = vmax.f32 %v819_v17, 0.0  ;;  %v821_v28 = vadd.f32 %v820_v22, %v9014_v43  ;;  %v1635_v3 = vld [vmem:[%s12000_s4 + $0x1b0] sm:$0xff]  ;;  %v9164_v22 = vpop.permute.xlu0 %470 }
  0xfc   :  { %2001 = vperm.xlu0 %6957, %v1639_v6   ;;  %v824_v42 = vpop.f32.mrf.mxu0  ;;  %1063 = vmatmul.mubr.bf16.gmra.mxu0 %v7008_v14  ;;  %v7009_v14 = vld [vmem:[%s11997_s1 + $0xd0] sm:$0xff]   ;;  %12114 = vst [vmem:[#allocation33_spill] sm:$0xff] %v9164_v22 }
  0xfd   :  { %v9145_v48 = vpack.c.bf16 %v1135_v24, %v1133_v23  ;;  %v1136_v52 = vmax.f32 %v821_v28, 0.0  ;;  %1072 = vmatprep.mubr.bf16.mxu0 %v12005_v1  ;;  %v825_v60 = vadd.f32 %v824_v42, %v8981_v25  ;;  %v1633_v42 = vld [vmem:[%s12000_s4 + $0x1a0] sm:$0xff] }
  0xfe   :  { %v826_v43 = vpop.f32.mrf.mxu0 }
  0xff   :  { %1996 = vperm.xlu1 %6958, %v1638_v30   ;;  %v9157_v6 = vpack.c.bf16 %v1136_v52, %v1134_v44  ;;  %v827_v16 = vadd.f32 %v826_v43, %v8981_v25  ;;  %v1137_v24 = vmax.f32 %v825_v60, 0.0  ;;  %v9173_v25 = vpop.permute.xlu1 %475 }
 0x100   :  { %1991 = vperm.xlu0 %6957, %v1637_v35   ;;  %v828_v11 = vpop.f32.mrf.mxu0  ;;  %v1634_v35 = vld [vmem:[%s12000_s4 + $0x1a8] sm:$0xff]  ;;  %12115 = vst [vmem:[#allocation34_spill] sm:$0xff] %v9173_v25 }
 0x101   :  { %v829_v17 = vadd.f32 %v828_v11, %v8983_v26  ;;  %v1138_v52 = vmax.f32 %v827_v16, 0.0  ;;  %v1631_v11 = vld [vmem:[%s12000_s4 + $0x190] sm:$0xff]  ;;  %v9189_v16 = vpop.permute.xlu0 %300 }
 0x102   :  { %v830_v23 = vpop.f32.mrf.mxu0  ;;  %12116 = vst [vmem:[#allocation35_spill] sm:$0xff] %v9189_v16 }
 0x103   :  { %1986 = vperm.xlu1 %6958, %v1636_v62   ;;  %v1139_v28 = vmax.f32 %v829_v17, 0.0  ;;  %v831_v30 = vadd.f32 %v830_v23, %v8983_v26  ;;  %v7010_v23 = vld [vmem:[%s11997_s1 + $0xd8] sm:$0xff]  }
 0x104   :  { %1981 = vperm.xlu0 %6957, %v1635_v3   ;;  %v834_v44 = vpop.f32.mrf.mxu0  ;;  %1073 = vmatmul.mubr.bf16.gmra.mxu0 %v7009_v14  ;;  %v1632_v3 = vld [vmem:[%s12000_s4 + $0x198] sm:$0xff] }
 0x105   :  { %v9175_v43 = vpack.c.bf16 %v1139_v28, %v1137_v24  ;;  %v1140_v62 = vmax.f32 %v831_v30, 0.0  ;;  %1082 = vmatprep.mubr.bf16.mxu0 %v12005_v1  ;;  %v835_v60 = vadd.f32 %v834_v44, %v8947_v13  ;;  %v9195_v28 = vpop.permute.xlu1 %305  ;;  %v1630_v44 = vld [vmem:[%s12000_s4 + $0x188] sm:$0xff] }
 0x106   :  { %v9178_v26 = vpop.f32.mrf.mxu0  ;;  %12117 = vst [vmem:[#allocation36_spill] sm:$0xff] %v9195_v28  ;;  %v1674_v28 = vld [vmem:[%s12000_s4 + $0x2e8] sm:$0xff] }
 0x107   :  { %1976 = vperm.xlu1 %6958, %v1634_v35   ;;  %v9187_v14 = vpack.c.bf16 %v1140_v62, %v1138_v52  ;;  %v1141_v35 = vmax.f32 %v835_v60, 0.0  ;;  %v1629_v52 = vld [vmem:[%s12000_s4 + $0x180] sm:$0xff] }
 0x108   :  { %1971 = vperm.xlu0 %6957, %v1633_v42   ;;  %v838_v17 = vpop.f32.mrf.mxu0 }
 0x109   :  { %v839_v24 = vadd.f32 %v838_v17, %v8953_v15  ;;  %v9220_v22 = vpop.permute.xlu1 %465 }
 0x10a   :  { %v9197_v30 = vpop.f32.mrf.mxu0  ;;  %12119 = vst [vmem:[#allocation38_spill] sm:$0xff] %v9220_v22  ;;  %v12120_v22 = vmov 0  }
 0x10b   :  { %1966 = vperm.xlu1 %6958, %v1632_v3   ;;  %v1143_v42 = vmax.f32 %v839_v24, 0.0  ;;  %v9210_v3 = vpop.permute.xlu0 %460  ;;  %v1659_v24 = vld [vmem:[%s12000_s4 + $0x270] sm:$0xff] }
 0x10c   :  { %1961 = vperm.xlu0 %6957, %v1631_v11   ;;  %v9205_v62 = vpop.f32.mrf.mxu0  ;;  %1083 = vmatmul.mubr.bf16.gmra.mxu0 %v7010_v23  ;;  %12118 = vst [vmem:[#allocation37_spill] sm:$0xff] %v9210_v3  ;;  %v1660_v11 = vld [vmem:[%s12000_s4 + $0x278] sm:$0xff] }
 0x10d   :  { %v9207_v17 = vpack.c.bf16 %v1143_v42, %v1141_v35  ;;  %1092 = vmatprep.mubr.bf16.mxu0 %v12005_v1  ;;  %v7011_v35 = vld [vmem:[%s11997_s1 + $0xe0] sm:$0xff]   ;;  %v9240_v25 = vpop.permute.xlu1 %295 }
 0x10e   :  { %v9212_v60 = vpop.f32.mrf.mxu0 }
 0x10f   :  { %1956 = vperm.xlu1 %6958, %v1630_v44   ;;  %v1658_v44 = vld [vmem:[%s12000_s4 + $0x268] sm:$0xff]  ;;  %v9235_v1 = vpop.permute.xlu0 %290 }
 0x110   :  { %1951 = vperm.xlu0 %6957, %v1629_v52   ;;  %v9222_v23 = vpop.f32.mrf.mxu0  ;;  %v1657_v52 = vld [vmem:[%s12000_s4 + $0x260] sm:$0xff] }
 0x111   :  { %v9265_v33 = vpop.permute.xlu1 %455 }
 0x112   :  { %v9227_v42 = vpop.f32.mrf.mxu0  ;;  %12122 = vst [vmem:[#allocation40_spill] sm:$0xff] %v9265_v33 }
 0x113   :  { %2106 = vperm.xlu1 %6958, %v1660_v11  }
 0x114   :  { %2101 = vperm.xlu0 %6957, %v1659_v24   ;;  %v9237_v3 = vpop.f32.mrf.mxu0  ;;  %1093 = vmatmul.mubr.bf16.gmra.mxu0 %v7011_v35  ;;  %v1656_v24 = vld [vmem:[%s12000_s4 + $0x258] sm:$0xff]  ;;  %v7012_v35 = vld [vmem:[%s11997_s1 + $0xe8] sm:$0xff]  }
 0x115   :  { %1102 = vmatprep.mubr.bf16.mxu0 %v12120_v22 }
 0x116   :  { %v9242_v11 = vpop.f32.mrf.mxu0 }
 0x117   :  { %2096 = vperm.xlu1 %6958, %v1658_v44   ;;  %v9255_v44 = vpop.permute.xlu0 %450 }
 0x118   :  { %2091 = vperm.xlu0 %6957, %v1657_v52   ;;  %v9250_v27 = vpop.f32.mrf.mxu0  ;;  %12121 = vst [vmem:[#allocation39_spill] sm:$0xff] %v9255_v44 }
 0x11a   :  { %v9257_v52 = vpop.f32.mrf.mxu0 }
 0x11b   :  { %2086 = vperm.xlu1 %6958, %v1656_v24   ;;  %v1651_v24 = vld [vmem:[%s12000_s4 + $0x230] sm:$0xff]  ;;  %v9278_v44 = vpop.permute.xlu0 %280 }
 0x11c   :  { %2081 = vperm.xlu0 %6957, %v1655_v57   ;;  %v9267_v18 = vpop.f32.mrf.mxu0  ;;  %1103 = vmatmul.mubr.bf16.gmra.mxu0 %v7012_v35  ;;  %v7013_v35 = vld [vmem:[%s11997_s1 + $0xf0] sm:$0xff]  }
 0x11d   :  { %1112 = vmatprep.mubr.bf16.mxu0 %v12120_v22 }
 0x11e   :  { %v9270_v57 = vpop.f32.mrf.mxu0 }
 0x11f   :  { %2076 = vperm.xlu1 %6958, %v1654_v12   ;;  %v9285_v12 = vpop.permute.xlu1 %285  ;;  %v9294_v0 = vpop.permute.xlu0 %440 }
 0x120   :  { %2071 = vperm.xlu0 %6957, %v1653_v7   ;;  %v9280_v33 = vpop.f32.mrf.mxu0  ;;  %12123 = vst [vmem:[#allocation41_spill] sm:$0xff] %v9294_v0 }
 0x122   :  { %v870_v7 = vpop.f32.mrf.mxu0 }
 0x123   :  { %2066 = vperm.xlu1 %6958, %v1652_v8   ;;  %v1648_v8 = vld [vmem:[%s12000_s4 + $0x218] sm:$0xff]  ;;  %v9302_v55 = vpop.permute.xlu1 %445  ;;  %v9313_v0 = vpop.permute.xlu0 %270 }
 0x124   :  { %2061 = vperm.xlu0 %6957, %v1651_v24   ;;  %v874_v9 = vpop.f32.mrf.mxu0  ;;  %1113 = vmatmul.mubr.bf16.gmra.mxu0 %v7013_v35  ;;  %v1647_v24 = vld [vmem:[%s12000_s4 + $0x210] sm:$0xff]  ;;  %12124 = vst [vmem:[#allocation42_spill] sm:$0xff] %v9302_v55  ;;  %v1645_v35 = vld [vmem:[%s12000_s4 + $0x200] sm:$0xff] }
 0x125   :  { %1122 = vmatprep.mubr.bf16.mxu0 %v12120_v22  ;;  %v7014_v22 = vld [vmem:[%s11997_s1 + $0xf8] sm:$0xff]   ;;  %v875_v53 = vadd.f32 %v874_v9, %v8853_v41 }
 0x126   :  { %v876_v63 = vpop.f32.mrf.mxu0 }
 0x127   :  { %2056 = vperm.xlu1 %6958, %v1650_v21   ;;  %v9315_v55 = vpop.permute.xlu1 %275  ;;  %v9325_v16 = vpop.permute.xlu0 %430 }
 0x128   :  { %2051 = vperm.xlu0 %6957, %v1649_v10   ;;  %v878_v54 = vpop.f32.mrf.mxu0  ;;  %v1646_v10 = vld [vmem:[%s12000_s4 + $0x208] sm:$0xff]  ;;  %12125 = vst [vmem:[#allocation43_spill] sm:$0xff] %v9325_v16  ;;  %v877_v16 = vadd.f32 %v876_v63, %v8853_v41  ;;  %v867_v63 = vadd.f32 %v9270_v57, %v8877_v50  ;;  %v869_v41 = vadd.f32 %v9280_v33, %v8875_v49 }
 0x129   :  { %v865_v57 = vadd.f32 %v9267_v18, %v8877_v50  ;;  %v859_v50 = vadd.f32 %v9250_v27, %v8899_v58  ;;  %v1668_v27 = vld [vmem:[%s12000_s4 + $0x2b8] sm:$0xff] }
 0x12a   :  { %v880_v21 = vpop.f32.mrf.mxu0  ;;  %v1155_v18 = vmax.f32 %v869_v41, 0.0 }
 0x12b   :  { %2046 = vperm.xlu1 %6958, %v1648_v8   ;;  %v1676_v8 = vld [vmem:[%s12000_s4 + $0x2f8] sm:$0xff] }
 0x12c   :  { %2041 = vperm.xlu0 %6957, %v1647_v24   ;;  %v884_v46 = vpop.f32.mrf.mxu0  ;;  %1123 = vmatmul.mubr.bf16.gmra.mxu0 %v7014_v22  ;;  %v1675_v24 = vld [vmem:[%s12000_s4 + $0x2f0] sm:$0xff]  ;;  %v881_v22 = vadd.f32 %v880_v21, %v8851_v40 }
 0x12e   :  { %v886_v36 = vpop.f32.mrf.mxu0 }
 0x12f   :  { %2036 = vperm.xlu1 %6958, %v1646_v10   ;;  %v887_v45 = vadd.f32 %v886_v36, %v8829_v32  ;;  %v1673_v36 = vld [vmem:[%s12000_s4 + $0x2e0] sm:$0xff] }
 0x130   :  { %2031 = vperm.xlu0 %6957, %v1645_v35   ;;  %v888_v31 = vpop.f32.mrf.mxu0  ;;  %v885_v35 = vadd.f32 %v884_v46, %v8829_v32  ;;  %v1160_v46 = vmax.f32 %v881_v22, 0.0 }
 0x131   :  { %v889_v34 = vadd.f32 %v888_v31, %v8843_v37  ;;  %v9336_v31 = vpop.permute.xlu1 %435 }
 0x132   :  { %v890_v10 = vpop.f32.mrf.mxu0  ;;  %12126 = vst [vmem:[#allocation44_spill] sm:$0xff] %v9336_v31  ;;  %v1161_v56 = vmax.f32 %v885_v35, 0.0  ;;  %v861_v35 = vadd.f32 %v9257_v52, %v8899_v58  ;;  %v1154_v52 = vmax.f32 %v867_v63, 0.0  ;;  %v1153_v63 = vmax.f32 %v865_v57, 0.0 }
 0x133   :  { %2186 = vperm.xlu1 %6958, %v1676_v8   ;;  %v891_v29 = vadd.f32 %v890_v10, %v8843_v37  ;;  %v879_v8 = vadd.f32 %v878_v54, %v8851_v40  ;;  %v1163_v38 = vmax.f32 %v889_v34, 0.0  ;;  %v871_v37 = vadd.f32 %v870_v7, %v8875_v49  ;;  %v1672_v40 = vld [vmem:[%s12000_s4 + $0x2d8] sm:$0xff]  ;;  %v9351_v54 = vpop.permute.xlu0 %1781 }
 0x134   :  { %2181 = vperm.xlu0 %6957, %v1675_v24   ;;  %v894_v21 = vpop.f32.mrf.mxu0  ;;  %v1162_v24 = vmax.f32 %v887_v45, 0.0  ;;  %v1671_v45 = vld [vmem:[%s12000_s4 + $0x2d0] sm:$0xff]  ;;  %12127 = vst [vmem:[#allocation45_spill] sm:$0xff] %v9351_v54  ;;  %v1157_v49 = vmax.f32 %v875_v53, 0.0  ;;  %v845_v57 = vadd.f32 %v9205_v62, %v8925_v5  ;;  %v1706_v54 = vld [vmem:[%s12000_s4 + $0x3e8] sm:$0xff] }
 0x135   :  { %v1164_v32 = vmax.f32 %v891_v29, 0.0  ;;  %v895_v31 = vadd.f32 %v894_v21, %v9313_v0  ;;  %v1158_v29 = vmax.f32 %v877_v16, 0.0  ;;  %v1159_v9 = vmax.f32 %v879_v8, 0.0  ;;  %v9358_v22 = vpop.permute.xlu1 %1786 }
 0x136   :  { %v9341_v10 = vpop.f32.mrf.mxu0  ;;  %v1531_v7 = vpack.c.bf16 %v1163_v38, %v1161_v56  ;;  %12128 = vst [vmem:[#allocation46_spill] sm:$0xff] %v9358_v22  ;;  %v1670_v56 = vld [vmem:[%s12000_s4 + $0x2c8] sm:$0xff]  ;;  %v857_v38 = vadd.f32 %v9242_v11, %v8901_v59 }
 0x137   :  { %2176 = vperm.xlu1 %6958, %v1674_v28   ;;  %v1532_v39 = vpack.c.bf16 %v1164_v32, %v1162_v24  ;;  %v1530_v16 = vpack.c.bf16 %v1160_v46, %v1158_v29  ;;  %v1165_v33 = vmax.f32 %v895_v31, 0.0  ;;  %v1529_v53 = vpack.c.bf16 %v1159_v9, %v1157_v49  ;;  %v9378_v32 = vpop.permute.xlu0 %1771 }
 0x138   :  { %2171 = vperm.xlu0 %6957, %v1673_v36   ;;  %v898_v34 = vpop.f32.mrf.mxu0  ;;  %v1156_v36 = vmax.f32 %v871_v37, 0.0  ;;  %12129 = vst [vmem:[#allocation47_spill] sm:$0xff] %v9378_v32  ;;  %v851_v37 = vadd.f32 %v9227_v42, %v8923_v4  ;;  %v1152_v46 = vmax.f32 %v861_v35, 0.0  ;;  %v1667_v42 = vld [vmem:[%s12000_s4 + $0x2b0] sm:$0xff]  ;;  %v847_v29 = vadd.f32 %v9212_v60, %v8925_v5 }
 0x139   :  { %v899_v28 = vadd.f32 %v898_v34, %v9315_v55  ;;  %3629 = vmatprep.subr.bf16.mxu1 %v1532_v39  ;;  %v1669_v39 = vld [vmem:[%s12000_s4 + $0x2c0] sm:$0xff]  ;;  %v9395_v34 = vpop.permute.xlu1 %1776  ;;  %v1150_v41 = vmax.f32 %v857_v38, 0.0  ;;  %v1151_v9 = vmax.f32 %v859_v50, 0.0  ;;  %v841_v35 = vadd.f32 %v9197_v30, %v8953_v15 }
 0x13a   :  { %v9362_v21 = vpop.f32.mrf.mxu0  ;;  %3630 = vmatpush1.bf16.msra.mxu1 %v1531_v7  ;;  %v1528_v11 = vpack.c.bf16 %v1156_v36, %v1154_v52  ;;  %12130 = vst [vmem:[#allocation48_spill] sm:$0xff] %v9395_v34  ;;  %v1148_v36 = vmax.f32 %v851_v37, 0.0  ;;  %v1665_v15 = vld [vmem:[%s12000_s4 + $0x2a0] sm:$0xff]  ;;  %v837_v30 = vadd.f32 %v9178_v26, %v8947_v13  ;;  %v1664_v26 = vld [vmem:[%s12000_s4 + $0x298] sm:$0xff]  ;;  %v1663_v37 = vld [vmem:[%s12000_s4 + $0x290] sm:$0xff] }
 0x13b   :  { %2166 = vperm.xlu1 %6958, %v1672_v40   ;;  %v1167_v8 = vmax.f32 %v899_v28, 0.0  ;;  %3631 = vmatprep.subr.bf16.mxu1 %v1530_v16  ;;  %v1527_v28 = vpack.c.bf16 %v1155_v18, %v1153_v63  ;;  %v1526_v60 = vpack.c.bf16 %v1152_v46, %v1150_v41  ;;  %v1144_v52 = vmax.f32 %v841_v35, 0.0 }
 0x13c   :  { %2161 = vperm.xlu0 %6957, %v1671_v45   ;;  %v904_v24 = vpop.f32.mrf.mxu0  ;;  %v855_v45 = vadd.f32 %v9237_v3, %v8901_v59  ;;  %v849_v3 = vadd.f32 %v9222_v23, %v8923_v4  ;;  %v1666_v4 = vld [vmem:[%s12000_s4 + $0x2a8] sm:$0xff]  ;;  %v1146_v23 = vmax.f32 %v847_v29, 0.0  ;;  %v1142_v46 = vmax.f32 %v837_v30, 0.0 }
 0x13d   :  { %v9376_v31 = vpack.c.bf16 %v1167_v8, %v1165_v33  ;;  %v905_v58 = vadd.f32 %v904_v24, %v9278_v44  ;;  %v9418_v24 = vpop.permute.xlu1 %1766 }
 0x13e   :  { %v9382_v40 = vpop.f32.mrf.mxu0  ;;  %3632 = vmatpush1.bf16.msra.mxu1 %v1529_v53  ;;  %v1149_v49 = vmax.f32 %v855_v45, 0.0  ;;  %v1147_v62 = vmax.f32 %v849_v3, 0.0  ;;  %12132 = vst [vmem:[#allocation50_spill] sm:$0xff] %v9418_v24  ;;  %v1524_v18 = vpack.c.bf16 %v1148_v36, %v1146_v23  ;;  %v1145_v53 = vmax.f32 %v845_v57, 0.0  ;;  %v1661_v3 = vld [vmem:[%s12000_s4 + $0x280] sm:$0xff]  ;;  %v1692_v36 = vld [vmem:[%s12000_s4 + $0x378] sm:$0xff] }
 0x13f   :  { %2156 = vperm.xlu1 %6958, %v1670_v56   ;;  %3633 = vmatprep.subr.bf16.mxu1 %v1528_v11  ;;  %v1169_v33 = vmax.f32 %v905_v58, 0.0  ;;  %v9414_v56 = vpop.permute.xlu0 %1761  ;;  %v1687_v23 = vld [vmem:[%s12000_s4 + $0x350] sm:$0xff] }
 0x140   :  { %2151 = vperm.xlu0 %6957, %v1669_v39   ;;  %v908_v59 = vpop.f32.mrf.mxu0  ;;  %12131 = vst [vmem:[#allocation49_spill] sm:$0xff] %v9414_v56  ;;  %v1525_v39 = vpack.c.bf16 %v1151_v9, %v1149_v49  ;;  %v1523_v45 = vpack.c.bf16 %v1147_v62, %v1145_v53 }
 0x141   :  { %v909_v7 = vadd.f32 %v908_v59, %v9285_v12  ;;  %v1662_v59 = vld [vmem:[%s12000_s4 + $0x288] sm:$0xff]  ;;  %v9440_v9 = vpop.permute.xlu1 %1756 }
 0x142   :  { %v9402_v16 = vpop.f32.mrf.mxu0  ;;  %3634 = vmatpush1.bf16.msra.mxu1 %v1527_v28  ;;  %12134 = vst [vmem:[#allocation52_spill] sm:$0xff] %v9440_v9 }
 0x143   :  { %2146 = vperm.xlu1 %6958, %v1668_v27   ;;  %v1171_v8 = vmax.f32 %v909_v7, 0.0  ;;  %3635 = vmatprep.subr.bf16.mxu1 %v1526_v60  ;;  %v9430_v58 = vpop.permute.xlu0 %1751  ;;  %v1691_v60 = vld [vmem:[%s12000_s4 + $0x370] sm:$0xff] }
 0x144   :  { %2141 = vperm.xlu0 %6957, %v1667_v42   ;;  %v914_v5 = vpop.f32.mrf.mxu0  ;;  %12133 = vst [vmem:[#allocation51_spill] sm:$0xff] %v9430_v58  ;;  %v1522_v42 = vpack.c.bf16 %v1144_v52, %v1142_v46 }
 0x145   :  { %v9416_v38 = vpack.c.bf16 %v1171_v8, %v1169_v33  ;;  %v915_v13 = vadd.f32 %v914_v5, %v9235_v1  ;;  %v9460_v33 = vpop.permute.xlu1 %1746 }
 0x146   :  { %v9420_v50 = vpop.f32.mrf.mxu0  ;;  %3636 = vmatpush1.bf16.msra.mxu1 %v1525_v39  ;;  %v1685_v39 = vld [vmem:[%s12000_s4 + $0x340] sm:$0xff] }
 0x147   :  { %2136 = vperm.xlu1 %6958, %v1666_v4   ;;  %3637 = vmatprep.subr.bf16.mxu1 %v1524_v18  ;;  %v1173_v29 = vmax.f32 %v915_v13, 0.0  ;;  %v9455_v57 = vpop.permute.xlu0 %1741  ;;  %v1689_v4 = vld [vmem:[%s12000_s4 + $0x360] sm:$0xff] }
 0x148   :  { %2131 = vperm.xlu0 %6957, %v1665_v15   ;;  %v918_v11 = vpop.f32.mrf.mxu0 }
 0x149   :  { %v919_v63 = vadd.f32 %v918_v11, %v9240_v25  ;;  %v9485_v5 = vpop.permute.xlu1 %1736 }
 0x14a   :  { %v9432_v27 = vpop.f32.mrf.mxu0  ;;  %3638 = vmatpush1.bf16.msra.mxu1 %v1523_v45 }
 0x14b   :  { %2126 = vperm.xlu1 %6958, %v1664_v26   ;;  %v1175_v41 = vmax.f32 %v919_v63, 0.0  ;;  %3639 = vmatprep.subr.bf16.mxu1 %v1522_v42  ;;  %v9474_v15 = vpop.permute.xlu0 %1731  ;;  %v1684_v26 = vld [vmem:[%s12000_s4 + $0x338] sm:$0xff]  ;;  %v1682_v63 = vld [vmem:[%s12000_s4 + $0x328] sm:$0xff]  ;;  %v1681_v42 = vld [vmem:[%s12000_s4 + $0x320] sm:$0xff] }
 0x14c   :  { %2121 = vperm.xlu0 %6957, %v1663_v37   ;;  %v9442_v28 = vpop.f32.mrf.mxu0  ;;  %v1683_v37 = vld [vmem:[%s12000_s4 + $0x330] sm:$0xff] }
 0x14d   :  { %v9444_v7 = vpack.c.bf16 %v1175_v41, %v1173_v29  ;;  %v9501_v53 = vpop.permute.xlu1 %1726 }
 0x14e   :  { %v9446_v35 = vpop.f32.mrf.mxu0  ;;  %3640 = vmatpush1.bf16.msra.mxu1 %v9207_v17  ;;  %v1690_v17 = vld [vmem:[%s12000_s4 + $0x368] sm:$0xff] }
 0x14f   :  { %2116 = vperm.xlu1 %6958, %v1662_v59   ;;  %3641 = vmatprep.subr.bf16.mxu1 %v9187_v14  ;;  %v9497_v52 = vpop.permute.xlu0 %1721 }
 0x150   :  { %2111 = vperm.xlu0 %6957, %v1661_v3   ;;  %v9458_v49 = vpop.f32.mrf.mxu0  ;;  %v1680_v3 = vld [vmem:[%s12000_s4 + $0x318] sm:$0xff] }
 0x151   :  { %v9521_v29 = vpop.permute.xlu1 %1716 }
 0x152   :  { %v9462_v8 = vpop.f32.mrf.mxu0  ;;  %3642 = vmatpush1.bf16.msra.mxu1 %v9175_v43  ;;  %v1688_v43 = vld [vmem:[%s12000_s4 + $0x358] sm:$0xff] }
 0x153   :  { %2266 = vperm.xlu1 %6958, %v1692_v36   ;;  %3643 = vmatprep.subr.bf16.mxu1 %v9157_v6  ;;  %v9513_v11 = vpop.permute.xlu0 %1711  ;;  %v1679_v36 = vld [vmem:[%s12000_s4 + $0x310] sm:$0xff] }
 0x154   :  { %2261 = vperm.xlu0 %6957, %v1691_v60   ;;  %v9472_v14 = vpop.f32.mrf.mxu0 }
 0x156   :  { %v9476_v30 = vpop.f32.mrf.mxu0  ;;  %3644 = vmatpush1.bf16.msra.mxu1 %v9145_v48  ;;  %v1686_v48 = vld [vmem:[%s12000_s4 + $0x348] sm:$0xff] }
 0x157   :  { %2256 = vperm.xlu1 %6958, %v1690_v17   ;;  %v9529_v60 = vpop.permute.xlu0 %1861 }
 0x158   :  { %2251 = vperm.xlu0 %6957, %v1689_v4   ;;  %v9487_v6 = vpop.f32.mrf.mxu0  ;;  %12135 = vst [vmem:[#allocation53_spill] sm:$0xff] %v9529_v60  ;;  %v9531_v4 = vpop.permute.xlu1 %1866 }
 0x159   :  { %12136 = vst [vmem:[#allocation54_spill] sm:$0xff] %v9531_v4 }
 0x15a   :  { %v9489_v62 = vpop.f32.mrf.mxu0 }
 0x15b   :  { %2246 = vperm.xlu1 %6958, %v1688_v43  }
 0x15c   :  { %2241 = vperm.xlu0 %6957, %v1687_v23   ;;  %v9499_v18 = vpop.f32.mrf.mxu0  ;;  %v1678_v23 = vld [vmem:[%s12000_s4 + $0x308] sm:$0xff] }
 0x15e   :  { %v9503_v13 = vpop.f32.mrf.mxu0 }
 0x15f   :  { %2236 = vperm.xlu1 %6958, %v1686_v48   ;;  %v1677_v48 = vld [vmem:[%s12000_s4 + $0x300] sm:$0xff] }
 0x160   :  { %2231 = vperm.xlu0 %6957, %v1685_v39   ;;  %v9511_v46 = vpop.f32.mrf.mxu0 }
 0x162   :  { %v950_v45 = vpop.f32.mrf.mxu0 }
 0x163   :  { %2226 = vperm.xlu1 %6958, %v1684_v26   ;;  %v9539_v26 = vpop.permute.xlu0 %1851 }
 0x164   :  { %2221 = vperm.xlu0 %6957, %v1683_v37   ;;  %v954_v41 = vpop.f32.mrf.mxu0  ;;  %12137 = vst [vmem:[#allocation55_spill] sm:$0xff] %v9539_v26 }
 0x165   :  { %v955_v24 = vadd.f32 %v954_v41, %v9075_v19 }
 0x166   :  { %v956_v59 = vpop.f32.mrf.mxu0 }
 0x167   :  { %2216 = vperm.xlu1 %6958, %v1682_v63   ;;  %v1708_v63 = vld [vmem:[%s12000_s4 + $0x3f8] sm:$0xff] }
 0x168   :  { %2211 = vperm.xlu0 %6957, %v1681_v42   ;;  %v958_v17 = vpop.f32.mrf.mxu0  ;;  %v1707_v42 = vld [vmem:[%s12000_s4 + $0x3f0] sm:$0xff] }
 0x16a   :  { %v960_v43 = vpop.f32.mrf.mxu0 }
 0x16b   :  { %2206 = vperm.xlu1 %6958, %v1680_v3   ;;  %v9547_v3 = vpop.permute.xlu1 %1856  ;;  %v961_v26 = vadd.f32 %v960_v43, %v9078_v20 }
 0x16c   :  { %2201 = vperm.xlu0 %6957, %v1679_v36   ;;  %v964_v39 = vpop.f32.mrf.mxu0  ;;  %12138 = vst [vmem:[#allocation56_spill] sm:$0xff] %v9547_v3  ;;  %v1705_v3 = vld [vmem:[%s12000_s4 + $0x3e0] sm:$0xff] }
 0x16e   :  { %v966_v37 = vpop.f32.mrf.mxu0 }
 0x16f   :  { %2196 = vperm.xlu1 %6958, %v1678_v23   ;;  %v967_v4 = vadd.f32 %v966_v37, %v9042_v61  ;;  %v9560_v37 = vpop.permute.xlu0 %1841 }
 0x170   :  { %2191 = vperm.xlu0 %6957, %v1677_v48   ;;  %v968_v36 = vpop.f32.mrf.mxu0  ;;  %v965_v48 = vadd.f32 %v964_v39, %v9042_v61  ;;  %12139 = vst [vmem:[#allocation57_spill] sm:$0xff] %v9560_v37  ;;  %v9564_v39 = vpop.permute.xlu1 %1846 }
 0x171   :  { %v969_v60 = vadd.f32 %v968_v36, %v9047_v2  ;;  %v957_v36 = vadd.f32 %v956_v59, %v9075_v19  ;;  %12140 = vst [vmem:[#allocation58_spill] sm:$0xff] %v9564_v39  ;;  %v949_v19 = vadd.f32 %v9511_v46, %v9111_v47 }
 0x172   :  { %v970_v23 = vpop.f32.mrf.mxu0  ;;  %v1193_v37 = vmax.f32 %v965_v48, 0.0 }
 0x173   :  { %2346 = vperm.xlu1 %6958, %v1708_v63   ;;  %v971_v22 = vadd.f32 %v970_v23, %v9047_v2  ;;  %v959_v63 = vadd.f32 %v958_v17, %v9078_v20  ;;  %v1195_v34 = vmax.f32 %v969_v60, 0.0  ;;  %v951_v2 = vadd.f32 %v950_v45, %v9111_v47  ;;  %v1704_v20 = vld [vmem:[%s12000_s4 + $0x3d8] sm:$0xff]  ;;  %v9582_v48 = vpop.permute.xlu0 %1831 }
 0x174   :  { %2341 = vperm.xlu0 %6957, %v1707_v42   ;;  %v974_v43 = vpop.f32.mrf.mxu0  ;;  %v1194_v42 = vmax.f32 %v967_v4, 0.0  ;;  %v1192_v23 = vmax.f32 %v961_v26, 0.0  ;;  %v12141_v45 = vld [vmem:[#allocation28_spill] sm:$0xff]  ;;  %v1190_v60 = vmax.f32 %v957_v36, 0.0  ;;  %v12142_v26 = vld [vmem:[#allocation23_spill] sm:$0xff]  ;;  %v1189_v47 = vmax.f32 %v955_v24, 0.0 }
 0x175   :  { %v1196_v61 = vmax.f32 %v971_v22, 0.0  ;;  %v975_v59 = vadd.f32 %v974_v43, %v9025_v51  ;;  %v1703_v22 = vld [vmem:[%s12000_s4 + $0x3d0] sm:$0xff]  ;;  %v1191_v41 = vmax.f32 %v959_v63, 0.0  ;;  %v1547_v4 = vpack.c.bf16 %v1195_v34, %v1193_v37  ;;  %12143 = vst [vmem:[#allocation28_spill] sm:$0xff] %v9582_v48  ;;  %v12144_v43 = vld [vmem:[#allocation32_spill] sm:$0xff]  ;;  %v9596_v37 = vpop.permute.xlu1 %1836 }
 0x176   :  { %v9567_v32 = vpop.f32.mrf.mxu0  ;;  %v945_v36 = vadd.f32 %v9499_v18, %v12141_v45  ;;  %12145 = vst [vmem:[#allocation23_spill] sm:$0xff] %v9596_v37  ;;  %v12146_v63 = vld [vmem:[#allocation31_spill] sm:$0xff]  ;;  %v939_v24 = vadd.f32 %v9487_v6, %v12144_v43 }
 0x177   :  { %2336 = vperm.xlu1 %6958, %v1706_v54   ;;  %v1548_v56 = vpack.c.bf16 %v1196_v61, %v1194_v42  ;;  %v947_v54 = vadd.f32 %v9503_v13, %v12141_v45  ;;  %v941_v42 = vadd.f32 %v9489_v62, %v12144_v43  ;;  %v1188_v61 = vmax.f32 %v951_v2, 0.0  ;;  %v1701_v62 = vld [vmem:[%s12000_s4 + $0x3c0] sm:$0xff]  ;;  %v1700_v6 = vld [vmem:[%s12000_s4 + $0x3b8] sm:$0xff] }
 0x178   :  { %2331 = vperm.xlu0 %6957, %v1705_v3   ;;  %v978_v17 = vpop.f32.mrf.mxu0  ;;  %v1546_v13 = vpack.c.bf16 %v1192_v23, %v1190_v60  ;;  %v1197_v46 = vmax.f32 %v975_v59, 0.0  ;;  %v937_v2 = vadd.f32 %v9476_v30, %v12146_v63  ;;  %v1187_v59 = vmax.f32 %v949_v19, 0.0  ;;  %v12147_v45 = vld [vmem:[#allocation36_spill] sm:$0xff]  ;;  %v9617_v19 = vpop.permute.xlu0 %1821 }
 0x179   :  { %v979_v3 = vadd.f32 %v978_v17, %v12142_v26  ;;  %3645 = vmatprep.subr.bf16.mxu1 %v1548_v56  ;;  %v1702_v56 = vld [vmem:[%s12000_s4 + $0x3c8] sm:$0xff]  ;;  %v1186_v23 = vmax.f32 %v947_v54, 0.0  ;;  %v931_v60 = vadd.f32 %v9462_v8, %v12147_v45  ;;  %v1184_v17 = vmax.f32 %v941_v42, 0.0  ;;  %v1699_v8 = vld [vmem:[%s12000_s4 + $0x3b0] sm:$0xff]  ;;  %12149 = vst [vmem:[#allocation32_spill] sm:$0xff] %v9617_v19 }
 0x17a   :  { %v9586_v39 = vpop.f32.mrf.mxu0  ;;  %3646 = vmatpush2.bf16.msra.mxu1 %v1547_v4  ;;  %v935_v30 = vadd.f32 %v9472_v14, %v12146_v63  ;;  %v1185_v54 = vmax.f32 %v945_v36, 0.0  ;;  %v1182_v42 = vmax.f32 %v937_v2, 0.0  ;;  %v1183_v36 = vmax.f32 %v939_v24, 0.0 }
 0x17b   :  { %2326 = vperm.xlu1 %6958, %v1704_v20   ;;  %v1199_v34 = vmax.f32 %v979_v3, 0.0  ;;  %3647 = vmatprep.subr.bf16.mxu1 %v1546_v13  ;;  %v1545_v20 = vpack.c.bf16 %v1191_v41, %v1189_v47  ;;  %v1544_v3 = vpack.c.bf16 %v1188_v61, %v1186_v23  ;;  %v12148_v13 = vld [vmem:[#allocation21_spill] sm:$0xff]  ;;  %v12150_v41 = vld [vmem:[#allocation35_spill] sm:$0xff]  ;;  %v929_v61 = vadd.f32 %v9458_v49, %v12147_v45 }
 0x17c   :  { %2321 = vperm.xlu0 %6957, %v1703_v22   ;;  %v984_v18 = vpop.f32.mrf.mxu0  ;;  %v927_v43 = vadd.f32 %v9446_v35, %v12150_v41  ;;  %v1543_v47 = vpack.c.bf16 %v1187_v59, %v1185_v54  ;;  %v1180_v63 = vmax.f32 %v931_v60, 0.0  ;;  %v1542_v35 = vpack.c.bf16 %v1184_v17, %v1182_v42  ;;  %v1698_v59 = vld [vmem:[%s12000_s4 + $0x3a8] sm:$0xff]  ;;  %v9644_v17 = vpop.permute.xlu0 %1811 }
 0x17d   :  { %v9602_v22 = vpack.c.bf16 %v1199_v34, %v1197_v46  ;;  %v985_v37 = vadd.f32 %v984_v18, %v12148_v13  ;;  %v12151_v46 = vld [vmem:[#allocation22_spill] sm:$0xff]  ;;  %v925_v2 = vadd.f32 %v9442_v28, %v12150_v41  ;;  %v1181_v18 = vmax.f32 %v935_v30, 0.0  ;;  %12153 = vst [vmem:[#allocation36_spill] sm:$0xff] %v9644_v17 }
 0x17e   :  { %v9606_v4 = vpop.f32.mrf.mxu0  ;;  %3648 = vmatpush2.bf16.msra.mxu1 %v1545_v20  ;;  %v1178_v20 = vmax.f32 %v927_v43, 0.0  ;;  %v1179_v28 = vmax.f32 %v929_v61, 0.0  ;;  %v907_v41 = vadd.f32 %v9382_v40, %v9278_v44  ;;  %v1694_v44 = vld [vmem:[%s12000_s4 + $0x388] sm:$0xff]  ;;  %v1693_v40 = vld [vmem:[%s12000_s4 + $0x380] sm:$0xff] }
 0x17f   :  { %2316 = vperm.xlu1 %6958, %v1702_v56   ;;  %3649 = vmatprep.subr.bf16.mxu1 %v1544_v3  ;;  %v9624_v56 = vpop.permute.xlu1 %1826  ;;  %v1201_v49 = vmax.f32 %v985_v37, 0.0  ;;  %v1541_v60 = vpack.c.bf16 %v1183_v36, %v1181_v18  ;;  %v911_v3 = vadd.f32 %v9402_v16, %v9285_v12 }
 0x180   :  { %2311 = vperm.xlu0 %6957, %v1701_v62   ;;  %v988_v14 = vpop.f32.mrf.mxu0  ;;  %12152 = vst [vmem:[#allocation31_spill] sm:$0xff] %v9624_v56  ;;  %v921_v62 = vadd.f32 %v9432_v27, %v9240_v25  ;;  %v1697_v25 = vld [vmem:[%s12000_s4 + $0x3a0] sm:$0xff]  ;;  %v917_v27 = vadd.f32 %v9420_v50, %v9235_v1  ;;  %v1177_v1 = vmax.f32 %v925_v2, 0.0  ;;  %v1696_v50 = vld [vmem:[%s12000_s4 + $0x398] sm:$0xff] }
 0x181   :  { %v989_v34 = vadd.f32 %v988_v14, %v12151_v46  ;;  %v901_v14 = vadd.f32 %v9362_v21, %v9315_v55  ;;  %v1172_v61 = vmax.f32 %v911_v3, 0.0  ;;  %v9674_v55 = vpop.permute.xlu0 %1801 }
 0x182   :  { %v9628_v23 = vpop.f32.mrf.mxu0  ;;  %3650 = vmatpush2.bf16.msra.mxu1 %v1543_v47  ;;  %v1176_v30 = vmax.f32 %v921_v62, 0.0  ;;  %v1174_v16 = vmax.f32 %v917_v27, 0.0  ;;  %v1539_v42 = vpack.c.bf16 %v1179_v28, %v1177_v1  ;;  %v1170_v62 = vmax.f32 %v907_v41, 0.0  ;;  %12155 = vst [vmem:[#allocation35_spill] sm:$0xff] %v9674_v55  ;;  %v7015_v28 = vld [vmem:[#allocation3] ss:$16 sps:$4 sm:$0xff]  }
 0x183   :  { %2306 = vperm.xlu1 %6958, %v1700_v6   ;;  %v1203_v24 = vmax.f32 %v989_v34, 0.0  ;;  %3651 = vmatprep.subr.bf16.mxu1 %v1542_v35  ;;  %v1540_v6 = vpack.c.bf16 %v1180_v63, %v1178_v20  ;;  %v9658_v12 = vpop.permute.xlu1 %1816  ;;  %v897_v34 = vadd.f32 %v9341_v10, %v9313_v0  ;;  %v1168_v63 = vmax.f32 %v901_v14, 0.0  ;;  %v7023_v14 = vld [vmem:[#allocation3 + $0x40] ss:$16 sps:$4 sm:$0xff]  }
 0x184   :  { %2301 = vperm.xlu0 %6957, %v1699_v8   ;;  %v9640_v45 = vpop.f32.mrf.mxu0  ;;  %v1695_v8 = vld [vmem:[%s12000_s4 + $0x390] sm:$0xff]  ;;  %12154 = vst [vmem:[#allocation21_spill] sm:$0xff] %v9658_v12  ;;  %v1538_v47 = vpack.c.bf16 %v1176_v30, %v1174_v16  ;;  %v1536_v18 = vpack.c.bf16 %v1172_v61, %v1170_v62  ;;  %v12162_v12 = vld [vmem:[#allocation13_spill] sm:$0xff] }
 0x185   :  { %v9642_v37 = vpack.c.bf16 %v1203_v24, %v1201_v49  ;;  %v6579_v49 = vld [vmem:[#allocation2] sm:$0x1]  ;;  %v1166_v24 = vmax.f32 %v897_v34, 0.0  ;;  %v9685_v10 = vpop.permute.xlu0 %1791  ;;  %v7024_v61 = vld [vmem:[#allocation3 + $0x64] ss:$16 sps:$4 sm:$0xff]  }
 0x186   :  { %v9648_v54 = vpop.f32.mrf.mxu0  ;;  %3652 = vmatpush2.bf16.msra.mxu1 %v1541_v60  ;;  %12157 = vst [vmem:[#allocation59_spill] sm:$0xff] %v9685_v10  ;;  %v7018_v60 = vld [vmem:[#allocation3 + $0x24] ss:$16 sps:$4 sm:$0xff]   ;;  %v7026_v34 = vld [vmem:[#allocation3 + $0x60] ss:$16 sps:$4 sm:$0xff]  }
 0x187   :  { %2296 = vperm.xlu1 %6958, %v1698_v59   ;;  %3653 = vmatprep.subr.bf16.mxu1 %v1540_v6  ;;  %v9678_v35 = vpop.permute.xlu1 %1806  ;;  %v7027_v62 = vld [vmem:[#allocation3 + $0x84] ss:$16 sps:$4 sm:$0xff]  }
 0x188   :  { %2291 = vperm.xlu0 %6957, %v1697_v25   ;;  %v9660_v43 = vpop.f32.mrf.mxu0  ;;  %12156 = vst [vmem:[#allocation22_spill] sm:$0xff] %v9678_v35  ;;  %v1534_v25 = vpack.c.bf16 %v1168_v63, %v1166_v24  ;;  %v12159_v24 = vld [vmem:[#allocation9_spill] sm:$0xff] }
 0x18a   :  { %v9664_v36 = vpop.f32.mrf.mxu0  ;;  %3654 = vmatpush2.bf16.msra.mxu1 %v1539_v42 }
 0x18b   :  { %2286 = vperm.xlu1 %6958, %v1696_v50   ;;  %3655 = vmatprep.subr.bf16.mxu1 %v1538_v47  ;;  %v7020_v50 = vld [vmem:[#allocation3 + $0x20] ss:$16 sps:$4 sm:$0xff]  }
 0x18c   :  { %2281 = vperm.xlu0 %6957, %v1695_v8   ;;  %v9676_v21 = vpop.f32.mrf.mxu0 }
 0x18e   :  { %v9680_v2 = vpop.f32.mrf.mxu0  ;;  %3656 = vmatpush2.bf16.msra.mxu1 %v9444_v7  ;;  %v7067_v7 = vld [vmem:[#allocation3 + $0xc] ss:$16 sps:$4 sm:$0xff]  }
 0x18f   :  { %2276 = vperm.xlu1 %6958, %v1694_v44   ;;  %3657 = vmatprep.subr.bf16.mxu1 %v1536_v18  ;;  %v12158_v18 = vld [vmem:[#allocation11_spill] sm:$0xff] }
 0x190   :  { %2271 = vperm.xlu0 %6957, %v1693_v40   ;;  %v9683_v0 = vpop.f32.mrf.mxu0  ;;  %4334 = vmatprep.mubr.bf16.mxu0 %v7067_v7 }
 0x192   :  { %v9687_v59 = vpop.f32.mrf.mxu0  ;;  %3658 = vmatpush2.bf16.msra.mxu1 %v9416_v38  ;;  %v7021_v38 = vld [vmem:[#allocation3 + $0x44] ss:$16 sps:$4 sm:$0xff]  }
 0x193   :  { %3659 = vmatprep.subr.bf16.mxu1 %v1534_v25 }
 0x194   :  { %6582 = vperm.xlu0 %6957, %v6579_v49   ;;  %v9690_v27 = vpop.f32.mrf.mxu0 }
 0x196   :  { %v9692_v20 = vpop.f32.mrf.mxu0  ;;  %3660 = vmatpush2.bf16.msra.mxu1 %v9376_v31 }
 0x198   :  { %v9695_v3 = vpop.f32.mrf.mxu0 }
 0x199   :  { %3662 = vmatmul.mubr.bf16.vlgmr.msra.gmra.mxu1 %v7015_v28  ;;  %v12160_v28 = vld [vmem:[#allocation10_spill] sm:$0xff] }
 0x19a   :  { %v1020_v30 = vpop.f32.mrf.mxu0  ;;  %3671 = vmatprep.mubr.bf16.mxu1 %v7018_v60 }
 0x19c   :  { %v1024_v6 = vpop.f32.mrf.mxu0 }
 0x19e   :  { %v1026_v1 = vpop.f32.mrf.mxu0 }
 0x1a0   :  { %v1028_v8 = vpop.f32.mrf.mxu0 }
 0x1a1   :  { %3672 = vmatmul.mubr.bf16.gmra.mxu1 %v7020_v50 }
 0x1a2   :  { %v1030_v41 = vpop.f32.mrf.mxu0  ;;  %3681 = vmatprep.mubr.bf16.mxu1 %v7021_v38  ;;  %v12161_v38 = vld [vmem:[#allocation12_spill] sm:$0xff] }
 0x1a3   :  { %v1031_v17 = vadd.f32 %v1030_v41, %v12162_v12 }
 0x1a4   :  { %v1034_v16 = vpop.f32.mrf.mxu0 }
 0x1a5   :  { %v1220_v9 = vmax.f32 %v1031_v17, 0.0 }
 0x1a6   :  { %v1036_v42 = vpop.f32.mrf.mxu0 }
 0x1a7   :  { %v1037_v48 = vadd.f32 %v1036_v42, %v12161_v38 }
 0x1a8   :  { %v1038_v31 = vpop.f32.mrf.mxu0 }
 0x1a9   :  { %3682 = vmatmul.mubr.bf16.gmra.mxu1 %v7023_v14  ;;  %v1222_v10 = vmax.f32 %v1037_v48, 0.0 }
 0x1aa   :  { %v1040_v47 = vpop.f32.mrf.mxu0  ;;  %3691 = vmatprep.mubr.bf16.mxu1 %v7024_v61  ;;  %v1039_v61 = vadd.f32 %v1038_v31, %v12158_v18  ;;  %v7030_v31 = vld [vmem:[#allocation3 + $0xa4] ss:$16 sps:$4 sm:$0xff]  }
 0x1ab   :  { %v1041_v49 = vadd.f32 %v1040_v47, %v12158_v18  ;;  %v1029_v18 = vadd.f32 %v1028_v8, %v12162_v12 }
 0x1ac   :  { %v1044_v44 = vpop.f32.mrf.mxu0 }
 0x1ad   :  { %v1045_v60 = vadd.f32 %v1044_v44, %v12159_v24  ;;  %v1224_v47 = vmax.f32 %v1041_v49, 0.0 }
 0x1ae   :  { %v1046_v40 = vpop.f32.mrf.mxu0 }
 0x1af   :  { %v1047_v25 = vadd.f32 %v1046_v40, %v12159_v24  ;;  %v1225_v55 = vmax.f32 %v1045_v60, 0.0  ;;  %v12163_v24 = vld [vmem:[#allocation14_spill] sm:$0xff] }
 0x1b0   :  { %v1048_v63 = vpop.f32.mrf.mxu0  ;;  %v1027_v42 = vadd.f32 %v1026_v1, %v12163_v24  ;;  %v1025_v58 = vadd.f32 %v1024_v6, %v12163_v24  ;;  %v12168_v6 = vld [vmem:[#allocation17_spill] sm:$0xff] }
 0x1b1   :  { %v1049_v7 = vadd.f32 %v1048_v63, %v12160_v28  ;;  %3692 = vmatmul.mubr.bf16.gmra.mxu1 %v7026_v34  ;;  %v1226_v35 = vmax.f32 %v1047_v25, 0.0  ;;  %v1035_v63 = vadd.f32 %v1034_v16, %v12161_v38  ;;  %v7029_v34 = vld [vmem:[#allocation3 + $0x80] ss:$16 sps:$4 sm:$0xff]   ;;  %v1562_v38 = vpack.c.bf16 %v1224_v47, %v1222_v10 }
 0x1b2   :  { %v1050_v50 = vpop.f32.mrf.mxu0  ;;  %3701 = vmatprep.mubr.bf16.mxu1 %v7027_v62  ;;  %v12165_v25 = vld [vmem:[#allocation15_spill] sm:$0xff]  ;;  %v12166_v16 = vld [vmem:[#allocation44_spill] sm:$0xff] }
 0x1b3   :  { %v1051_v14 = vadd.f32 %v1050_v50, %v12160_v28  ;;  %v1227_v56 = vmax.f32 %v1049_v7, 0.0  ;;  %v12164_v28 = vld [vmem:[#allocation43_spill] sm:$0xff]  ;;  %v1223_v7 = vmax.f32 %v1039_v61, 0.0  ;;  %v1221_v1 = vmax.f32 %v1035_v63, 0.0 }
 0x1b4   :  { %v1054_v19 = vpop.f32.mrf.mxu0  ;;  %v1019_v17 = vadd.f32 %v9695_v3, %v12165_v25  ;;  %v1011_v61 = vadd.f32 %v9687_v59, %v12168_v6  ;;  %v7033_v59 = vld [vmem:[#allocation3 + $0xc4] ss:$16 sps:$4 sm:$0xff]  }
 0x1b5   :  { %v1228_v40 = vmax.f32 %v1051_v14, 0.0  ;;  %v1055_v62 = vadd.f32 %v1054_v19, %v12164_v28  ;;  %v1563_v41 = vpack.c.bf16 %v1227_v56, %v1225_v55  ;;  %v1021_v14 = vadd.f32 %v1020_v30, %v12165_v25  ;;  %v12167_v19 = vld [vmem:[#allocation16_spill] sm:$0xff] }
 0x1b6   :  { %v9706_v44 = vpop.f32.mrf.mxu0  ;;  %v1017_v12 = vadd.f32 %v9692_v20, %v12167_v19  ;;  %v1219_v30 = vmax.f32 %v1029_v18, 0.0  ;;  %v1561_v10 = vpack.c.bf16 %v1223_v7, %v1221_v1  ;;  %v1015_v20 = vadd.f32 %v9690_v27, %v12167_v19  ;;  %v12171_v27 = vld [vmem:[#allocation20_spill] sm:$0xff] }
 0x1b7   :  { %v1564_v50 = vpack.c.bf16 %v1228_v40, %v1226_v35  ;;  %v1218_v35 = vmax.f32 %v1027_v42, 0.0  ;;  %v1229_v56 = vmax.f32 %v1055_v62, 0.0  ;;  %v1216_v47 = vmax.f32 %v1021_v14, 0.0  ;;  %v7032_v42 = vld [vmem:[#allocation3 + $0xa0] ss:$16 sps:$4 sm:$0xff]  }
 0x1b8   :  { %v1058_v49 = vpop.f32.mrf.mxu0  ;;  %v12169_v62 = vld [vmem:[#allocation18_spill] sm:$0xff]  ;;  %v1009_v7 = vadd.f32 %v9683_v0, %v12168_v6  ;;  %v1212_v25 = vmax.f32 %v1011_v61, 0.0  ;;  %v1213_v1 = vmax.f32 %v1015_v20, 0.0 }
 0x1b9   :  { %v1059_v60 = vadd.f32 %v1058_v49, %v12166_v16  ;;  %4302 = vmatprep.subr.bf16.mxu0 %v1564_v50  ;;  %3702 = vmatmul.mubr.bf16.gmra.mxu1 %v7029_v34  ;;  %v1560_v63 = vpack.c.bf16 %v1220_v9, %v1218_v35  ;;  %v1217_v34 = vmax.f32 %v1025_v58, 0.0  ;;  %v1007_v3 = vadd.f32 %v9680_v2, %v12169_v62  ;;  %v12172_v14 = vld [vmem:[#allocation42_spill] sm:$0xff] }
 0x1ba   :  { %v9714_v48 = vpop.f32.mrf.mxu0  ;;  %4303 = vmatpush1.bf16.msra.mxu0 %v1563_v41  ;;  %3711 = vmatprep.mubr.bf16.mxu1 %v7030_v31  ;;  %v1214_v50 = vmax.f32 %v1017_v12, 0.0  ;;  %v12170_v31 = vld [vmem:[#allocation41_spill] sm:$0xff]  ;;  %v1215_v9 = vmax.f32 %v1019_v17, 0.0  ;;  %v1001_v58 = vadd.f32 %v9664_v36, %v12171_v27  ;;  %v1005_v2 = vadd.f32 %v9676_v21, %v12169_v62  ;;  %v12173_v12 = vld [vmem:[#allocation19_spill] sm:$0xff] }
 0x1bb   :  { %v1231_v55 = vmax.f32 %v1059_v60, 0.0  ;;  %4304 = vmatprep.subr.bf16.mxu0 %v1562_v38  ;;  %v1559_v41 = vpack.c.bf16 %v1219_v30, %v1217_v34  ;;  %v997_v0 = vadd.f32 %v9648_v54, %v12173_v12  ;;  %v1210_v35 = vmax.f32 %v1007_v3, 0.0  ;;  %v7035_v20 = vld [vmem:[#allocation3 + $0xc0] ss:$16 sps:$4 sm:$0xff]  }
 0x1bc   :  { %v1064_v8 = vpop.f32.mrf.mxu0  ;;  %v1558_v38 = vpack.c.bf16 %v1216_v47, %v1214_v50  ;;  %v999_v36 = vadd.f32 %v9660_v43, %v12171_v27  ;;  %v1211_v17 = vmax.f32 %v1009_v7, 0.0  ;;  %v1557_v30 = vpack.c.bf16 %v1215_v9, %v1213_v1  ;;  %v7042_v1 = vld [vmem:[#allocation3 + $0x124] ss:$16 sps:$4 sm:$0xff]  }
 0x1bd   :  { %v9722_v40 = vpack.c.bf16 %v1231_v55, %v1229_v56  ;;  %v1065_v18 = vadd.f32 %v1064_v8, %v12170_v31  ;;  %v991_v21 = vadd.f32 %v9628_v23, %v12151_v46  ;;  %v1208_v8 = vmax.f32 %v1001_v58, 0.0  ;;  %v7039_v58 = vld [vmem:[#allocation3 + $0x104] ss:$16 sps:$4 sm:$0xff]  }
 0x1be   :  { %v9726_v24 = vpop.f32.mrf.mxu0  ;;  %4305 = vmatpush1.bf16.msra.mxu0 %v1561_v10  ;;  %v1556_v61 = vpack.c.bf16 %v1212_v25, %v1210_v35  ;;  %v995_v54 = vadd.f32 %v9640_v45, %v12173_v12  ;;  %v1209_v47 = vmax.f32 %v1005_v2, 0.0  ;;  %v987_v43 = vadd.f32 %v9606_v4, %v12148_v13  ;;  %v7041_v2 = vld [vmem:[#allocation3 + $0x100] ss:$16 sps:$4 sm:$0xff]  }
 0x1bf   :  { %4306 = vmatprep.subr.bf16.mxu0 %v1560_v63  ;;  %v1233_v56 = vmax.f32 %v1065_v18, 0.0  ;;  %v1206_v34 = vmax.f32 %v997_v0, 0.0  ;;  %v1207_v62 = vmax.f32 %v999_v36, 0.0  ;;  %v981_v3 = vadd.f32 %v9586_v39, %v12142_v26  ;;  %v7038_v39 = vld [vmem:[#allocation3 + $0xe0] ss:$16 sps:$4 sm:$0xff]  }
 0x1c0   :  { %v1068_v49 = vpop.f32.mrf.mxu0  ;;  %v1555_v46 = vpack.c.bf16 %v1211_v17, %v1209_v47  ;;  %v1204_v50 = vmax.f32 %v991_v21, 0.0  ;;  %v1205_v18 = vmax.f32 %v995_v54, 0.0  ;;  %v977_v4 = vadd.f32 %v9567_v32, %v9025_v51  ;;  %v7045_v36 = vld [vmem:[#allocation3 + $0x144] ss:$16 sps:$4 sm:$0xff]  }
 0x1c1   :  { %v1069_v60 = vadd.f32 %v1068_v49, %v12172_v14  ;;  %3712 = vmatmul.mubr.bf16.gmra.mxu1 %v7032_v42  ;;  %v7036_v42 = vld [vmem:[#allocation3 + $0xe4] ss:$16 sps:$4 sm:$0xff]   ;;  %v1554_v45 = vpack.c.bf16 %v1208_v8, %v1206_v34  ;;  %v1202_v13 = vmax.f32 %v987_v43, 0.0  ;;  %v7047_v8 = vld [vmem:[#allocation3 + $0x140] ss:$16 sps:$4 sm:$0xff]  }
 0x1c2   :  { %v9738_v19 = vpop.f32.mrf.mxu0  ;;  %4307 = vmatpush1.bf16.msra.mxu0 %v1559_v41  ;;  %3721 = vmatprep.mubr.bf16.mxu1 %v7033_v59  ;;  %v1553_v7 = vpack.c.bf16 %v1207_v62, %v1205_v18  ;;  %v1200_v41 = vmax.f32 %v981_v3, 0.0  ;;  %v1198_v26 = vmax.f32 %v977_v4, 0.0  ;;  %v7050_v43 = vld [vmem:[#allocation3 + $0x160] ss:$16 sps:$4 sm:$0xff]   ;;  %v7051_v34 = vld [vmem:[#allocation3 + $0x184] ss:$16 sps:$4 sm:$0xff]  }
 0x1c3   :  { %v1235_v55 = vmax.f32 %v1069_v60, 0.0  ;;  %4308 = vmatprep.subr.bf16.mxu0 %v1558_v38  ;;  %v1552_v49 = vpack.c.bf16 %v1204_v50, %v1202_v13  ;;  %v12174_v62 = vld [vmem:[#allocation27_spill] sm:$0xff]  ;;  %v12175_v3 = vld [vmem:[#allocation24_spill] sm:$0xff] }
 0x1c4   :  { %v9744_v10 = vpop.f32.mrf.mxu0  ;;  %v1550_v60 = vpack.c.bf16 %v1200_v41, %v1198_v26 }
 0x1c5   :  { %v9748_v6 = vpack.c.bf16 %v1235_v55, %v1233_v56  ;;  %v7044_v55 = vld [vmem:[#allocation3 + $0x120] ss:$16 sps:$4 sm:$0xff]  }
 0x1c6   :  { %v9752_v63 = vpop.f32.mrf.mxu0  ;;  %4309 = vmatpush1.bf16.msra.mxu0 %v1557_v30 }
 0x1c7   :  { %4310 = vmatprep.subr.bf16.mxu0 %v1556_v61  ;;  %v7048_v61 = vld [vmem:[#allocation3 + $0x164] ss:$16 sps:$4 sm:$0xff]  }
 0x1c8   :  { %v9756_v23 = vpop.f32.mrf.mxu0 }
 0x1c9   :  { %3722 = vmatmul.mubr.bf16.gmra.mxu1 %v7035_v20 }
 0x1ca   :  { %v9760_v59 = vpop.f32.mrf.mxu0  ;;  %4311 = vmatpush1.bf16.msra.mxu0 %v1555_v46  ;;  %3731 = vmatprep.mubr.bf16.mxu1 %v7036_v42 }
 0x1cb   :  { %4312 = vmatprep.subr.bf16.mxu0 %v1554_v45  ;;  %v12176_v45 = vld [vmem:[#allocation25_spill] sm:$0xff] }
 0x1cc   :  { %v9764_v9 = vpop.f32.mrf.mxu0 }
 0x1ce   :  { %v9766_v27 = vpop.f32.mrf.mxu0  ;;  %4313 = vmatpush1.bf16.msra.mxu0 %v1553_v7  ;;  %v12177_v7 = vld [vmem:[#allocation26_spill] sm:$0xff] }
 0x1cf   :  { %4314 = vmatprep.subr.bf16.mxu0 %v1552_v49 }
 0x1d0   :  { %v9768_v25 = vpop.f32.mrf.mxu0 }
 0x1d1   :  { %3732 = vmatmul.mubr.bf16.gmra.mxu1 %v7038_v39 }
 0x1d2   :  { %v9770_v51 = vpop.f32.mrf.mxu0  ;;  %4315 = vmatpush1.bf16.msra.mxu0 %v9642_v37  ;;  %3741 = vmatprep.mubr.bf16.mxu1 %v7039_v58  ;;  %v12178_v58 = vld [vmem:[#allocation30_spill] sm:$0xff] }
 0x1d3   :  { %4316 = vmatprep.subr.bf16.mxu0 %v1550_v60 }
 0x1d4   :  { %v9773_v32 = vpop.f32.mrf.mxu0 }
 0x1d6   :  { %v1096_v38 = vpop.f32.mrf.mxu0  ;;  %4317 = vmatpush1.bf16.msra.mxu0 %v9602_v22 }
 0x1d8   :  { %v1098_v12 = vpop.f32.mrf.mxu0 }
 0x1d9   :  { %3742 = vmatmul.mubr.bf16.gmra.mxu1 %v7041_v2 }
 0x1da   :  { %v1100_v0 = vpop.f32.mrf.mxu0  ;;  %3751 = vmatprep.mubr.bf16.mxu1 %v7042_v1 }
 0x1dc   :  { %v1104_v35 = vpop.f32.mrf.mxu0 }
 0x1de   :  { %v1106_v56 = vpop.f32.mrf.mxu0 }
 0x1e0   :  { %v1108_v17 = vpop.f32.mrf.mxu0 }
 0x1e1   :  { %3752 = vmatmul.mubr.bf16.gmra.mxu1 %v7044_v55 }
 0x1e2   :  { %v1110_v37 = vpop.f32.mrf.mxu0  ;;  %3761 = vmatprep.mubr.bf16.mxu1 %v7045_v36 }
 0x1e3   :  { %v1111_v60 = vadd.f32 %v1110_v37, %v12178_v58 }
 0x1e4   :  { %v1114_v30 = vpop.f32.mrf.mxu0 }
 0x1e5   :  { %v1115_v36 = vadd.f32 %v1114_v30, %v12177_v7  ;;  %v12181_v30 = vld [vmem:[#allocation33_spill] sm:$0xff] }
 0x1e6   :  { %v1116_v21 = vpop.f32.mrf.mxu0 }
 0x1e7   :  { %v1117_v41 = vadd.f32 %v1116_v21, %v12177_v7  ;;  %v7054_v21 = vld [vmem:[#allocation3 + $0x1a4] ss:$16 sps:$4 sm:$0xff]   ;;  %v12182_v7 = vld [vmem:[#allocation38_spill] sm:$0xff] }
 0x1e8   :  { %v1118_v54 = vpop.f32.mrf.mxu0 }
 0x1e9   :  { %3762 = vmatmul.mubr.bf16.gmra.mxu1 %v7047_v8  ;;  %v1119_v39 = vadd.f32 %v1118_v54, %v12174_v62  ;;  %v12180_v54 = vld [vmem:[#allocation34_spill] sm:$0xff] }
 0x1ea   :  { %v1120_v22 = vpop.f32.mrf.mxu0  ;;  %3771 = vmatprep.mubr.bf16.mxu1 %v7048_v61  ;;  %v7053_v61 = vld [vmem:[#allocation3 + $0x180] ss:$16 sps:$4 sm:$0xff]  }
 0x1eb   :  { %v1121_v46 = vadd.f32 %v1120_v22, %v12174_v62  ;;  %v12179_v22 = vld [vmem:[#allocation29_spill] sm:$0xff]  ;;  %v1101_v62 = vadd.f32 %v1100_v0, %v12180_v54  ;;  %v1091_v0 = vadd.f32 %v9770_v51, %v12182_v7  ;;  %v12184_v51 = vld [vmem:[#allocation40_spill] sm:$0xff] }
 0x1ec   :  { %v1124_v47 = vpop.f32.mrf.mxu0 }
 0x1ed   :  { %v1125_v4 = vadd.f32 %v1124_v47, %v12175_v3  ;;  %v1256_v2 = vmax.f32 %v1121_v46, 0.0  ;;  %v1107_v47 = vadd.f32 %v1106_v56, %v12179_v22  ;;  %v1105_v46 = vadd.f32 %v1104_v35, %v12179_v22 }
 0x1ee   :  { %v1126_v20 = vpop.f32.mrf.mxu0  ;;  %v1095_v35 = vadd.f32 %v9773_v32, %v12181_v30 }
 0x1ef   :  { %v1127_v50 = vadd.f32 %v1126_v20, %v12175_v3  ;;  %v1257_v8 = vmax.f32 %v1125_v4, 0.0  ;;  %v1254_v20 = vmax.f32 %v1117_v41, 0.0  ;;  %v1250_v56 = vmax.f32 %v1107_v47, 0.0 }
 0x1f0   :  { %v1128_v42 = vpop.f32.mrf.mxu0  ;;  %v1099_v4 = vadd.f32 %v1098_v12, %v12180_v54  ;;  %v1248_v41 = vmax.f32 %v1101_v62, 0.0  ;;  %v1089_v12 = vadd.f32 %v9768_v25, %v12182_v7  ;;  %v1245_v22 = vmax.f32 %v1095_v35, 0.0  ;;  %v7059_v54 = vld [vmem:[#allocation3 + $0x1c0] ss:$16 sps:$4 sm:$0xff]   ;;  %v7071_v7 = vld [vmem:[#allocation3 + $0x28] ss:$16 sps:$4 sm:$0xff]  }
 0x1f1   :  { %v1129_v18 = vadd.f32 %v1128_v42, %v12176_v45  ;;  %3772 = vmatmul.mubr.bf16.gmra.mxu1 %v7050_v43  ;;  %v1258_v1 = vmax.f32 %v1127_v50, 0.0  ;;  %v1109_v42 = vadd.f32 %v1108_v17, %v12178_v58  ;;  %v1578_v37 = vpack.c.bf16 %v1256_v2, %v1254_v20  ;;  %v12183_v58 = vld [vmem:[#allocation37_spill] sm:$0xff] }
 0x1f2   :  { %v1130_v13 = vpop.f32.mrf.mxu0  ;;  %3781 = vmatprep.mubr.bf16.mxu1 %v7051_v34  ;;  %v1255_v34 = vmax.f32 %v1119_v39, 0.0  ;;  %v1253_v50 = vmax.f32 %v1115_v36, 0.0  ;;  %v1249_v39 = vmax.f32 %v1105_v46, 0.0  ;;  %v7057_v2 = vld [vmem:[#allocation3 + $0x1c4] ss:$16 sps:$4 sm:$0xff]   ;;  %v1081_v36 = vadd.f32 %v9760_v59, %v12184_v51 }
 0x1f3   :  { %v1131_v49 = vadd.f32 %v1130_v13, %v12176_v45  ;;  %v1259_v26 = vmax.f32 %v1129_v18, 0.0  ;;  %v1252_v45 = vmax.f32 %v1111_v60, 0.0  ;;  %v1097_v18 = vadd.f32 %v1096_v38, %v12181_v30  ;;  %v7080_v35 = vld [vmem:[#allocation3 + $0x240] ss:$16 sps:$4 sm:$0xff]  }
 0x1f4   :  { %v1251_v17 = vmax.f32 %v1109_v42, 0.0  ;;  %v1577_v13 = vpack.c.bf16 %v1255_v34, %v1253_v50  ;;  %v1087_v38 = vadd.f32 %v9766_v27, %v12183_v58  ;;  %v1085_v32 = vadd.f32 %v9764_v9, %v12183_v58  ;;  %v12185_v27 = vld [vmem:[#allocation39_spill] sm:$0xff] }
 0x1f5   :  { %v1260_v55 = vmax.f32 %v1131_v49, 0.0  ;;  %v1579_v3 = vpack.c.bf16 %v1259_v26, %v1257_v8  ;;  %v1576_v49 = vpack.c.bf16 %v1252_v45, %v1250_v56  ;;  %v7056_v26 = vld [vmem:[#allocation3 + $0x1a0] ss:$16 sps:$4 sm:$0xff]   ;;  %v1246_v60 = vmax.f32 %v1097_v18, 0.0  ;;  %v7060_v45 = vld [vmem:[#allocation3 + $0x1e4] ss:$16 sps:$4 sm:$0xff]  }
 0x1f6   :  { %v1244_v8 = vmax.f32 %v1091_v0, 0.0  ;;  %v1077_v47 = vadd.f32 %v9752_v63, %v12185_v27  ;;  %v1242_v20 = vmax.f32 %v1087_v38, 0.0  ;;  %v1079_v25 = vadd.f32 %v9756_v23, %v12184_v51  ;;  %v7062_v56 = vld [vmem:[#allocation3 + $0x1e0] ss:$16 sps:$4 sm:$0xff]   ;;  %v7091_v38 = vld [vmem:[#allocation3 + $0x8c] ss:$16 sps:$4 sm:$0xff]  }
 0x1f7   :  { %v1580_v43 = vpack.c.bf16 %v1260_v55, %v1258_v1  ;;  %v1247_v1 = vmax.f32 %v1099_v4, 0.0  ;;  %v1575_v55 = vpack.c.bf16 %v1251_v17, %v1249_v39  ;;  %v1071_v59 = vadd.f32 %v9738_v19, %v12172_v14  ;;  %v7063_v17 = vld [vmem:[#allocation3 + $0x204] ss:$16 sps:$4 sm:$0xff]   ;;  %v7074_v0 = vld [vmem:[#allocation3 + $0x220] ss:$16 sps:$4 sm:$0xff]  }
 0x1f8   :  { %v1240_v42 = vmax.f32 %v1081_v36, 0.0  ;;  %v1572_v34 = vpack.c.bf16 %v1244_v8, %v1242_v20  ;;  %v1075_v9 = vadd.f32 %v9744_v10, %v12185_v27  ;;  %v1067_v63 = vadd.f32 %v9726_v24, %v12170_v31  ;;  %v7085_v39 = vld [vmem:[#allocation3 + $0x6c] ss:$16 sps:$4 sm:$0xff]   ;;  %v7086_v58 = vld [vmem:[#allocation3 + $0x260] ss:$16 sps:$4 sm:$0xff]  }
 0x1f9   :  { %4318 = vmatprep.subr.bf16.mxu0 %v1580_v43  ;;  %3782 = vmatmul.mubr.bf16.gmra.mxu1 %v7053_v61  ;;  %v1574_v61 = vpack.c.bf16 %v1248_v41, %v1246_v60  ;;  %v1243_v43 = vmax.f32 %v1089_v12, 0.0  ;;  %v1238_v62 = vmax.f32 %v1077_v47, 0.0  ;;  %v1239_v23 = vmax.f32 %v1079_v25, 0.0  ;;  %v7079_v41 = vld [vmem:[#allocation3 + $0x4c] ss:$16 sps:$4 sm:$0xff]  }
 0x1fa   :  { %4319 = vmatpush2.bf16.msra.mxu0 %v1579_v3  ;;  %3791 = vmatprep.mubr.bf16.mxu1 %v7054_v21  ;;  %v1573_v21 = vpack.c.bf16 %v1247_v1, %v1245_v22  ;;  %v1241_v3 = vmax.f32 %v1085_v32, 0.0  ;;  %v1061_v46 = vadd.f32 %v9714_v48, %v12166_v16  ;;  %v1236_v14 = vmax.f32 %v1071_v59, 0.0  ;;  %v7065_v48 = vld [vmem:[#allocation3 + $0x8] ss:$16 sps:$4 sm:$0xff]   ;;  %v7087_v60 = vld [vmem:[#allocation3 + $0x284] ss:$16 sps:$4 sm:$0xff]  }
 0x1fb   :  { %4320 = vmatprep.subr.bf16.mxu0 %v1578_v37  ;;  %v1570_v19 = vpack.c.bf16 %v1240_v42, %v1238_v62  ;;  %v1237_v50 = vmax.f32 %v1075_v9, 0.0  ;;  %v1057_v10 = vadd.f32 %v9706_v44, %v12164_v28  ;;  %v1234_v30 = vmax.f32 %v1067_v63, 0.0  ;;  %v7068_v44 = vld [vmem:[#allocation3 + $0x200] ss:$16 sps:$4 sm:$0xff]   ;;  %v7073_v28 = vld [vmem:[#allocation3 + $0x2c] ss:$16 sps:$4 sm:$0xff]  }
 0x1fc   :  { %v1571_v37 = vpack.c.bf16 %v1243_v43, %v1241_v3  ;;  %v1232_v31 = vmax.f32 %v1061_v46, 0.0  ;;  %v7092_v12 = vld [vmem:[#allocation3 + $0x280] ss:$16 sps:$4 sm:$0xff]   ;;  %v7097_v1 = vld [vmem:[#allocation3 + $0xac] ss:$16 sps:$4 sm:$0xff]  }
 0x1fd   :  { %v1569_v24 = vpack.c.bf16 %v1239_v23, %v1237_v50  ;;  %v1568_v18 = vpack.c.bf16 %v1236_v14, %v1234_v30  ;;  %v1230_v4 = vmax.f32 %v1057_v10, 0.0  ;;  %v7095_v51 = vld [vmem:[#allocation3 + $0xa8] ss:$16 sps:$4 sm:$0xff]   ;;  %v7098_v36 = vld [vmem:[#allocation3 + $0x2a0] ss:$16 sps:$4 sm:$0xff]  }
 0x1fe   :  { %4321 = vmatpush2.bf16.msra.mxu0 %v1577_v13  ;;  %v7069_v13 = vld [vmem:[#allocation3 + $0x224] ss:$16 sps:$4 sm:$0xff]   ;;  %v7103_v8 = vld [vmem:[#allocation3 + $0xcc] ss:$16 sps:$4 sm:$0xff]   ;;  %v7101_v32 = vld [vmem:[#allocation3 + $0xc8] ss:$16 sps:$4 sm:$0xff]  }
 0x1ff   :  { %4322 = vmatprep.subr.bf16.mxu0 %v1576_v49  ;;  %v1566_v16 = vpack.c.bf16 %v1232_v31, %v1230_v4  ;;  %v7075_v49 = vld [vmem:[#allocation3 + $0x244] ss:$16 sps:$4 sm:$0xff]   ;;  %v7104_v22 = vld [vmem:[#allocation3 + $0x2c0] ss:$16 sps:$4 sm:$0xff]   ;;  %v7109_v27 = vld [vmem:[#allocation3 + $0xec] ss:$16 sps:$4 sm:$0xff]  }
 0x200   :  { %v7105_v47 = vld [vmem:[#allocation3 + $0x2e4] ss:$16 sps:$4 sm:$0xff]   ;;  %v7107_v20 = vld [vmem:[#allocation3 + $0xe8] ss:$16 sps:$4 sm:$0xff]   ;;  %v7110_v25 = vld [vmem:[#allocation3 + $0x2e0] ss:$16 sps:$4 sm:$0xff]  }
 0x201   :  { %3792 = vmatmul.mubr.bf16.gmra.mxu1 %v7056_v26  ;;  %v7081_v26 = vld [vmem:[#allocation3 + $0x264] ss:$16 sps:$4 sm:$0xff]   ;;  %v7115_v43 = vld [vmem:[#allocation3 + $0x10c] ss:$16 sps:$4 sm:$0xff]   ;;  %v7113_v59 = vld [vmem:[#allocation3 + $0x108] ss:$16 sps:$4 sm:$0xff]  }
 0x202   :  { %4323 = vmatpush2.bf16.msra.mxu0 %v1575_v55  ;;  %3801 = vmatprep.mubr.bf16.mxu1 %v7057_v2  ;;  %v7089_v2 = vld [vmem:[#allocation3 + $0x88] ss:$16 sps:$4 sm:$0xff]   ;;  %v7093_v55 = vld [vmem:[#allocation3 + $0x2a4] ss:$16 sps:$4 sm:$0xff]   ;;  %v7116_v42 = vld [vmem:[#allocation3 + $0x300] ss:$16 sps:$4 sm:$0xff]  }
 0x203   :  { %4324 = vmatprep.subr.bf16.mxu0 %v1574_v61  ;;  %v7099_v61 = vld [vmem:[#allocation3 + $0x2c4] ss:$16 sps:$4 sm:$0xff]   ;;  %v7119_v63 = vld [vmem:[#allocation3 + $0x128] ss:$16 sps:$4 sm:$0xff]   ;;  %v7127_v23 = vld [vmem:[#allocation3 + $0x14c] ss:$16 sps:$4 sm:$0xff]  }
 0x204   :  { %v7117_v9 = vld [vmem:[#allocation3 + $0x324] ss:$16 sps:$4 sm:$0xff]   ;;  %v7125_v50 = vld [vmem:[#allocation3 + $0x148] ss:$16 sps:$4 sm:$0xff]   ;;  %v7128_v30 = vld [vmem:[#allocation3 + $0x340] ss:$16 sps:$4 sm:$0xff]  }
 0x205   :  { %v7129_v31 = vld [vmem:[#allocation3 + $0x364] ss:$16 sps:$4 sm:$0xff]  }
 0x206   :  { %4325 = vmatpush2.bf16.msra.mxu0 %v1573_v21  ;;  %v7111_v21 = vld [vmem:[#allocation3 + $0x304] ss:$16 sps:$4 sm:$0xff]  }
 0x207   :  { %4326 = vmatprep.subr.bf16.mxu0 %v1572_v34  ;;  %v7121_v34 = vld [vmem:[#allocation3 + $0x12c] ss:$16 sps:$4 sm:$0xff]  }
 0x209   :  { %3802 = vmatmul.mubr.bf16.gmra.mxu1 %v7059_v54 }
 0x20a   :  { %4327 = vmatpush2.bf16.msra.mxu0 %v1571_v37  ;;  %3811 = vmatprep.mubr.bf16.mxu1 %v7060_v45  ;;  %v7122_v45 = vld [vmem:[#allocation3 + $0x320] ss:$16 sps:$4 sm:$0xff]   ;;  %v7123_v37 = vld [vmem:[#allocation3 + $0x344] ss:$16 sps:$4 sm:$0xff]  }
 0x20b   :  { %4328 = vmatprep.subr.bf16.mxu0 %v1570_v19 }
 0x20e   :  { %4329 = vmatpush2.bf16.msra.mxu0 %v1569_v24  ;;  %v7133_v24 = vld [vmem:[#allocation3 + $0x16c] ss:$16 sps:$4 sm:$0xff]  }
 0x20f   :  { %4330 = vmatprep.subr.bf16.mxu0 %v1568_v18 }
 0x211   :  { %3812 = vmatmul.mubr.bf16.gmra.mxu1 %v7062_v56 }
 0x212   :  { %4331 = vmatpush2.bf16.msra.mxu0 %v9748_v6  ;;  %3821 = vmatprep.mubr.bf16.mxu1 %v7063_v17  ;;  %v7077_v6 = vld [vmem:[#allocation3 + $0x48] ss:$16 sps:$4 sm:$0xff]  }
 0x213   :  { %4332 = vmatprep.subr.bf16.mxu0 %v1566_v16  ;;  %v7131_v17 = vld [vmem:[#allocation3 + $0x168] ss:$16 sps:$4 sm:$0xff]  }
 0x216   :  { %4333 = vmatpush2.bf16.msra.mxu0 %v9722_v40  ;;  %v7083_v40 = vld [vmem:[#allocation3 + $0x68] ss:$16 sps:$4 sm:$0xff]  }
 0x219   :  { %4335 = vmatmul.mubr.bf16.vlgmr.msra.gmra.mxu0 %v7065_v48  ;;  %3822 = vmatmul.mubr.bf16.gmra.mxu1 %v7068_v44  ;;  %v7134_v48 = vld [vmem:[#allocation3 + $0x360] ss:$16 sps:$4 sm:$0xff]   ;;  %v7140_v44 = vld [vmem:[#allocation3 + $0x18c] ss:$16 sps:$4 sm:$0xff]  }
 0x21a   :  { %4344 = vmatprep.mubr.bf16.mxu0 %v7073_v28  ;;  %3831 = vmatprep.mubr.bf16.mxu1 %v7069_v13  ;;  %v7137_v28 = vld [vmem:[#allocation3 + $0x384] ss:$16 sps:$4 sm:$0xff]  }
 0x221   :  { %4345 = vmatmul.mubr.bf16.gmra.mxu0 %v7071_v7  ;;  %3832 = vmatmul.mubr.bf16.gmra.mxu1 %v7074_v0 }
 0x222   :  { %4354 = vmatprep.mubr.bf16.mxu0 %v7079_v41  ;;  %3841 = vmatprep.mubr.bf16.mxu1 %v7075_v49  ;;  %v7138_v41 = vld [vmem:[#allocation3 + $0x188] ss:$16 sps:$4 sm:$0xff]  }
 0x229   :  { %4355 = vmatmul.mubr.bf16.gmra.mxu0 %v7077_v6  ;;  %3842 = vmatmul.mubr.bf16.gmra.mxu1 %v7080_v35  ;;  %v7135_v6 = vld [vmem:[#allocation3 + $0x380] ss:$16 sps:$4 sm:$0xff]   ;;  %v7146_v35 = vld [vmem:[#allocation3 + $0x1ac] ss:$16 sps:$4 sm:$0xff]  }
 0x22a   :  { %4364 = vmatprep.mubr.bf16.mxu0 %v7085_v39  ;;  %3851 = vmatprep.mubr.bf16.mxu1 %v7081_v26  ;;  %v7143_v39 = vld [vmem:[#allocation3 + $0x3a4] ss:$16 sps:$4 sm:$0xff]  }
 0x231   :  { %4365 = vmatmul.mubr.bf16.gmra.mxu0 %v7083_v40  ;;  %3852 = vmatmul.mubr.bf16.gmra.mxu1 %v7086_v58 }
 0x232   :  { %4374 = vmatprep.mubr.bf16.mxu0 %v7091_v38  ;;  %3861 = vmatprep.mubr.bf16.mxu1 %v7087_v60  ;;  %v7144_v38 = vld [vmem:[#allocation3 + $0x1a8] ss:$16 sps:$4 sm:$0xff]  }
 0x239   :  { %4375 = vmatmul.mubr.bf16.gmra.mxu0 %v7089_v2  ;;  %3862 = vmatmul.mubr.bf16.gmra.mxu1 %v7092_v12  ;;  %v7141_v2 = vld [vmem:[#allocation3 + $0x3a0] ss:$16 sps:$4 sm:$0xff]   ;;  %v7152_v12 = vld [vmem:[#allocation3 + $0x1cc] ss:$16 sps:$4 sm:$0xff]  }
 0x23a   :  { %4384 = vmatprep.mubr.bf16.mxu0 %v7097_v1  ;;  %3871 = vmatprep.mubr.bf16.mxu1 %v7093_v55  ;;  %v7149_v1 = vld [vmem:[#allocation3 + $0x3c4] ss:$16 sps:$4 sm:$0xff]  }
 0x241   :  { %4385 = vmatmul.mubr.bf16.gmra.mxu0 %v7095_v51  ;;  %3872 = vmatmul.mubr.bf16.gmra.mxu1 %v7098_v36 }
 0x242   :  { %4394 = vmatprep.mubr.bf16.mxu0 %v7103_v8  ;;  %3881 = vmatprep.mubr.bf16.mxu1 %v7099_v61  ;;  %v7150_v8 = vld [vmem:[#allocation3 + $0x1c8] ss:$16 sps:$4 sm:$0xff]  }
 0x249   :  { %4395 = vmatmul.mubr.bf16.gmra.mxu0 %v7101_v32  ;;  %3882 = vmatmul.mubr.bf16.gmra.mxu1 %v7104_v22  ;;  %v7147_v32 = vld [vmem:[#allocation3 + $0x3c0] ss:$16 sps:$4 sm:$0xff]   ;;  %v7158_v22 = vld [vmem:[#allocation3 + $0x1ec] ss:$16 sps:$4 sm:$0xff]  }
 0x24a   :  { %4404 = vmatprep.mubr.bf16.mxu0 %v7109_v27  ;;  %3891 = vmatprep.mubr.bf16.mxu1 %v7105_v47  ;;  %v7155_v27 = vld [vmem:[#allocation3 + $0x3e4] ss:$16 sps:$4 sm:$0xff]  }
 0x251   :  { %4405 = vmatmul.mubr.bf16.gmra.mxu0 %v7107_v20  ;;  %3892 = vmatmul.mubr.bf16.gmra.mxu1 %v7110_v25 }
 0x252   :  { %4414 = vmatprep.mubr.bf16.mxu0 %v7115_v43  ;;  %3901 = vmatprep.mubr.bf16.mxu1 %v7111_v21  ;;  %v7156_v43 = vld [vmem:[#allocation3 + $0x1e8] ss:$16 sps:$4 sm:$0xff]  }
 0x259   :  { %4415 = vmatmul.mubr.bf16.gmra.mxu0 %v7113_v59  ;;  %v9819_v3 = vpop.f32.mrf.mxu1  ;;  %3902 = vmatmul.mubr.bf16.gmra.mxu1 %v7116_v42  ;;  %v7153_v59 = vld [vmem:[#allocation3 + $0x3e0] ss:$16 sps:$4 sm:$0xff]   ;;  %v7164_v42 = vld [vmem:[#allocation3 + $0x20c] ss:$16 sps:$4 sm:$0xff]  }
 0x25a   :  { %4424 = vmatprep.mubr.bf16.mxu0 %v7121_v34  ;;  %3911 = vmatprep.mubr.bf16.mxu1 %v7117_v9  ;;  %v7161_v34 = vld [vmem:[#allocation3 + $0x404] ss:$16 sps:$4 sm:$0xff]  }
 0x25b   :  { %v9821_v54 = vpop.f32.mrf.mxu1 }
 0x25d   :  { %v9823_v62 = vpop.f32.mrf.mxu1 }
 0x25f   :  { %v9825_v46 = vpop.f32.mrf.mxu1 }
 0x261   :  { %4425 = vmatmul.mubr.bf16.gmra.mxu0 %v7119_v63  ;;  %v9827_v14 = vpop.f32.mrf.mxu1  ;;  %3912 = vmatmul.mubr.bf16.gmra.mxu1 %v7122_v45 }
 0x262   :  { %4434 = vmatprep.mubr.bf16.mxu0 %v7127_v23  ;;  %3921 = vmatprep.mubr.bf16.mxu1 %v7123_v37  ;;  %v7162_v23 = vld [vmem:[#allocation3 + $0x208] ss:$16 sps:$4 sm:$0xff]  }
 0x263   :  { %v9829_v19 = vpop.f32.mrf.mxu1 }
 0x265   :  { %v9831_v10 = vpop.f32.mrf.mxu1 }
 0x267   :  { %v9833_v18 = vpop.f32.mrf.mxu1 }
 0x269   :  { %4435 = vmatmul.mubr.bf16.gmra.mxu0 %v7125_v50  ;;  %v9835_v56 = vpop.f32.mrf.mxu1  ;;  %3922 = vmatmul.mubr.bf16.gmra.mxu1 %v7128_v30  ;;  %v7159_v50 = vld [vmem:[#allocation3 + $0x400] ss:$16 sps:$4 sm:$0xff]   ;;  %v7170_v30 = vld [vmem:[#allocation3 + $0x22c] ss:$16 sps:$4 sm:$0xff]  }
 0x26a   :  { %4444 = vmatprep.mubr.bf16.mxu0 %v7133_v24  ;;  %3931 = vmatprep.mubr.bf16.mxu1 %v7129_v31  ;;  %v7167_v24 = vld [vmem:[#allocation3 + $0x424] ss:$16 sps:$4 sm:$0xff]  }
 0x26b   :  { %v9837_v4 = vpop.f32.mrf.mxu1 }
 0x26d   :  { %v9839_v16 = vpop.f32.mrf.mxu1 }
 0x26f   :  { %v9841_v13 = vpop.f32.mrf.mxu1 }
 0x271   :  { %4445 = vmatmul.mubr.bf16.gmra.mxu0 %v7131_v17  ;;  %v9843_v7 = vpop.f32.mrf.mxu1  ;;  %3932 = vmatmul.mubr.bf16.gmra.mxu1 %v7134_v48 }
 0x272   :  { %4454 = vmatprep.mubr.bf16.mxu0 %v7140_v44  ;;  %3941 = vmatprep.mubr.bf16.mxu1 %v7137_v28  ;;  %v7168_v44 = vld [vmem:[#allocation3 + $0x228] ss:$16 sps:$4 sm:$0xff]  }
 0x273   :  { %v9845_v0 = vpop.f32.mrf.mxu1 }
 0x275   :  { %v9847_v49 = vpop.f32.mrf.mxu1 }
 0x277   :  { %v9849_v26 = vpop.f32.mrf.mxu1 }
 0x279   :  { %4455 = vmatmul.mubr.bf16.gmra.mxu0 %v7138_v41  ;;  %v9851_v40 = vpop.f32.mrf.mxu1  ;;  %3942 = vmatmul.mubr.bf16.gmra.mxu1 %v7135_v6  ;;  %v7165_v41 = vld [vmem:[#allocation3 + $0x420] ss:$16 sps:$4 sm:$0xff]   ;;  %v7176_v6 = vld [vmem:[#allocation3 + $0x24c] ss:$16 sps:$4 sm:$0xff]  }
 0x27a   :  { %4464 = vmatprep.mubr.bf16.mxu0 %v7146_v35  ;;  %3951 = vmatprep.mubr.bf16.mxu1 %v7143_v39  ;;  %v7173_v35 = vld [vmem:[#allocation3 + $0x444] ss:$16 sps:$4 sm:$0xff]  }
 0x27b   :  { %v9853_v58 = vpop.f32.mrf.mxu1 }
 0x27d   :  { %v9855_v60 = vpop.f32.mrf.mxu1 }
 0x27f   :  { %v9857_v55 = vpop.f32.mrf.mxu1 }
 0x281   :  { %4465 = vmatmul.mubr.bf16.gmra.mxu0 %v7144_v38  ;;  %v9859_v51 = vpop.f32.mrf.mxu1  ;;  %3952 = vmatmul.mubr.bf16.gmra.mxu1 %v7141_v2 }
 0x282   :  { %4474 = vmatprep.mubr.bf16.mxu0 %v7152_v12  ;;  %3961 = vmatprep.mubr.bf16.mxu1 %v7149_v1  ;;  %v7174_v12 = vld [vmem:[#allocation3 + $0x248] ss:$16 sps:$4 sm:$0xff]  }
 0x283   :  { %v9861_v36 = vpop.f32.mrf.mxu1 }
 0x285   :  { %v9863_v61 = vpop.f32.mrf.mxu1 }
 0x287   :  { %v9865_v47 = vpop.f32.mrf.mxu1 }
 0x289   :  { %4475 = vmatmul.mubr.bf16.gmra.mxu0 %v7150_v8  ;;  %v9867_v20 = vpop.f32.mrf.mxu1  ;;  %3962 = vmatmul.mubr.bf16.gmra.mxu1 %v7147_v32  ;;  %v7171_v8 = vld [vmem:[#allocation3 + $0x440] ss:$16 sps:$4 sm:$0xff]   ;;  %v7182_v32 = vld [vmem:[#allocation3 + $0x26c] ss:$16 sps:$4 sm:$0xff]  }
 0x28a   :  { %4484 = vmatprep.mubr.bf16.mxu0 %v7158_v22  ;;  %3971 = vmatprep.mubr.bf16.mxu1 %v7155_v27  ;;  %v7179_v22 = vld [vmem:[#allocation3 + $0x464] ss:$16 sps:$4 sm:$0xff]  }
 0x28b   :  { %v9869_v25 = vpop.f32.mrf.mxu1 }
 0x28d   :  { %v9871_v21 = vpop.f32.mrf.mxu1 }
 0x28f   :  { %v9873_v9 = vpop.f32.mrf.mxu1 }
 0x291   :  { %4485 = vmatmul.mubr.bf16.gmra.mxu0 %v7156_v43  ;;  %v9875_v63 = vpop.f32.mrf.mxu1  ;;  %3972 = vmatmul.mubr.bf16.gmra.mxu1 %v7153_v59 }
 0x292   :  { %4494 = vmatprep.mubr.bf16.mxu0 %v7164_v42  ;;  %3981 = vmatprep.mubr.bf16.mxu1 %v7161_v34  ;;  %v7180_v42 = vld [vmem:[#allocation3 + $0x268] ss:$16 sps:$4 sm:$0xff]  }
 0x293   :  { %v9877_v45 = vpop.f32.mrf.mxu1 }
 0x295   :  { %v9879_v37 = vpop.f32.mrf.mxu1 }
 0x297   :  { %v9881_v31 = vpop.f32.mrf.mxu1 }
 0x299   :  { %4495 = vmatmul.mubr.bf16.gmra.mxu0 %v7162_v23  ;;  %v9883_v17 = vpop.f32.mrf.mxu1  ;;  %3982 = vmatmul.mubr.bf16.gmra.mxu1 %v7159_v50  ;;  %v7177_v23 = vld [vmem:[#allocation3 + $0x460] ss:$16 sps:$4 sm:$0xff]   ;;  %v7188_v50 = vld [vmem:[#allocation3 + $0x28c] ss:$16 sps:$4 sm:$0xff]  }
 0x29a   :  { %4504 = vmatprep.mubr.bf16.mxu0 %v7170_v30  ;;  %3991 = vmatprep.mubr.bf16.mxu1 %v7167_v24  ;;  %v7185_v30 = vld [vmem:[#allocation3 + $0x484] ss:$16 sps:$4 sm:$0xff]  }
 0x29b   :  { %v9885_v48 = vpop.f32.mrf.mxu1 }
 0x29d   :  { %v9887_v28 = vpop.f32.mrf.mxu1 }
 0x29f   :  { %v9889_v39 = vpop.f32.mrf.mxu1 }
 0x2a1   :  { %4505 = vmatmul.mubr.bf16.gmra.mxu0 %v7168_v44  ;;  %v9891_v38 = vpop.f32.mrf.mxu1  ;;  %3992 = vmatmul.mubr.bf16.gmra.mxu1 %v7165_v41 }
 0x2a2   :  { %4514 = vmatprep.mubr.bf16.mxu0 %v7176_v6  ;;  %4001 = vmatprep.mubr.bf16.mxu1 %v7173_v35  ;;  %v7186_v6 = vld [vmem:[#allocation3 + $0x288] ss:$16 sps:$4 sm:$0xff]  }
 0x2a3   :  { %v9893_v2 = vpop.f32.mrf.mxu1 }
 0x2a5   :  { %v9895_v1 = vpop.f32.mrf.mxu1 }
 0x2a7   :  { %v9897_v27 = vpop.f32.mrf.mxu1 }
 0x2a9   :  { %4515 = vmatmul.mubr.bf16.gmra.mxu0 %v7174_v12  ;;  %v9899_v43 = vpop.f32.mrf.mxu1  ;;  %4002 = vmatmul.mubr.bf16.gmra.mxu1 %v7171_v8  ;;  %v7183_v12 = vld [vmem:[#allocation3 + $0x480] ss:$16 sps:$4 sm:$0xff]   ;;  %v7194_v8 = vld [vmem:[#allocation3 + $0x2ac] ss:$16 sps:$4 sm:$0xff]  }
 0x2aa   :  { %4524 = vmatprep.mubr.bf16.mxu0 %v7182_v32  ;;  %4011 = vmatprep.mubr.bf16.mxu1 %v7179_v22  ;;  %v7191_v32 = vld [vmem:[#allocation3 + $0x4a4] ss:$16 sps:$4 sm:$0xff]  }
 0x2ab   :  { %v9901_v59 = vpop.f32.mrf.mxu1 }
 0x2ac   :  { %12186 = vst [vmem:[#allocation11_spill] sm:$0xff] %v9901_v59  ;;  %v7213_v59 = vld [vmem:[#allocation3 + $0x520] ss:$16 sps:$4 sm:$0xff]  }
 0x2ad   :  { %v9903_v34 = vpop.f32.mrf.mxu1 }
 0x2ae   :  { %12187 = vst [vmem:[#allocation9_spill] sm:$0xff] %v9903_v34 }
 0x2af   :  { %v9905_v24 = vpop.f32.mrf.mxu1 }
 0x2b0   :  { %12188 = vst [vmem:[#allocation10_spill] sm:$0xff] %v9905_v24 }
 0x2b1   :  { %4525 = vmatmul.mubr.bf16.gmra.mxu0 %v7180_v42  ;;  %v9907_v44 = vpop.f32.mrf.mxu1  ;;  %4012 = vmatmul.mubr.bf16.gmra.mxu1 %v7177_v23  ;;  %v7192_v23 = vld [vmem:[#allocation3 + $0x2a8] ss:$16 sps:$4 sm:$0xff]  }
 0x2b2   :  { %12189 = vst [vmem:[#allocation12_spill] sm:$0xff] %v9907_v44  ;;  %4534 = vmatprep.mubr.bf16.mxu0 %v7188_v50  ;;  %4021 = vmatprep.mubr.bf16.mxu1 %v7185_v30  ;;  %v7189_v30 = vld [vmem:[#allocation3 + $0x4a0] ss:$16 sps:$4 sm:$0xff]   ;;  %v7197_v44 = vld [vmem:[#allocation3 + $0x4c4] ss:$16 sps:$4 sm:$0xff]  }
 0x2b3   :  { %v9909_v41 = vpop.f32.mrf.mxu1 }
 0x2b4   :  { %12190 = vst [vmem:[#allocation13_spill] sm:$0xff] %v9909_v41  ;;  %v7200_v41 = vld [vmem:[#allocation3 + $0x2cc] ss:$16 sps:$4 sm:$0xff]  }
 0x2b5   :  { %v9911_v35 = vpop.f32.mrf.mxu1 }
 0x2b6   :  { %12191 = vst [vmem:[#allocation14_spill] sm:$0xff] %v9911_v35 }
 0x2b7   :  { %v9913_v22 = vpop.f32.mrf.mxu1 }
 0x2b8   :  { %12192 = vst [vmem:[#allocation43_spill] sm:$0xff] %v9913_v22 }
 0x2b9   :  { %4535 = vmatmul.mubr.bf16.gmra.mxu0 %v7186_v6  ;;  %v9915_v34 = vpop.f32.mrf.mxu1  ;;  %4022 = vmatmul.mubr.bf16.gmra.mxu1 %v7183_v12  ;;  %v7198_v12 = vld [vmem:[#allocation3 + $0x2c8] ss:$16 sps:$4 sm:$0xff]  }
 0x2ba   :  { %12193 = vst [vmem:[#allocation15_spill] sm:$0xff] %v9915_v34  ;;  %4544 = vmatprep.mubr.bf16.mxu0 %v7194_v8  ;;  %4031 = vmatprep.mubr.bf16.mxu1 %v7191_v32  ;;  %v7195_v32 = vld [vmem:[#allocation3 + $0x4c0] ss:$16 sps:$4 sm:$0xff]   ;;  %v7203_v34 = vld [vmem:[#allocation3 + $0x4e4] ss:$16 sps:$4 sm:$0xff]  }
 0x2bb   :  { %v9917_v42 = vpop.f32.mrf.mxu1 }
 0x2bc   :  { %12194 = vst [vmem:[#allocation44_spill] sm:$0xff] %v9917_v42  ;;  %v7206_v42 = vld [vmem:[#allocation3 + $0x2ec] ss:$16 sps:$4 sm:$0xff]  }
 0x2bd   :  { %v9919_v50 = vpop.f32.mrf.mxu1 }
 0x2be   :  { %12195 = vst [vmem:[#allocation16_spill] sm:$0xff] %v9919_v50 }
 0x2bf   :  { %v9921_v35 = vpop.f32.mrf.mxu1 }
 0x2c0   :  { %12196 = vst [vmem:[#allocation17_spill] sm:$0xff] %v9921_v35 }
 0x2c1   :  { %4545 = vmatmul.mubr.bf16.gmra.mxu0 %v7192_v23  ;;  %v9923_v24 = vpop.f32.mrf.mxu1  ;;  %4032 = vmatmul.mubr.bf16.gmra.mxu1 %v7189_v30  ;;  %v7201_v30 = vld [vmem:[#allocation3 + $0x4e0] ss:$16 sps:$4 sm:$0xff]  }
 0x2c2   :  { %12197 = vst [vmem:[#allocation18_spill] sm:$0xff] %v9923_v24  ;;  %4554 = vmatprep.mubr.bf16.mxu0 %v7200_v41  ;;  %4041 = vmatprep.mubr.bf16.mxu1 %v7197_v44  ;;  %v7204_v41 = vld [vmem:[#allocation3 + $0x2e8] ss:$16 sps:$4 sm:$0xff]   ;;  %v7209_v24 = vld [vmem:[#allocation3 + $0x504] ss:$16 sps:$4 sm:$0xff]  }
 0x2c3   :  { %v9925_v6 = vpop.f32.mrf.mxu1 }
 0x2c4   :  { %12198 = vst [vmem:[#allocation41_spill] sm:$0xff] %v9925_v6  ;;  %v7212_v6 = vld [vmem:[#allocation3 + $0x30c] ss:$16 sps:$4 sm:$0xff]  }
 0x2c5   :  { %v9927_v8 = vpop.f32.mrf.mxu1 }
 0x2c6   :  { %12199 = vst [vmem:[#allocation20_spill] sm:$0xff] %v9927_v8 }
 0x2c7   :  { %v9929_v50 = vpop.f32.mrf.mxu1 }
 0x2c8   :  { %12200 = vst [vmem:[#allocation42_spill] sm:$0xff] %v9929_v50 }
 0x2c9   :  { %4555 = vmatmul.mubr.bf16.gmra.mxu0 %v7198_v12  ;;  %v9931_v22 = vpop.f32.mrf.mxu1  ;;  %4042 = vmatmul.mubr.bf16.gmra.mxu1 %v7195_v32  ;;  %v7207_v32 = vld [vmem:[#allocation3 + $0x500] ss:$16 sps:$4 sm:$0xff]  }
 0x2ca   :  { %12201 = vst [vmem:[#allocation19_spill] sm:$0xff] %v9931_v22  ;;  %4564 = vmatprep.mubr.bf16.mxu0 %v7206_v42  ;;  %4051 = vmatprep.mubr.bf16.mxu1 %v7203_v34  ;;  %v7210_v42 = vld [vmem:[#allocation3 + $0x308] ss:$16 sps:$4 sm:$0xff]   ;;  %v7215_v22 = vld [vmem:[#allocation3 + $0x524] ss:$16 sps:$4 sm:$0xff]  }
 0x2cb   :  { %v9933_v23 = vpop.f32.mrf.mxu1 }
 0x2cc   :  { %12202 = vst [vmem:[#allocation27_spill] sm:$0xff] %v9933_v23  ;;  %v7218_v23 = vld [vmem:[#allocation3 + $0x32c] ss:$16 sps:$4 sm:$0xff]  }
 0x2cd   :  { %v9935_v44 = vpop.f32.mrf.mxu1 }
 0x2ce   :  { %12203 = vst [vmem:[#allocation24_spill] sm:$0xff] %v9935_v44  ;;  %v3664_v44 = vadd.f32 %v9819_v3, %v9513_v11 }
 0x2cf   :  { %v9937_v8 = vpop.f32.mrf.mxu1 }
 0x2d0   :  { %12204 = vst [vmem:[#allocation25_spill] sm:$0xff] %v9937_v8 }
 0x2d1   :  { %4565 = vmatmul.mubr.bf16.gmra.mxu0 %v7204_v41  ;;  %v9939_v35 = vpop.f32.mrf.mxu1  ;;  %4052 = vmatmul.mubr.bf16.gmra.mxu1 %v7201_v30  ;;  %v3666_v41 = vadd.f32 %v9821_v54, %v9513_v11  ;;  %v3670_v11 = vadd.f32 %v9825_v46, %v9521_v29 }
 0x2d2   :  { %12205 = vst [vmem:[#allocation26_spill] sm:$0xff] %v9939_v35  ;;  %4574 = vmatprep.mubr.bf16.mxu0 %v7212_v6  ;;  %4061 = vmatprep.mubr.bf16.mxu1 %v7209_v24 }
 0x2d3   :  { %v9941_v12 = vpop.f32.mrf.mxu1 }
 0x2d4   :  { %12206 = vst [vmem:[#allocation30_spill] sm:$0xff] %v9941_v12 }
 0x2d5   :  { %v9943_v34 = vpop.f32.mrf.mxu1 }
 0x2d6   :  { %12207 = vst [vmem:[#allocation29_spill] sm:$0xff] %v9943_v34  ;;  %v3668_v34 = vadd.f32 %v9823_v62, %v9521_v29  ;;  %v3676_v29 = vadd.f32 %v9829_v19, %v9497_v52  ;;  %v3680_v19 = vadd.f32 %v9833_v18, %v9501_v53  ;;  %v3686_v18 = vadd.f32 %v9837_v4, %v9474_v15 }
 0x2d7   :  { %v9947_v50 = vpop.f32.mrf.mxu1  ;;  %v3690_v4 = vadd.f32 %v9841_v13, %v9485_v5 }
 0x2d8   :  { %12208 = vst [vmem:[#allocation34_spill] sm:$0xff] %v9947_v50 }
 0x2d9   :  { %v4336_v8 = vpop.f32.mrf.mxu0  ;;  %4575 = vmatmul.mubr.bf16.gmra.mxu0 %v7210_v42  ;;  %v9951_v6 = vpop.f32.mrf.mxu1  ;;  %4062 = vmatmul.mubr.bf16.gmra.mxu1 %v7207_v32  ;;  %v7216_v42 = vld [vmem:[#allocation3 + $0x328] ss:$16 sps:$4 sm:$0xff]  }
 0x2da   :  { %12209 = vst [vmem:[#allocation33_spill] sm:$0xff] %v9951_v6  ;;  %v4337_v24 = vadd.f32 %v4336_v8, %v3664_v44  ;;  %4584 = vmatprep.mubr.bf16.mxu0 %v7218_v23  ;;  %4071 = vmatprep.mubr.bf16.mxu1 %v7215_v22  ;;  %v7224_v23 = vld [vmem:[#allocation3 + $0x34c] ss:$16 sps:$4 sm:$0xff]   ;;  %v3674_v22 = vadd.f32 %v9827_v14, %v9497_v52  ;;  %v7221_v44 = vld [vmem:[#allocation3 + $0x544] ss:$16 sps:$4 sm:$0xff]  }
 0x2db   :  { %v4338_v30 = vpop.f32.mrf.mxu0  ;;  %v9955_v35 = vpop.f32.mrf.mxu1 }
 0x2dc   :  { %v4975_v12 = vsub.f32 0.0, %v4337_v24  ;;  %12210 = vst [vmem:[#allocation38_spill] sm:$0xff] %v9955_v35  ;;  %v4339_v3 = vadd.f32 %v4338_v30, %v3666_v41 }
 0x2dd   :  { %v4340_v50 = vpop.f32.mrf.mxu0  ;;  %v9959_v32 = vpop.f32.mrf.mxu1 }
 0x2de   :  { %v5231_v54 = vmul.f32 1.442695, %v4975_v12  ;;  %v4976_v6 = vsub.f32 0.0, %v4339_v3  ;;  %v4341_v8 = vadd.f32 %v4340_v50, %v3668_v34 }
 0x2df   :  { %v4342_v62 = vpop.f32.mrf.mxu0  ;;  %v9963_v30 = vpop.f32.mrf.mxu1 }
 0x2e0   :  { %7407 = vpow2.f32 %v5231_v54  ;;  %v5233_v24 = vmul.f32 1.442695, %v4976_v6  ;;  %v4977_v41 = vsub.f32 0.0, %v4341_v8  ;;  %v4343_v35 = vadd.f32 %v4342_v62, %v3670_v11  ;;  %v7222_v62 = vld [vmem:[#allocation3 + $0x348] ss:$16 sps:$4 sm:$0xff]  }
 0x2e1   :  { %v4346_v46 = vpop.f32.mrf.mxu0  ;;  %4585 = vmatmul.mubr.bf16.gmra.mxu0 %v7216_v42  ;;  %v9967_v34 = vpop.f32.mrf.mxu1  ;;  %4072 = vmatmul.mubr.bf16.gmra.mxu1 %v7213_v59  ;;  %v3678_v6 = vadd.f32 %v9831_v10, %v9501_v53  ;;  %v7219_v42 = vld [vmem:[#allocation3 + $0x540] ss:$16 sps:$4 sm:$0xff]  }
 0x2e2   :  { %7409 = vpow2.f32 %v5233_v24  ;;  %v5235_v12 = vmul.f32 1.442695, %v4977_v41  ;;  %v4978_v50 = vsub.f32 0.0, %v4343_v35  ;;  %v4347_v14 = vadd.f32 %v4346_v46, %v3674_v22  ;;  %4594 = vmatprep.mubr.bf16.mxu0 %v7224_v23  ;;  %4081 = vmatprep.mubr.bf16.mxu1 %v7221_v44  ;;  %v7230_v24 = vld [vmem:[#allocation3 + $0x36c] ss:$16 sps:$4 sm:$0xff]  }
 0x2e3   :  { %v4348_v3 = vpop.f32.mrf.mxu0  ;;  %v9971_v8 = vpop.f32.mrf.mxu1  ;;  %v3684_v44 = vadd.f32 %v9835_v56, %v9474_v15  ;;  %v7227_v46 = vld [vmem:[#allocation3 + $0x564] ss:$16 sps:$4 sm:$0xff]   ;;  %v3688_v15 = vadd.f32 %v9839_v16, %v9485_v5 }
 0x2e4   :  { %7411 = vpow2.f32 %v5235_v12  ;;  %v5237_v11 = vmul.f32 1.442695, %v4978_v50  ;;  %v4979_v54 = vsub.f32 0.0, %v4347_v14  ;;  %v4349_v52 = vadd.f32 %v4348_v3, %v3676_v29  ;;  %v7233_v16 = vld [vmem:[#allocation3 + $0x584] ss:$16 sps:$4 sm:$0xff]  }
 0x2e5   :  { %v4350_v35 = vpop.f32.mrf.mxu0  ;;  %v9975_v22 = vpop.f32.mrf.mxu1 }
 0x2e6   :  { %7413 = vpow2.f32 %v5237_v11  ;;  %v5239_v59 = vmul.f32 1.442695, %v4979_v54  ;;  %v4980_v23 = vsub.f32 0.0, %v4349_v52  ;;  %v4351_v10 = vadd.f32 %v4350_v35, %v3678_v6 }
 0x2e7   :  { %v4352_v41 = vpop.f32.mrf.mxu0  ;;  %v9979_v50 = vpop.f32.mrf.mxu1 }
 0x2e8   :  { %7415 = vpow2.f32 %v5239_v59  ;;  %v5241_v29 = vmul.f32 1.442695, %v4980_v23  ;;  %v4981_v12 = vsub.f32 0.0, %v4351_v10  ;;  %v4353_v53 = vadd.f32 %v4352_v41, %v3680_v19  ;;  %v7225_v10 = vld [vmem:[#allocation3 + $0x560] ss:$16 sps:$4 sm:$0xff]  }
 0x2e9   :  { %v4356_v14 = vpop.f32.mrf.mxu0  ;;  %4595 = vmatmul.mubr.bf16.gmra.mxu0 %v7222_v62  ;;  %v9983_v11 = vpop.f32.mrf.mxu1  ;;  %4082 = vmatmul.mubr.bf16.gmra.mxu1 %v7219_v42  ;;  %v7228_v42 = vld [vmem:[#allocation3 + $0x368] ss:$16 sps:$4 sm:$0xff]  }
 0x2ea   :  { %7417 = vpow2.f32 %v5241_v29  ;;  %v5243_v3 = vmul.f32 1.442695, %v4981_v12  ;;  %v4982_v6 = vsub.f32 0.0, %v4353_v53  ;;  %v4357_v56 = vadd.f32 %v4356_v14, %v3684_v44  ;;  %4604 = vmatprep.mubr.bf16.mxu0 %v7230_v24  ;;  %4091 = vmatprep.mubr.bf16.mxu1 %v7227_v46  ;;  %v7236_v29 = vld [vmem:[#allocation3 + $0x38c] ss:$16 sps:$4 sm:$0xff]  }
 0x2eb   :  { %v4358_v54 = vpop.f32.mrf.mxu0  ;;  %v9985_v59 = vpop.f32.mrf.mxu1  ;;  %v3694_v53 = vadd.f32 %v9843_v7, %v9455_v57 }
 0x2ec   :  { %7419 = vpow2.f32 %v5243_v3  ;;  %v5245_v52 = vmul.f32 1.442695, %v4982_v6  ;;  %v4983_v35 = vsub.f32 0.0, %v4357_v56  ;;  %12211 = vst [vmem:[#allocation37_spill] sm:$0xff] %v9985_v59  ;;  %v4359_v19 = vadd.f32 %v4358_v54, %v3686_v18 }
 0x2ed   :  { %v7408_v23 = vpop.eup %7407  ;;  %v4360_v62 = vpop.f32.mrf.mxu0 }
 0x2ee   :  { %v5743_v44 = vadd.f32 1.0, %v7408_v23  ;;  %7421 = vpow2.f32 %v5245_v52  ;;  %v5247_v24 = vmul.f32 1.442695, %v4983_v35  ;;  %v4984_v41 = vsub.f32 0.0, %v4359_v19  ;;  %v9991_v46 = vpop.f32.mrf.mxu1 }
 0x2ef   :  { %12212 = vst [vmem:[#allocation40_spill] sm:$0xff] %v9991_v46  ;;  %v7410_v12 = vpop.eup %7409  ;;  %v4361_v18 = vadd.f32 %v4360_v62, %v3688_v15  ;;  %v4362_v14 = vpop.f32.mrf.mxu0  ;;  %v3696_v62 = vadd.f32 %v9845_v0, %v9455_v57  ;;  %v7231_v0 = vld [vmem:[#allocation3 + $0x580] ss:$16 sps:$4 sm:$0xff]  }
 0x2f0   :  { %7423 = vrcp.f32 %v5743_v44  ;;  %v5744_v3 = vadd.f32 1.0, %v7410_v12  ;;  %v5249_v5 = vmul.f32 1.442695, %v4984_v41  ;;  %v9995_v13 = vpop.f32.mrf.mxu1  ;;  %v4363_v6 = vadd.f32 %v4362_v14, %v3690_v4  ;;  %v7234_v14 = vld [vmem:[#allocation3 + $0x388] ss:$16 sps:$4 sm:$0xff]  }
 0x2f1   :  { %12213 = vst [vmem:[#allocation39_spill] sm:$0xff] %v9995_v13  ;;  %v7412_v56 = vpop.eup %7411  ;;  %7425 = vpow2.f32 %v5247_v24  ;;  %v4985_v54 = vsub.f32 0.0, %v4361_v18  ;;  %v4366_v52 = vpop.f32.mrf.mxu0  ;;  %4605 = vmatmul.mubr.bf16.gmra.mxu0 %v7228_v42  ;;  %4092 = vmatmul.mubr.bf16.gmra.mxu1 %v7225_v10  ;;  %v3698_v4 = vadd.f32 %v9847_v49, %v9460_v33 }
 0x2f2   :  { %7427 = vrcp.f32 %v5744_v3  ;;  %v5745_v35 = vadd.f32 1.0, %v7412_v56  ;;  %v4986_v19 = vsub.f32 0.0, %v4363_v6  ;;  %v9997_v23 = vpop.f32.mrf.mxu1  ;;  %v4367_v7 = vadd.f32 %v4366_v52, %v3694_v53  ;;  %4614 = vmatprep.mubr.bf16.mxu0 %v7236_v29  ;;  %4101 = vmatprep.mubr.bf16.mxu1 %v7233_v16  ;;  %v7242_v6 = vld [vmem:[#allocation3 + $0x3ac] ss:$16 sps:$4 sm:$0xff]  }
 0x2f3   :  { %12214 = vst [vmem:[#allocation60_spill] sm:$0xff] %v9997_v23  ;;  %v7414_v15 = vpop.eup %7413  ;;  %7429 = vpow2.f32 %v5249_v5  ;;  %v5251_v44 = vmul.f32 1.442695, %v4985_v54  ;;  %v4368_v24 = vpop.f32.mrf.mxu0  ;;  %v3700_v29 = vadd.f32 %v9849_v26, %v9460_v33 }
 0x2f4   :  { %7431 = vrcp.f32 %v5745_v35  ;;  %v5746_v42 = vadd.f32 1.0, %v7414_v15  ;;  %v5253_v41 = vmul.f32 1.442695, %v4986_v19  ;;  %v4987_v12 = vsub.f32 0.0, %v4367_v7  ;;  %v10003_v18 = vpop.f32.mrf.mxu1  ;;  %v7239_v35 = vld [vmem:[#allocation3 + $0x5a4] ss:$16 sps:$4 sm:$0xff]  }
 0x2f5   :  { %12215 = vst [vmem:[#allocation61_spill] sm:$0xff] %v10003_v18  ;;  %v7416_v10 = vpop.eup %7415  ;;  %7433 = vpow2.f32 %v5251_v44  ;;  %v4369_v53 = vadd.f32 %v4368_v24, %v3696_v62  ;;  %v4370_v57 = vpop.f32.mrf.mxu0  ;;  %v12218_v62 = vld [vmem:[#allocation51_spill] sm:$0xff] }
 0x2f6   :  { %7435 = vrcp.f32 %v5746_v42  ;;  %v5747_v49 = vadd.f32 1.0, %v7416_v10  ;;  %v5255_v3 = vmul.f32 1.442695, %v4987_v12  ;;  %v10007_v5 = vpop.f32.mrf.mxu1  ;;  %v4371_v16 = vadd.f32 %v4370_v57, %v3698_v4  ;;  %v12220_v57 = vld [vmem:[#allocation52_spill] sm:$0xff]  ;;  %v7287_v18 = vld [vmem:[#allocation3 + $0x6a4] ss:$16 sps:$4 sm:$0xff]  }
 0x2f7   :  { %12216 = vst [vmem:[#allocation62_spill] sm:$0xff] %v10007_v5  ;;  %v7418_v56 = vpop.eup %7417  ;;  %7437 = vpow2.f32 %v5253_v41  ;;  %v4988_v54 = vsub.f32 0.0, %v4369_v53  ;;  %v4372_v52 = vpop.f32.mrf.mxu0  ;;  %v3704_v44 = vadd.f32 %v9851_v40, %v12218_v62  ;;  %v3706_v24 = vadd.f32 %v9853_v58, %v12218_v62  ;;  %v7248_v62 = vld [vmem:[#allocation3 + $0x3cc] ss:$16 sps:$4 sm:$0xff]  }
 0x2f8   :  { %7439 = vrcp.f32 %v5747_v49  ;;  %v5748_v19 = vadd.f32 1.0, %v7418_v56  ;;  %v4989_v33 = vsub.f32 0.0, %v4371_v16  ;;  %v10009_v26 = vpop.f32.mrf.mxu1  ;;  %v4373_v7 = vadd.f32 %v4372_v52, %v3700_v29  ;;  %v12270_v5 = vld [vmem:[#allocation14_spill] sm:$0xff] }
 0x2f9   :  { %12217 = vst [vmem:[#allocation63_spill] sm:$0xff] %v10009_v26  ;;  %v7420_v15 = vpop.eup %7419  ;;  %7441 = vpow2.f32 %v5255_v3  ;;  %v5257_v4 = vmul.f32 1.442695, %v4988_v54  ;;  %v4376_v42 = vpop.f32.mrf.mxu0  ;;  %4615 = vmatmul.mubr.bf16.gmra.mxu0 %v7234_v14  ;;  %4102 = vmatmul.mubr.bf16.gmra.mxu1 %v7231_v0  ;;  %v3708_v49 = vadd.f32 %v9855_v60, %v12220_v57  ;;  %v3710_v60 = vadd.f32 %v9857_v55, %v12220_v57 }
 0x2fa   :  { %7443 = vrcp.f32 %v5748_v19  ;;  %v5749_v41 = vadd.f32 1.0, %v7420_v15  ;;  %v5259_v12 = vmul.f32 1.442695, %v4989_v33  ;;  %v4990_v10 = vsub.f32 0.0, %v4373_v7  ;;  %v10015_v53 = vpop.f32.mrf.mxu1  ;;  %4624 = vmatprep.mubr.bf16.mxu0 %v7242_v6  ;;  %4111 = vmatprep.mubr.bf16.mxu1 %v7239_v35  ;;  %v7240_v6 = vld [vmem:[#allocation3 + $0x3a8] ss:$16 sps:$4 sm:$0xff]  }
 0x2fb   :  { %12219 = vst [vmem:[#allocation51_spill] sm:$0xff] %v10015_v53  ;;  %v7422_v29 = vpop.eup %7421  ;;  %7445 = vpow2.f32 %v5257_v4  ;;  %v4377_v40 = vadd.f32 %v4376_v42, %v3704_v44  ;;  %v4378_v16 = vpop.f32.mrf.mxu0  ;;  %v7237_v15 = vld [vmem:[#allocation3 + $0x5a0] ss:$16 sps:$4 sm:$0xff]  }
 0x2fc   :  { %7447 = vrcp.f32 %v5749_v41  ;;  %v5750_v58 = vadd.f32 1.0, %v7422_v29  ;;  %v5261_v3 = vmul.f32 1.442695, %v4990_v10  ;;  %v10019_v14 = vpop.f32.mrf.mxu1  ;;  %v4379_v56 = vadd.f32 %v4378_v16, %v3706_v24  ;;  %v7245_v41 = vld [vmem:[#allocation3 + $0x5c4] ss:$16 sps:$4 sm:$0xff]  }
 0x2fd   :  { %12221 = vst [vmem:[#allocation52_spill] sm:$0xff] %v10019_v14  ;;  %v10021_v54 = vpop.eup %7423  ;;  %7449 = vpow2.f32 %v5259_v12  ;;  %v4991_v52 = vsub.f32 0.0, %v4377_v40  ;;  %v4380_v0 = vpop.f32.mrf.mxu0  ;;  %v12223_v10 = vld [vmem:[#allocation49_spill] sm:$0xff] }
 0x2fe   :  { %v7426_v19 = vpop.eup %7425  ;;  %7451 = vrcp.f32 %v5750_v58  ;;  %v4992_v33 = vsub.f32 0.0, %v4379_v56  ;;  %v10025_v7 = vpop.f32.mrf.mxu1  ;;  %v4381_v35 = vadd.f32 %v4380_v0, %v3708_v49  ;;  %v3714_v29 = vadd.f32 %v9859_v51, %v12223_v10  ;;  %v7281_v14 = vld [vmem:[#allocation3 + $0x684] ss:$16 sps:$4 sm:$0xff]  }
 0x2ff   :  { %12222 = vst [vmem:[#allocation64_spill] sm:$0xff] %v10025_v7  ;;  %v10027_v44 = vpop.eup %7427  ;;  %v5751_v24 = vadd.f32 1.0, %v7426_v19  ;;  %7453 = vpow2.f32 %v5261_v3  ;;  %v5263_v4 = vmul.f32 1.442695, %v4991_v52  ;;  %v4382_v42 = vpop.f32.mrf.mxu0  ;;  %v3716_v49 = vadd.f32 %v9861_v36, %v12223_v10 }
 0x300   :  { %v7430_v12 = vpop.eup %7429  ;;  %v5265_v40 = vmul.f32 1.442695, %v4992_v33  ;;  %v4993_v55 = vsub.f32 0.0, %v4381_v35  ;;  %v10031_v57 = vpop.f32.mrf.mxu1  ;;  %v4383_v16 = vadd.f32 %v4382_v42, %v3710_v60  ;;  %v12226_v60 = vld [vmem:[#allocation50_spill] sm:$0xff] }
 0x301   :  { %12224 = vst [vmem:[#allocation49_spill] sm:$0xff] %v10031_v57  ;;  %v10033_v58 = vpop.eup %7431  ;;  %7455 = vrcp.f32 %v5751_v24  ;;  %v5752_v56 = vadd.f32 1.0, %v7430_v12  ;;  %v4386_v3 = vpop.f32.mrf.mxu0  ;;  %4625 = vmatmul.mubr.bf16.gmra.mxu0 %v7240_v6  ;;  %4112 = vmatmul.mubr.bf16.gmra.mxu1 %v7237_v15  ;;  %v3718_v35 = vadd.f32 %v9863_v61, %v12226_v60  ;;  %v12229_v6 = vld [vmem:[#allocation47_spill] sm:$0xff] }
 0x302   :  { %v7434_v52 = vpop.eup %7433  ;;  %7457 = vpow2.f32 %v5263_v4  ;;  %v5267_v0 = vmul.f32 1.442695, %v4993_v55  ;;  %v4994_v19 = vsub.f32 0.0, %v4383_v16  ;;  %v10037_v7 = vpop.f32.mrf.mxu1  ;;  %v4387_v51 = vadd.f32 %v4386_v3, %v3714_v29  ;;  %4634 = vmatprep.mubr.bf16.mxu0 %v7248_v62  ;;  %4121 = vmatprep.mubr.bf16.mxu1 %v7245_v41  ;;  %v7243_v16 = vld [vmem:[#allocation3 + $0x5c0] ss:$16 sps:$4 sm:$0xff]  }
 0x303   :  { %12225 = vst [vmem:[#allocation65_spill] sm:$0xff] %v10037_v7  ;;  %v10039_v33 = vpop.eup %7435  ;;  %7459 = vrcp.f32 %v5752_v56  ;;  %v5753_v36 = vadd.f32 1.0, %v7434_v52  ;;  %v4388_v24 = vpop.f32.mrf.mxu0  ;;  %v3720_v29 = vadd.f32 %v9865_v47, %v12226_v60  ;;  %v7246_v41 = vld [vmem:[#allocation3 + $0x3c8] ss:$16 sps:$4 sm:$0xff]   ;;  %v3724_v47 = vadd.f32 %v9867_v20, %v12229_v6 }
 0x304   :  { %v7438_v4 = vpop.eup %7437  ;;  %7461 = vpow2.f32 %v5265_v40  ;;  %v5269_v42 = vmul.f32 1.442695, %v4994_v19  ;;  %v4995_v12 = vsub.f32 0.0, %v4387_v51  ;;  %v10045_v10 = vpop.f32.mrf.mxu1  ;;  %v4389_v15 = vadd.f32 %v4388_v24, %v3716_v49  ;;  %v7254_v51 = vld [vmem:[#allocation3 + $0x3ec] ss:$16 sps:$4 sm:$0xff]  }
 0x305   :  { %12227 = vst [vmem:[#allocation50_spill] sm:$0xff] %v10045_v10  ;;  %v10047_v62 = vpop.eup %7439  ;;  %7463 = vrcp.f32 %v5753_v36  ;;  %v5754_v61 = vadd.f32 1.0, %v7438_v4  ;;  %v4390_v55 = vpop.f32.mrf.mxu0  ;;  %v7251_v4 = vld [vmem:[#allocation3 + $0x5e4] ss:$16 sps:$4 sm:$0xff]  }
 0x306   :  { %v7442_v3 = vpop.eup %7441  ;;  %7465 = vpow2.f32 %v5267_v0  ;;  %v5271_v40 = vmul.f32 1.442695, %v4995_v12  ;;  %v4996_v52 = vsub.f32 0.0, %v4389_v15  ;;  %v10053_v19 = vpop.f32.mrf.mxu1  ;;  %v4391_v49 = vadd.f32 %v4390_v55, %v3718_v35 }
 0x307   :  { %12228 = vst [vmem:[#allocation66_spill] sm:$0xff] %v10053_v19  ;;  %v10055_v24 = vpop.eup %7443  ;;  %7467 = vrcp.f32 %v5754_v61  ;;  %v5755_v60 = vadd.f32 1.0, %v7442_v3  ;;  %v4392_v36 = vpop.f32.mrf.mxu0  ;;  %v3726_v35 = vadd.f32 %v9869_v25, %v12229_v6 }
 0x308   :  { %v7446_v10 = vpop.eup %7445  ;;  %7469 = vpow2.f32 %v5269_v42  ;;  %v5273_v56 = vmul.f32 1.442695, %v4996_v52  ;;  %v4997_v7 = vsub.f32 0.0, %v4391_v49  ;;  %v10059_v0 = vpop.f32.mrf.mxu1  ;;  %v4393_v12 = vadd.f32 %v4392_v36, %v3720_v29  ;;  %v12232_v29 = vld [vmem:[#allocation48_spill] sm:$0xff] }
 0x309   :  { %12230 = vst [vmem:[#allocation47_spill] sm:$0xff] %v10059_v0  ;;  %v10061_v15 = vpop.eup %7447  ;;  %7471 = vrcp.f32 %v5755_v60  ;;  %v5756_v55 = vadd.f32 1.0, %v7446_v10  ;;  %v4396_v19 = vpop.f32.mrf.mxu0  ;;  %4635 = vmatmul.mubr.bf16.gmra.mxu0 %v7246_v41  ;;  %4122 = vmatmul.mubr.bf16.gmra.mxu1 %v7243_v16  ;;  %v3728_v49 = vadd.f32 %v9871_v21, %v12232_v29  ;;  %v7252_v36 = vld [vmem:[#allocation3 + $0x3e8] ss:$16 sps:$4 sm:$0xff]   ;;  %v7257_v10 = vld [vmem:[#allocation3 + $0x604] ss:$16 sps:$4 sm:$0xff]  }
 0x30a   :  { %v7450_v20 = vpop.eup %7449  ;;  %7473 = vpow2.f32 %v5271_v40  ;;  %v5275_v61 = vmul.f32 1.442695, %v4997_v7  ;;  %v4998_v3 = vsub.f32 0.0, %v4393_v12  ;;  %v10065_v57 = vpop.f32.mrf.mxu1  ;;  %v4397_v42 = vadd.f32 %v4396_v19, %v3724_v47  ;;  %4644 = vmatprep.mubr.bf16.mxu0 %v7254_v51  ;;  %4131 = vmatprep.mubr.bf16.mxu1 %v7251_v4  ;;  %v7249_v47 = vld [vmem:[#allocation3 + $0x5e0] ss:$16 sps:$4 sm:$0xff]  }
 0x30b   :  { %12231 = vst [vmem:[#allocation67_spill] sm:$0xff] %v10065_v57  ;;  %v10067_v52 = vpop.eup %7451  ;;  %7475 = vrcp.f32 %v5756_v55  ;;  %v5757_v25 = vadd.f32 1.0, %v7450_v20  ;;  %v4398_v6 = vpop.f32.mrf.mxu0 }
 0x30c   :  { %v7454_v41 = vpop.eup %7453  ;;  %7477 = vpow2.f32 %v5273_v56  ;;  %v5277_v7 = vmul.f32 1.442695, %v4998_v3  ;;  %v4999_v40 = vsub.f32 0.0, %v4397_v42  ;;  %v10073_v60 = vpop.f32.mrf.mxu1  ;;  %v4399_v16 = vadd.f32 %v4398_v6, %v3726_v35  ;;  %v7260_v3 = vld [vmem:[#allocation3 + $0x40c] ss:$16 sps:$4 sm:$0xff]  }
 0x30d   :  { %12233 = vst [vmem:[#allocation48_spill] sm:$0xff] %v10073_v60  ;;  %7479 = vrcp.f32 %v5757_v25  ;;  %v5758_v19 = vadd.f32 1.0, %v7454_v41  ;;  %v4400_v51 = vpop.f32.mrf.mxu0  ;;  %v3730_v35 = vadd.f32 %v9873_v9, %v12232_v29  ;;  %v12235_v25 = vld [vmem:[#allocation45_spill] sm:$0xff] }
 0x30e   :  { %v10077_v12 = vpop.eup %7455  ;;  %7481 = vpow2.f32 %v5275_v61  ;;  %v5279_v4 = vmul.f32 1.442695, %v4999_v40  ;;  %v5000_v55 = vsub.f32 0.0, %v4399_v16  ;;  %v10079_v20 = vpop.f32.mrf.mxu1  ;;  %v4401_v56 = vadd.f32 %v4400_v51, %v3728_v49 }
 0x30f   :  { %12234 = vst [vmem:[#allocation68_spill] sm:$0xff] %v10079_v20  ;;  %v7458_v42 = vpop.eup %7457  ;;  %v3734_v6 = vadd.f32 %v9875_v63, %v12235_v25  ;;  %7483 = vrcp.f32 %v5758_v19  ;;  %v4402_v41 = vpop.f32.mrf.mxu0  ;;  %v3736_v51 = vadd.f32 %v9877_v45, %v12235_v25 }
 0x310   :  { %v10085_v21 = vpop.eup %7459  ;;  %v5759_v60 = vadd.f32 1.0, %v7458_v42  ;;  %7485 = vpow2.f32 %v5277_v7  ;;  %v5281_v61 = vmul.f32 1.442695, %v5000_v55  ;;  %v5001_v40 = vsub.f32 0.0, %v4401_v56  ;;  %v10087_v16 = vpop.f32.mrf.mxu1  ;;  %v12238_v56 = vld [vmem:[#allocation46_spill] sm:$0xff] }
 0x311   :  { %12236 = vst [vmem:[#allocation45_spill] sm:$0xff] %v10087_v16  ;;  %v7462_v49 = vpop.eup %7461  ;;  %7487 = vpow2.f32 %v5279_v4  ;;  %v4403_v9 = vadd.f32 %v4402_v41, %v3730_v35  ;;  %v4406_v29 = vpop.f32.mrf.mxu0  ;;  %4645 = vmatmul.mubr.bf16.gmra.mxu0 %v7252_v36  ;;  %4132 = vmatmul.mubr.bf16.gmra.mxu1 %v7249_v47  ;;  %v3738_v42 = vadd.f32 %v9879_v37, %v12238_v56  ;;  %v12241_v36 = vld [vmem:[#allocation59_spill] sm:$0xff] }
 0x312   :  { %v10091_v63 = vpop.eup %7463  ;;  %7489 = vrcp.f32 %v5759_v60  ;;  %v5760_v19 = vadd.f32 1.0, %v7462_v49  ;;  %v5283_v20 = vmul.f32 1.442695, %v5001_v40  ;;  %v10093_v57 = vpop.f32.mrf.mxu1  ;;  %v4407_v7 = vadd.f32 %v4406_v29, %v3734_v6  ;;  %4654 = vmatprep.mubr.bf16.mxu0 %v7260_v3  ;;  %4141 = vmatprep.mubr.bf16.mxu1 %v7257_v10  ;;  %v7255_v40 = vld [vmem:[#allocation3 + $0x600] ss:$16 sps:$4 sm:$0xff]  }
 0x313   :  { %12237 = vst [vmem:[#allocation69_spill] sm:$0xff] %v10093_v57  ;;  %v7466_v55 = vpop.eup %7465  ;;  %7491 = vpow2.f32 %v5281_v61  ;;  %v5002_v45 = vsub.f32 0.0, %v4403_v9  ;;  %v4408_v4 = vpop.f32.mrf.mxu0  ;;  %v3740_v6 = vadd.f32 %v9881_v31, %v12238_v56  ;;  %v7258_v10 = vld [vmem:[#allocation3 + $0x408] ss:$16 sps:$4 sm:$0xff]   ;;  %v3744_v31 = vadd.f32 %v9883_v17, %v12241_v36 }
 0x314   :  { %v10099_v35 = vpop.eup %7467  ;;  %7493 = vrcp.f32 %v5760_v19  ;;  %v5761_v60 = vadd.f32 1.0, %v7466_v55  ;;  %v5003_v25 = vsub.f32 0.0, %v4407_v7  ;;  %v10101_v41 = vpop.f32.mrf.mxu1  ;;  %v4409_v47 = vadd.f32 %v4408_v4, %v3736_v51  ;;  %v7266_v51 = vld [vmem:[#allocation3 + $0x42c] ss:$16 sps:$4 sm:$0xff]  }
 0x315   :  { %12239 = vst [vmem:[#allocation46_spill] sm:$0xff] %v10101_v41  ;;  %v7470_v3 = vpop.eup %7469  ;;  %7495 = vpow2.f32 %v5283_v20  ;;  %v5285_v37 = vmul.f32 1.442695, %v5002_v45  ;;  %v4410_v61 = vpop.f32.mrf.mxu0  ;;  %v7263_v45 = vld [vmem:[#allocation3 + $0x624] ss:$16 sps:$4 sm:$0xff]  }
 0x316   :  { %v10107_v9 = vpop.eup %7471  ;;  %7497 = vrcp.f32 %v5761_v60  ;;  %v5762_v29 = vadd.f32 1.0, %v7470_v3  ;;  %v5287_v19 = vmul.f32 1.442695, %v5003_v25  ;;  %v5004_v7 = vsub.f32 0.0, %v4409_v47  ;;  %v10109_v55 = vpop.f32.mrf.mxu1 }
 0x317   :  { %12240 = vst [vmem:[#allocation70_spill] sm:$0xff] %v10109_v55  ;;  %v7474_v4 = vpop.eup %7473  ;;  %7499 = vpow2.f32 %v5285_v37  ;;  %v4411_v20 = vadd.f32 %v4410_v61, %v3738_v42  ;;  %v4412_v56 = vpop.f32.mrf.mxu0  ;;  %v3746_v3 = vadd.f32 %v9885_v48, %v12241_v36 }
 0x318   :  { %v10113_v41 = vpop.eup %7475  ;;  %7501 = vrcp.f32 %v5762_v29  ;;  %v5763_v49 = vadd.f32 1.0, %v7474_v4  ;;  %v5289_v57 = vmul.f32 1.442695, %v5004_v7  ;;  %v10115_v60 = vpop.f32.mrf.mxu1  ;;  %v4413_v25 = vadd.f32 %v4412_v56, %v3740_v6 }
 0x319   :  { %12242 = vst [vmem:[#allocation59_spill] sm:$0xff] %v10115_v60  ;;  %v7478_v47 = vpop.eup %7477  ;;  %7503 = vpow2.f32 %v5287_v19  ;;  %v5005_v55 = vsub.f32 0.0, %v4411_v20  ;;  %v4416_v16 = vpop.f32.mrf.mxu0  ;;  %4655 = vmatmul.mubr.bf16.gmra.mxu0 %v7258_v10  ;;  %4142 = vmatmul.mubr.bf16.gmra.mxu1 %v7255_v40 }
 0x31a   :  { %v10119_v17 = vpop.eup %7479  ;;  %v1797_v42 = vpop.permute.xlu1 %1796  ;;  %7505 = vrcp.f32 %v5763_v49  ;;  %v5764_v37 = vadd.f32 1.0, %v7478_v47  ;;  %v5006_v61 = vsub.f32 0.0, %v4413_v25  ;;  %v4417_v7 = vadd.f32 %v4416_v16, %v3744_v31  ;;  %4664 = vmatprep.mubr.bf16.mxu0 %v7266_v51  ;;  %4151 = vmatprep.mubr.bf16.mxu1 %v7263_v45  ;;  %v7264_v51 = vld [vmem:[#allocation3 + $0x428] ss:$16 sps:$4 sm:$0xff]  }
 0x31b   :  { %v10121_v29 = vpop.f32.mrf.mxu1  ;;  %v7482_v6 = vpop.eup %7481  ;;  %v3748_v4 = vadd.f32 %v9887_v28, %v1797_v42  ;;  %7507 = vpow2.f32 %v5289_v57  ;;  %v5291_v48 = vmul.f32 1.442695, %v5005_v55  ;;  %v3750_v40 = vadd.f32 %v9889_v39, %v1797_v42  ;;  %v7261_v55 = vld [vmem:[#allocation3 + $0x620] ss:$16 sps:$4 sm:$0xff]   ;;  %v7269_v42 = vld [vmem:[#allocation3 + $0x644] ss:$16 sps:$4 sm:$0xff]  }
 0x31c   :  { %12243 = vst [vmem:[#allocation71_spill] sm:$0xff] %v10121_v29  ;;  %v4418_v36 = vpop.f32.mrf.mxu0  ;;  %v10126_v19 = vpop.eup %7483  ;;  %7509 = vrcp.f32 %v5764_v37  ;;  %v5765_v49 = vadd.f32 1.0, %v7482_v6  ;;  %v5293_v20 = vmul.f32 1.442695, %v5006_v61  ;;  %v5007_v56 = vsub.f32 0.0, %v4417_v7 }
 0x31d   :  { %v10128_v25 = vpop.f32.mrf.mxu1  ;;  %v7486_v16 = vpop.eup %7485  ;;  %7511 = vpow2.f32 %v5291_v48  ;;  %v4419_v28 = vadd.f32 %v4418_v36, %v3746_v3  ;;  %v7272_v7 = vld [vmem:[#allocation3 + $0x44c] ss:$16 sps:$4 sm:$0xff]   ;;  %v12246_v36 = vld [vmem:[#allocation35_spill] sm:$0xff] }
 0x31e   :  { %12244 = vst [vmem:[#allocation72_spill] sm:$0xff] %v10128_v25  ;;  %v4420_v57 = vpop.f32.mrf.mxu0  ;;  %v7488_v45 = vpop.eup %7487  ;;  %7513 = vrcp.f32 %v5765_v49  ;;  %v5766_v47 = vadd.f32 1.0, %v7486_v16  ;;  %v5295_v37 = vmul.f32 1.442695, %v5007_v56  ;;  %v3754_v29 = vadd.f32 %v9891_v38, %v12246_v36 }
 0x31f   :  { %v10133_v6 = vpop.f32.mrf.mxu1  ;;  %v4421_v61 = vadd.f32 %v4420_v57, %v3748_v4  ;;  %v10135_v10 = vpop.eup %7489  ;;  %v5767_v25 = vadd.f32 1.0, %v7488_v45  ;;  %7515 = vpow2.f32 %v5293_v20  ;;  %v5008_v39 = vsub.f32 0.0, %v4419_v28 }
 0x320   :  { %12245 = vst [vmem:[#allocation73_spill] sm:$0xff] %v10133_v6  ;;  %v4422_v3 = vpop.f32.mrf.mxu0  ;;  %v7492_v48 = vpop.eup %7491  ;;  %7517 = vrcp.f32 %v5766_v47  ;;  %v3756_v4 = vadd.f32 %v9893_v2, %v12246_v36 }
 0x321   :  { %v5009_v31 = vsub.f32 0.0, %v4421_v61  ;;  %v10139_v49 = vpop.f32.mrf.mxu1  ;;  %v4423_v56 = vadd.f32 %v4422_v3, %v3750_v40  ;;  %v10141_v16 = vpop.eup %7493  ;;  %7519 = vrcp.f32 %v5767_v25  ;;  %v5768_v57 = vadd.f32 1.0, %v7492_v48  ;;  %4665 = vmatmul.mubr.bf16.gmra.mxu0 %v7264_v51  ;;  %4152 = vmatmul.mubr.bf16.gmra.mxu1 %v7261_v55  ;;  %v12249_v61 = vld [vmem:[#allocation22_spill] sm:$0xff] }
 0x322   :  { %12247 = vst [vmem:[#allocation35_spill] sm:$0xff] %v10139_v49  ;;  %v5297_v20 = vmul.f32 1.442695, %v5008_v39  ;;  %v4426_v28 = vpop.f32.mrf.mxu0  ;;  %v7496_v45 = vpop.eup %7495  ;;  %7521 = vpow2.f32 %v5295_v37  ;;  %4674 = vmatprep.mubr.bf16.mxu0 %v7272_v7  ;;  %v3758_v3 = vadd.f32 %v9895_v1, %v12249_v61  ;;  %4161 = vmatprep.mubr.bf16.mxu1 %v7269_v42  ;;  %v7267_v1 = vld [vmem:[#allocation3 + $0x640] ss:$16 sps:$4 sm:$0xff]  }
 0x323   :  { %v5299_v6 = vmul.f32 1.442695, %v5009_v31  ;;  %v5010_v60 = vsub.f32 0.0, %v4423_v56  ;;  %v10145_v38 = vpop.f32.mrf.mxu1  ;;  %v4427_v47 = vadd.f32 %v4426_v28, %v3754_v29  ;;  %v10147_v40 = vpop.eup %7497  ;;  %7523 = vrcp.f32 %v5768_v57  ;;  %v7270_v56 = vld [vmem:[#allocation3 + $0x448] ss:$16 sps:$4 sm:$0xff]  }
 0x324   :  { %12248 = vst [vmem:[#allocation74_spill] sm:$0xff] %v10145_v38  ;;  %v5769_v2 = vadd.f32 1.0, %v7496_v45  ;;  %v4428_v25 = vpop.f32.mrf.mxu0  ;;  %v7500_v39 = vpop.eup %7499  ;;  %7525 = vpow2.f32 %v5297_v20  ;;  %v3760_v29 = vadd.f32 %v9897_v27, %v12249_v61  ;;  %v7278_v45 = vld [vmem:[#allocation3 + $0x46c] ss:$16 sps:$4 sm:$0xff]  }
 0x325   :  { %v5301_v51 = vmul.f32 1.442695, %v5010_v60  ;;  %v5011_v37 = vsub.f32 0.0, %v4427_v47  ;;  %v10151_v31 = vpop.f32.mrf.mxu1  ;;  %v4429_v48 = vadd.f32 %v4428_v25, %v3756_v4  ;;  %v10153_v36 = vpop.eup %7501  ;;  %v5770_v55 = vadd.f32 1.0, %v7500_v39  ;;  %v12252_v25 = vld [vmem:[#allocation36_spill] sm:$0xff] }
 0x326   :  { %12250 = vst [vmem:[#allocation22_spill] sm:$0xff] %v10151_v31  ;;  %7527 = vrcp.f32 %v5769_v2  ;;  %v4430_v7 = vpop.f32.mrf.mxu0  ;;  %v7504_v57 = vpop.eup %7503  ;;  %v3764_v27 = vadd.f32 %v9899_v43, %v12252_v25  ;;  %v7275_v39 = vld [vmem:[#allocation3 + $0x664] ss:$16 sps:$4 sm:$0xff]  }
 0x327   :  { %7529 = vpow2.f32 %v5299_v6  ;;  %v5303_v60 = vmul.f32 1.442695, %v5011_v37  ;;  %v5012_v20 = vsub.f32 0.0, %v4429_v48  ;;  %v10159_v28 = vpop.f32.mrf.mxu1  ;;  %v4431_v4 = vadd.f32 %v4430_v7, %v3758_v3  ;;  %v10161_v47 = vpop.eup %7505 }
 0x328   :  { %12251 = vst [vmem:[#allocation75_spill] sm:$0xff] %v10159_v28  ;;  %7531 = vrcp.f32 %v5770_v55  ;;  %v5771_v61 = vadd.f32 1.0, %v7504_v57  ;;  %v4432_v2 = vpop.f32.mrf.mxu0  ;;  %v7508_v31 = vpop.eup %7507  ;;  %v12254_v28 = vld [vmem:[#allocation11_spill] sm:$0xff] }
 0x329   :  { %7533 = vpow2.f32 %v5301_v51  ;;  %v5305_v6 = vmul.f32 1.442695, %v5012_v20  ;;  %v5013_v37 = vsub.f32 0.0, %v4431_v4  ;;  %v10167_v48 = vpop.f32.mrf.mxu1  ;;  %v4433_v3 = vadd.f32 %v4432_v2, %v3760_v29  ;;  %v10169_v7 = vpop.eup %7509  ;;  %4675 = vmatmul.mubr.bf16.gmra.mxu0 %v7270_v56  ;;  %4162 = vmatmul.mubr.bf16.gmra.mxu1 %v7267_v1  ;;  %v12256_v29 = vld [vmem:[#allocation21_spill] sm:$0xff] }
 0x32a   :  { %12253 = vst [vmem:[#allocation36_spill] sm:$0xff] %v10167_v48  ;;  %v3766_v38 = vadd.f32 %v12254_v28, %v12252_v25  ;;  %7535 = vrcp.f32 %v5771_v61  ;;  %v5772_v43 = vadd.f32 1.0, %v7508_v31  ;;  %v4436_v55 = vpop.f32.mrf.mxu0  ;;  %v7512_v57 = vpop.eup %7511  ;;  %4684 = vmatprep.mubr.bf16.mxu0 %v7278_v45  ;;  %v12257_v4 = vld [vmem:[#allocation9_spill] sm:$0xff]  ;;  %4171 = vmatprep.mubr.bf16.mxu1 %v7275_v39 }
 0x32b   :  { %7537 = vpow2.f32 %v5303_v60  ;;  %v5307_v49 = vmul.f32 1.442695, %v5013_v37  ;;  %v5014_v42 = vsub.f32 0.0, %v4433_v3  ;;  %v10173_v0 = vpop.f32.mrf.mxu1  ;;  %v4437_v51 = vadd.f32 %v4436_v55, %v3764_v27  ;;  %v10175_v20 = vpop.eup %7513  ;;  %v7273_v55 = vld [vmem:[#allocation3 + $0x660] ss:$16 sps:$4 sm:$0xff]  }
 0x32c   :  { %12255 = vst [vmem:[#allocation11_spill] sm:$0xff] %v10173_v0  ;;  %v3768_v2 = vadd.f32 %v12257_v4, %v12256_v29  ;;  %7539 = vrcp.f32 %v5772_v43  ;;  %v5773_v28 = vadd.f32 1.0, %v7512_v57  ;;  %v4438_v25 = vpop.f32.mrf.mxu0  ;;  %v7516_v31 = vpop.eup %7515  ;;  %v7276_v4 = vld [vmem:[#allocation3 + $0x468] ss:$16 sps:$4 sm:$0xff]  }
 0x32d   :  { %v10179_v56 = vpop.permute.xlu0 %1941  ;;  %7541 = vpow2.f32 %v5305_v6  ;;  %v5309_v60 = vmul.f32 1.442695, %v5014_v42  ;;  %v5015_v61 = vsub.f32 0.0, %v4437_v51  ;;  %v10181_v37 = vpop.f32.mrf.mxu1  ;;  %v4439_v1 = vadd.f32 %v4438_v25, %v3766_v38  ;;  %v12261_v25 = vld [vmem:[#allocation10_spill] sm:$0xff]  ;;  %v12263_v0 = vld [vmem:[#allocation12_spill] sm:$0xff] }
 0x32e   :  { %12258 = vst [vmem:[#allocation21_spill] sm:$0xff] %v10179_v56  ;;  %12259 = vst [vmem:[#allocation9_spill] sm:$0xff] %v10181_v37  ;;  %v10183_v27 = vpop.eup %7517  ;;  %7543 = vrcp.f32 %v5773_v28  ;;  %v5774_v45 = vadd.f32 1.0, %v7516_v31  ;;  %v4440_v3 = vpop.f32.mrf.mxu0  ;;  %v7284_v37 = vld [vmem:[#allocation3 + $0x48c] ss:$16 sps:$4 sm:$0xff]   ;;  %v3770_v28 = vadd.f32 %v12261_v25, %v12256_v29  ;;  %v12266_v25 = vld [vmem:[#allocation13_spill] sm:$0xff] }
 0x32f   :  { %v10187_v39 = vpop.eup %7519  ;;  %7545 = vpow2.f32 %v5307_v49  ;;  %v5311_v57 = vmul.f32 1.442695, %v5015_v61  ;;  %v5016_v6 = vsub.f32 0.0, %v4439_v1  ;;  %v10189_v42 = vpop.f32.mrf.mxu1  ;;  %v4441_v51 = vadd.f32 %v4440_v3, %v3768_v2  ;;  %v12262_v31 = vld [vmem:[#allocation32_spill] sm:$0xff] }
 0x330   :  { %12260 = vst [vmem:[#allocation76_spill] sm:$0xff] %v10189_v42  ;;  %v7522_v38 = vpop.eup %7521  ;;  %v3774_v48 = vadd.f32 %v12263_v0, %v12262_v31  ;;  %7547 = vrcp.f32 %v5774_v45  ;;  %v4442_v56 = vpop.f32.mrf.mxu0  ;;  %v3776_v0 = vadd.f32 %v12266_v25, %v12262_v31  ;;  %v7279_v25 = vld [vmem:[#allocation3 + $0x680] ss:$16 sps:$4 sm:$0xff]  }
 0x331   :  { %v10197_v49 = vpop.eup %7523  ;;  %v10199_v61 = vpop.permute.xlu1 %1946  ;;  %v5775_v1 = vadd.f32 1.0, %v7522_v38  ;;  %7549 = vpow2.f32 %v5309_v60  ;;  %v5313_v2 = vmul.f32 1.442695, %v5016_v6  ;;  %v5017_v3 = vsub.f32 0.0, %v4441_v51  ;;  %4685 = vmatmul.mubr.bf16.gmra.mxu0 %v7276_v4  ;;  %4172 = vmatmul.mubr.bf16.gmra.mxu1 %v7273_v55 }
 0x332   :  { %12264 = vst [vmem:[#allocation10_spill] sm:$0xff] %v10199_v61  ;;  %v10201_v42 = vpop.f32.mrf.mxu1  ;;  %v7526_v29 = vpop.eup %7525  ;;  %7551 = vpow2.f32 %v5311_v57  ;;  %v4443_v45 = vadd.f32 %v4442_v56, %v3770_v28  ;;  %4694 = vmatprep.mubr.bf16.mxu0 %v7284_v37  ;;  %4181 = vmatprep.mubr.bf16.mxu1 %v7281_v14  ;;  %v12272_v37 = vld [vmem:[#allocation43_spill] sm:$0xff] }
 0x333   :  { %12265 = vst [vmem:[#allocation32_spill] sm:$0xff] %v10201_v42  ;;  %v4446_v53 = vpop.f32.mrf.mxu0  ;;  %v10205_v26 = vpop.eup %7527  ;;  %7553 = vrcp.f32 %v5775_v1  ;;  %v5776_v61 = vadd.f32 1.0, %v7526_v29  ;;  %v5315_v38 = vmul.f32 1.442695, %v5017_v3  ;;  %v12269_v42 = vld [vmem:[#allocation31_spill] sm:$0xff] }
 0x334   :  { %v10207_v43 = vpop.permute.xlu0 %1931  ;;  %v10209_v60 = vpop.f32.mrf.mxu1  ;;  %v4447_v6 = vadd.f32 %v4446_v53, %v3774_v48  ;;  %v3778_v31 = vadd.f32 %v12270_v5, %v12269_v42  ;;  %7555 = vpow2.f32 %v5313_v2  ;;  %v5018_v56 = vsub.f32 0.0, %v4443_v45  ;;  %v7282_v14 = vld [vmem:[#allocation3 + $0x488] ss:$16 sps:$4 sm:$0xff]  }
 0x335   :  { %12267 = vst [vmem:[#allocation12_spill] sm:$0xff] %v10207_v43  ;;  %12268 = vst [vmem:[#allocation13_spill] sm:$0xff] %v10209_v60  ;;  %v7530_v51 = vpop.eup %7529  ;;  %v4448_v57 = vpop.f32.mrf.mxu0  ;;  %7557 = vrcp.f32 %v5776_v61  ;;  %v3780_v55 = vadd.f32 %v12272_v37, %v12269_v42 }
 0x336   :  { %v10215_v28 = vpop.eup %7531  ;;  %v5777_v1 = vadd.f32 1.0, %v7530_v51  ;;  %v5019_v3 = vsub.f32 0.0, %v4447_v6  ;;  %v10217_v29 = vpop.f32.mrf.mxu1  ;;  %v4449_v53 = vadd.f32 %v4448_v57, %v3776_v0  ;;  %7559 = vpow2.f32 %v5315_v38  ;;  %v12275_v38 = vld [vmem:[#allocation28_spill] sm:$0xff] }
 0x337   :  { %12271 = vst [vmem:[#allocation31_spill] sm:$0xff] %v10217_v29  ;;  %v7534_v48 = vpop.eup %7533  ;;  %v5317_v5 = vmul.f32 1.442695, %v5018_v56  ;;  %v4450_v2 = vpop.f32.mrf.mxu0  ;;  %v7290_v29 = vld [vmem:[#allocation3 + $0x4ac] ss:$16 sps:$4 sm:$0xff]   ;;  %v12276_v56 = vld [vmem:[#allocation15_spill] sm:$0xff] }
 0x338   :  { %v10223_v4 = vpop.eup %7535  ;;  %v10225_v61 = vpop.permute.xlu1 %1936  ;;  %7561 = vrcp.f32 %v5777_v1  ;;  %v5778_v6 = vadd.f32 1.0, %v7534_v48  ;;  %v5319_v51 = vmul.f32 1.442695, %v5019_v3  ;;  %v5020_v0 = vsub.f32 0.0, %v4449_v53 }
 0x339   :  { %12273 = vst [vmem:[#allocation14_spill] sm:$0xff] %v10225_v61  ;;  %v10227_v57 = vpop.f32.mrf.mxu1  ;;  %v7538_v42 = vpop.eup %7537  ;;  %v3784_v37 = vadd.f32 %v12276_v56, %v12275_v38  ;;  %7563 = vpow2.f32 %v5317_v5  ;;  %v4451_v60 = vadd.f32 %v4450_v2, %v3778_v31  ;;  %4695 = vmatmul.mubr.bf16.gmra.mxu0 %v7282_v14  ;;  %4182 = vmatmul.mubr.bf16.gmra.mxu1 %v7279_v25 }
 0x33a   :  { %12274 = vst [vmem:[#allocation43_spill] sm:$0xff] %v10227_v57  ;;  %v4452_v43 = vpop.f32.mrf.mxu0  ;;  %v7540_v45 = vpop.eup %7539  ;;  %7565 = vrcp.f32 %v5778_v6  ;;  %v5779_v61 = vadd.f32 1.0, %v7538_v42  ;;  %v5321_v1 = vmul.f32 1.442695, %v5020_v0  ;;  %v12278_v57 = vld [vmem:[#allocation44_spill] sm:$0xff]  ;;  %4704 = vmatprep.mubr.bf16.mxu0 %v7290_v29  ;;  %v12280_v42 = vld [vmem:[#allocation23_spill] sm:$0xff]  ;;  %4191 = vmatprep.mubr.bf16.mxu1 %v7287_v18 }
 0x33b   :  { %v10231_v23 = vpop.permute.xlu0 %1921  ;;  %v10233_v48 = vpop.f32.mrf.mxu1  ;;  %v4453_v3 = vadd.f32 %v4452_v43, %v3780_v55  ;;  %v3786_v13 = vadd.f32 %v12278_v57, %v12275_v38  ;;  %7567 = vpow2.f32 %v5319_v51  ;;  %v5021_v46 = vsub.f32 0.0, %v4451_v60  ;;  %v12281_v43 = vld [vmem:[#allocation16_spill] sm:$0xff] }
 0x33c   :  { %12277 = vst [vmem:[#allocation28_spill] sm:$0xff] %v10233_v48  ;;  %v7542_v53 = vpop.eup %7541  ;;  %v4456_v56 = vpop.f32.mrf.mxu0  ;;  %7569 = vrcp.f32 %v5779_v61  ;;  %v3788_v55 = vadd.f32 %v12281_v43, %v12280_v42  ;;  %v7285_v43 = vld [vmem:[#allocation3 + $0x6a0] ss:$16 sps:$4 sm:$0xff]  }
 0x33d   :  { %v7544_v31 = vpop.eup %7543  ;;  %v5780_v5 = vadd.f32 1.0, %v7542_v53  ;;  %v5022_v2 = vsub.f32 0.0, %v4453_v3  ;;  %v10237_v59 = vpop.f32.mrf.mxu1  ;;  %v4457_v6 = vadd.f32 %v4456_v56, %v3784_v37  ;;  %7571 = vpow2.f32 %v5321_v1  ;;  %v12284_v37 = vld [vmem:[#allocation17_spill] sm:$0xff] }
 0x33e   :  { %12279 = vst [vmem:[#allocation15_spill] sm:$0xff] %v10237_v59  ;;  %v7546_v0 = vpop.eup %7545  ;;  %v5323_v48 = vmul.f32 1.442695, %v5021_v46  ;;  %v4458_v57 = vpop.f32.mrf.mxu0  ;;  %v6273_v60 = vpack.c.bf16 %v7544_v31, %v10223_v4  ;;  %v3790_v53 = vadd.f32 %v12284_v37, %v12280_v42  ;;  %v7288_v4 = vld [vmem:[#allocation3 + $0x4a8] ss:$16 sps:$4 sm:$0xff]  }
 0x33f   :  { %v7548_v14 = vpop.eup %7547  ;;  %v10242_v51 = vpop.permute.xlu1 %1926  ;;  %7573 = vrcp.f32 %v5780_v5  ;;  %v5781_v61 = vadd.f32 1.0, %v7546_v0  ;;  %v5325_v38 = vmul.f32 1.442695, %v5022_v2  ;;  %v5023_v3 = vsub.f32 0.0, %v4457_v6 }
 0x340   :  { %12282 = vst [vmem:[#allocation44_spill] sm:$0xff] %v10242_v51  ;;  %v10244_v25 = vpop.f32.mrf.mxu1  ;;  %v7550_v29 = vpop.eup %7549  ;;  %7575 = vpow2.f32 %v5323_v48  ;;  %v4459_v1 = vadd.f32 %v4458_v57, %v3786_v13  ;;  %v6274_v56 = vpack.c.bf16 %v7548_v14, %v7540_v45  ;;  %v7293_v45 = vld [vmem:[#allocation3 + $0x6c4] ss:$16 sps:$4 sm:$0xff]   ;;  %v12287_v14 = vld [vmem:[#allocation18_spill] sm:$0xff] }
 0x341   :  { %12283 = vst [vmem:[#allocation23_spill] sm:$0xff] %v10244_v25  ;;  %v4460_v46 = vpop.f32.mrf.mxu0  ;;  %v7552_v18 = vpop.eup %7551  ;;  %7577 = vrcp.f32 %v5781_v61  ;;  %v5782_v5 = vadd.f32 1.0, %v7550_v29  ;;  %v5327_v0 = vmul.f32 1.442695, %v5023_v3  ;;  %v7296_v25 = vld [vmem:[#allocation3 + $0x4cc] ss:$16 sps:$4 sm:$0xff]   ;;  %4705 = vmatmul.mubr.bf16.gmra.mxu0 %v7288_v4  ;;  %4192 = vmatmul.mubr.bf16.gmra.mxu1 %v7285_v43 }
 0x342   :  { %v10248_v31 = vpop.permute.xlu0 %1911  ;;  %v10250_v2 = vpop.f32.mrf.mxu1  ;;  %v4461_v6 = vadd.f32 %v4460_v46, %v3788_v55  ;;  %v5783_v51 = vadd.f32 1.0, %v7552_v18  ;;  %7579 = vpow2.f32 %v5325_v38  ;;  %v5024_v48 = vsub.f32 0.0, %v4459_v1  ;;  %6415 = vmatprep.subr.bf16.mxu1 %v6274_v56  ;;  %v12286_v57 = vld [vmem:[#allocation57_spill] sm:$0xff]  ;;  %4714 = vmatprep.mubr.bf16.mxu0 %v7296_v25 }
 0x343   :  { %12285 = vst [vmem:[#allocation16_spill] sm:$0xff] %v10250_v2  ;;  %v10252_v59 = vpop.eup %7553  ;;  %v4462_v13 = vpop.f32.mrf.mxu0  ;;  %v3794_v37 = vadd.f32 %v12287_v14, %v12286_v57  ;;  %7581 = vrcp.f32 %v5782_v5  ;;  %6416 = vmatpush1.bf16.msra.mxu1 %v6273_v60  ;;  %v12288_v46 = vld [vmem:[#allocation41_spill] sm:$0xff]  ;;  %v12289_v56 = vpack.c.bf16 %v10215_v28, %v10197_v49  ;;  %4201 = vmatprep.mubr.bf16.mxu1 %v7293_v45 }
 0x344   :  { %v7556_v42 = vpop.eup %7555  ;;  %v5025_v61 = vsub.f32 0.0, %v4461_v6  ;;  %v10256_v29 = vpop.f32.mrf.mxu1  ;;  %v4463_v3 = vadd.f32 %v4462_v13, %v3790_v53  ;;  %v3796_v18 = vadd.f32 %v12288_v46, %v12286_v57  ;;  %7583 = vrcp.f32 %v5783_v51 }
 0x345   :  { %v10258_v55 = vpop.eup %7557  ;;  %v5784_v38 = vadd.f32 1.0, %v7556_v42  ;;  %v5329_v1 = vmul.f32 1.442695, %v5024_v48  ;;  %6417 = vmatprep.subr.bf16.mxu1 %v12289_v56  ;;  %v4466_v2 = vpop.f32.mrf.mxu0  ;;  %7585 = vpow2.f32 %v5327_v0  ;;  %v12291_v48 = vld [vmem:[#allocation58_spill] sm:$0xff]  ;;  %v12292_v42 = vld [vmem:[#allocation20_spill] sm:$0xff]  ;;  %v12294_v25 = vpack.c.bf16 %v10205_v26, %v10187_v39 }
 0x346   :  { %v7560_v5 = vpop.eup %7559  ;;  %v10265_v6 = vpop.permute.xlu1 %1916  ;;  %v5331_v53 = vmul.f32 1.442695, %v5025_v61  ;;  %v5026_v60 = vsub.f32 0.0, %v4463_v3  ;;  %v4467_v14 = vadd.f32 %v4466_v2, %v3794_v37  ;;  %v3798_v57 = vadd.f32 %v12292_v42, %v12291_v48  ;;  %v12295_v37 = vld [vmem:[#allocation42_spill] sm:$0xff] }
 0x347   :  { %v10267_v13 = vpop.f32.mrf.mxu1  ;;  %v10269_v51 = vpop.eup %7561  ;;  %7587 = vrcp.f32 %v5784_v38  ;;  %v5785_v49 = vadd.f32 1.0, %v7560_v5  ;;  %6418 = vmatpush1.bf16.msra.mxu1 %v12294_v25  ;;  %v3800_v38 = vadd.f32 %v12295_v37, %v12291_v48  ;;  %v12296_v56 = vpack.c.bf16 %v10183_v27, %v10169_v7  ;;  %v7291_v5 = vld [vmem:[#allocation3 + $0x6c0] ss:$16 sps:$4 sm:$0xff]   ;;  %v7302_v48 = vld [vmem:[#allocation3 + $0x4ec] ss:$16 sps:$4 sm:$0xff]  }
 0x348   :  { %12290 = vst [vmem:[#allocation17_spill] sm:$0xff] %v10267_v13  ;;  %v4468_v28 = vpop.f32.mrf.mxu0  ;;  %v7564_v4 = vpop.eup %7563  ;;  %7589 = vpow2.f32 %v5329_v1  ;;  %v5333_v0 = vmul.f32 1.442695, %v5026_v60  ;;  %v5027_v61 = vsub.f32 0.0, %v4467_v14  ;;  %v7294_v60 = vld [vmem:[#allocation3 + $0x4c8] ss:$16 sps:$4 sm:$0xff]   ;;  %v12302_v13 = vpack.c.bf16 %v10153_v36, %v10141_v16 }
 0x349   :  { %v10273_v46 = vpop.permute.xlu0 %1901  ;;  %v10275_v3 = vpop.f32.mrf.mxu1  ;;  %v4469_v43 = vadd.f32 %v4468_v28, %v3796_v18  ;;  %7591 = vrcp.f32 %v5785_v49  ;;  %v5786_v45 = vadd.f32 1.0, %v7564_v4  ;;  %6419 = vmatprep.subr.bf16.mxu1 %v12296_v56  ;;  %v12298_v4 = vld [vmem:[#allocation55_spill] sm:$0xff]  ;;  %4715 = vmatmul.mubr.bf16.gmra.mxu0 %v7294_v60 }
 0x34a   :  { %12293 = vst [vmem:[#allocation57_spill] sm:$0xff] %v10275_v3  ;;  %v10280_v2 = vpop.eup %7565  ;;  %v4470_v1 = vpop.f32.mrf.mxu0  ;;  %7593 = vpow2.f32 %v5331_v53  ;;  %v5335_v26 = vmul.f32 1.442695, %v5027_v61  ;;  %v12299_v25 = vld [vmem:[#allocation19_spill] sm:$0xff]  ;;  %4202 = vmatmul.mubr.bf16.gmra.mxu1 %v7291_v5  ;;  %4724 = vmatprep.mubr.bf16.mxu0 %v7302_v48  ;;  %v12307_v5 = vpack.c.bf16 %v10147_v40, %v10135_v10 }
 0x34b   :  { %v7568_v14 = vpop.eup %7567  ;;  %v5028_v39 = vsub.f32 0.0, %v4469_v43  ;;  %v10289_v42 = vpop.f32.mrf.mxu1  ;;  %v4471_v28 = vadd.f32 %v4470_v1, %v3798_v57  ;;  %v3804_v7 = vadd.f32 %v12299_v25, %v12298_v4  ;;  %7595 = vrcp.f32 %v5786_v45  ;;  %v7299_v56 = vld [vmem:[#allocation3 + $0x6e4] ss:$16 sps:$4 sm:$0xff]  }
 0x34c   :  { %12297 = vst [vmem:[#allocation18_spill] sm:$0xff] %v10289_v42  ;;  %v10291_v49 = vpop.eup %7569  ;;  %v5787_v27 = vadd.f32 1.0, %v7568_v14  ;;  %v4472_v37 = vpop.f32.mrf.mxu0  ;;  %7597 = vpow2.f32 %v5333_v0  ;;  %v12300_v42 = vpack.c.bf16 %v10175_v20, %v10161_v47  ;;  %v12301_v14 = vld [vmem:[#allocation27_spill] sm:$0xff]  ;;  %4211 = vmatprep.mubr.bf16.mxu1 %v7299_v56 }
 0x34d   :  { %v7572_v3 = vpop.eup %7571  ;;  %v10297_v53 = vpop.permute.xlu1 %1906  ;;  %v5337_v61 = vmul.f32 1.442695, %v5028_v39  ;;  %v5029_v43 = vsub.f32 0.0, %v4471_v28  ;;  %v4473_v1 = vadd.f32 %v4472_v37, %v3800_v38  ;;  %v3806_v25 = vadd.f32 %v12301_v14, %v12298_v4  ;;  %v7297_v14 = vld [vmem:[#allocation3 + $0x6e0] ss:$16 sps:$4 sm:$0xff]  }
 0x34e   :  { %v10299_v57 = vpop.f32.mrf.mxu1  ;;  %6420 = vmatpush1.bf16.msra.mxu1 %v12300_v42  ;;  %v10304_v45 = vpop.eup %7573  ;;  %7599 = vrcp.f32 %v5787_v27  ;;  %v5788_v18 = vadd.f32 1.0, %v7572_v3  ;;  %v12304_v3 = vld [vmem:[#allocation56_spill] sm:$0xff] }
 0x34f   :  { %6421 = vmatprep.subr.bf16.mxu1 %v12302_v13  ;;  %v4476_v0 = vpop.f32.mrf.mxu0  ;;  %v7576_v39 = vpop.eup %7575  ;;  %7601 = vpow2.f32 %v5335_v26  ;;  %v5339_v38 = vmul.f32 1.442695, %v5029_v43  ;;  %v5030_v47 = vsub.f32 0.0, %v4473_v1  ;;  %v12305_v27 = vld [vmem:[#allocation24_spill] sm:$0xff] }
 0x350   :  { %v10311_v28 = vpop.permute.xlu0 %1891  ;;  %v10313_v20 = vpop.f32.mrf.mxu1  ;;  %v4477_v42 = vadd.f32 %v4476_v0, %v3804_v7  ;;  %v3808_v37 = vadd.f32 %v12305_v27, %v12304_v3  ;;  %7603 = vrcp.f32 %v5788_v18  ;;  %v5789_v16 = vadd.f32 1.0, %v7576_v39  ;;  %v7308_v27 = vld [vmem:[#allocation3 + $0x50c] ss:$16 sps:$4 sm:$0xff]   ;;  %v7305_v0 = vld [vmem:[#allocation3 + $0x704] ss:$16 sps:$4 sm:$0xff]  }
 0x351   :  { %12303 = vst [vmem:[#allocation41_spill] sm:$0xff] %v10313_v20  ;;  %v10315_v4 = vpop.eup %7577  ;;  %v4478_v36 = vpop.f32.mrf.mxu0  ;;  %7605 = vpow2.f32 %v5337_v61  ;;  %v5341_v60 = vmul.f32 1.442695, %v5030_v47  ;;  %v12308_v18 = vpack.c.bf16 %v10126_v19, %v10113_v41  ;;  %v7300_v61 = vld [vmem:[#allocation3 + $0x4e8] ss:$16 sps:$4 sm:$0xff]   ;;  %v12316_v20 = vpack.c.bf16 %v10099_v35, %v10085_v21 }
 0x352   :  { %v7580_v13 = vpop.eup %7579  ;;  %v5031_v26 = vsub.f32 0.0, %v4477_v42  ;;  %v10319_v43 = vpop.f32.mrf.mxu1  ;;  %v4479_v1 = vadd.f32 %v4478_v36, %v3806_v25  ;;  %6422 = vmatpush1.bf16.msra.mxu1 %v12307_v5  ;;  %7607 = vrcp.f32 %v5789_v16  ;;  %v12310_v41 = vld [vmem:[#allocation25_spill] sm:$0xff]  ;;  %4725 = vmatmul.mubr.bf16.gmra.mxu0 %v7300_v61 }
 0x353   :  { %12306 = vst [vmem:[#allocation58_spill] sm:$0xff] %v10319_v43  ;;  %v10324_v48 = vpop.eup %7581  ;;  %v5790_v7 = vadd.f32 1.0, %v7580_v13  ;;  %6423 = vmatprep.subr.bf16.mxu1 %v12308_v18  ;;  %v4480_v56 = vpop.f32.mrf.mxu0  ;;  %7609 = vpow2.f32 %v5339_v38  ;;  %v3810_v19 = vadd.f32 %v12310_v41, %v12304_v3  ;;  %v12311_v36 = vld [vmem:[#allocation53_spill] sm:$0xff]  ;;  %v12312_v13 = vld [vmem:[#allocation26_spill] sm:$0xff]  ;;  %v12314_v3 = vpack.c.bf16 %v10119_v17, %v10107_v9  ;;  %4212 = vmatmul.mubr.bf16.gmra.mxu1 %v7297_v14 }
 0x354   :  { %v10331_v39 = vpop.eup %7583  ;;  %v10333_v25 = vpop.permute.xlu1 %1896  ;;  %v5343_v10 = vmul.f32 1.442695, %v5031_v26  ;;  %v5032_v40 = vsub.f32 0.0, %v4479_v1  ;;  %v4481_v42 = vadd.f32 %v4480_v56, %v3808_v37  ;;  %v3814_v5 = vadd.f32 %v12312_v13, %v12311_v36  ;;  %v12315_v41 = vld [vmem:[#allocation30_spill] sm:$0xff]  ;;  %4734 = vmatprep.mubr.bf16.mxu0 %v7308_v27  ;;  %4221 = vmatprep.mubr.bf16.mxu1 %v7305_v0 }
 0x355   :  { %v10335_v47 = vpop.f32.mrf.mxu1  ;;  %v7586_v16 = vpop.eup %7585  ;;  %7611 = vrcp.f32 %v5790_v7  ;;  %v3816_v13 = vadd.f32 %v12315_v41, %v12311_v36  ;;  %v12318_v36 = vld [vmem:[#allocation54_spill] sm:$0xff] }
 0x356   :  { %12309 = vst [vmem:[#allocation20_spill] sm:$0xff] %v10335_v47  ;;  %v4482_v18 = vpop.f32.mrf.mxu0  ;;  %v10343_v38 = vpop.eup %7587  ;;  %v5791_v1 = vadd.f32 1.0, %v7586_v16  ;;  %7613 = vpow2.f32 %v5341_v60  ;;  %v5345_v37 = vmul.f32 1.442695, %v5032_v40  ;;  %v5033_v56 = vsub.f32 0.0, %v4481_v42  ;;  %6424 = vmatpush1.bf16.msra.mxu1 %v12314_v3  ;;  %v12322_v0 = vld [vmem:[#allocation34_spill] sm:$0xff] }
 0x357   :  { %v10345_v26 = vpop.permute.xlu0 %1881  ;;  %v10347_v47 = vpop.f32.mrf.mxu1  ;;  %7615 = vpow2.f32 %v5343_v10  ;;  %v4483_v43 = vadd.f32 %v4482_v18, %v3810_v19  ;;  %6425 = vmatprep.subr.bf16.mxu1 %v12316_v20  ;;  %v12319_v10 = vld [vmem:[#allocation29_spill] sm:$0xff] }
 0x358   :  { %12313 = vst [vmem:[#allocation42_spill] sm:$0xff] %v10347_v47  ;;  %v7590_v7 = vpop.eup %7589  ;;  %v4486_v16 = vpop.f32.mrf.mxu0  ;;  %7617 = vrcp.f32 %v5791_v1  ;;  %v5347_v42 = vmul.f32 1.442695, %v5033_v56  ;;  %v3818_v19 = vadd.f32 %v12319_v10, %v12318_v36  ;;  %v12321_v56 = vpack.c.bf16 %v10091_v63, %v10077_v12 }
 0x359   :  { %v10357_v60 = vpop.eup %7591  ;;  %v5792_v40 = vadd.f32 1.0, %v7590_v7  ;;  %v10359_v47 = vpop.f32.mrf.mxu1  ;;  %v4487_v9 = vadd.f32 %v4486_v16, %v3814_v5  ;;  %7619 = vpow2.f32 %v5345_v37  ;;  %v5034_v18 = vsub.f32 0.0, %v4483_v43  ;;  %v7303_v16 = vld [vmem:[#allocation3 + $0x700] ss:$16 sps:$4 sm:$0xff]  }
 0x35a   :  { %12317 = vst [vmem:[#allocation55_spill] sm:$0xff] %v10359_v47  ;;  %v7594_v17 = vpop.eup %7593  ;;  %v4488_v21 = vpop.f32.mrf.mxu0  ;;  %6426 = vmatpush1.bf16.msra.mxu1 %v12321_v56  ;;  %v3820_v37 = vadd.f32 %v12322_v0, %v12318_v36  ;;  %v12323_v7 = vpack.c.bf16 %v10067_v52, %v10055_v24  ;;  %v7311_v0 = vld [vmem:[#allocation3 + $0x724] ss:$16 sps:$4 sm:$0xff]  }
 0x35b   :  { %v10365_v20 = vpop.eup %7595  ;;  %v10367_v61 = vpop.permute.xlu1 %1886  ;;  %7621 = vrcp.f32 %v5792_v40  ;;  %v5793_v1 = vadd.f32 1.0, %v7594_v17  ;;  %v5035_v14 = vsub.f32 0.0, %v4487_v9  ;;  %v4489_v27 = vadd.f32 %v4488_v21, %v3816_v13  ;;  %v7306_v40 = vld [vmem:[#allocation3 + $0x508] ss:$16 sps:$4 sm:$0xff]   ;;  %4222 = vmatmul.mubr.bf16.gmra.mxu1 %v7303_v16 }
 0x35c   :  { %v10369_v5 = vpop.f32.mrf.mxu1  ;;  %v7598_v43 = vpop.eup %7597  ;;  %7623 = vpow2.f32 %v5347_v42  ;;  %v5349_v3 = vmul.f32 1.442695, %v5034_v18  ;;  %6427 = vmatprep.subr.bf16.mxu1 %v12323_v7  ;;  %v7314_v42 = vld [vmem:[#allocation3 + $0x52c] ss:$16 sps:$4 sm:$0xff]   ;;  %v12325_v21 = vld [vmem:[#allocation33_spill] sm:$0xff]  ;;  %4735 = vmatmul.mubr.bf16.gmra.mxu0 %v7306_v40  ;;  %v12332_v16 = vpack.c.bf16 %v10033_v58, %v10021_v54 }
 0x35d   :  { %12320 = vst [vmem:[#allocation19_spill] sm:$0xff] %v10369_v5  ;;  %v4490_v41 = vpop.f32.mrf.mxu0  ;;  %v10381_v9 = vpop.eup %7599  ;;  %7625 = vrcp.f32 %v5793_v1  ;;  %v5794_v63 = vadd.f32 1.0, %v7598_v43  ;;  %v5351_v17 = vmul.f32 1.442695, %v5035_v14  ;;  %v5036_v10 = vsub.f32 0.0, %v4489_v27  ;;  %v12328_v43 = vld [vmem:[#allocation38_spill] sm:$0xff]  ;;  %4744 = vmatprep.mubr.bf16.mxu0 %v7314_v42  ;;  %4231 = vmatprep.mubr.bf16.mxu1 %v7311_v0 }
 0x35e   :  { %v1872_v12 = vpop.permute.xlu0 %1871  ;;  %v10383_v36 = vpop.f32.mrf.mxu1  ;;  %7627 = vpow2.f32 %v5349_v3  ;;  %v4491_v52 = vadd.f32 %v4490_v41, %v3818_v19  ;;  %v12327_v14 = vpack.c.bf16 %v10061_v15, %v10047_v62  ;;  %v12329_v19 = vpack.c.bf16 %v10039_v33, %v10027_v44  ;;  %v7309_v0 = vld [vmem:[#allocation3 + $0x720] ss:$16 sps:$4 sm:$0xff]   ;;  %v7320_v54 = vld [vmem:[#allocation3 + $0x54c] ss:$16 sps:$4 sm:$0xff]  }
 0x35f   :  { %12324 = vst [vmem:[#allocation27_spill] sm:$0xff] %v10383_v36  ;;  %v7602_v18 = vpop.eup %7601  ;;  %v3824_v24 = vadd.f32 %v12325_v21, %v1872_v12  ;;  %v4492_v56 = vpop.f32.mrf.mxu0  ;;  %7629 = vrcp.f32 %v5794_v63  ;;  %v5353_v13 = vmul.f32 1.442695, %v5036_v10  ;;  %v3826_v36 = vadd.f32 %v12328_v43, %v1872_v12  ;;  %v12339_v33 = vld [vmem:[#allocation37_spill] sm:$0xff] }
 0x360   :  { %v10386_v7 = vpop.eup %7603  ;;  %v5795_v35 = vadd.f32 1.0, %v7602_v18  ;;  %v10388_v5 = vpop.f32.mrf.mxu1  ;;  %v4493_v1 = vadd.f32 %v4492_v56, %v3820_v37  ;;  %6428 = vmatpush1.bf16.msra.mxu1 %v12327_v14  ;;  %7631 = vpow2.f32 %v5351_v17  ;;  %v5037_v3 = vsub.f32 0.0, %v4491_v52  ;;  %v7312_v14 = vld [vmem:[#allocation3 + $0x528] ss:$16 sps:$4 sm:$0xff]  }
 0x361   :  { %12326 = vst [vmem:[#allocation56_spill] sm:$0xff] %v10388_v5  ;;  %v7606_v27 = vpop.eup %7605  ;;  %6429 = vmatprep.subr.bf16.mxu1 %v12329_v19  ;;  %v4496_v41 = vpop.f32.mrf.mxu0 }
 0x362   :  { %v10397_v63 = vpop.eup %7607  ;;  %v1877_v10 = vpop.permute.xlu1 %1876  ;;  %7633 = vrcp.f32 %v5795_v35  ;;  %v5796_v37 = vadd.f32 1.0, %v7606_v27  ;;  %v5038_v18 = vsub.f32 0.0, %v4493_v1  ;;  %v4497_v62 = vadd.f32 %v4496_v41, %v3824_v24 }
 0x363   :  { %v10399_v21 = vpop.f32.mrf.mxu1  ;;  %v7610_v15 = vpop.eup %7609  ;;  %v3828_v12 = vadd.f32 %v9959_v32, %v1877_v10  ;;  %7635 = vpow2.f32 %v5353_v13  ;;  %v5355_v17 = vmul.f32 1.442695, %v5037_v3  ;;  %v3830_v13 = vadd.f32 %v9963_v30, %v1877_v10  ;;  %v7317_v10 = vld [vmem:[#allocation3 + $0x744] ss:$16 sps:$4 sm:$0xff]   ;;  %4232 = vmatmul.mubr.bf16.gmra.mxu1 %v7309_v0 }
 0x364   :  { %12330 = vst [vmem:[#allocation24_spill] sm:$0xff] %v10399_v21  ;;  %v4498_v44 = vpop.f32.mrf.mxu0  ;;  %v10404_v40 = vpop.eup %7611  ;;  %7637 = vrcp.f32 %v5796_v37  ;;  %v5797_v35 = vadd.f32 1.0, %v7610_v15  ;;  %v5357_v52 = vmul.f32 1.442695, %v5038_v18  ;;  %v5039_v56 = vsub.f32 0.0, %v4497_v62  ;;  %6430 = vmatpush1.bf16.msra.mxu1 %v12332_v16  ;;  %4745 = vmatmul.mubr.bf16.gmra.mxu0 %v7312_v14 }
 0x365   :  { %v10406_v1 = vpop.f32.mrf.mxu1  ;;  %v7614_v32 = vpop.eup %7613  ;;  %7639 = vpow2.f32 %v5355_v17  ;;  %v4499_v42 = vadd.f32 %v4498_v44, %v3826_v36  ;;  %v3834_v15 = vadd.f32 %v9967_v34, %v10345_v26  ;;  %4754 = vmatprep.mubr.bf16.mxu0 %v7320_v54  ;;  %4241 = vmatprep.mubr.bf16.mxu1 %v7317_v10  ;;  %v3840_v0 = vadd.f32 %v9979_v50, %v10367_v61 }
 0x366   :  { %12331 = vst [vmem:[#allocation25_spill] sm:$0xff] %v10406_v1  ;;  %v4500_v24 = vpop.f32.mrf.mxu0  ;;  %v7616_v43 = vpop.eup %7615  ;;  %7641 = vrcp.f32 %v5797_v35  ;;  %v5798_v3 = vadd.f32 1.0, %v7614_v32  ;;  %v5359_v19 = vmul.f32 1.442695, %v5039_v56  ;;  %v3844_v50 = vadd.f32 %v9983_v11, %v10311_v28 }
 0x367   :  { %v10414_v41 = vpop.f32.mrf.mxu1  ;;  %v4501_v37 = vadd.f32 %v4500_v24, %v3828_v12  ;;  %v10416_v58 = vpop.eup %7617  ;;  %v5799_v18 = vadd.f32 1.0, %v7616_v43  ;;  %7643 = vpow2.f32 %v5357_v52  ;;  %v5040_v30 = vsub.f32 0.0, %v4499_v42 }
 0x368   :  { %12333 = vst [vmem:[#allocation53_spill] sm:$0xff] %v10414_v41  ;;  %v4502_v36 = vpop.f32.mrf.mxu0  ;;  %v7620_v62 = vpop.eup %7619  ;;  %7645 = vrcp.f32 %v5798_v3  ;;  %v3836_v12 = vadd.f32 %v9971_v8, %v10345_v26  ;;  %v3846_v27 = vadd.f32 %v12339_v33, %v10311_v28  ;;  %v7335_v41 = vld [vmem:[#allocation3 + $0x7a4] ss:$16 sps:$4 sm:$0xff]  }
 0x369   :  { %v5041_v17 = vsub.f32 0.0, %v4501_v37  ;;  %v10420_v44 = vpop.f32.mrf.mxu1  ;;  %v4503_v35 = vadd.f32 %v4502_v36, %v3830_v13  ;;  %v10422_v56 = vpop.eup %7621  ;;  %7647 = vrcp.f32 %v5799_v18  ;;  %v5800_v16 = vadd.f32 1.0, %v7620_v62 }
 0x36a   :  { %12334 = vst [vmem:[#allocation26_spill] sm:$0xff] %v10420_v44  ;;  %v5361_v52 = vmul.f32 1.442695, %v5040_v30  ;;  %v4506_v32 = vpop.f32.mrf.mxu0  ;;  %v7624_v42 = vpop.eup %7623  ;;  %7649 = vpow2.f32 %v5359_v19  ;;  %v3838_v37 = vadd.f32 %v9975_v22, %v10367_v61  ;;  %v7315_v22 = vld [vmem:[#allocation3 + $0x740] ss:$16 sps:$4 sm:$0xff]  }
 0x36b   :  { %v5363_v24 = vmul.f32 1.442695, %v5041_v17  ;;  %v5042_v43 = vsub.f32 0.0, %v4503_v35  ;;  %v10426_v34 = vpop.f32.mrf.mxu1  ;;  %v4507_v3 = vadd.f32 %v4506_v32, %v3834_v15  ;;  %v10428_v13 = vpop.eup %7625  ;;  %7651 = vrcp.f32 %v5800_v16  ;;  %v7318_v17 = vld [vmem:[#allocation3 + $0x548] ss:$16 sps:$4 sm:$0xff]   ;;  %4242 = vmatmul.mubr.bf16.gmra.mxu1 %v7315_v22 }
 0x36c   :  { %12335 = vst [vmem:[#allocation30_spill] sm:$0xff] %v10426_v34  ;;  %v5801_v8 = vadd.f32 1.0, %v7624_v42  ;;  %v4508_v26 = vpop.f32.mrf.mxu0  ;;  %v7628_v18 = vpop.eup %7627  ;;  %7653 = vpow2.f32 %v5361_v52  ;;  %v7326_v42 = vld [vmem:[#allocation3 + $0x56c] ss:$16 sps:$4 sm:$0xff]   ;;  %4755 = vmatmul.mubr.bf16.gmra.mxu0 %v7318_v17 }
 0x36d   :  { %v5365_v14 = vmul.f32 1.442695, %v5042_v43  ;;  %v5043_v19 = vsub.f32 0.0, %v4507_v3  ;;  %v10432_v30 = vpop.f32.mrf.mxu1  ;;  %v4509_v36 = vadd.f32 %v4508_v26, %v3836_v12  ;;  %v10434_v62 = vpop.eup %7629  ;;  %v5802_v54 = vadd.f32 1.0, %v7628_v18  ;;  %4764 = vmatprep.mubr.bf16.mxu0 %v7326_v42 }
 0x36e   :  { %12336 = vst [vmem:[#allocation54_spill] sm:$0xff] %v10432_v30  ;;  %7655 = vrcp.f32 %v5801_v8  ;;  %v4510_v15 = vpop.f32.mrf.mxu0  ;;  %v7632_v35 = vpop.eup %7631  ;;  %v7323_v8 = vld [vmem:[#allocation3 + $0x764] ss:$16 sps:$4 sm:$0xff]  }
 0x36f   :  { %7657 = vpow2.f32 %v5363_v24  ;;  %v5367_v16 = vmul.f32 1.442695, %v5043_v19  ;;  %v5044_v52 = vsub.f32 0.0, %v4509_v36  ;;  %v10440_v32 = vpop.f32.mrf.mxu1  ;;  %v4511_v12 = vadd.f32 %v4510_v15, %v3838_v37  ;;  %v10442_v43 = vpop.eup %7633  ;;  %4251 = vmatprep.mubr.bf16.mxu1 %v7323_v8 }
 0x370   :  { %12337 = vst [vmem:[#allocation29_spill] sm:$0xff] %v10440_v32  ;;  %7659 = vrcp.f32 %v5802_v54  ;;  %v5803_v61 = vadd.f32 1.0, %v7632_v35  ;;  %v4512_v3 = vpop.f32.mrf.mxu0  ;;  %v7636_v18 = vpop.eup %7635 }
 0x371   :  { %7661 = vpow2.f32 %v5365_v14  ;;  %v5369_v24 = vmul.f32 1.442695, %v5044_v52  ;;  %v5045_v19 = vsub.f32 0.0, %v4511_v12  ;;  %v10448_v36 = vpop.f32.mrf.mxu1  ;;  %v4513_v37 = vadd.f32 %v4512_v3, %v3840_v0  ;;  %v10450_v15 = vpop.eup %7637  ;;  %v12341_v0 = vld [vmem:[#allocation40_spill] sm:$0xff] }
 0x372   :  { %12338 = vst [vmem:[#allocation34_spill] sm:$0xff] %v10448_v36  ;;  %7663 = vrcp.f32 %v5803_v61  ;;  %v5804_v11 = vadd.f32 1.0, %v7636_v18  ;;  %v4516_v54 = vpop.f32.mrf.mxu0  ;;  %v7640_v35 = vpop.eup %7639  ;;  %v3848_v12 = vadd.f32 %v12341_v0, %v10333_v25  ;;  %v7332_v0 = vld [vmem:[#allocation3 + $0x58c] ss:$16 sps:$4 sm:$0xff]   ;;  %v7329_v36 = vld [vmem:[#allocation3 + $0x784] ss:$16 sps:$4 sm:$0xff]  }
 0x373   :  { %7665 = vpow2.f32 %v5367_v16  ;;  %v5371_v10 = vmul.f32 1.442695, %v5045_v19  ;;  %v5046_v26 = vsub.f32 0.0, %v4513_v37  ;;  %v10454_v32 = vpop.f32.mrf.mxu1  ;;  %v4517_v14 = vadd.f32 %v4516_v54, %v3844_v50  ;;  %v10456_v52 = vpop.eup %7641  ;;  %v7321_v37 = vld [vmem:[#allocation3 + $0x760] ss:$16 sps:$4 sm:$0xff]  }
 0x374   :  { %12340 = vst [vmem:[#allocation33_spill] sm:$0xff] %v10454_v32  ;;  %7667 = vrcp.f32 %v5804_v11  ;;  %v5805_v28 = vadd.f32 1.0, %v7640_v35  ;;  %v4518_v33 = vpop.f32.mrf.mxu0  ;;  %v7644_v61 = vpop.eup %7643  ;;  %v7324_v54 = vld [vmem:[#allocation3 + $0x568] ss:$16 sps:$4 sm:$0xff]   ;;  %4252 = vmatmul.mubr.bf16.gmra.mxu1 %v7321_v37 }
 0x375   :  { %v10460_v17 = vpop.permute.xlu0 %2021  ;;  %7669 = vpow2.f32 %v5369_v24  ;;  %v5373_v16 = vmul.f32 1.442695, %v5046_v26  ;;  %v5047_v3 = vsub.f32 0.0, %v4517_v14  ;;  %v10462_v18 = vpop.f32.mrf.mxu1  ;;  %v4519_v22 = vadd.f32 %v4518_v33, %v3846_v27  ;;  %4765 = vmatmul.mubr.bf16.gmra.mxu0 %v7324_v54  ;;  %4261 = vmatprep.mubr.bf16.mxu1 %v7329_v36 }
 0x376   :  { %12342 = vst [vmem:[#allocation38_spill] sm:$0xff] %v10462_v18  ;;  %v10464_v50 = vpop.eup %7645  ;;  %7671 = vrcp.f32 %v5805_v28  ;;  %v5806_v42 = vadd.f32 1.0, %v7644_v61  ;;  %v4520_v19 = vpop.f32.mrf.mxu0  ;;  %v12345_v28 = vld [vmem:[#allocation39_spill] sm:$0xff]  ;;  %v12346_v18 = vld [vmem:[#allocation60_spill] sm:$0xff]  ;;  %4774 = vmatprep.mubr.bf16.mxu0 %v7332_v0 }
 0x377   :  { %v10468_v8 = vpop.eup %7647  ;;  %v10470_v35 = vpop.permute.xlu1 %2026  ;;  %7673 = vpow2.f32 %v5371_v10  ;;  %v5375_v26 = vmul.f32 1.442695, %v5047_v3  ;;  %v5048_v24 = vsub.f32 0.0, %v4519_v22  ;;  %v4521_v27 = vadd.f32 %v4520_v19, %v3848_v12 }
 0x378   :  { %12343 = vst [vmem:[#allocation37_spill] sm:$0xff] %v10470_v35  ;;  %v10472_v14 = vpop.f32.mrf.mxu1  ;;  %v7650_v33 = vpop.eup %7649  ;;  %v3850_v61 = vadd.f32 %v12345_v28, %v10333_v25  ;;  %v3854_v32 = vadd.f32 %v12346_v18, %v10273_v46  ;;  %7675 = vrcp.f32 %v5806_v42  ;;  %v12348_v25 = vld [vmem:[#allocation61_spill] sm:$0xff] }
 0x379   :  { %12344 = vst [vmem:[#allocation40_spill] sm:$0xff] %v10472_v14  ;;  %v4522_v11 = vpop.f32.mrf.mxu0  ;;  %v10480_v10 = vpop.eup %7651  ;;  %v5807_v3 = vadd.f32 1.0, %v7650_v33  ;;  %7677 = vpow2.f32 %v5373_v16  ;;  %v5377_v22 = vmul.f32 1.442695, %v5048_v24  ;;  %v5049_v12 = vsub.f32 0.0, %v4521_v27 }
 0x37a   :  { %v10482_v19 = vpop.f32.mrf.mxu1  ;;  %v7654_v14 = vpop.eup %7653  ;;  %v3856_v28 = vadd.f32 %v12348_v25, %v10273_v46  ;;  %7679 = vpow2.f32 %v5375_v26  ;;  %v4523_v18 = vadd.f32 %v4522_v11, %v3850_v61 }
 0x37b   :  { %12347 = vst [vmem:[#allocation39_spill] sm:$0xff] %v10482_v19  ;;  %v4526_v42 = vpop.f32.mrf.mxu0  ;;  %v10486_v34 = vpop.eup %7655  ;;  %7681 = vrcp.f32 %v5807_v3  ;;  %v5808_v30 = vadd.f32 1.0, %v7654_v14  ;;  %v5379_v33 = vmul.f32 1.442695, %v5049_v12  ;;  %v12350_v19 = vld [vmem:[#allocation62_spill] sm:$0xff] }
 0x37c   :  { %v10488_v44 = vpop.permute.xlu0 %2011  ;;  %v10490_v16 = vpop.f32.mrf.mxu1  ;;  %v4527_v24 = vadd.f32 %v4526_v42, %v3854_v32  ;;  %v3858_v46 = vadd.f32 %v12350_v19, %v10297_v53  ;;  %7683 = vpow2.f32 %v5377_v22  ;;  %v5050_v11 = vsub.f32 0.0, %v4523_v18  ;;  %v12352_v19 = vld [vmem:[#allocation63_spill] sm:$0xff] }
 0x37d   :  { %12349 = vst [vmem:[#allocation60_spill] sm:$0xff] %v10490_v16  ;;  %v7658_v27 = vpop.eup %7657  ;;  %v4528_v26 = vpop.f32.mrf.mxu0  ;;  %7685 = vrcp.f32 %v5808_v30  ;;  %v3860_v22 = vadd.f32 %v12352_v19, %v10297_v53  ;;  %v7327_v18 = vld [vmem:[#allocation3 + $0x780] ss:$16 sps:$4 sm:$0xff]   ;;  %v7330_v42 = vld [vmem:[#allocation3 + $0x588] ss:$16 sps:$4 sm:$0xff]  }
 0x37e   :  { %v10496_v61 = vpop.eup %7659  ;;  %v10498_v14 = vpop.permute.xlu1 %2016  ;;  %v5809_v3 = vadd.f32 1.0, %v7658_v27  ;;  %v5051_v37 = vsub.f32 0.0, %v4527_v24  ;;  %v4529_v0 = vadd.f32 %v4528_v26, %v3856_v28  ;;  %7687 = vpow2.f32 %v5379_v33  ;;  %v7338_v28 = vld [vmem:[#allocation3 + $0x5ac] ss:$16 sps:$4 sm:$0xff]   ;;  %v12354_v53 = vld [vmem:[#allocation51_spill] sm:$0xff]  ;;  %4775 = vmatmul.mubr.bf16.gmra.mxu0 %v7330_v42  ;;  %4262 = vmatmul.mubr.bf16.gmra.mxu1 %v7327_v18 }
 0x37f   :  { %v10500_v32 = vpop.f32.mrf.mxu1  ;;  %v7662_v12 = vpop.eup %7661  ;;  %v5381_v25 = vmul.f32 1.442695, %v5050_v11  ;;  %v3864_v33 = vadd.f32 %v12354_v53, %v10248_v31  ;;  %4784 = vmatprep.mubr.bf16.mxu0 %v7338_v28  ;;  %4271 = vmatprep.mubr.bf16.mxu1 %v7335_v41  ;;  %v12360_v28 = vld [vmem:[#allocation49_spill] sm:$0xff] }
 0x380   :  { %12351 = vst [vmem:[#allocation61_spill] sm:$0xff] %v10500_v32  ;;  %v4530_v36 = vpop.f32.mrf.mxu0  ;;  %v10506_v16 = vpop.eup %7663  ;;  %7689 = vrcp.f32 %v5809_v3  ;;  %v5810_v30 = vadd.f32 1.0, %v7662_v12  ;;  %v5383_v24 = vmul.f32 1.442695, %v5051_v37  ;;  %v5052_v27 = vsub.f32 0.0, %v4529_v0 }
 0x381   :  { %v10508_v32 = vpop.f32.mrf.mxu1  ;;  %v7666_v26 = vpop.eup %7665  ;;  %7691 = vpow2.f32 %v5381_v25  ;;  %v4531_v11 = vadd.f32 %v4530_v36, %v3858_v46 }
 0x382   :  { %12353 = vst [vmem:[#allocation62_spill] sm:$0xff] %v10508_v32  ;;  %v4532_v19 = vpop.f32.mrf.mxu0  ;;  %v7668_v1 = vpop.eup %7667  ;;  %7693 = vrcp.f32 %v5810_v30  ;;  %v5811_v54 = vadd.f32 1.0, %v7666_v26  ;;  %v5385_v3 = vmul.f32 1.442695, %v5052_v27  ;;  %v12356_v32 = vld [vmem:[#allocation52_spill] sm:$0xff] }
 0x383   :  { %v10512_v21 = vpop.permute.xlu0 %2001  ;;  %v10514_v12 = vpop.f32.mrf.mxu1  ;;  %v4533_v37 = vadd.f32 %v4532_v19, %v3860_v22  ;;  %v3866_v5 = vadd.f32 %v12356_v32, %v10248_v31  ;;  %7695 = vpow2.f32 %v5383_v24  ;;  %v5053_v35 = vsub.f32 0.0, %v4531_v11  ;;  %v12358_v26 = vld [vmem:[#allocation64_spill] sm:$0xff] }
 0x384   :  { %12355 = vst [vmem:[#allocation63_spill] sm:$0xff] %v10514_v12  ;;  %v7670_v0 = vpop.eup %7669  ;;  %v4536_v53 = vpop.f32.mrf.mxu0  ;;  %7697 = vrcp.f32 %v5811_v54  ;;  %v3868_v19 = vadd.f32 %v12358_v26, %v10265_v6 }
 0x385   :  { %v7672_v46 = vpop.eup %7671  ;;  %v10518_v25 = vpop.permute.xlu1 %2006  ;;  %v5812_v36 = vadd.f32 1.0, %v7670_v0  ;;  %v5054_v47 = vsub.f32 0.0, %v4533_v37  ;;  %v4537_v27 = vadd.f32 %v4536_v53, %v3864_v33  ;;  %7699 = vpow2.f32 %v5385_v3 }
 0x386   :  { %v10520_v30 = vpop.f32.mrf.mxu1  ;;  %v7674_v22 = vpop.eup %7673  ;;  %v5387_v31 = vmul.f32 1.442695, %v5053_v35  ;;  %v6289_v42 = vpack.c.bf16 %v7672_v46, %v10506_v16  ;;  %v3870_v33 = vadd.f32 %v12360_v28, %v10265_v6  ;;  %v7333_v35 = vld [vmem:[#allocation3 + $0x7a0] ss:$16 sps:$4 sm:$0xff]  }
 0x387   :  { %12357 = vst [vmem:[#allocation51_spill] sm:$0xff] %v10520_v30  ;;  %v4538_v32 = vpop.f32.mrf.mxu0  ;;  %v7676_v24 = vpop.eup %7675  ;;  %7701 = vrcp.f32 %v5812_v36  ;;  %v5813_v54 = vadd.f32 1.0, %v7674_v22  ;;  %v5389_v11 = vmul.f32 1.442695, %v5054_v47  ;;  %v5055_v37 = vsub.f32 0.0, %v4537_v27  ;;  %4272 = vmatmul.mubr.bf16.gmra.mxu1 %v7333_v35 }
 0x388   :  { %v10525_v0 = vpop.f32.mrf.mxu1  ;;  %v7678_v18 = vpop.eup %7677  ;;  %7703 = vpow2.f32 %v5387_v31  ;;  %v4539_v53 = vadd.f32 %v4538_v32, %v3866_v5  ;;  %v6290_v3 = vpack.c.bf16 %v7676_v24, %v7668_v1  ;;  %v7336_v30 = vld [vmem:[#allocation3 + $0x5a8] ss:$16 sps:$4 sm:$0xff]   ;;  %v7344_v27 = vld [vmem:[#allocation3 + $0x5cc] ss:$16 sps:$4 sm:$0xff]   ;;  %v7341_v1 = vld [vmem:[#allocation3 + $0x7c4] ss:$16 sps:$4 sm:$0xff]  }
 0x389   :  { %12359 = vst [vmem:[#allocation52_spill] sm:$0xff] %v10525_v0  ;;  %v4540_v26 = vpop.f32.mrf.mxu0  ;;  %v7680_v12 = vpop.eup %7679  ;;  %7705 = vrcp.f32 %v5813_v54  ;;  %v5814_v41 = vadd.f32 1.0, %v7678_v18  ;;  %v5391_v46 = vmul.f32 1.442695, %v5055_v37  ;;  %v12362_v24 = vld [vmem:[#allocation65_spill] sm:$0xff]  ;;  %4785 = vmatmul.mubr.bf16.gmra.mxu0 %v7336_v30  ;;  %4281 = vmatprep.mubr.bf16.mxu1 %v7341_v1 }
 0x38a   :  { %v10529_v16 = vpop.permute.xlu0 %1991  ;;  %v10531_v47 = vpop.f32.mrf.mxu1  ;;  %v4541_v36 = vadd.f32 %v4540_v26, %v3868_v19  ;;  %v5815_v0 = vadd.f32 1.0, %v7680_v12  ;;  %7707 = vpow2.f32 %v5389_v11  ;;  %v5056_v6 = vsub.f32 0.0, %v4539_v53  ;;  %6431 = vmatprep.subr.bf16.mxu1 %v6290_v3  ;;  %v12363_v12 = vld [vmem:[#allocation50_spill] sm:$0xff]  ;;  %4794 = vmatprep.mubr.bf16.mxu0 %v7344_v27 }
 0x38b   :  { %12361 = vst [vmem:[#allocation64_spill] sm:$0xff] %v10531_v47  ;;  %v10533_v22 = vpop.eup %7681  ;;  %v4542_v5 = vpop.f32.mrf.mxu0  ;;  %v3874_v54 = vadd.f32 %v12362_v24, %v10231_v23  ;;  %7709 = vrcp.f32 %v5814_v41  ;;  %6432 = vmatpush2.bf16.msra.mxu1 %v6289_v42  ;;  %v3876_v11 = vadd.f32 %v12363_v12, %v10231_v23  ;;  %v12364_v3 = vpack.c.bf16 %v10496_v61, %v10480_v10  ;;  %v12366_v23 = vld [vmem:[#allocation44_spill] sm:$0xff] }
 0x38c   :  { %v7684_v31 = vpop.eup %7683  ;;  %v10535_v32 = vpop.permute.xlu1 %1996  ;;  %v5057_v37 = vsub.f32 0.0, %v4541_v36  ;;  %v4543_v19 = vadd.f32 %v4542_v5, %v3870_v33  ;;  %7711 = vrcp.f32 %v5815_v0  ;;  %v5393_v26 = vmul.f32 1.442695, %v5056_v6  ;;  %v12367_v0 = vld [vmem:[#allocation66_spill] sm:$0xff] }
 0x38d   :  { %v10539_v18 = vpop.f32.mrf.mxu1  ;;  %v10541_v28 = vpop.eup %7685  ;;  %v5816_v53 = vadd.f32 1.0, %v7684_v31  ;;  %6433 = vmatprep.subr.bf16.mxu1 %v12364_v3  ;;  %7713 = vpow2.f32 %v5391_v46  ;;  %v3878_v6 = vadd.f32 %v12367_v0, %v12366_v23  ;;  %v7339_v3 = vld [vmem:[#allocation3 + $0x7c0] ss:$16 sps:$4 sm:$0xff]  }
 0x38e   :  { %v4546_v47 = vpop.f32.mrf.mxu0  ;;  %v7688_v41 = vpop.eup %7687  ;;  %v5395_v36 = vmul.f32 1.442695, %v5057_v37  ;;  %v5058_v24 = vsub.f32 0.0, %v4543_v19 }
 0x38f   :  { %v10548_v33 = vpop.f32.mrf.mxu1  ;;  %v4547_v42 = vadd.f32 %v4546_v47, %v3874_v54  ;;  %v10550_v5 = vpop.eup %7689  ;;  %7715 = vrcp.f32 %v5816_v53  ;;  %v5817_v31 = vadd.f32 1.0, %v7688_v41  ;;  %v12369_v47 = vpack.c.bf16 %v10486_v34, %v10468_v8  ;;  %v12370_v54 = vld [vmem:[#allocation47_spill] sm:$0xff]  ;;  %4282 = vmatmul.mubr.bf16.gmra.mxu1 %v7339_v3 }
 0x390   :  { %12365 = vst [vmem:[#allocation49_spill] sm:$0xff] %v10548_v33  ;;  %v4548_v10 = vpop.f32.mrf.mxu0  ;;  %v7692_v61 = vpop.eup %7691  ;;  %7717 = vpow2.f32 %v5393_v26  ;;  %v5397_v46 = vmul.f32 1.442695, %v5058_v24  ;;  %v3880_v12 = vadd.f32 %v12370_v54, %v12366_v23  ;;  %v12371_v53 = vpack.c.bf16 %v10464_v50, %v10450_v15  ;;  %v7342_v41 = vld [vmem:[#allocation3 + $0x5c8] ss:$16 sps:$4 sm:$0xff]  }
 0x391   :  { %v10554_v30 = vpop.permute.xlu0 %1981  ;;  %v5059_v37 = vsub.f32 0.0, %v4547_v42  ;;  %v10556_v19 = vpop.f32.mrf.mxu1  ;;  %v4549_v35 = vadd.f32 %v4548_v10, %v3876_v11  ;;  %6434 = vmatpush2.bf16.msra.mxu1 %v12369_v47  ;;  %7719 = vrcp.f32 %v5817_v31  ;;  %v5818_v1 = vadd.f32 1.0, %v7692_v61  ;;  %v7350_v31 = vld [vmem:[#allocation3 + $0x5ec] ss:$16 sps:$4 sm:$0xff]   ;;  %v12374_v50 = vld [vmem:[#allocation67_spill] sm:$0xff]  ;;  %4795 = vmatmul.mubr.bf16.gmra.mxu0 %v7342_v41 }
 0x392   :  { %12368 = vst [vmem:[#allocation65_spill] sm:$0xff] %v10556_v19  ;;  %v10561_v27 = vpop.eup %7693  ;;  %6435 = vmatprep.subr.bf16.mxu1 %v12371_v53  ;;  %v4550_v26 = vpop.f32.mrf.mxu0  ;;  %7721 = vpow2.f32 %v5395_v36  ;;  %v12373_v15 = vld [vmem:[#allocation12_spill] sm:$0xff]  ;;  %v7347_v53 = vld [vmem:[#allocation3 + $0x7e4] ss:$16 sps:$4 sm:$0xff]   ;;  %v12378_v11 = vpack.c.bf16 %v10434_v62, %v10422_v56  ;;  %4804 = vmatprep.mubr.bf16.mxu0 %v7350_v31  ;;  %v12383_v31 = vpack.c.bf16 %v10428_v13, %v10416_v58 }
 0x393   :  { %v7696_v24 = vpop.eup %7695  ;;  %v10570_v34 = vpop.permute.xlu1 %1986  ;;  %v5399_v8 = vmul.f32 1.442695, %v5059_v37  ;;  %v5060_v42 = vsub.f32 0.0, %v4549_v35  ;;  %v4551_v23 = vadd.f32 %v4550_v26, %v3878_v6  ;;  %v3884_v61 = vadd.f32 %v12374_v50, %v12373_v15  ;;  %4291 = vmatprep.mubr.bf16.mxu1 %v7347_v53  ;;  %v12384_v53 = vld [vmem:[#allocation45_spill] sm:$0xff] }
 0x394   :  { %v10572_v0 = vpop.f32.mrf.mxu1  ;;  %v10574_v10 = vpop.eup %7697  ;;  %7723 = vrcp.f32 %v5818_v1  ;;  %v5819_v47 = vadd.f32 1.0, %v7696_v24  ;;  %v12376_v26 = vpack.c.bf16 %v10456_v52, %v10442_v43  ;;  %v12377_v1 = vld [vmem:[#allocation48_spill] sm:$0xff] }
 0x395   :  { %12372 = vst [vmem:[#allocation50_spill] sm:$0xff] %v10572_v0  ;;  %v4552_v54 = vpop.f32.mrf.mxu0  ;;  %v7700_v19 = vpop.eup %7699  ;;  %7725 = vpow2.f32 %v5397_v46  ;;  %v5401_v36 = vmul.f32 1.442695, %v5060_v42  ;;  %v5061_v37 = vsub.f32 0.0, %v4551_v23  ;;  %v3886_v24 = vadd.f32 %v12377_v1, %v12373_v15  ;;  %v7348_v58 = vld [vmem:[#allocation3 + $0x5e8] ss:$16 sps:$4 sm:$0xff]  }
 0x396   :  { %v10580_v35 = vpop.f32.mrf.mxu1  ;;  %v4553_v6 = vadd.f32 %v4552_v54, %v3880_v12  ;;  %6436 = vmatpush2.bf16.msra.mxu1 %v12376_v26  ;;  %v10585_v0 = vpop.eup %7701  ;;  %7727 = vrcp.f32 %v5819_v47  ;;  %v5820_v50 = vadd.f32 1.0, %v7700_v19  ;;  %v12380_v19 = vld [vmem:[#allocation14_spill] sm:$0xff]  ;;  %v12381_v47 = vld [vmem:[#allocation68_spill] sm:$0xff] }
 0x397   :  { %12375 = vst [vmem:[#allocation44_spill] sm:$0xff] %v10580_v35  ;;  %6437 = vmatprep.subr.bf16.mxu1 %v12378_v11  ;;  %v4556_v46 = vpop.f32.mrf.mxu0  ;;  %v7704_v42 = vpop.eup %7703  ;;  %7729 = vpow2.f32 %v5399_v8  ;;  %v5403_v12 = vmul.f32 1.442695, %v5061_v37  ;;  %v3888_v26 = vadd.f32 %v12381_v47, %v12380_v19  ;;  %v12392_v35 = vpack.c.bf16 %v10365_v20, %v10343_v38 }
 0x398   :  { %v10592_v23 = vpop.permute.xlu0 %1971  ;;  %v5062_v43 = vsub.f32 0.0, %v4553_v6  ;;  %v10594_v52 = vpop.f32.mrf.mxu1  ;;  %v4557_v54 = vadd.f32 %v4556_v46, %v3884_v61  ;;  %7731 = vrcp.f32 %v5820_v50  ;;  %v5821_v56 = vadd.f32 1.0, %v7704_v42  ;;  %v10610_v61 = vld [vmem:[%s12001_s5] sm:$0xff] }
 0x399   :  { %12379 = vst [vmem:[#allocation66_spill] sm:$0xff] %v10594_v52  ;;  %v10596_v15 = vpop.eup %7705  ;;  %v4558_v62 = vpop.f32.mrf.mxu0  ;;  %7733 = vpow2.f32 %v5401_v36  ;;  %v3890_v50 = vadd.f32 %v12384_v53, %v12380_v19  ;;  %v12385_v46 = vpack.c.bf16 %v10404_v40, %v10386_v7  ;;  %v7345_v42 = vld [vmem:[#allocation3 + $0x7e0] ss:$16 sps:$4 sm:$0xff]   ;;  %4805 = vmatmul.mubr.bf16.gmra.mxu0 %v7348_v58 }
 0x39a   :  { %v7708_v41 = vpop.eup %7707  ;;  %v10600_v11 = vpop.permute.xlu1 %1976  ;;  %v5405_v8 = vmul.f32 1.442695, %v5062_v43  ;;  %v5063_v37 = vsub.f32 0.0, %v4557_v54  ;;  %v4559_v3 = vadd.f32 %v4558_v62, %v3886_v24  ;;  %6438 = vmatpush2.bf16.msra.mxu1 %v12383_v31  ;;  %7735 = vrcp.f32 %v5821_v56  ;;  %v7353_v56 = vld [vmem:[#allocation3 + $0x60c] ss:$16 sps:$4 sm:$0xff]   ;;  %v12387_v31 = vld [vmem:[#allocation21_spill] sm:$0xff] }
 0x39b   :  { %v10602_v6 = vpop.f32.mrf.mxu1  ;;  %v10612_v1 = vpop.eup %7709  ;;  %v5822_v36 = vadd.f32 1.0, %v7708_v41  ;;  %6439 = vmatprep.subr.bf16.mxu1 %v12385_v46  ;;  %7737 = vpow2.f32 %v5403_v12  ;;  %v12388_v53 = vld [vmem:[#allocation69_spill] sm:$0xff]  ;;  %v6944_v46 = vcombine.high %v10610_v61, %v10610_v61  ;;  %4292 = vmatmul.mubr.bf16.gmra.mxu1 %v7345_v42 }
 0x39c   :  { %12382 = vst [vmem:[#allocation47_spill] sm:$0xff] %v10602_v6  ;;  %v4560_v24 = vpop.f32.mrf.mxu0  ;;  %v10621_v43 = vpop.eup %7711  ;;  %v5407_v54 = vmul.f32 1.442695, %v5063_v37  ;;  %v5064_v47 = vsub.f32 0.0, %v4559_v3  ;;  %v3894_v7 = vadd.f32 %v12388_v53, %v12387_v31  ;;  %4814 = vmatprep.mubr.bf16.mxu0 %v7353_v56  ;;  %v12397_v56 = vpack.c.bf16 %v10357_v60, %v10331_v39 }
 0x39d   :  { %v10623_v62 = vpop.f32.mrf.mxu1  ;;  %v4561_v19 = vadd.f32 %v4560_v24, %v3888_v26  ;;  %v7714_v41 = vpop.eup %7713  ;;  %7739 = vrcp.f32 %v5822_v36  ;;  %v12390_v36 = vpack.c.bf16 %v10397_v63, %v10381_v9  ;;  %6447 = vmatprep.mubr.bf16.mxu1 %v6944_v46 }
 0x39e   :  { %12386 = vst [vmem:[#allocation12_spill] sm:$0xff] %v10623_v62  ;;  %v4562_v40 = vpop.f32.mrf.mxu0  ;;  %v10631_v6 = vpop.eup %7715  ;;  %v5823_v37 = vadd.f32 1.0, %v7714_v41  ;;  %7741 = vpow2.f32 %v5405_v8  ;;  %v5409_v26 = vmul.f32 1.442695, %v5064_v47  ;;  %v12391_v62 = vld [vmem:[#allocation46_spill] sm:$0xff] }
 0x39f   :  { %v10633_v12 = vpop.permute.xlu0 %1961  ;;  %v5065_v3 = vsub.f32 0.0, %v4561_v19  ;;  %v10635_v24 = vpop.f32.mrf.mxu1  ;;  %6440 = vmatpush2.bf16.msra.mxu1 %v12390_v36  ;;  %v3896_v52 = vadd.f32 %v12391_v62, %v12387_v31  ;;  %7743 = vpow2.f32 %v5407_v54  ;;  %v4563_v13 = vadd.f32 %v4562_v40, %v3890_v50  ;;  %v12394_v50 = vld [vmem:[#allocation10_spill] sm:$0xff] }
 0x3a0   :  { %12389 = vst [vmem:[#allocation67_spill] sm:$0xff] %v10635_v24  ;;  %v7718_v53 = vpop.eup %7717  ;;  %6441 = vmatprep.subr.bf16.mxu1 %v12392_v35  ;;  %v4566_v41 = vpop.f32.mrf.mxu0  ;;  %7745 = vrcp.f32 %v5823_v37  ;;  %v12395_v62 = vld [vmem:[#allocation70_spill] sm:$0xff] }
 0x3a1   :  { %v10645_v8 = vpop.eup %7719  ;;  %v10647_v47 = vpop.permute.xlu1 %1966  ;;  %v5824_v19 = vadd.f32 1.0, %v7718_v53  ;;  %v5411_v9 = vmul.f32 1.442695, %v5065_v3  ;;  %v4567_v36 = vadd.f32 %v4566_v41, %v3894_v7  ;;  %v3898_v31 = vadd.f32 %v12395_v62, %v12394_v50 }
 0x3a2   :  { %v10649_v63 = vpop.f32.mrf.mxu1  ;;  %v7722_v54 = vpop.eup %7721  ;;  %7747 = vpow2.f32 %v5409_v26  ;;  %v5066_v38 = vsub.f32 0.0, %v4563_v13  ;;  %v12398_v13 = vld [vmem:[#allocation59_spill] sm:$0xff]  ;;  %v12399_v53 = vpack.c.bf16 %v10324_v48, %v10304_v45 }
 0x3a3   :  { %12393 = vst [vmem:[#allocation48_spill] sm:$0xff] %v10649_v63  ;;  %v4568_v20 = vpop.f32.mrf.mxu0  ;;  %v10655_v58 = vpop.eup %7723  ;;  %7749 = vrcp.f32 %v5824_v19  ;;  %v5825_v40 = vadd.f32 1.0, %v7722_v54  ;;  %v5067_v37 = vsub.f32 0.0, %v4567_v36  ;;  %6442 = vmatpush2.bf16.msra.mxu1 %v12397_v56  ;;  %v3900_v26 = vadd.f32 %v12398_v13, %v12394_v50  ;;  %v7351_v19 = vld [vmem:[#allocation3 + $0x608] ss:$16 sps:$4 sm:$0xff]  }
 0x3a4   :  { %v10657_v3 = vpop.f32.mrf.mxu1  ;;  %v4569_v42 = vadd.f32 %v4568_v20, %v3896_v52  ;;  %v7726_v7 = vpop.eup %7725  ;;  %7751 = vpow2.f32 %v5411_v9  ;;  %v5413_v46 = vmul.f32 1.442695, %v5066_v38  ;;  %6443 = vmatprep.subr.bf16.mxu1 %v12399_v53  ;;  %v7356_v9 = vld [vmem:[#allocation3 + $0x62c] ss:$16 sps:$4 sm:$0xff]   ;;  %v12401_v38 = vld [vmem:[#allocation71_spill] sm:$0xff]  ;;  %4815 = vmatmul.mubr.bf16.gmra.mxu0 %v7351_v19 }
 0x3a5   :  { %12396 = vst [vmem:[#allocation14_spill] sm:$0xff] %v10657_v3  ;;  %v4570_v41 = vpop.f32.mrf.mxu0  ;;  %v10669_v52 = vpop.eup %7727  ;;  %7753 = vrcp.f32 %v5825_v40  ;;  %v5826_v39 = vadd.f32 1.0, %v7726_v7  ;;  %v5415_v60 = vmul.f32 1.442695, %v5067_v37  ;;  %v12403_v37 = vpack.c.bf16 %v10315_v4, %v10291_v49  ;;  %v12404_v7 = vld [vmem:[#allocation72_spill] sm:$0xff]  ;;  %4824 = vmatprep.mubr.bf16.mxu0 %v7356_v9 }
 0x3a6   :  { %v1952_v54 = vpop.permute.xlu0 %1951  ;;  %v5068_v62 = vsub.f32 0.0, %v4569_v42  ;;  %v10671_v20 = vpop.f32.mrf.mxu1  ;;  %7755 = vpow2.f32 %v5413_v46  ;;  %v4571_v45 = vadd.f32 %v4570_v41, %v3898_v31  ;;  %v12406_v41 = vpack.c.bf16 %v10280_v2, %v10258_v55 }
 0x3a7   :  { %12400 = vst [vmem:[#allocation68_spill] sm:$0xff] %v10671_v20  ;;  %v7730_v50 = vpop.eup %7729  ;;  %v3904_v56 = vadd.f32 %v12401_v38, %v1952_v54  ;;  %v4572_v48 = vpop.f32.mrf.mxu0  ;;  %7757 = vrcp.f32 %v5826_v39  ;;  %6444 = vmatpush2.bf16.msra.mxu1 %v12403_v37  ;;  %v3906_v20 = vadd.f32 %v12404_v7, %v1952_v54  ;;  %v12405_v38 = vld [vmem:[#allocation73_spill] sm:$0xff]  ;;  %v12409_v9 = vpack.c.bf16 %v10269_v51, %v10252_v59 }
 0x3a8   :  { %v10674_v13 = vpop.eup %7731  ;;  %v1957_v53 = vpop.permute.xlu1 %1956  ;;  %v5827_v35 = vadd.f32 1.0, %v7730_v50  ;;  %v5417_v36 = vmul.f32 1.442695, %v5068_v62  ;;  %v4573_v40 = vadd.f32 %v4572_v48, %v3900_v26  ;;  %7759 = vpow2.f32 %v5415_v60  ;;  %6445 = vmatprep.subr.bf16.mxu1 %v12406_v41 }
 0x3a9   :  { %v10676_v3 = vpop.f32.mrf.mxu1  ;;  %v7734_v42 = vpop.eup %7733  ;;  %v3908_v46 = vadd.f32 %v12405_v38, %v1957_v53  ;;  %v5069_v31 = vsub.f32 0.0, %v4571_v45  ;;  %v6943_v45 = vcombine.low %v10610_v61, %v10610_v61  ;;  %v7354_v38 = vld [vmem:[#allocation3 + $0x628] ss:$16 sps:$4 sm:$0xff]  }
 0x3aa   :  { %12402 = vst [vmem:[#allocation45_spill] sm:$0xff] %v10676_v3  ;;  %v4576_v39 = vpop.f32.mrf.mxu0  ;;  %v10686_v62 = vpop.eup %7735  ;;  %7761 = vrcp.f32 %v5827_v35  ;;  %v5828_v26 = vadd.f32 1.0, %v7734_v42  ;;  %v5070_v50 = vsub.f32 0.0, %v4573_v40 }
 0x3ab   :  { %v10688_v49 = vpop.f32.mrf.mxu1  ;;  %v4577_v4 = vadd.f32 %v4576_v39, %v3904_v56  ;;  %v7738_v54 = vpop.eup %7737  ;;  %7763 = vpow2.f32 %v5417_v36  ;;  %v5419_v48 = vmul.f32 1.442695, %v5069_v31  ;;  %6446 = vmatpush2.bf16.msra.mxu1 %v12409_v9  ;;  %v12410_v56 = vld [vmem:[#allocation35_spill] sm:$0xff] }
 0x3ac   :  { %12407 = vst [vmem:[#allocation21_spill] sm:$0xff] %v10688_v49  ;;  %v4578_v60 = vpop.f32.mrf.mxu0  ;;  %v10694_v2 = vpop.eup %7739  ;;  %7765 = vrcp.f32 %v5828_v26  ;;  %v5829_v35 = vadd.f32 1.0, %v7738_v54  ;;  %v5421_v19 = vmul.f32 1.442695, %v5070_v50  ;;  %v3910_v42 = vadd.f32 %v12410_v56, %v1957_v53  ;;  %v7359_v54 = vld [vmem:[#allocation3 + $0x64c] ss:$16 sps:$4 sm:$0xff]   ;;  %4825 = vmatmul.mubr.bf16.gmra.mxu0 %v7354_v38 }
 0x3ad   :  { %v5071_v40 = vsub.f32 0.0, %v4577_v4  ;;  %v10696_v37 = vpop.f32.mrf.mxu1  ;;  %v7742_v36 = vpop.eup %7741  ;;  %7767 = vpow2.f32 %v5419_v48  ;;  %v4579_v61 = vadd.f32 %v4578_v60, %v3906_v20  ;;  %v12412_v60 = vld [vmem:[#allocation74_spill] sm:$0xff]  ;;  %4834 = vmatprep.mubr.bf16.mxu0 %v7359_v54 }
 0x3ae   :  { %12408 = vst [vmem:[#allocation69_spill] sm:$0xff] %v10696_v37  ;;  %v4580_v7 = vpop.f32.mrf.mxu0  ;;  %v7744_v41 = vpop.eup %7743  ;;  %7769 = vrcp.f32 %v5829_v35  ;;  %v5830_v39 = vadd.f32 1.0, %v7742_v36  ;;  %6448 = vmatmul.mubr.bf16.vlgmr.msra.gmra.mxu1 %v6943_v45  ;;  %v3914_v9 = vadd.f32 %v12412_v60, %v10633_v12 }
 0x3af   :  { %v5423_v26 = vmul.f32 1.442695, %v5071_v40  ;;  %v10704_v50 = vpop.f32.mrf.mxu1  ;;  %v4581_v4 = vadd.f32 %v4580_v7, %v3908_v46  ;;  %v10706_v59 = vpop.eup %7745  ;;  %v5831_v51 = vadd.f32 1.0, %v7744_v41  ;;  %7771 = vpow2.f32 %v5421_v19  ;;  %v12414_v46 = vld [vmem:[#allocation22_spill] sm:$0xff] }
 0x3b0   :  { %12411 = vst [vmem:[#allocation46_spill] sm:$0xff] %v10704_v50  ;;  %v5072_v53 = vsub.f32 0.0, %v4579_v61  ;;  %v4582_v48 = vpop.f32.mrf.mxu0  ;;  %v7748_v20 = vpop.eup %7747  ;;  %7773 = vrcp.f32 %v5830_v39  ;;  %v3916_v7 = vadd.f32 %v12414_v46, %v10633_v12 }
 0x3b1   :  { %v5073_v56 = vsub.f32 0.0, %v4581_v4  ;;  %v10710_v35 = vpop.f32.mrf.mxu1  ;;  %v4583_v40 = vadd.f32 %v4582_v48, %v3910_v42  ;;  %v10712_v36 = vpop.eup %7749  ;;  %7775 = vrcp.f32 %v5831_v51  ;;  %v5832_v41 = vadd.f32 1.0, %v7748_v20  ;;  %v12416_v42 = vld [vmem:[#allocation75_spill] sm:$0xff] }
 0x3b2   :  { %12413 = vst [vmem:[#allocation10_spill] sm:$0xff] %v10710_v35  ;;  %v5425_v19 = vmul.f32 1.442695, %v5072_v53  ;;  %v4586_v61 = vpop.f32.mrf.mxu0  ;;  %v7752_v45 = vpop.eup %7751  ;;  %7777 = vpow2.f32 %v5423_v26  ;;  %v3918_v48 = vadd.f32 %v12416_v42, %v10647_v47 }
 0x3b3   :  { %v5427_v55 = vmul.f32 1.442695, %v5073_v56  ;;  %v5074_v31 = vsub.f32 0.0, %v4583_v40  ;;  %v10716_v60 = vpop.f32.mrf.mxu1  ;;  %v4587_v39 = vadd.f32 %v4586_v61, %v3914_v9  ;;  %v10718_v4 = vpop.eup %7753  ;;  %7779 = vrcp.f32 %v5832_v41  ;;  %v12418_v9 = vld [vmem:[#allocation36_spill] sm:$0xff] }
 0x3b4   :  { %12415 = vst [vmem:[#allocation70_spill] sm:$0xff] %v10716_v60  ;;  %v5833_v12 = vadd.f32 1.0, %v7752_v45  ;;  %v4588_v51 = vpop.f32.mrf.mxu0  ;;  %v7756_v20 = vpop.eup %7755  ;;  %7781 = vpow2.f32 %v5425_v19  ;;  %v3920_v54 = vadd.f32 %v12418_v9, %v10647_v47  ;;  %v7357_v60 = vld [vmem:[#allocation3 + $0x648] ss:$16 sps:$4 sm:$0xff]  }
 0x3b5   :  { %v5429_v53 = vmul.f32 1.442695, %v5074_v31  ;;  %v5075_v38 = vsub.f32 0.0, %v4587_v39  ;;  %v10722_v46 = vpop.f32.mrf.mxu1  ;;  %v4589_v26 = vadd.f32 %v4588_v51, %v3916_v7  ;;  %v10724_v56 = vpop.eup %7757  ;;  %v5834_v40 = vadd.f32 1.0, %v7756_v20  ;;  %v7362_v7 = vld [vmem:[#allocation3 + $0x66c] ss:$16 sps:$4 sm:$0xff]   ;;  %4835 = vmatmul.mubr.bf16.gmra.mxu0 %v7357_v60 }
 0x3b6   :  { %12417 = vst [vmem:[#allocation59_spill] sm:$0xff] %v10722_v46  ;;  %7783 = vrcp.f32 %v5833_v12  ;;  %v4590_v61 = vpop.f32.mrf.mxu0  ;;  %v7760_v45 = vpop.eup %7759  ;;  %v12420_v46 = vld [vmem:[#allocation11_spill] sm:$0xff]  ;;  %4844 = vmatprep.mubr.bf16.mxu0 %v7362_v7 }
 0x3b7   :  { %7785 = vpow2.f32 %v5427_v55  ;;  %v5431_v19 = vmul.f32 1.442695, %v5075_v38  ;;  %v5076_v31 = vsub.f32 0.0, %v4589_v26  ;;  %v10730_v39 = vpop.f32.mrf.mxu1  ;;  %v4591_v42 = vadd.f32 %v4590_v61, %v3918_v48  ;;  %v10732_v51 = vpop.eup %7761  ;;  %v12422_v61 = vld [vmem:[#allocation9_spill] sm:$0xff] }
 0x3b8   :  { %12419 = vst [vmem:[#allocation71_spill] sm:$0xff] %v10730_v39  ;;  %v3924_v47 = vadd.f32 %v12420_v46, %v10592_v23  ;;  %7787 = vrcp.f32 %v5834_v40  ;;  %v5835_v12 = vadd.f32 1.0, %v7760_v45  ;;  %v4592_v20 = vpop.f32.mrf.mxu0  ;;  %v7764_v41 = vpop.eup %7763  ;;  %v3926_v35 = vadd.f32 %v12422_v61, %v10592_v23 }
 0x3b9   :  { %7789 = vpow2.f32 %v5429_v53  ;;  %v5433_v55 = vmul.f32 1.442695, %v5076_v31  ;;  %v5077_v38 = vsub.f32 0.0, %v4591_v42  ;;  %v10738_v26 = vpop.f32.mrf.mxu1  ;;  %v4593_v39 = vadd.f32 %v4592_v20, %v3920_v54  ;;  %v10740_v48 = vpop.eup %7765  ;;  %v12424_v54 = vld [vmem:[#allocation76_spill] sm:$0xff] }
 0x3ba   :  { %12421 = vst [vmem:[#allocation72_spill] sm:$0xff] %v10738_v26  ;;  %7791 = vrcp.f32 %v5835_v12  ;;  %v5836_v46 = vadd.f32 1.0, %v7764_v41  ;;  %v4596_v40 = vpop.f32.mrf.mxu0  ;;  %v7768_v45 = vpop.eup %7767  ;;  %v3928_v42 = vadd.f32 %v12424_v54, %v10600_v11 }
 0x3bb   :  { %7793 = vpow2.f32 %v5431_v19  ;;  %v5435_v50 = vmul.f32 1.442695, %v5077_v38  ;;  %v5078_v9 = vsub.f32 0.0, %v4593_v39  ;;  %v10744_v37 = vpop.f32.mrf.mxu1  ;;  %v4597_v53 = vadd.f32 %v4596_v40, %v3924_v47  ;;  %v10746_v31 = vpop.eup %7769  ;;  %v7360_v40 = vld [vmem:[#allocation3 + $0x668] ss:$16 sps:$4 sm:$0xff]  }
 0x3bc   :  { %12423 = vst [vmem:[#allocation73_spill] sm:$0xff] %v10744_v37  ;;  %7795 = vrcp.f32 %v5836_v46  ;;  %v5837_v20 = vadd.f32 1.0, %v7768_v45  ;;  %v4598_v23 = vpop.f32.mrf.mxu0  ;;  %v7772_v12 = vpop.eup %7771 }
 0x3bd   :  { %v10750_v41 = vpop.permute.xlu0 %2101  ;;  %7797 = vpow2.f32 %v5433_v55  ;;  %v5437_v60 = vmul.f32 1.442695, %v5078_v9  ;;  %v5079_v19 = vsub.f32 0.0, %v4597_v53  ;;  %v10752_v38 = vpop.f32.mrf.mxu1  ;;  %v4599_v39 = vadd.f32 %v4598_v23, %v3926_v35  ;;  %v7365_v53 = vld [vmem:[#allocation3 + $0x68c] ss:$16 sps:$4 sm:$0xff]   ;;  %4845 = vmatmul.mubr.bf16.gmra.mxu0 %v7360_v40 }
 0x3be   :  { %12425 = vst [vmem:[#allocation35_spill] sm:$0xff] %v10750_v41  ;;  %12426 = vst [vmem:[#allocation74_spill] sm:$0xff] %v10752_v38  ;;  %v10754_v61 = vpop.eup %7773  ;;  %7799 = vrcp.f32 %v5837_v20  ;;  %v5838_v7 = vadd.f32 1.0, %v7772_v12  ;;  %v4600_v47 = vpop.f32.mrf.mxu0  ;;  %v12428_v35 = vld [vmem:[#allocation32_spill] sm:$0xff]  ;;  %v12429_v20 = vld [vmem:[#allocation13_spill] sm:$0xff]  ;;  %4854 = vmatprep.mubr.bf16.mxu0 %v7365_v53 }
 0x3bf   :  { %v10758_v45 = vpop.eup %7775  ;;  %7801 = vpow2.f32 %v5435_v50  ;;  %v5439_v54 = vmul.f32 1.442695, %v5079_v19  ;;  %v5080_v37 = vsub.f32 0.0, %v4599_v39  ;;  %v10760_v55 = vpop.f32.mrf.mxu1  ;;  %v4601_v9 = vadd.f32 %v4600_v47, %v3928_v42  ;;  %v12437_v53 = vld [vmem:[#allocation28_spill] sm:$0xff] }
 0x3c0   :  { %12427 = vst [vmem:[#allocation22_spill] sm:$0xff] %v10760_v55  ;;  %v7778_v38 = vpop.eup %7777  ;;  %v3930_v23 = vadd.f32 %v12428_v35, %v10600_v11  ;;  %v3934_v12 = vadd.f32 %v12429_v20, %v10554_v30  ;;  %7803 = vrcp.f32 %v5838_v7  ;;  %v4602_v26 = vpop.f32.mrf.mxu0  ;;  %v12432_v11 = vld [vmem:[#allocation31_spill] sm:$0xff] }
 0x3c1   :  { %v10768_v49 = vpop.eup %7779  ;;  %v10770_v50 = vpop.permute.xlu1 %2106  ;;  %v5839_v19 = vadd.f32 1.0, %v7778_v38  ;;  %7805 = vpow2.f32 %v5437_v60  ;;  %v5441_v42 = vmul.f32 1.442695, %v5080_v37  ;;  %v5081_v39 = vsub.f32 0.0, %v4601_v9 }
 0x3c2   :  { %12430 = vst [vmem:[#allocation75_spill] sm:$0xff] %v10770_v50  ;;  %v10772_v47 = vpop.f32.mrf.mxu1  ;;  %v7782_v55 = vpop.eup %7781  ;;  %v3936_v35 = vadd.f32 %v12432_v11, %v10554_v30  ;;  %7807 = vpow2.f32 %v5439_v54  ;;  %v4603_v7 = vadd.f32 %v4602_v26, %v3930_v23  ;;  %v3940_v11 = vadd.f32 %v12437_v53, %v10570_v34 }
 0x3c3   :  { %12431 = vst [vmem:[#allocation36_spill] sm:$0xff] %v10772_v47  ;;  %v4606_v20 = vpop.f32.mrf.mxu0  ;;  %v10776_v3 = vpop.eup %7783  ;;  %7809 = vrcp.f32 %v5839_v19  ;;  %v5840_v50 = vadd.f32 1.0, %v7782_v55  ;;  %v5443_v38 = vmul.f32 1.442695, %v5081_v39  ;;  %v12435_v47 = vld [vmem:[#allocation43_spill] sm:$0xff] }
 0x3c4   :  { %v10778_v46 = vpop.permute.xlu0 %2091  ;;  %v10780_v60 = vpop.f32.mrf.mxu1  ;;  %v4607_v37 = vadd.f32 %v4606_v20, %v3934_v12  ;;  %v3938_v63 = vadd.f32 %v12435_v47, %v10570_v34  ;;  %7811 = vpow2.f32 %v5441_v42  ;;  %v5082_v30 = vsub.f32 0.0, %v4603_v7  ;;  %v7363_v7 = vld [vmem:[#allocation3 + $0x688] ss:$16 sps:$4 sm:$0xff]  }
 0x3c5   :  { %12433 = vst [vmem:[#allocation11_spill] sm:$0xff] %v10778_v46  ;;  %12434 = vst [vmem:[#allocation9_spill] sm:$0xff] %v10780_v60  ;;  %v7786_v9 = vpop.eup %7785  ;;  %v4608_v26 = vpop.f32.mrf.mxu0  ;;  %7813 = vrcp.f32 %v5840_v50  ;;  %v12440_v34 = vld [vmem:[#allocation15_spill] sm:$0xff]  ;;  %4855 = vmatmul.mubr.bf16.gmra.mxu0 %v7363_v7 }
 0x3c6   :  { %v10786_v54 = vpop.eup %7787  ;;  %v5841_v23 = vadd.f32 1.0, %v7786_v9  ;;  %v5083_v55 = vsub.f32 0.0, %v4607_v37  ;;  %v10788_v19 = vpop.f32.mrf.mxu1  ;;  %v4609_v39 = vadd.f32 %v4608_v26, %v3936_v35  ;;  %7815 = vpow2.f32 %v5443_v38  ;;  %v7370_v26 = vld [vmem:[#allocation3 + $0x6ac] ss:$16 sps:$4 sm:$0xff]  }
 0x3c7   :  { %12436 = vst [vmem:[#allocation76_spill] sm:$0xff] %v10788_v19  ;;  %v7790_v12 = vpop.eup %7789  ;;  %v5445_v47 = vmul.f32 1.442695, %v5082_v30  ;;  %v4610_v42 = vpop.f32.mrf.mxu0  ;;  %v3944_v38 = vadd.f32 %v12440_v34, %v10529_v16  ;;  %4864 = vmatprep.mubr.bf16.mxu0 %v7370_v26  ;;  %v3950_v26 = vadd.f32 %v10256_v29, %v10535_v32 }
 0x3c8   :  { %v10794_v40 = vpop.eup %7791  ;;  %v10796_v60 = vpop.permute.xlu1 %2096  ;;  %7817 = vrcp.f32 %v5841_v23  ;;  %v5842_v50 = vadd.f32 1.0, %v7790_v12  ;;  %v5447_v37 = vmul.f32 1.442695, %v5083_v55  ;;  %v5084_v9 = vsub.f32 0.0, %v4609_v39  ;;  %v12442_v12 = vld [vmem:[#allocation23_spill] sm:$0xff] }
 0x3c9   :  { %12438 = vst [vmem:[#allocation32_spill] sm:$0xff] %v10796_v60  ;;  %v10798_v35 = vpop.f32.mrf.mxu1  ;;  %v7794_v19 = vpop.eup %7793  ;;  %7819 = vpow2.f32 %v5445_v47  ;;  %v4611_v30 = vadd.f32 %v4610_v42, %v3938_v63 }
 0x3ca   :  { %12439 = vst [vmem:[#allocation13_spill] sm:$0xff] %v10798_v35  ;;  %v4612_v53 = vpop.f32.mrf.mxu0  ;;  %v7796_v41 = vpop.eup %7795  ;;  %7821 = vrcp.f32 %v5842_v50  ;;  %v5843_v24 = vadd.f32 1.0, %v7794_v19  ;;  %v5449_v60 = vmul.f32 1.442695, %v5084_v9  ;;  %v3946_v35 = vadd.f32 %v12442_v12, %v10529_v16  ;;  %v12444_v9 = vld [vmem:[#allocation16_spill] sm:$0xff] }
 0x3cb   :  { %v10802_v20 = vpop.permute.xlu0 %2081  ;;  %v10804_v23 = vpop.f32.mrf.mxu1  ;;  %v4613_v55 = vadd.f32 %v4612_v53, %v3940_v11  ;;  %7823 = vpow2.f32 %v5447_v37  ;;  %v5085_v46 = vsub.f32 0.0, %v4611_v30  ;;  %v3948_v11 = vadd.f32 %v12444_v9, %v10535_v32  ;;  %v7368_v12 = vld [vmem:[#allocation3 + $0x6a8] ss:$16 sps:$4 sm:$0xff]  }
 0x3cc   :  { %12441 = vst [vmem:[#allocation31_spill] sm:$0xff] %v10804_v23  ;;  %v7798_v39 = vpop.eup %7797  ;;  %v4616_v33 = vpop.f32.mrf.mxu0  ;;  %7825 = vrcp.f32 %v5843_v24 }
 0x3cd   :  { %v7800_v47 = vpop.eup %7799  ;;  %v5844_v63 = vadd.f32 1.0, %v7798_v39  ;;  %v5086_v42 = vsub.f32 0.0, %v4613_v55  ;;  %v10808_v34 = vpop.f32.mrf.mxu1  ;;  %v4617_v50 = vadd.f32 %v4616_v33, %v3944_v38  ;;  %7827 = vpow2.f32 %v5449_v60  ;;  %4865 = vmatmul.mubr.bf16.gmra.mxu0 %v7368_v12 }
 0x3ce   :  { %12443 = vst [vmem:[#allocation43_spill] sm:$0xff] %v10808_v34  ;;  %v7802_v19 = vpop.eup %7801  ;;  %v5451_v53 = vmul.f32 1.442695, %v5085_v46  ;;  %v4618_v23 = vpop.f32.mrf.mxu0  ;;  %v6305_v16 = vpack.c.bf16 %v7800_v47, %v10794_v40 }
 0x3cf   :  { %v7804_v37 = vpop.eup %7803  ;;  %v10813_v30 = vpop.permute.xlu1 %2086  ;;  %7829 = vrcp.f32 %v5844_v63  ;;  %v5845_v24 = vadd.f32 1.0, %v7802_v19  ;;  %v5453_v7 = vmul.f32 1.442695, %v5086_v42  ;;  %v5087_v55 = vsub.f32 0.0, %v4617_v50  ;;  %v7373_v50 = vld [vmem:[#allocation3 + $0x6cc] ss:$16 sps:$4 sm:$0xff]  }
 0x3d0   :  { %v10815_v39 = vpop.f32.mrf.mxu1  ;;  %v7806_v33 = vpop.eup %7805  ;;  %7831 = vpow2.f32 %v5451_v53  ;;  %v4619_v38 = vadd.f32 %v4618_v23, %v3946_v35  ;;  %v6306_v46 = vpack.c.bf16 %v7804_v37, %v7796_v41  ;;  %v12446_v41 = vld [vmem:[#allocation17_spill] sm:$0xff]  ;;  %4874 = vmatprep.mubr.bf16.mxu0 %v7373_v50  ;;  %v12450_v50 = vpack.c.bf16 %v10776_v3, %v10758_v45 }
 0x3d1   :  { %12445 = vst [vmem:[#allocation28_spill] sm:$0xff] %v10815_v39  ;;  %v4620_v60 = vpop.f32.mrf.mxu0  ;;  %v7808_v9 = vpop.eup %7807  ;;  %7833 = vrcp.f32 %v5845_v24  ;;  %v5846_v47 = vadd.f32 1.0, %v7806_v33  ;;  %v5455_v63 = vmul.f32 1.442695, %v5087_v55  ;;  %v3954_v23 = vadd.f32 %v12446_v41, %v10512_v21 }
 0x3d2   :  { %v10819_v40 = vpop.permute.xlu0 %2071  ;;  %v10821_v19 = vpop.f32.mrf.mxu1  ;;  %v4621_v42 = vadd.f32 %v4620_v60, %v3948_v11  ;;  %v5847_v34 = vadd.f32 1.0, %v7808_v9  ;;  %7835 = vpow2.f32 %v5453_v7  ;;  %v5088_v29 = vsub.f32 0.0, %v4619_v38  ;;  %6456 = vmatprep.subr.bf16.mxu1 %v6306_v46  ;;  %v6256_v11 = vld [vmem:[%s12001_s5 + $0x8] sm:$0xff] }
 0x3d3   :  { %v10823_v39 = vpop.eup %7809  ;;  %v4622_v32 = vpop.f32.mrf.mxu0  ;;  %7837 = vrcp.f32 %v5846_v47  ;;  %6457 = vmatpush1.bf16.msra.mxu1 %v6305_v16  ;;  %v12447_v7 = vld [vmem:[#allocation57_spill] sm:$0xff]  ;;  %v12448_v46 = vpack.c.bf16 %v10786_v54, %v10768_v49 }
 0x3d4   :  { %v7812_v35 = vpop.eup %7811  ;;  %v5089_v53 = vsub.f32 0.0, %v4621_v42  ;;  %v10827_v37 = vpop.f32.mrf.mxu1  ;;  %v4623_v24 = vadd.f32 %v4622_v32, %v3950_v26  ;;  %v3956_v33 = vadd.f32 %v12447_v7, %v10512_v21  ;;  %7839 = vrcp.f32 %v5847_v34  ;;  %v12449_v34 = vld [vmem:[#allocation18_spill] sm:$0xff] }
 0x3d5   :  { %v10832_v55 = vpop.eup %7813  ;;  %v5848_v38 = vadd.f32 1.0, %v7812_v35  ;;  %v5457_v60 = vmul.f32 1.442695, %v5088_v29  ;;  %6458 = vmatprep.subr.bf16.mxu1 %v12448_v46  ;;  %v4626_v9 = vpop.f32.mrf.mxu0  ;;  %7841 = vpow2.f32 %v5455_v63  ;;  %v3958_v29 = vadd.f32 %v12449_v34, %v10518_v25 }
 0x3d6   :  { %v7816_v26 = vpop.eup %7815  ;;  %v10839_v16 = vpop.permute.xlu1 %2076  ;;  %v5459_v47 = vmul.f32 1.442695, %v5089_v53  ;;  %v5090_v42 = vsub.f32 0.0, %v4623_v24  ;;  %v4627_v41 = vadd.f32 %v4626_v9, %v3954_v23  ;;  %v6946_v35 = vcombine.high %v6256_v11, %v6256_v11 }
 0x3d7   :  { %v10841_v32 = vpop.f32.mrf.mxu1  ;;  %v10843_v21 = vpop.eup %7817  ;;  %7843 = vrcp.f32 %v5848_v38  ;;  %v5849_v49 = vadd.f32 1.0, %v7816_v26  ;;  %6459 = vmatpush1.bf16.msra.mxu1 %v12450_v50  ;;  %v3960_v38 = vadd.f32 %v10299_v57, %v10518_v25  ;;  %v12451_v9 = vpack.c.bf16 %v10754_v61, %v10740_v48  ;;  %v7371_v26 = vld [vmem:[#allocation3 + $0x6c8] ss:$16 sps:$4 sm:$0xff]   ;;  %v7376_v57 = vld [vmem:[#allocation3 + $0x6ec] ss:$16 sps:$4 sm:$0xff]  }
 0x3d8   :  { %v4628_v54 = vpop.f32.mrf.mxu0  ;;  %v7820_v12 = vpop.eup %7819  ;;  %7845 = vpow2.f32 %v5457_v60  ;;  %v5461_v63 = vmul.f32 1.442695, %v5090_v42  ;;  %v5091_v53 = vsub.f32 0.0, %v4627_v41  ;;  %6488 = vmatprep.mubr.bf16.mxu1 %v6946_v35  ;;  %4875 = vmatmul.mubr.bf16.gmra.mxu0 %v7371_v26 }
 0x3d9   :  { %v10847_v7 = vpop.permute.xlu0 %2061  ;;  %v10849_v24 = vpop.f32.mrf.mxu1  ;;  %v4629_v46 = vadd.f32 %v4628_v54, %v3956_v33  ;;  %7847 = vrcp.f32 %v5849_v49  ;;  %v5850_v11 = vadd.f32 1.0, %v7820_v12  ;;  %6460 = vmatprep.subr.bf16.mxu1 %v12451_v9  ;;  %v12452_v49 = vld [vmem:[#allocation41_spill] sm:$0xff]  ;;  %v12454_v9 = vpack.c.bf16 %v10746_v31, %v10732_v51  ;;  %4884 = vmatprep.mubr.bf16.mxu0 %v7376_v57 }
 0x3da   :  { %v10854_v23 = vpop.eup %7821  ;;  %v4630_v60 = vpop.f32.mrf.mxu0  ;;  %7849 = vpow2.f32 %v5459_v47  ;;  %v5463_v3 = vmul.f32 1.442695, %v5091_v53  ;;  %v3964_v48 = vadd.f32 %v12452_v49, %v10488_v44  ;;  %v12456_v33 = vpack.c.bf16 %v10724_v56, %v10712_v36 }
 0x3db   :  { %v7824_v42 = vpop.eup %7823  ;;  %v5092_v45 = vsub.f32 0.0, %v4629_v46  ;;  %v10863_v41 = vpop.f32.mrf.mxu1  ;;  %v4631_v34 = vadd.f32 %v4630_v60, %v3958_v29  ;;  %7851 = vrcp.f32 %v5850_v11  ;;  %6461 = vmatpush1.bf16.msra.mxu1 %v12454_v9  ;;  %v12455_v11 = vld [vmem:[#allocation58_spill] sm:$0xff] }
 0x3dc   :  { %v10865_v25 = vpop.eup %7825  ;;  %v5851_v61 = vadd.f32 1.0, %v7824_v42  ;;  %v4632_v54 = vpop.f32.mrf.mxu0  ;;  %7853 = vpow2.f32 %v5461_v63  ;;  %v3966_v42 = vadd.f32 %v12455_v11, %v10488_v44  ;;  %6462 = vmatprep.subr.bf16.mxu1 %v12456_v33  ;;  %v12458_v44 = vld [vmem:[#allocation20_spill] sm:$0xff] }
 0x3dd   :  { %v7828_v35 = vpop.eup %7827  ;;  %v10871_v50 = vpop.permute.xlu1 %2066  ;;  %v5465_v47 = vmul.f32 1.442695, %v5092_v45  ;;  %v5093_v53 = vsub.f32 0.0, %v4631_v34  ;;  %v4633_v29 = vadd.f32 %v4632_v54, %v3960_v38 }
 0x3de   :  { %v10873_v46 = vpop.f32.mrf.mxu1  ;;  %v10878_v60 = vpop.eup %7829  ;;  %7855 = vrcp.f32 %v5851_v61  ;;  %v5852_v49 = vadd.f32 1.0, %v7828_v35  ;;  %v3968_v61 = vadd.f32 %v12458_v44, %v10498_v14  ;;  %v7379_v44 = vld [vmem:[#allocation3 + $0x70c] ss:$16 sps:$4 sm:$0xff]  }
 0x3df   :  { %12453 = vst [vmem:[#allocation15_spill] sm:$0xff] %v10873_v46  ;;  %v4636_v63 = vpop.f32.mrf.mxu0  ;;  %v7832_v45 = vpop.eup %7831  ;;  %7857 = vpow2.f32 %v5463_v3  ;;  %v5467_v38 = vmul.f32 1.442695, %v5093_v53  ;;  %v5094_v51 = vsub.f32 0.0, %v4633_v29  ;;  %v12460_v53 = vpack.c.bf16 %v10718_v4, %v10706_v59 }
 0x3e0   :  { %v10885_v34 = vpop.permute.xlu0 %2051  ;;  %v10887_v31 = vpop.f32.mrf.mxu1  ;;  %v4637_v54 = vadd.f32 %v4636_v63, %v3964_v48  ;;  %7859 = vrcp.f32 %v5852_v49  ;;  %v5853_v36 = vadd.f32 1.0, %v7832_v45  ;;  %v12461_v29 = vpack.c.bf16 %v10694_v2, %v10674_v13  ;;  %v7374_v63 = vld [vmem:[#allocation3 + $0x6e8] ss:$16 sps:$4 sm:$0xff]  }
 0x3e1   :  { %12457 = vst [vmem:[#allocation23_spill] sm:$0xff] %v10887_v31  ;;  %v10889_v9 = vpop.eup %7833  ;;  %v4638_v56 = vpop.f32.mrf.mxu0  ;;  %7861 = vpow2.f32 %v5465_v47  ;;  %v5469_v26 = vmul.f32 1.442695, %v5094_v51  ;;  %6463 = vmatpush1.bf16.msra.mxu1 %v12460_v53  ;;  %v12463_v13 = vld [vmem:[#allocation42_spill] sm:$0xff]  ;;  %4885 = vmatmul.mubr.bf16.gmra.mxu0 %v7374_v63 }
 0x3e2   :  { %v7836_v33 = vpop.eup %7835  ;;  %v5095_v35 = vsub.f32 0.0, %v4637_v54  ;;  %v10893_v11 = vpop.f32.mrf.mxu1  ;;  %v4639_v3 = vadd.f32 %v4638_v56, %v3966_v42  ;;  %7863 = vrcp.f32 %v5853_v36  ;;  %6464 = vmatprep.subr.bf16.mxu1 %v12461_v29  ;;  %v3970_v2 = vadd.f32 %v12463_v13, %v10498_v14  ;;  %v12464_v56 = vld [vmem:[#allocation55_spill] sm:$0xff]  ;;  %4894 = vmatprep.mubr.bf16.mxu0 %v7379_v44 }
 0x3e3   :  { %12459 = vst [vmem:[#allocation16_spill] sm:$0xff] %v10893_v11  ;;  %v10898_v57 = vpop.eup %7837  ;;  %v5854_v48 = vadd.f32 1.0, %v7836_v33  ;;  %v4640_v49 = vpop.f32.mrf.mxu0  ;;  %7865 = vpow2.f32 %v5467_v38  ;;  %v3974_v33 = vadd.f32 %v12464_v56, %v10460_v17  ;;  %v12466_v14 = vpack.c.bf16 %v10686_v62, %v10669_v52 }
 0x3e4   :  { %v10905_v45 = vpop.eup %7839  ;;  %v10907_v42 = vpop.permute.xlu1 %2056  ;;  %v5471_v59 = vmul.f32 1.442695, %v5095_v35  ;;  %v5096_v4 = vsub.f32 0.0, %v4639_v3  ;;  %v4641_v54 = vadd.f32 %v4640_v49, %v3968_v61  ;;  %v12468_v29 = vpack.c.bf16 %v10655_v58, %v10631_v6 }
 0x3e5   :  { %v10909_v51 = vpop.f32.mrf.mxu1  ;;  %v7842_v36 = vpop.eup %7841  ;;  %7867 = vrcp.f32 %v5854_v48  ;;  %6465 = vmatpush1.bf16.msra.mxu1 %v12466_v14  ;;  %v12467_v48 = vld [vmem:[#allocation19_spill] sm:$0xff]  ;;  %v12470_v14 = vld [vmem:[#allocation37_spill] sm:$0xff] }
 0x3e6   :  { %12462 = vst [vmem:[#allocation17_spill] sm:$0xff] %v10909_v51  ;;  %v4642_v53 = vpop.f32.mrf.mxu0  ;;  %v10917_v12 = vpop.eup %7843  ;;  %v5855_v35 = vadd.f32 1.0, %v7842_v36  ;;  %7869 = vpow2.f32 %v5469_v26  ;;  %v5473_v61 = vmul.f32 1.442695, %v5096_v4  ;;  %v5097_v3 = vsub.f32 0.0, %v4641_v54  ;;  %6466 = vmatprep.subr.bf16.mxu1 %v12468_v29 }
 0x3e7   :  { %v10919_v38 = vpop.permute.xlu0 %2041  ;;  %v10921_v49 = vpop.f32.mrf.mxu1  ;;  %v3976_v56 = vadd.f32 %v12467_v48, %v10460_v17  ;;  %7871 = vpow2.f32 %v5471_v59  ;;  %v4643_v47 = vadd.f32 %v4642_v53, %v3970_v2  ;;  %v12471_v17 = vld [vmem:[#allocation27_spill] sm:$0xff] }
 0x3e8   :  { %12465 = vst [vmem:[#allocation57_spill] sm:$0xff] %v10921_v49  ;;  %v7846_v13 = vpop.eup %7845  ;;  %v4646_v36 = vpop.f32.mrf.mxu0  ;;  %7873 = vrcp.f32 %v5855_v35  ;;  %v5475_v54 = vmul.f32 1.442695, %v5097_v3  ;;  %v3978_v59 = vadd.f32 %v12471_v17, %v12470_v14 }
 0x3e9   :  { %v10931_v26 = vpop.eup %7847  ;;  %v5856_v4 = vadd.f32 1.0, %v7846_v13  ;;  %v10933_v49 = vpop.f32.mrf.mxu1  ;;  %v4647_v52 = vadd.f32 %v4646_v36, %v3974_v33  ;;  %7875 = vpow2.f32 %v5473_v61  ;;  %v5098_v2 = vsub.f32 0.0, %v4643_v47  ;;  %v12474_v47 = vld [vmem:[#allocation56_spill] sm:$0xff] }
 0x3ea   :  { %12469 = vst [vmem:[#allocation18_spill] sm:$0xff] %v10933_v49  ;;  %v7850_v62 = vpop.eup %7849  ;;  %v4648_v53 = vpop.f32.mrf.mxu0  ;;  %v12473_v33 = vpack.c.bf16 %v10645_v8, %v10621_v43  ;;  %v3980_v13 = vadd.f32 %v12474_v47, %v12470_v14  ;;  %v12475_v36 = vpack.c.bf16 %v10612_v1, %v10585_v0 }
 0x3eb   :  { %v10939_v58 = vpop.eup %7851  ;;  %v10941_v63 = vpop.permute.xlu1 %2046  ;;  %7877 = vrcp.f32 %v5856_v4  ;;  %v5857_v29 = vadd.f32 1.0, %v7850_v62  ;;  %v5099_v35 = vsub.f32 0.0, %v4647_v52  ;;  %v4649_v44 = vadd.f32 %v4648_v53, %v3976_v56  ;;  %v7377_v62 = vld [vmem:[#allocation3 + $0x708] ss:$16 sps:$4 sm:$0xff]  }
 0x3ec   :  { %v10943_v3 = vpop.f32.mrf.mxu1  ;;  %6467 = vmatpush1.bf16.msra.mxu1 %v12473_v33  ;;  %v7854_v61 = vpop.eup %7853  ;;  %7879 = vpow2.f32 %v5475_v54  ;;  %v5477_v48 = vmul.f32 1.442695, %v5098_v2  ;;  %v7382_v54 = vld [vmem:[#allocation3 + $0x72c] ss:$16 sps:$4 sm:$0xff]   ;;  %4895 = vmatmul.mubr.bf16.gmra.mxu0 %v7377_v62 }
 0x3ed   :  { %12472 = vst [vmem:[#allocation41_spill] sm:$0xff] %v10943_v3  ;;  %6468 = vmatprep.subr.bf16.mxu1 %v12475_v36  ;;  %v4650_v4 = vpop.f32.mrf.mxu0  ;;  %v10955_v56 = vpop.eup %7855  ;;  %7881 = vrcp.f32 %v5857_v29  ;;  %v5858_v43 = vadd.f32 1.0, %v7854_v61  ;;  %v5479_v8 = vmul.f32 1.442695, %v5099_v35  ;;  %v5100_v53 = vsub.f32 0.0, %v4649_v44  ;;  %v12477_v2 = vld [vmem:[#allocation24_spill] sm:$0xff]  ;;  %4904 = vmatprep.mubr.bf16.mxu0 %v7382_v54 }
 0x3ee   :  { %v2032_v17 = vpop.permute.xlu0 %2031  ;;  %v10957_v33 = vpop.f32.mrf.mxu1  ;;  %7883 = vpow2.f32 %v5477_v48  ;;  %v4651_v0 = vadd.f32 %v4650_v4, %v3978_v59  ;;  %v12479_v35 = vpack.c.bf16 %v10596_v15, %v10574_v10  ;;  %v12480_v61 = vld [vmem:[#allocation25_spill] sm:$0xff]  ;;  %v12481_v59 = vpack.c.bf16 %v10561_v27, %v10541_v28  ;;  %v7385_v28 = vld [vmem:[#allocation3 + $0x74c] ss:$16 sps:$4 sm:$0xff]  }
 0x3ef   :  { %12476 = vst [vmem:[#allocation58_spill] sm:$0xff] %v10957_v33  ;;  %v7858_v14 = vpop.eup %7857  ;;  %v3984_v47 = vadd.f32 %v12477_v2, %v2032_v17  ;;  %v4652_v1 = vpop.f32.mrf.mxu0  ;;  %7885 = vrcp.f32 %v5858_v43  ;;  %v5481_v52 = vmul.f32 1.442695, %v5100_v53  ;;  %v3986_v33 = vadd.f32 %v12480_v61, %v2032_v17  ;;  %v12483_v17 = vld [vmem:[#allocation53_spill] sm:$0xff] }
 0x3f0   :  { %v10960_v36 = vpop.eup %7859  ;;  %v5859_v6 = vadd.f32 1.0, %v7858_v14  ;;  %v10962_v3 = vpop.f32.mrf.mxu1  ;;  %v4653_v29 = vadd.f32 %v4652_v1, %v3980_v13  ;;  %6469 = vmatpush1.bf16.msra.mxu1 %v12479_v35  ;;  %7887 = vpow2.f32 %v5479_v8  ;;  %v5101_v2 = vsub.f32 0.0, %v4651_v0 }
 0x3f1   :  { %12478 = vst [vmem:[#allocation20_spill] sm:$0xff] %v10962_v3  ;;  %v7862_v44 = vpop.eup %7861  ;;  %6470 = vmatprep.subr.bf16.mxu1 %v12481_v59  ;;  %v4656_v48 = vpop.f32.mrf.mxu0  ;;  %v12485_v54 = vpack.c.bf16 %v10550_v5, %v10533_v22  ;;  %v7380_v59 = vld [vmem:[#allocation3 + $0x728] ss:$16 sps:$4 sm:$0xff]  }
 0x3f2   :  { %v10971_v4 = vpop.eup %7863  ;;  %v2037_v43 = vpop.permute.xlu1 %2036  ;;  %7889 = vrcp.f32 %v5859_v6  ;;  %v5860_v13 = vadd.f32 1.0, %v7862_v44  ;;  %v5102_v53 = vsub.f32 0.0, %v4653_v29  ;;  %v4657_v10 = vadd.f32 %v4656_v48, %v3984_v47  ;;  %v12486_v44 = vld [vmem:[#allocation26_spill] sm:$0xff] }
 0x3f3   :  { %v10973_v14 = vpop.f32.mrf.mxu1  ;;  %v7866_v15 = vpop.eup %7865  ;;  %v3988_v8 = vadd.f32 %v12483_v17, %v2037_v43  ;;  %7891 = vpow2.f32 %v5481_v52  ;;  %v5483_v0 = vmul.f32 1.442695, %v5101_v2  ;;  %v3990_v52 = vadd.f32 %v12486_v44, %v2037_v43 }
 0x3f4   :  { %12482 = vst [vmem:[#allocation42_spill] sm:$0xff] %v10973_v14  ;;  %v4658_v1 = vpop.f32.mrf.mxu0  ;;  %v10978_v27 = vpop.eup %7867  ;;  %7893 = vrcp.f32 %v5860_v13  ;;  %v5861_v62 = vadd.f32 1.0, %v7866_v15  ;;  %v5485_v6 = vmul.f32 1.442695, %v5102_v53  ;;  %v5103_v35 = vsub.f32 0.0, %v4657_v10  ;;  %6471 = vmatpush1.bf16.msra.mxu1 %v12485_v54  ;;  %4905 = vmatmul.mubr.bf16.gmra.mxu0 %v7380_v59 }
 0x3f5   :  { %v10980_v29 = vpop.f32.mrf.mxu1  ;;  %v7870_v47 = vpop.eup %7869  ;;  %7895 = vpow2.f32 %v5483_v0  ;;  %v4659_v61 = vadd.f32 %v4658_v1, %v3986_v33  ;;  %v12488_v1 = vld [vmem:[#allocation30_spill] sm:$0xff]  ;;  %4914 = vmatprep.mubr.bf16.mxu0 %v7385_v28 }
 0x3f6   :  { %12484 = vst [vmem:[#allocation55_spill] sm:$0xff] %v10980_v29  ;;  %v4660_v2 = vpop.f32.mrf.mxu0  ;;  %v7872_v13 = vpop.eup %7871  ;;  %7897 = vrcp.f32 %v5861_v62  ;;  %v5862_v53 = vadd.f32 1.0, %v7870_v47  ;;  %v5487_v10 = vmul.f32 1.442695, %v5103_v35  ;;  %v3994_v54 = vadd.f32 %v12488_v1, %v10919_v38 }
 0x3f7   :  { %v10988_v15 = vpop.f32.mrf.mxu1  ;;  %v4661_v17 = vadd.f32 %v4660_v2, %v3988_v8  ;;  %v10990_v22 = vpop.eup %7873  ;;  %v5863_v5 = vadd.f32 1.0, %v7872_v13  ;;  %7899 = vpow2.f32 %v5485_v6  ;;  %v5104_v43 = vsub.f32 0.0, %v4659_v61  ;;  %v12490_v8 = vld [vmem:[#allocation54_spill] sm:$0xff] }
 0x3f8   :  { %12487 = vst [vmem:[#allocation19_spill] sm:$0xff] %v10988_v15  ;;  %v4662_v0 = vpop.f32.mrf.mxu0  ;;  %v7876_v33 = vpop.eup %7875  ;;  %7901 = vrcp.f32 %v5862_v53  ;;  %v3996_v47 = vadd.f32 %v12490_v8, %v10919_v38 }
 0x3f9   :  { %v5105_v44 = vsub.f32 0.0, %v4661_v17  ;;  %v10994_v48 = vpop.f32.mrf.mxu1  ;;  %v4663_v62 = vadd.f32 %v4662_v0, %v3990_v52  ;;  %v10996_v35 = vpop.eup %7877  ;;  %7903 = vrcp.f32 %v5863_v5  ;;  %v5864_v2 = vadd.f32 1.0, %v7876_v33  ;;  %v12492_v52 = vld [vmem:[#allocation29_spill] sm:$0xff] }
 0x3fa   :  { %12489 = vst [vmem:[#allocation37_spill] sm:$0xff] %v10994_v48  ;;  %v5489_v13 = vmul.f32 1.442695, %v5104_v43  ;;  %v4666_v6 = vpop.f32.mrf.mxu0  ;;  %v7880_v61 = vpop.eup %7879  ;;  %7905 = vpow2.f32 %v5487_v10  ;;  %v3998_v0 = vadd.f32 %v12492_v52, %v10941_v63 }
 0x3fb   :  { %v5491_v15 = vmul.f32 1.442695, %v5105_v44  ;;  %v5106_v29 = vsub.f32 0.0, %v4663_v62  ;;  %v11000_v1 = vpop.f32.mrf.mxu1  ;;  %v4667_v53 = vadd.f32 %v4666_v6, %v3994_v54  ;;  %v11002_v17 = vpop.eup %7881  ;;  %7907 = vrcp.f32 %v5864_v2  ;;  %v12494_v54 = vld [vmem:[#allocation34_spill] sm:$0xff] }
 0x3fc   :  { %12491 = vst [vmem:[#allocation27_spill] sm:$0xff] %v11000_v1  ;;  %v5865_v38 = vadd.f32 1.0, %v7880_v61  ;;  %v4668_v5 = vpop.f32.mrf.mxu0  ;;  %v7884_v33 = vpop.eup %7883  ;;  %7909 = vpow2.f32 %v5489_v13  ;;  %v4000_v28 = vadd.f32 %v12494_v54, %v10941_v63  ;;  %v7383_v1 = vld [vmem:[#allocation3 + $0x748] ss:$16 sps:$4 sm:$0xff]  }
 0x3fd   :  { %v5493_v43 = vmul.f32 1.442695, %v5106_v29  ;;  %v5107_v59 = vsub.f32 0.0, %v4667_v53  ;;  %v11006_v8 = vpop.f32.mrf.mxu1  ;;  %v4669_v10 = vadd.f32 %v4668_v5, %v3996_v47  ;;  %v11008_v44 = vpop.eup %7885  ;;  %v5866_v62 = vadd.f32 1.0, %v7884_v33  ;;  %v7388_v47 = vld [vmem:[#allocation3 + $0x76c] ss:$16 sps:$4 sm:$0xff]   ;;  %4915 = vmatmul.mubr.bf16.gmra.mxu0 %v7383_v1 }
 0x3fe   :  { %12493 = vst [vmem:[#allocation56_spill] sm:$0xff] %v11006_v8  ;;  %7911 = vrcp.f32 %v5865_v38  ;;  %v4670_v6 = vpop.f32.mrf.mxu0  ;;  %v7888_v61 = vpop.eup %7887  ;;  %v12496_v8 = vld [vmem:[#allocation33_spill] sm:$0xff]  ;;  %4924 = vmatprep.mubr.bf16.mxu0 %v7388_v47 }
 0x3ff   :  { %7913 = vpow2.f32 %v5491_v15  ;;  %v5495_v13 = vmul.f32 1.442695, %v5107_v59  ;;  %v5108_v29 = vsub.f32 0.0, %v4669_v10  ;;  %v11014_v53 = vpop.f32.mrf.mxu1  ;;  %v4671_v52 = vadd.f32 %v4670_v6, %v3998_v0  ;;  %v11016_v5 = vpop.eup %7889  ;;  %v12498_v6 = vld [vmem:[#allocation38_spill] sm:$0xff] }
 0x400   :  { %12495 = vst [vmem:[#allocation24_spill] sm:$0xff] %v11014_v53  ;;  %v4004_v63 = vadd.f32 %v12496_v8, %v10885_v34  ;;  %7915 = vrcp.f32 %v5866_v62  ;;  %v5867_v38 = vadd.f32 1.0, %v7888_v61  ;;  %v4672_v33 = vpop.f32.mrf.mxu0  ;;  %v7892_v2 = vpop.eup %7891  ;;  %v4006_v48 = vadd.f32 %v12498_v6, %v10885_v34 }
 0x401   :  { %7917 = vpow2.f32 %v5493_v43  ;;  %v5497_v15 = vmul.f32 1.442695, %v5108_v29  ;;  %v5109_v59 = vsub.f32 0.0, %v4671_v52  ;;  %v11022_v10 = vpop.f32.mrf.mxu1  ;;  %v4673_v53 = vadd.f32 %v4672_v33, %v4000_v28  ;;  %v11024_v0 = vpop.eup %7893  ;;  %v12500_v28 = vld [vmem:[#allocation40_spill] sm:$0xff] }
 0x402   :  { %12497 = vst [vmem:[#allocation25_spill] sm:$0xff] %v11022_v10  ;;  %7919 = vrcp.f32 %v5867_v38  ;;  %v5868_v8 = vadd.f32 1.0, %v7892_v2  ;;  %v4676_v62 = vpop.f32.mrf.mxu0  ;;  %v7896_v61 = vpop.eup %7895  ;;  %v4008_v52 = vadd.f32 %v12500_v28, %v10907_v42 }
 0x403   :  { %7921 = vpow2.f32 %v5495_v13  ;;  %v5499_v14 = vmul.f32 1.442695, %v5109_v59  ;;  %v5110_v54 = vsub.f32 0.0, %v4673_v53  ;;  %v11028_v3 = vpop.f32.mrf.mxu1  ;;  %v4677_v43 = vadd.f32 %v4676_v62, %v4004_v63  ;;  %v11030_v29 = vpop.eup %7897  ;;  %v7386_v62 = vld [vmem:[#allocation3 + $0x768] ss:$16 sps:$4 sm:$0xff]  }
 0x404   :  { %12499 = vst [vmem:[#allocation53_spill] sm:$0xff] %v11028_v3  ;;  %7923 = vrcp.f32 %v5868_v8  ;;  %v5869_v33 = vadd.f32 1.0, %v7896_v61  ;;  %v4678_v34 = vpop.f32.mrf.mxu0  ;;  %v7900_v38 = vpop.eup %7899  ;;  %v12506_v3 = vld [vmem:[#allocation60_spill] sm:$0xff] }
 0x405   :  { %v11034_v2 = vpop.permute.xlu0 %2181  ;;  %7925 = vpow2.f32 %v5497_v15  ;;  %v5501_v1 = vmul.f32 1.442695, %v5110_v54  ;;  %v5111_v13 = vsub.f32 0.0, %v4677_v43  ;;  %v11036_v59 = vpop.f32.mrf.mxu1  ;;  %v4679_v53 = vadd.f32 %v4678_v34, %v4006_v48  ;;  %v7391_v48 = vld [vmem:[#allocation3 + $0x78c] ss:$16 sps:$4 sm:$0xff]   ;;  %4925 = vmatmul.mubr.bf16.gmra.mxu0 %v7386_v62 }
 0x406   :  { %12501 = vst [vmem:[#allocation26_spill] sm:$0xff] %v11034_v2  ;;  %12502 = vst [vmem:[#allocation30_spill] sm:$0xff] %v11036_v59  ;;  %v11038_v6 = vpop.eup %7901  ;;  %7927 = vrcp.f32 %v5869_v33  ;;  %v5870_v47 = vadd.f32 1.0, %v7900_v38  ;;  %v4680_v63 = vpop.f32.mrf.mxu0  ;;  %v12505_v33 = vld [vmem:[#allocation39_spill] sm:$0xff]  ;;  %v4014_v10 = vadd.f32 %v12506_v3, %v10847_v7  ;;  %4934 = vmatprep.mubr.bf16.mxu0 %v7391_v48 }
 0x407   :  { %v11042_v61 = vpop.eup %7903  ;;  %v11044_v28 = vpop.permute.xlu1 %2186  ;;  %7929 = vpow2.f32 %v5499_v14  ;;  %v5503_v15 = vmul.f32 1.442695, %v5111_v13  ;;  %v5112_v54 = vsub.f32 0.0, %v4679_v53  ;;  %v4681_v59 = vadd.f32 %v4680_v63, %v4008_v52 }
 0x408   :  { %12503 = vst [vmem:[#allocation54_spill] sm:$0xff] %v11044_v28  ;;  %v11046_v43 = vpop.f32.mrf.mxu1  ;;  %v7906_v34 = vpop.eup %7905  ;;  %v4010_v38 = vadd.f32 %v12505_v33, %v10907_v42  ;;  %7931 = vrcp.f32 %v5870_v47 }
 0x409   :  { %12504 = vst [vmem:[#allocation29_spill] sm:$0xff] %v11046_v43  ;;  %v4682_v8 = vpop.f32.mrf.mxu0  ;;  %v11054_v28 = vpop.eup %7907  ;;  %v5871_v14 = vadd.f32 1.0, %v7906_v34  ;;  %7933 = vpow2.f32 %v5501_v1  ;;  %v5505_v13 = vmul.f32 1.442695, %v5112_v54  ;;  %v5113_v53 = vsub.f32 0.0, %v4681_v59  ;;  %v12508_v43 = vld [vmem:[#allocation61_spill] sm:$0xff] }
 0x40a   :  { %v11056_v52 = vpop.f32.mrf.mxu1  ;;  %v7910_v63 = vpop.eup %7909  ;;  %v4016_v42 = vadd.f32 %v12508_v43, %v10847_v7  ;;  %7935 = vpow2.f32 %v5503_v15  ;;  %v4683_v33 = vadd.f32 %v4682_v8, %v4010_v38 }
 0x40b   :  { %12507 = vst [vmem:[#allocation34_spill] sm:$0xff] %v11056_v52  ;;  %v4686_v3 = vpop.f32.mrf.mxu0  ;;  %v11060_v47 = vpop.eup %7911  ;;  %7937 = vrcp.f32 %v5871_v14  ;;  %v5872_v49 = vadd.f32 1.0, %v7910_v63  ;;  %v5507_v34 = vmul.f32 1.442695, %v5113_v53  ;;  %v12511_v52 = vld [vmem:[#allocation62_spill] sm:$0xff]  ;;  %v12514_v63 = vld [vmem:[#allocation63_spill] sm:$0xff] }
 0x40c   :  { %v11062_v2 = vpop.permute.xlu0 %2171  ;;  %v11064_v1 = vpop.f32.mrf.mxu1  ;;  %v4687_v59 = vadd.f32 %v4686_v3, %v4014_v10  ;;  %v4018_v51 = vadd.f32 %v12511_v52, %v10871_v50  ;;  %7939 = vpow2.f32 %v5505_v13  ;;  %v5114_v7 = vsub.f32 0.0, %v4683_v33  ;;  %v7389_v3 = vld [vmem:[#allocation3 + $0x788] ss:$16 sps:$4 sm:$0xff]  }
 0x40d   :  { %12509 = vst [vmem:[#allocation33_spill] sm:$0xff] %v11062_v2  ;;  %12510 = vst [vmem:[#allocation38_spill] sm:$0xff] %v11064_v1  ;;  %v7914_v54 = vpop.eup %7913  ;;  %v4688_v8 = vpop.f32.mrf.mxu0  ;;  %7941 = vrcp.f32 %v5872_v49  ;;  %v4020_v52 = vadd.f32 %v12514_v63, %v10871_v50  ;;  %4935 = vmatmul.mubr.bf16.gmra.mxu0 %v7389_v3 }
 0x40e   :  { %v11070_v15 = vpop.eup %7915  ;;  %v11072_v43 = vpop.permute.xlu1 %2176  ;;  %v5873_v38 = vadd.f32 1.0, %v7914_v54  ;;  %v5115_v14 = vsub.f32 0.0, %v4687_v59  ;;  %v4689_v10 = vadd.f32 %v4688_v8, %v4016_v42  ;;  %7943 = vpow2.f32 %v5507_v34  ;;  %v7394_v42 = vld [vmem:[#allocation3 + $0x7ac] ss:$16 sps:$4 sm:$0xff]  }
 0x40f   :  { %12512 = vst [vmem:[#allocation40_spill] sm:$0xff] %v11072_v43  ;;  %v11074_v53 = vpop.f32.mrf.mxu1  ;;  %v7918_v48 = vpop.eup %7917  ;;  %v5509_v13 = vmul.f32 1.442695, %v5114_v7  ;;  %4944 = vmatprep.mubr.bf16.mxu0 %v7394_v42 }
 0x410   :  { %12513 = vst [vmem:[#allocation39_spill] sm:$0xff] %v11074_v53  ;;  %v4690_v33 = vpop.f32.mrf.mxu0  ;;  %v11080_v1 = vpop.eup %7919  ;;  %7945 = vrcp.f32 %v5873_v38  ;;  %v5874_v49 = vadd.f32 1.0, %v7918_v48  ;;  %v5511_v54 = vmul.f32 1.442695, %v5115_v14  ;;  %v5116_v59 = vsub.f32 0.0, %v4689_v10  ;;  %v12516_v53 = vld [vmem:[#allocation51_spill] sm:$0xff] }
 0x411   :  { %v11082_v43 = vpop.f32.mrf.mxu1  ;;  %v7922_v8 = vpop.eup %7921  ;;  %v4024_v50 = vadd.f32 %v12516_v53, %v10819_v40  ;;  %7947 = vpow2.f32 %v5509_v13  ;;  %v4691_v34 = vadd.f32 %v4690_v33, %v4018_v51  ;;  %v12518_v48 = vld [vmem:[#allocation52_spill] sm:$0xff] }
 0x412   :  { %12515 = vst [vmem:[#allocation60_spill] sm:$0xff] %v11082_v43  ;;  %v4692_v7 = vpop.f32.mrf.mxu0  ;;  %v7924_v63 = vpop.eup %7923  ;;  %7949 = vrcp.f32 %v5874_v49  ;;  %v5875_v62 = vadd.f32 1.0, %v7922_v8  ;;  %v5513_v31 = vmul.f32 1.442695, %v5116_v59  ;;  %v4026_v43 = vadd.f32 %v12518_v48, %v10819_v40 }
 0x413   :  { %v11086_v11 = vpop.permute.xlu0 %2161  ;;  %v11088_v38 = vpop.f32.mrf.mxu1  ;;  %v4693_v14 = vadd.f32 %v4692_v7, %v4020_v52  ;;  %7951 = vpow2.f32 %v5511_v54  ;;  %v5117_v2 = vsub.f32 0.0, %v4691_v34  ;;  %v12520_v52 = vld [vmem:[#allocation64_spill] sm:$0xff] }
 0x414   :  { %12517 = vst [vmem:[#allocation61_spill] sm:$0xff] %v11088_v38  ;;  %v7926_v10 = vpop.eup %7925  ;;  %v4696_v46 = vpop.f32.mrf.mxu0  ;;  %7953 = vrcp.f32 %v5875_v62  ;;  %v4028_v7 = vadd.f32 %v12520_v52, %v10839_v16 }
 0x415   :  { %v7928_v53 = vpop.eup %7927  ;;  %v11092_v51 = vpop.permute.xlu1 %2166  ;;  %v5876_v13 = vadd.f32 1.0, %v7926_v10  ;;  %v5118_v33 = vsub.f32 0.0, %v4693_v14  ;;  %v4697_v59 = vadd.f32 %v4696_v46, %v4024_v50  ;;  %7955 = vpow2.f32 %v5513_v31  ;;  %v7392_v31 = vld [vmem:[#allocation3 + $0x7a8] ss:$16 sps:$4 sm:$0xff]  }
 0x416   :  { %v11094_v49 = vpop.f32.mrf.mxu1  ;;  %v7930_v8 = vpop.eup %7929  ;;  %v5515_v40 = vmul.f32 1.442695, %v5117_v2  ;;  %v6321_v34 = vpack.c.bf16 %v7928_v53, %v11080_v1  ;;  %v4030_v46 = vadd.f32 %v10539_v18, %v10839_v16  ;;  %4945 = vmatmul.mubr.bf16.gmra.mxu0 %v7392_v31 }
 0x417   :  { %12519 = vst [vmem:[#allocation62_spill] sm:$0xff] %v11094_v49  ;;  %v4698_v54 = vpop.f32.mrf.mxu0  ;;  %v7932_v3 = vpop.eup %7931  ;;  %7957 = vrcp.f32 %v5876_v13  ;;  %v5877_v48 = vadd.f32 1.0, %v7930_v8  ;;  %v5517_v38 = vmul.f32 1.442695, %v5118_v33  ;;  %v5119_v62 = vsub.f32 0.0, %v4697_v59 }
 0x418   :  { %v11099_v10 = vpop.f32.mrf.mxu1  ;;  %v7934_v14 = vpop.eup %7933  ;;  %7959 = vpow2.f32 %v5515_v40  ;;  %v4699_v42 = vadd.f32 %v4698_v54, %v4026_v43  ;;  %v6322_v52 = vpack.c.bf16 %v7932_v3, %v7924_v63  ;;  %v7397_v59 = vld [vmem:[#allocation3 + $0x7cc] ss:$16 sps:$4 sm:$0xff]   ;;  %v12522_v40 = vld [vmem:[#allocation49_spill] sm:$0xff] }
 0x419   :  { %12521 = vst [vmem:[#allocation63_spill] sm:$0xff] %v11099_v10  ;;  %v4700_v50 = vpop.f32.mrf.mxu0  ;;  %v7936_v2 = vpop.eup %7935  ;;  %7961 = vrcp.f32 %v5877_v48  ;;  %v5878_v1 = vadd.f32 1.0, %v7934_v14  ;;  %v5519_v53 = vmul.f32 1.442695, %v5119_v62  ;;  %v4034_v54 = vadd.f32 %v12522_v40, %v10802_v20  ;;  %v12523_v14 = vld [vmem:[#allocation65_spill] sm:$0xff]  ;;  %4954 = vmatprep.mubr.bf16.mxu0 %v7397_v59 }
 0x41a   :  { %v11103_v49 = vpop.permute.xlu0 %2151  ;;  %v11105_v13 = vpop.f32.mrf.mxu1  ;;  %v4701_v33 = vadd.f32 %v4700_v50, %v4028_v7  ;;  %v5879_v10 = vadd.f32 1.0, %v7936_v2  ;;  %7963 = vpow2.f32 %v5517_v38  ;;  %v5120_v18 = vsub.f32 0.0, %v4699_v42  ;;  %6472 = vmatprep.subr.bf16.mxu1 %v6322_v52 }
 0x41b   :  { %v11107_v8 = vpop.eup %7937  ;;  %v4702_v16 = vpop.f32.mrf.mxu0  ;;  %7965 = vrcp.f32 %v5878_v1  ;;  %6473 = vmatpush2.bf16.msra.mxu1 %v6321_v34  ;;  %v4036_v38 = vadd.f32 %v12523_v14, %v10802_v20  ;;  %v12524_v52 = vpack.c.bf16 %v11070_v15, %v11054_v28  ;;  %v12526_v20 = vld [vmem:[#allocation50_spill] sm:$0xff]  ;;  %v12528_v59 = vpack.c.bf16 %v11060_v47, %v11042_v61  ;;  %v12529_v14 = vld [vmem:[#allocation44_spill] sm:$0xff] }
 0x41c   :  { %v7940_v43 = vpop.eup %7939  ;;  %v11109_v63 = vpop.permute.xlu1 %2156  ;;  %v5121_v3 = vsub.f32 0.0, %v4701_v33  ;;  %v4703_v62 = vadd.f32 %v4702_v16, %v4030_v46  ;;  %7967 = vrcp.f32 %v5879_v10  ;;  %v5521_v50 = vmul.f32 1.442695, %v5120_v18 }
 0x41d   :  { %v11113_v48 = vpop.f32.mrf.mxu1  ;;  %v11115_v7 = vpop.eup %7941  ;;  %v5880_v42 = vadd.f32 1.0, %v7940_v43  ;;  %6474 = vmatprep.subr.bf16.mxu1 %v12524_v52  ;;  %7969 = vpow2.f32 %v5519_v53  ;;  %v4038_v10 = vadd.f32 %v12526_v20, %v10813_v30 }
 0x41e   :  { %v4706_v2 = vpop.f32.mrf.mxu0  ;;  %v7944_v1 = vpop.eup %7943  ;;  %v5523_v33 = vmul.f32 1.442695, %v5121_v3  ;;  %v5122_v40 = vsub.f32 0.0, %v4703_v62 }
 0x41f   :  { %v11122_v46 = vpop.f32.mrf.mxu1  ;;  %v4707_v34 = vadd.f32 %v4706_v2, %v4034_v54  ;;  %v11124_v16 = vpop.eup %7945  ;;  %7971 = vrcp.f32 %v5880_v42  ;;  %v5881_v18 = vadd.f32 1.0, %v7944_v1  ;;  %6475 = vmatpush2.bf16.msra.mxu1 %v12528_v59  ;;  %v4040_v42 = vadd.f32 %v12529_v14, %v10813_v30  ;;  %v7395_v1 = vld [vmem:[#allocation3 + $0x7c8] ss:$16 sps:$4 sm:$0xff]  }
 0x420   :  { %12525 = vst [vmem:[#allocation51_spill] sm:$0xff] %v11122_v46  ;;  %v4708_v43 = vpop.f32.mrf.mxu0  ;;  %v7948_v28 = vpop.eup %7947  ;;  %7973 = vpow2.f32 %v5521_v50  ;;  %v5525_v31 = vmul.f32 1.442695, %v5122_v40  ;;  %v12530_v2 = vpack.c.bf16 %v11038_v6, %v11024_v0  ;;  %v12533_v0 = vld [vmem:[#allocation66_spill] sm:$0xff]  ;;  %4955 = vmatmul.mubr.bf16.gmra.mxu0 %v7395_v1 }
 0x421   :  { %v11128_v15 = vpop.permute.xlu0 %2141  ;;  %v5123_v53 = vsub.f32 0.0, %v4707_v34  ;;  %v11130_v3 = vpop.f32.mrf.mxu1  ;;  %v4709_v62 = vadd.f32 %v4708_v43, %v4036_v38  ;;  %7975 = vrcp.f32 %v5881_v18  ;;  %v5882_v52 = vadd.f32 1.0, %v7948_v28  ;;  %v7400_v18 = vld [vmem:[#allocation3 + $0x7ec] ss:$16 sps:$4 sm:$0xff]   ;;  %v12532_v28 = vld [vmem:[#allocation11_spill] sm:$0xff] }
 0x422   :  { %12527 = vst [vmem:[#allocation52_spill] sm:$0xff] %v11130_v3  ;;  %v11135_v54 = vpop.eup %7949  ;;  %6476 = vmatprep.subr.bf16.mxu1 %v12530_v2  ;;  %v4710_v50 = vpop.f32.mrf.mxu0  ;;  %7977 = vpow2.f32 %v5523_v33  ;;  %v4044_v6 = vadd.f32 %v12533_v0, %v12532_v28  ;;  %v12537_v2 = vpack.c.bf16 %v11008_v44, %v10996_v35  ;;  %4964 = vmatprep.mubr.bf16.mxu0 %v7400_v18 }
 0x423   :  { %v7952_v40 = vpop.eup %7951  ;;  %v11144_v34 = vpop.permute.xlu1 %2146  ;;  %v5527_v61 = vmul.f32 1.442695, %v5123_v53  ;;  %v5124_v47 = vsub.f32 0.0, %v4709_v62  ;;  %v4711_v30 = vadd.f32 %v4710_v50, %v4038_v10  ;;  %7979 = vrcp.f32 %v5882_v52  ;;  %v12536_v52 = vld [vmem:[#allocation47_spill] sm:$0xff] }
 0x424   :  { %v11146_v20 = vpop.f32.mrf.mxu1  ;;  %v11148_v43 = vpop.eup %7953  ;;  %v5883_v59 = vadd.f32 1.0, %v7952_v40  ;;  %7981 = vpow2.f32 %v5525_v31  ;;  %v12535_v10 = vpack.c.bf16 %v11030_v29, %v11016_v5  ;;  %v4046_v40 = vadd.f32 %v12536_v52, %v12532_v28  ;;  %v12539_v28 = vld [vmem:[#allocation32_spill] sm:$0xff] }
 0x425   :  { %12531 = vst [vmem:[#allocation64_spill] sm:$0xff] %v11146_v20  ;;  %v4712_v14 = vpop.f32.mrf.mxu0  ;;  %v7956_v38 = vpop.eup %7955  ;;  %v5529_v33 = vmul.f32 1.442695, %v5124_v47  ;;  %v5125_v53 = vsub.f32 0.0, %v4711_v30  ;;  %v12542_v18 = vpack.c.bf16 %v11002_v17, %v10990_v22 }
 0x426   :  { %v11154_v62 = vpop.f32.mrf.mxu1  ;;  %v4713_v20 = vadd.f32 %v4712_v14, %v4040_v42  ;;  %6477 = vmatpush2.bf16.msra.mxu1 %v12535_v10  ;;  %v11159_v50 = vpop.eup %7957  ;;  %7983 = vrcp.f32 %v5883_v59  ;;  %v5884_v0 = vadd.f32 1.0, %v7956_v38  ;;  %v12540_v38 = vld [vmem:[#allocation12_spill] sm:$0xff] }
 0x427   :  { %12534 = vst [vmem:[#allocation49_spill] sm:$0xff] %v11154_v62  ;;  %6478 = vmatprep.subr.bf16.mxu1 %v12537_v2  ;;  %v4716_v31 = vpop.f32.mrf.mxu0  ;;  %v7960_v47 = vpop.eup %7959  ;;  %7985 = vpow2.f32 %v5527_v61  ;;  %v5531_v42 = vmul.f32 1.442695, %v5125_v53  ;;  %v4048_v59 = vadd.f32 %v12540_v38, %v12539_v28  ;;  %v7398_v38 = vld [vmem:[#allocation3 + $0x7e8] ss:$16 sps:$4 sm:$0xff]  }
 0x428   :  { %v11166_v30 = vpop.permute.xlu0 %2131  ;;  %v5126_v5 = vsub.f32 0.0, %v4713_v20  ;;  %v11168_v29 = vpop.f32.mrf.mxu1  ;;  %v4717_v14 = vadd.f32 %v4716_v31, %v4044_v6  ;;  %7987 = vrcp.f32 %v5884_v0  ;;  %v5885_v35 = vadd.f32 1.0, %v7960_v47  ;;  %4965 = vmatmul.mubr.bf16.gmra.mxu0 %v7398_v38 }
 0x429   :  { %12538 = vst [vmem:[#allocation65_spill] sm:$0xff] %v11168_v29  ;;  %v11170_v10 = vpop.eup %7961  ;;  %v4718_v44 = vpop.f32.mrf.mxu0  ;;  %7989 = vpow2.f32 %v5529_v33  ;;  %v12543_v0 = vpack.c.bf16 %v10978_v27, %v10960_v36  ;;  %v12547_v36 = vld [vmem:[#allocation48_spill] sm:$0xff] }
 0x42a   :  { %v7964_v2 = vpop.eup %7963  ;;  %v11174_v1 = vpop.permute.xlu1 %2136  ;;  %v5533_v52 = vmul.f32 1.442695, %v5126_v5  ;;  %v5127_v61 = vsub.f32 0.0, %v4717_v14  ;;  %v4719_v20 = vadd.f32 %v4718_v44, %v4046_v40  ;;  %6479 = vmatpush2.bf16.msra.mxu1 %v12542_v18  ;;  %7991 = vrcp.f32 %v5885_v35  ;;  %v12545_v35 = vld [vmem:[#allocation67_spill] sm:$0xff] }
 0x42b   :  { %v11176_v53 = vpop.f32.mrf.mxu1  ;;  %v11181_v6 = vpop.eup %7965  ;;  %v5886_v31 = vadd.f32 1.0, %v7964_v2  ;;  %6480 = vmatprep.subr.bf16.mxu1 %v12543_v0  ;;  %7993 = vpow2.f32 %v5531_v42  ;;  %v4050_v2 = vadd.f32 %v12545_v35, %v12539_v28  ;;  %v12546_v18 = vld [vmem:[#allocation35_spill] sm:$0xff]  ;;  %v12549_v28 = vpack.c.bf16 %v10971_v4, %v10955_v56 }
 0x42c   :  { %12541 = vst [vmem:[#allocation50_spill] sm:$0xff] %v11176_v53  ;;  %v4720_v47 = vpop.f32.mrf.mxu0  ;;  %v11188_v5 = vpop.eup %7967  ;;  %v5535_v40 = vmul.f32 1.442695, %v5127_v61  ;;  %v5128_v14 = vsub.f32 0.0, %v4719_v20  ;;  %v4054_v27 = vadd.f32 %v12547_v36, %v12546_v18 }
 0x42d   :  { %v11190_v22 = vpop.f32.mrf.mxu1  ;;  %v4721_v17 = vadd.f32 %v4720_v47, %v4048_v59  ;;  %v7970_v44 = vpop.eup %7969  ;;  %7995 = vrcp.f32 %v5886_v31  ;;  %v12550_v31 = vld [vmem:[#allocation14_spill] sm:$0xff] }
 0x42e   :  { %12544 = vst [vmem:[#allocation44_spill] sm:$0xff] %v11190_v22  ;;  %v4722_v0 = vpop.f32.mrf.mxu0  ;;  %v11198_v53 = vpop.eup %7971  ;;  %v5887_v61 = vadd.f32 1.0, %v7970_v44  ;;  %7997 = vpow2.f32 %v5533_v52  ;;  %v5537_v20 = vmul.f32 1.442695, %v5128_v14  ;;  %6481 = vmatpush2.bf16.msra.mxu1 %v12549_v28  ;;  %v4056_v36 = vadd.f32 %v12550_v31, %v12546_v18  ;;  %v12553_v18 = vld [vmem:[#allocation75_spill] sm:$0xff] }
 0x42f   :  { %v11200_v42 = vpop.permute.xlu0 %2121  ;;  %v5129_v59 = vsub.f32 0.0, %v4721_v17  ;;  %v11202_v47 = vpop.f32.mrf.mxu1  ;;  %7999 = vpow2.f32 %v5535_v40  ;;  %v4723_v33 = vadd.f32 %v4722_v0, %v4050_v2  ;;  %v12551_v22 = vpack.c.bf16 %v10939_v58, %v10917_v12  ;;  %v12554_v40 = vld [vmem:[#allocation68_spill] sm:$0xff] }
 0x430   :  { %12548 = vst [vmem:[#allocation11_spill] sm:$0xff] %v11202_v47  ;;  %v7974_v35 = vpop.eup %7973  ;;  %v4726_v44 = vpop.f32.mrf.mxu0  ;;  %8001 = vrcp.f32 %v5887_v61  ;;  %v4058_v2 = vadd.f32 %v12554_v40, %v12553_v18  ;;  %v12558_v40 = vpack.c.bf16 %v10898_v57, %v10878_v60 }
 0x431   :  { %6482 = vmatprep.subr.bf16.mxu1 %v12551_v22  ;;  %v11212_v52 = vpop.eup %7975  ;;  %v11214_v14 = vpop.permute.xlu1 %2126  ;;  %v5888_v17 = vadd.f32 1.0, %v7974_v35  ;;  %v5539_v56 = vmul.f32 1.442695, %v5129_v59  ;;  %v4727_v28 = vadd.f32 %v4726_v44, %v4054_v27  ;;  %8003 = vpow2.f32 %v5537_v20  ;;  %v12557_v20 = vld [vmem:[#allocation45_spill] sm:$0xff] }
 0x432   :  { %v11216_v4 = vpop.f32.mrf.mxu1  ;;  %v7978_v47 = vpop.eup %7977  ;;  %v5130_v0 = vsub.f32 0.0, %v4723_v33  ;;  %v12556_v27 = vpack.c.bf16 %v10931_v26, %v10905_v45  ;;  %v4060_v33 = vadd.f32 %v12557_v20, %v12553_v18 }
 0x433   :  { %12552 = vst [vmem:[#allocation66_spill] sm:$0xff] %v11216_v4  ;;  %v4728_v12 = vpop.f32.mrf.mxu0  ;;  %v11222_v38 = vpop.eup %7979  ;;  %8005 = vrcp.f32 %v5888_v17  ;;  %v5889_v22 = vadd.f32 1.0, %v7978_v47  ;;  %v5131_v61 = vsub.f32 0.0, %v4727_v28 }
 0x434   :  { %v11224_v35 = vpop.f32.mrf.mxu1  ;;  %v4729_v59 = vadd.f32 %v4728_v12, %v4056_v36  ;;  %6483 = vmatpush2.bf16.msra.mxu1 %v12556_v27  ;;  %v7982_v31 = vpop.eup %7981  ;;  %8007 = vpow2.f32 %v5539_v56  ;;  %v5541_v44 = vmul.f32 1.442695, %v5130_v0  ;;  %v12560_v56 = vld [vmem:[#allocation21_spill] sm:$0xff] }
 0x435   :  { %12555 = vst [vmem:[#allocation47_spill] sm:$0xff] %v11224_v35  ;;  %6484 = vmatprep.subr.bf16.mxu1 %v12558_v40  ;;  %v4730_v17 = vpop.f32.mrf.mxu0  ;;  %v11236_v28 = vpop.eup %7983  ;;  %8009 = vrcp.f32 %v5889_v22  ;;  %v5890_v45 = vadd.f32 1.0, %v7982_v31  ;;  %v5543_v26 = vmul.f32 1.442695, %v5131_v61  ;;  %v12562_v61 = vpack.c.bf16 %v10889_v9, %v10865_v25  ;;  %v12563_v31 = vld [vmem:[#allocation69_spill] sm:$0xff] }
 0x436   :  { %v2112_v36 = vpop.permute.xlu0 %2111  ;;  %v5132_v12 = vsub.f32 0.0, %v4729_v59  ;;  %v11238_v27 = vpop.f32.mrf.mxu1  ;;  %8011 = vpow2.f32 %v5541_v44  ;;  %v4731_v20 = vadd.f32 %v4730_v17, %v4058_v2  ;;  %v12565_v17 = vpack.c.bf16 %v10854_v23, %v10832_v55 }
 0x437   :  { %12559 = vst [vmem:[#allocation32_spill] sm:$0xff] %v11238_v27  ;;  %v7986_v18 = vpop.eup %7985  ;;  %v4064_v0 = vadd.f32 %v12560_v56, %v2112_v36  ;;  %v4732_v60 = vpop.f32.mrf.mxu0  ;;  %8013 = vrcp.f32 %v5890_v45  ;;  %v4066_v27 = vadd.f32 %v12563_v31, %v2112_v36  ;;  %v12564_v56 = vld [vmem:[#allocation46_spill] sm:$0xff] }
 0x438   :  { %v11241_v57 = vpop.eup %7987  ;;  %v2117_v40 = vpop.permute.xlu1 %2116  ;;  %v5891_v58 = vadd.f32 1.0, %v7986_v18  ;;  %v5545_v47 = vmul.f32 1.442695, %v5132_v12  ;;  %v4733_v22 = vadd.f32 %v4732_v60, %v4060_v33  ;;  %6485 = vmatpush2.bf16.msra.mxu1 %v12562_v61  ;;  %8015 = vpow2.f32 %v5543_v26  ;;  %v8439_v26 = vld [vmem:[%s12001_s5 + $0x8] sm:$0xff] }
 0x439   :  { %v11243_v35 = vpop.f32.mrf.mxu1  ;;  %v7990_v59 = vpop.eup %7989  ;;  %v4068_v44 = vadd.f32 %v12564_v56, %v2117_v40  ;;  %v5133_v2 = vsub.f32 0.0, %v4731_v20  ;;  %6486 = vmatprep.subr.bf16.mxu1 %v12565_v17  ;;  %v6945_v20 = vcombine.low %v8439_v26, %v8439_v26  ;;  %v12568_v31 = vld [vmem:[#allocation10_spill] sm:$0xff] }
 0x43a   :  { %12561 = vst [vmem:[#allocation12_spill] sm:$0xff] %v11243_v35  ;;  %v4736_v45 = vpop.f32.mrf.mxu0  ;;  %v11253_v12 = vpop.eup %7991  ;;  %8017 = vrcp.f32 %v5891_v58  ;;  %v5892_v33 = vadd.f32 1.0, %v7990_v59  ;;  %v5134_v18 = vsub.f32 0.0, %v4733_v22  ;;  %v4070_v56 = vadd.f32 %v12568_v31, %v2117_v40 }
 0x43b   :  { %v11255_v60 = vpop.f32.mrf.mxu1  ;;  %v4737_v25 = vadd.f32 %v4736_v45, %v4064_v0  ;;  %v7994_v9 = vpop.eup %7993  ;;  %8019 = vpow2.f32 %v5545_v47  ;;  %v5547_v36 = vmul.f32 1.442695, %v5133_v2  ;;  %v12567_v0 = vpack.c.bf16 %v10843_v21, %v10823_v39 }
 0x43c   :  { %12566 = vst [vmem:[#allocation67_spill] sm:$0xff] %v11255_v60  ;;  %v4738_v61 = vpop.f32.mrf.mxu0  ;;  %v11262_v23 = vpop.eup %7995  ;;  %8021 = vrcp.f32 %v5892_v33  ;;  %v5893_v58 = vadd.f32 1.0, %v7994_v9  ;;  %v5549_v22 = vmul.f32 1.442695, %v5134_v18 }
 0x43d   :  { %v5135_v59 = vsub.f32 0.0, %v4737_v25  ;;  %6487 = vmatpush2.bf16.msra.mxu1 %v12567_v0  ;;  %v7998_v47 = vpop.eup %7997  ;;  %8023 = vpow2.f32 %v5547_v36  ;;  %v4739_v2 = vadd.f32 %v4738_v61, %v4066_v27  ;;  %v11270_v9 = vpop.f32.mrf.mxu1  ;;  %v12570_v27 = vld [vmem:[#allocation70_spill] sm:$0xff] }
 0x43e   :  { %v4740_v17 = vpop.f32.mrf.mxu0  ;;  %v8000_v26 = vpop.eup %7999  ;;  %8025 = vrcp.f32 %v5893_v58  ;;  %v5894_v55 = vadd.f32 1.0, %v7998_v47  ;;  %12569 = vst [vmem:[#allocation35_spill] sm:$0xff] %v11270_v9  ;;  %v4074_v36 = vadd.f32 %v12570_v27, %v11200_v42  ;;  %v6257_v58 = vld [vmem:[%s12001_s5 + $0x10] sm:$0xff] }
 0x43f   :  { %v5551_v33 = vmul.f32 1.442695, %v5135_v59  ;;  %v4741_v18 = vadd.f32 %v4740_v17, %v4068_v44  ;;  %v11272_v25 = vpop.eup %8001  ;;  %v5895_v39 = vadd.f32 1.0, %v8000_v26  ;;  %8027 = vpow2.f32 %v5549_v22  ;;  %v12571_v44 = vld [vmem:[#allocation59_spill] sm:$0xff]  ;;  %v11283_v26 = vpop.f32.mrf.mxu1 }
 0x440   :  { %v5136_v21 = vsub.f32 0.0, %v4739_v2  ;;  %v4742_v0 = vpop.f32.mrf.mxu0  ;;  %6489 = vmatmul.mubr.bf16.vlgmr.msra.gmra.mxu1 %v6945_v20  ;;  %v8004_v40 = vpop.eup %8003  ;;  %8029 = vrcp.f32 %v5894_v55  ;;  %v4076_v47 = vadd.f32 %v12571_v44, %v11200_v42  ;;  %12572 = vst [vmem:[#allocation48_spill] sm:$0xff] %v11283_v26  ;;  %v12573_v27 = vld [vmem:[#allocation71_spill] sm:$0xff]  ;;  %v6948_v42 = vcombine.high %v6257_v58, %v6257_v58 }
 0x441   :  { %v5137_v61 = vsub.f32 0.0, %v4741_v18  ;;  %v4743_v31 = vadd.f32 %v4742_v0, %v4070_v56  ;;  %v11279_v59 = vpop.eup %8005  ;;  %8031 = vrcp.f32 %v5895_v39  ;;  %v5896_v22 = vadd.f32 1.0, %v8004_v40  ;;  %v11295_v58 = vpop.f32.mrf.mxu1 }
 0x442   :  { %v5553_v2 = vmul.f32 1.442695, %v5136_v21  ;;  %v4746_v20 = vpop.f32.mrf.mxu0  ;;  %v8008_v17 = vpop.eup %8007  ;;  %8033 = vpow2.f32 %v5551_v33  ;;  %v4078_v45 = vadd.f32 %v12573_v27, %v11214_v14  ;;  %6529 = vmatprep.mubr.bf16.mxu1 %v6948_v42  ;;  %12575 = vst [vmem:[#allocation14_spill] sm:$0xff] %v11295_v58 }
 0x443   :  { %v5555_v55 = vmul.f32 1.442695, %v5137_v61  ;;  %v5138_v18 = vsub.f32 0.0, %v4743_v31  ;;  %v4747_v56 = vadd.f32 %v4746_v20, %v4074_v36  ;;  %v11285_v0 = vpop.eup %8009  ;;  %8035 = vrcp.f32 %v5896_v22  ;;  %v12574_v61 = vld [vmem:[#allocation72_spill] sm:$0xff] }
 0x444   :  { %v5897_v9 = vadd.f32 1.0, %v8008_v17  ;;  %v4748_v60 = vpop.f32.mrf.mxu0  ;;  %v8012_v39 = vpop.eup %8011  ;;  %8037 = vpow2.f32 %v5553_v2  ;;  %v4080_v31 = vadd.f32 %v12574_v61, %v11214_v14 }
 0x445   :  { %v5557_v21 = vmul.f32 1.442695, %v5138_v18  ;;  %v5139_v40 = vsub.f32 0.0, %v4747_v56  ;;  %v4749_v44 = vadd.f32 %v4748_v60, %v4076_v47  ;;  %v11289_v33 = vpop.eup %8013  ;;  %v5898_v36 = vadd.f32 1.0, %v8012_v39  ;;  %v12576_v47 = vld [vmem:[#allocation73_spill] sm:$0xff] }
 0x446   :  { %8039 = vrcp.f32 %v5897_v9  ;;  %v4750_v20 = vpop.f32.mrf.mxu0  ;;  %v8016_v22 = vpop.eup %8015  ;;  %v4084_v56 = vadd.f32 %v12576_v47, %v11166_v30 }
 0x447   :  { %8041 = vpow2.f32 %v5555_v55  ;;  %v5559_v2 = vmul.f32 1.442695, %v5139_v40  ;;  %v5140_v17 = vsub.f32 0.0, %v4749_v44  ;;  %v4751_v18 = vadd.f32 %v4750_v20, %v4078_v45  ;;  %v11297_v60 = vpop.eup %8017  ;;  %v12577_v45 = vld [vmem:[#allocation74_spill] sm:$0xff] }
 0x448   :  { %8043 = vrcp.f32 %v5898_v36  ;;  %v5899_v14 = vadd.f32 1.0, %v8016_v22  ;;  %v4752_v9 = vpop.f32.mrf.mxu0  ;;  %v8020_v61 = vpop.eup %8019  ;;  %v4086_v40 = vadd.f32 %v12577_v45, %v11166_v30 }
 0x449   :  { %8045 = vpow2.f32 %v5557_v21  ;;  %v5561_v42 = vmul.f32 1.442695, %v5140_v17  ;;  %v5141_v55 = vsub.f32 0.0, %v4751_v18  ;;  %v4753_v27 = vadd.f32 %v4752_v9, %v4080_v31  ;;  %v11303_v58 = vpop.eup %8021  ;;  %v11307_v36 = vpop.f32.mrf.mxu1  ;;  %v12579_v21 = vld [vmem:[#allocation22_spill] sm:$0xff] }
 0x44a   :  { %8047 = vrcp.f32 %v5899_v14  ;;  %v5900_v44 = vadd.f32 1.0, %v8020_v61  ;;  %v4756_v20 = vpop.f32.mrf.mxu0  ;;  %v8024_v47 = vpop.eup %8023  ;;  %12578 = vst [vmem:[#allocation75_spill] sm:$0xff] %v11307_v36  ;;  %v4088_v31 = vadd.f32 %v12579_v21, %v11174_v1 }
 0x44b   :  { %8049 = vpow2.f32 %v5559_v2  ;;  %v5563_v22 = vmul.f32 1.442695, %v5141_v55  ;;  %v5142_v26 = vsub.f32 0.0, %v4753_v27  ;;  %v4757_v39 = vadd.f32 %v4756_v20, %v4084_v56  ;;  %v11309_v35 = vpop.eup %8025  ;;  %v11313_v30 = vpop.permute.xlu0 %2261 }
 0x44c   :  { %8051 = vrcp.f32 %v5900_v44  ;;  %v5901_v17 = vadd.f32 1.0, %v8024_v47  ;;  %v4758_v18 = vpop.f32.mrf.mxu0  ;;  %v8028_v9 = vpop.eup %8027  ;;  %12580 = vst [vmem:[#allocation68_spill] sm:$0xff] %v11313_v30 }
 0x44d   :  { %8053 = vpow2.f32 %v5561_v42  ;;  %v5565_v14 = vmul.f32 1.442695, %v5142_v26  ;;  %v5143_v61 = vsub.f32 0.0, %v4757_v39  ;;  %v4759_v45 = vadd.f32 %v4758_v18, %v4086_v40  ;;  %v11315_v36 = vpop.eup %8029  ;;  %v11321_v44 = vpop.f32.mrf.mxu1  ;;  %v12582_v26 = vld [vmem:[#allocation36_spill] sm:$0xff]  ;;  %v12583_v40 = vld [vmem:[#allocation9_spill] sm:$0xff] }
 0x44e   :  { %8055 = vrcp.f32 %v5901_v17  ;;  %v5902_v27 = vadd.f32 1.0, %v8028_v9  ;;  %v4760_v2 = vpop.f32.mrf.mxu0  ;;  %v11319_v55 = vpop.eup %8031  ;;  %12581 = vst [vmem:[#allocation45_spill] sm:$0xff] %v11321_v44  ;;  %v4090_v39 = vadd.f32 %v12582_v26, %v11174_v1  ;;  %v4094_v17 = vadd.f32 %v12583_v40, %v11128_v15 }
 0x44f   :  { %8057 = vpow2.f32 %v5563_v22  ;;  %v5567_v20 = vmul.f32 1.442695, %v5143_v61  ;;  %v5144_v47 = vsub.f32 0.0, %v4759_v45  ;;  %v4761_v21 = vadd.f32 %v4760_v2, %v4088_v31  ;;  %v8034_v42 = vpop.eup %8033  ;;  %v11329_v56 = vpop.permute.xlu1 %2266  ;;  %v12585_v31 = vld [vmem:[#allocation76_spill] sm:$0xff] }
 0x450   :  { %8059 = vrcp.f32 %v5902_v27  ;;  %v4762_v18 = vpop.f32.mrf.mxu0  ;;  %v11327_v9 = vpop.eup %8035  ;;  %12584 = vst [vmem:[#allocation21_spill] sm:$0xff] %v11329_v56  ;;  %v5903_v4 = vadd.f32 1.0, %v8034_v42  ;;  %v4096_v45 = vadd.f32 %v12585_v31, %v11128_v15 }
 0x451   :  { %8061 = vpow2.f32 %v5565_v14  ;;  %v5569_v44 = vmul.f32 1.442695, %v5144_v47  ;;  %v5145_v22 = vsub.f32 0.0, %v4761_v21  ;;  %v8038_v61 = vpop.eup %8037  ;;  %v4763_v2 = vadd.f32 %v4762_v18, %v4090_v39  ;;  %v11335_v40 = vpop.permute.xlu0 %2251 }
 0x452   :  { %8063 = vpow2.f32 %v5567_v20  ;;  %v4766_v1 = vpop.f32.mrf.mxu0  ;;  %12586 = vst [vmem:[#allocation69_spill] sm:$0xff] %v11335_v40  ;;  %v5904_v27 = vadd.f32 1.0, %v8038_v61  ;;  %v11337_v30 = vpop.f32.mrf.mxu1 }
 0x453   :  { %v11333_v26 = vpop.eup %8039  ;;  %8065 = vrcp.f32 %v5903_v4  ;;  %12587 = vst [vmem:[#allocation46_spill] sm:$0xff] %v11337_v30  ;;  %v5571_v56 = vmul.f32 1.442695, %v5145_v22  ;;  %v4767_v42 = vadd.f32 %v4766_v1, %v4094_v17  ;;  %v5146_v47 = vsub.f32 0.0, %v4763_v2  ;;  %v12588_v4 = vld [vmem:[#allocation13_spill] sm:$0xff]  ;;  %v12589_v22 = vld [vmem:[#allocation31_spill] sm:$0xff]  ;;  %v11349_v30 = vpop.permute.xlu1 %2256 }
 0x454   :  { %v8042_v14 = vpop.eup %8041  ;;  %8067 = vpow2.f32 %v5569_v44  ;;  %v4768_v21 = vpop.f32.mrf.mxu0  ;;  %v4098_v61 = vadd.f32 %v12588_v4, %v11144_v34  ;;  %v4100_v17 = vadd.f32 %v12589_v22, %v11144_v34  ;;  %12590 = vst [vmem:[#allocation10_spill] sm:$0xff] %v11349_v30 }
 0x455   :  { %v11341_v20 = vpop.eup %8043  ;;  %8069 = vrcp.f32 %v5904_v27  ;;  %v5905_v39 = vadd.f32 1.0, %v8042_v14  ;;  %v5147_v18 = vsub.f32 0.0, %v4767_v42  ;;  %v4769_v31 = vadd.f32 %v4768_v21, %v4096_v45  ;;  %v11351_v27 = vpop.f32.mrf.mxu1  ;;  %v12592_v21 = vld [vmem:[#allocation43_spill] sm:$0xff] }
 0x456   :  { %v8046_v29 = vpop.eup %8045  ;;  %8071 = vpow2.f32 %v5571_v56  ;;  %v5573_v44 = vmul.f32 1.442695, %v5146_v47  ;;  %v4770_v2 = vpop.f32.mrf.mxu0  ;;  %12591 = vst [vmem:[#allocation70_spill] sm:$0xff] %v11351_v27  ;;  %v4104_v4 = vadd.f32 %v12592_v21, %v11103_v49 }
 0x457   :  { %v11347_v1 = vpop.eup %8047  ;;  %8073 = vrcp.f32 %v5905_v39  ;;  %v5906_v15 = vadd.f32 1.0, %v8046_v29  ;;  %v5575_v42 = vmul.f32 1.442695, %v5147_v18  ;;  %v5148_v45 = vsub.f32 0.0, %v4769_v31  ;;  %v11355_v47 = vpop.permute.xlu0 %2241  ;;  %v12593_v29 = vld [vmem:[#allocation28_spill] sm:$0xff] }
 0x458   :  { %v8050_v14 = vpop.eup %8049  ;;  %8075 = vpow2.f32 %v5573_v44  ;;  %v4771_v40 = vadd.f32 %v4770_v2, %v4098_v61  ;;  %v4772_v34 = vpop.f32.mrf.mxu0  ;;  %v4106_v27 = vadd.f32 %v12593_v29, %v11103_v49 }
 0x459   :  { %v8052_v56 = vpop.eup %8051  ;;  %8077 = vrcp.f32 %v5906_v15  ;;  %v5907_v22 = vadd.f32 1.0, %v8050_v14  ;;  %v5577_v62 = vmul.f32 1.442695, %v5148_v45  ;;  %v4773_v30 = vadd.f32 %v4772_v34, %v4100_v17  ;;  %v11359_v44 = vpop.f32.mrf.mxu1 }
 0x45a   :  { %v8054_v39 = vpop.eup %8053  ;;  %8079 = vpow2.f32 %v5575_v42  ;;  %v5149_v18 = vsub.f32 0.0, %v4771_v40  ;;  %v4776_v31 = vpop.f32.mrf.mxu0  ;;  %v4108_v15 = vadd.f32 %v10821_v19, %v11109_v63 }
 0x45b   :  { %v8056_v3 = vpop.eup %8055  ;;  %8081 = vrcp.f32 %v5907_v22  ;;  %v5908_v21 = vadd.f32 1.0, %v8054_v39  ;;  %v5150_v61 = vsub.f32 0.0, %v4773_v30  ;;  %v4777_v2 = vadd.f32 %v4776_v31, %v4104_v4  ;;  %v11364_v42 = vpop.permute.xlu1 %2246 }
 0x45c   :  { %v8058_v46 = vpop.eup %8057  ;;  %8083 = vpow2.f32 %v5577_v62  ;;  %v5579_v17 = vmul.f32 1.442695, %v5149_v18  ;;  %v4778_v45 = vpop.f32.mrf.mxu0  ;;  %v6337_v14 = vpack.c.bf16 %v8056_v3, %v11347_v1  ;;  %v4110_v30 = vadd.f32 %v10827_v37, %v11109_v63 }
 0x45d   :  { %v8060_v49 = vpop.eup %8059  ;;  %8085 = vrcp.f32 %v5908_v21  ;;  %v5909_v40 = vadd.f32 1.0, %v8058_v46  ;;  %v5581_v34 = vmul.f32 1.442695, %v5150_v61  ;;  %v5151_v22 = vsub.f32 0.0, %v4777_v2  ;;  %v11368_v18 = vpop.permute.xlu0 %2231 }
 0x45e   :  { %v8062_v39 = vpop.eup %8061  ;;  %8087 = vpow2.f32 %v5579_v17  ;;  %v4779_v4 = vadd.f32 %v4778_v45, %v4106_v27  ;;  %v4780_v29 = vpop.f32.mrf.mxu0  ;;  %v6338_v19 = vpack.c.bf16 %v8060_v49, %v8052_v56  ;;  %v6336_v63 = vpack.c.bf16 %v11341_v20, %v11327_v9 }
 0x45f   :  { %v8064_v62 = vpop.eup %8063  ;;  %8089 = vrcp.f32 %v5909_v40  ;;  %v5910_v3 = vadd.f32 1.0, %v8062_v39  ;;  %v11370_v1 = vpop.f32.mrf.mxu1  ;;  %v5583_v31 = vmul.f32 1.442695, %v5151_v22  ;;  %v4781_v21 = vadd.f32 %v4780_v29, %v4108_v15 }
 0x460   :  { %v11372_v46 = vpop.eup %8065  ;;  %v5911_v61 = vadd.f32 1.0, %v8064_v62  ;;  %8091 = vpow2.f32 %v5581_v34  ;;  %v5152_v2 = vsub.f32 0.0, %v4779_v4  ;;  %6497 = vmatprep.subr.bf16.mxu1 %v6338_v19  ;;  %v4782_v37 = vpop.f32.mrf.mxu0  ;;  %v4114_v56 = vadd.f32 %v10841_v32, %v11086_v11 }
 0x461   :  { %v8068_v27 = vpop.eup %8067  ;;  %8093 = vrcp.f32 %v5910_v3  ;;  %v5153_v17 = vsub.f32 0.0, %v4781_v21  ;;  %v4783_v45 = vadd.f32 %v4782_v37, %v4110_v30  ;;  %6498 = vmatpush1.bf16.msra.mxu1 %v6337_v14  ;;  %v4116_v15 = vadd.f32 %v10849_v24, %v11086_v11  ;;  %v11382_v9 = vpop.permute.xlu1 %2236 }
 0x462   :  { %v11378_v49 = vpop.eup %8069  ;;  %8095 = vrcp.f32 %v5911_v61  ;;  %v5912_v40 = vadd.f32 1.0, %v8068_v27  ;;  %v5585_v34 = vmul.f32 1.442695, %v5152_v2  ;;  %6499 = vmatprep.subr.bf16.mxu1 %v6336_v63  ;;  %v4786_v22 = vpop.f32.mrf.mxu0  ;;  %v4118_v29 = vadd.f32 %v10863_v41, %v11092_v51  ;;  %v12595_v41 = vld [vmem:[#allocation15_spill] sm:$0xff] }
 0x463   :  { %v8072_v39 = vpop.eup %8071  ;;  %v11384_v20 = vpop.f32.mrf.mxu1  ;;  %8097 = vpow2.f32 %v5583_v31  ;;  %v5587_v32 = vmul.f32 1.442695, %v5153_v17  ;;  %v5154_v4 = vsub.f32 0.0, %v4783_v45  ;;  %v4787_v30 = vadd.f32 %v4786_v22, %v4114_v56 }
 0x464   :  { %v11386_v14 = vpop.eup %8073  ;;  %8099 = vrcp.f32 %v5912_v40  ;;  %v5913_v24 = vadd.f32 1.0, %v8072_v39  ;;  %v4788_v11 = vpop.f32.mrf.mxu0  ;;  %v6334_v19 = vpack.c.bf16 %v11315_v36, %v11303_v58  ;;  %v12594_v2 = vpack.c.bf16 %v11333_v26, %v11319_v55  ;;  %v12596_v40 = vld [vmem:[#allocation33_spill] sm:$0xff] }
 0x465   :  { %v8076_v62 = vpop.eup %8075  ;;  %v11392_v3 = vpop.permute.xlu0 %2221  ;;  %8101 = vpow2.f32 %v5585_v34  ;;  %v5589_v21 = vmul.f32 1.442695, %v5154_v4  ;;  %v5155_v31 = vsub.f32 0.0, %v4787_v30  ;;  %v4789_v61 = vadd.f32 %v4788_v11, %v4116_v15  ;;  %v12597_v34 = vld [vmem:[#allocation23_spill] sm:$0xff] }
 0x466   :  { %6500 = vmatpush1.bf16.msra.mxu1 %v12594_v2  ;;  %v11397_v37 = vpop.eup %8077  ;;  %v4120_v63 = vadd.f32 %v12595_v41, %v11092_v51  ;;  %8103 = vrcp.f32 %v5913_v24  ;;  %v5914_v27 = vadd.f32 1.0, %v8076_v62  ;;  %v4790_v58 = vpop.f32.mrf.mxu0  ;;  %v4124_v22 = vadd.f32 %v12597_v34, %v12596_v40 }
 0x467   :  { %6501 = vmatprep.subr.bf16.mxu1 %v6334_v19  ;;  %v8080_v56 = vpop.eup %8079  ;;  %v11403_v17 = vpop.f32.mrf.mxu1  ;;  %8105 = vpow2.f32 %v5587_v32  ;;  %v5591_v45 = vmul.f32 1.442695, %v5155_v31  ;;  %v5156_v15 = vsub.f32 0.0, %v4789_v61  ;;  %v4791_v55 = vadd.f32 %v4790_v58, %v4118_v29  ;;  %v12599_v31 = vld [vmem:[#allocation16_spill] sm:$0xff] }
 0x468   :  { %v11405_v26 = vpop.eup %8081  ;;  %8107 = vrcp.f32 %v5914_v27  ;;  %v5915_v51 = vadd.f32 1.0, %v8080_v56  ;;  %v4792_v39 = vpop.f32.mrf.mxu0  ;;  %v12598_v29 = vpack.c.bf16 %v11309_v35, %v11297_v60  ;;  %v4126_v61 = vadd.f32 %v12599_v31, %v12596_v40  ;;  %v12602_v40 = vld [vmem:[#allocation17_spill] sm:$0xff] }
 0x469   :  { %v8084_v30 = vpop.eup %8083  ;;  %v11411_v24 = vpop.permute.xlu1 %2226  ;;  %8109 = vpow2.f32 %v5589_v21  ;;  %v5593_v11 = vmul.f32 1.442695, %v5156_v15  ;;  %v5157_v32 = vsub.f32 0.0, %v4791_v55  ;;  %v4793_v19 = vadd.f32 %v4792_v39, %v4120_v63  ;;  %v12601_v55 = vld [vmem:[#allocation40_spill] sm:$0xff] }
 0x46a   :  { %6502 = vmatpush1.bf16.msra.mxu1 %v12598_v29  ;;  %v11416_v62 = vpop.eup %8085  ;;  %8111 = vrcp.f32 %v5915_v51  ;;  %v5916_v2 = vadd.f32 1.0, %v8084_v30  ;;  %v12600_v41 = vpack.c.bf16 %v11289_v33, %v11279_v59  ;;  %v4796_v27 = vpop.f32.mrf.mxu0  ;;  %v4128_v34 = vadd.f32 %v12602_v40, %v12601_v55 }
 0x46b   :  { %v8088_v21 = vpop.eup %8087  ;;  %v11423_v58 = vpop.permute.xlu0 %2211  ;;  %8113 = vpow2.f32 %v5591_v45  ;;  %v5595_v35 = vmul.f32 1.442695, %v5157_v32  ;;  %v5158_v60 = vsub.f32 0.0, %v4793_v19  ;;  %v4797_v56 = vadd.f32 %v4796_v27, %v4124_v22 }
 0x46c   :  { %6503 = vmatprep.subr.bf16.mxu1 %v12600_v41  ;;  %v11425_v63 = vpop.f32.mrf.mxu1  ;;  %v11427_v15 = vpop.eup %8089  ;;  %8115 = vrcp.f32 %v5916_v2  ;;  %v5917_v51 = vadd.f32 1.0, %v8088_v21  ;;  %v12603_v31 = vpack.c.bf16 %v11285_v0, %v11272_v25  ;;  %v12604_v32 = vpack.c.bf16 %v11262_v23, %v11241_v57  ;;  %v12607_v57 = vld [vmem:[#allocation26_spill] sm:$0xff] }
 0x46d   :  { %v4798_v39 = vpop.f32.mrf.mxu0  ;;  %v8092_v59 = vpop.eup %8091  ;;  %8117 = vpow2.f32 %v5593_v11  ;;  %v5597_v33 = vmul.f32 1.442695, %v5158_v60  ;;  %v5159_v30 = vsub.f32 0.0, %v4797_v56  ;;  %v12606_v60 = vld [vmem:[#allocation57_spill] sm:$0xff]  ;;  %v12608_v23 = vld [vmem:[#allocation18_spill] sm:$0xff]  ;;  %v12620_v2 = vpack.c.bf16 %v11170_v10, %v11148_v43 }
 0x46e   :  { %v4799_v29 = vadd.f32 %v4798_v39, %v4126_v61  ;;  %6504 = vmatpush1.bf16.msra.mxu1 %v12603_v31  ;;  %v11434_v45 = vpop.eup %8093  ;;  %8119 = vrcp.f32 %v5917_v51  ;;  %v5918_v22 = vadd.f32 1.0, %v8092_v59  ;;  %v11443_v41 = vpop.permute.xlu1 %2216  ;;  %v4130_v56 = vadd.f32 %v12606_v60, %v12601_v55 }
 0x46f   :  { %6505 = vmatprep.subr.bf16.mxu1 %v12604_v32  ;;  %v4800_v19 = vpop.f32.mrf.mxu0  ;;  %v11441_v11 = vpop.eup %8095  ;;  %8121 = vpow2.f32 %v5595_v35  ;;  %v5599_v25 = vmul.f32 1.442695, %v5159_v30  ;;  %v4134_v40 = vadd.f32 %v12608_v23, %v12607_v57  ;;  %v12610_v32 = vld [vmem:[#allocation41_spill] sm:$0xff]  ;;  %v12611_v60 = vpack.c.bf16 %v11222_v38, %v11198_v53 }
 0x470   :  { %v11445_v61 = vpop.f32.mrf.mxu1  ;;  %v5160_v0 = vsub.f32 0.0, %v4799_v29  ;;  %v4801_v27 = vadd.f32 %v4800_v19, %v4128_v34  ;;  %v8098_v21 = vpop.eup %8097  ;;  %8123 = vrcp.f32 %v5918_v22  ;;  %v12609_v29 = vpack.c.bf16 %v11253_v12, %v11236_v28 }
 0x471   :  { %12605 = vst [vmem:[#allocation59_spill] sm:$0xff] %v11445_v61  ;;  %v4802_v51 = vpop.f32.mrf.mxu0  ;;  %v11453_v59 = vpop.eup %8099  ;;  %v5919_v35 = vadd.f32 1.0, %v8098_v21  ;;  %8125 = vpow2.f32 %v5597_v33  ;;  %v4136_v22 = vadd.f32 %v12610_v32, %v12607_v57  ;;  %v12613_v21 = vld [vmem:[#allocation54_spill] sm:$0xff] }
 0x472   :  { %v11455_v31 = vpop.permute.xlu0 %2201  ;;  %v5601_v30 = vmul.f32 1.442695, %v5160_v0  ;;  %v5161_v34 = vsub.f32 0.0, %v4801_v27  ;;  %6506 = vmatpush1.bf16.msra.mxu1 %v12609_v29  ;;  %v8102_v55 = vpop.eup %8101  ;;  %8127 = vpow2.f32 %v5599_v25  ;;  %v4803_v19 = vadd.f32 %v4802_v51, %v4130_v56  ;;  %v12614_v29 = vld [vmem:[#allocation58_spill] sm:$0xff] }
 0x473   :  { %6507 = vmatprep.subr.bf16.mxu1 %v12611_v60  ;;  %v4806_v23 = vpop.f32.mrf.mxu0  ;;  %v11465_v36 = vpop.eup %8103  ;;  %8129 = vrcp.f32 %v5919_v35  ;;  %v5920_v0 = vadd.f32 1.0, %v8102_v55  ;;  %v4138_v4 = vadd.f32 %v12614_v29, %v12613_v21  ;;  %v12617_v60 = vpack.c.bf16 %v11181_v6, %v11159_v50 }
 0x474   :  { %v11467_v33 = vpop.f32.mrf.mxu1  ;;  %v5603_v27 = vmul.f32 1.442695, %v5161_v34  ;;  %v4807_v28 = vadd.f32 %v4806_v23, %v4134_v40  ;;  %v8106_v12 = vpop.eup %8105  ;;  %8131 = vpow2.f32 %v5601_v30  ;;  %v5162_v25 = vsub.f32 0.0, %v4803_v19  ;;  %v12616_v30 = vld [vmem:[#allocation20_spill] sm:$0xff] }
 0x475   :  { %12612 = vst [vmem:[#allocation71_spill] sm:$0xff] %v11467_v33  ;;  %v4808_v56 = vpop.f32.mrf.mxu0  ;;  %v11473_v38 = vpop.eup %8107  ;;  %8133 = vrcp.f32 %v5920_v0  ;;  %v5921_v51 = vadd.f32 1.0, %v8106_v12  ;;  %v12615_v40 = vpack.c.bf16 %v11212_v52, %v11188_v5  ;;  %v4140_v32 = vadd.f32 %v12616_v30, %v12613_v21 }
 0x476   :  { %v11475_v57 = vpop.permute.xlu1 %2206  ;;  %v5163_v35 = vsub.f32 0.0, %v4807_v28  ;;  %v4809_v55 = vadd.f32 %v4808_v56, %v4136_v22  ;;  %v8110_v34 = vpop.eup %8109  ;;  %8135 = vpow2.f32 %v5603_v27  ;;  %v5605_v19 = vmul.f32 1.442695, %v5162_v25  ;;  %v12619_v27 = vld [vmem:[#allocation42_spill] sm:$0xff] }
 0x477   :  { %6508 = vmatpush1.bf16.msra.mxu1 %v12615_v40  ;;  %v4810_v23 = vpop.f32.mrf.mxu0  ;;  %v11487_v28 = vpop.eup %8111  ;;  %8137 = vrcp.f32 %v5921_v51  ;;  %v5922_v5 = vadd.f32 1.0, %v8110_v34  ;;  %v12621_v34 = vld [vmem:[#allocation55_spill] sm:$0xff] }
 0x478   :  { %6509 = vmatprep.subr.bf16.mxu1 %v12617_v60  ;;  %v2192_v22 = vpop.permute.xlu0 %2191  ;;  %v11489_v12 = vpop.f32.mrf.mxu1  ;;  %v5607_v52 = vmul.f32 1.442695, %v5163_v35  ;;  %v5164_v29 = vsub.f32 0.0, %v4809_v55  ;;  %8139 = vpow2.f32 %v5605_v19  ;;  %v4811_v56 = vadd.f32 %v4810_v23, %v4138_v4 }
 0x479   :  { %12618 = vst [vmem:[#allocation72_spill] sm:$0xff] %v11489_v12  ;;  %v8114_v21 = vpop.eup %8113  ;;  %v4144_v25 = vadd.f32 %v12619_v27, %v2192_v22  ;;  %v4812_v50 = vpop.f32.mrf.mxu0  ;;  %8141 = vrcp.f32 %v5922_v5  ;;  %v4146_v35 = vadd.f32 %v12621_v34, %v2192_v22  ;;  %v12622_v19 = vpack.c.bf16 %v11135_v54, %v11115_v7 }
 0x47a   :  { %v11492_v6 = vpop.eup %8115  ;;  %v5923_v40 = vadd.f32 1.0, %v8114_v21  ;;  %v5609_v30 = vmul.f32 1.442695, %v5164_v29  ;;  %v4813_v60 = vadd.f32 %v4812_v50, %v4140_v32  ;;  %8143 = vpow2.f32 %v5607_v52  ;;  %v2197_v5 = vpop.permute.xlu1 %2196 }
 0x47b   :  { %6510 = vmatpush1.bf16.msra.mxu1 %v12620_v2  ;;  %v8118_v51 = vpop.eup %8117  ;;  %v5165_v55 = vsub.f32 0.0, %v4811_v56  ;;  %v4816_v4 = vpop.f32.mrf.mxu0  ;;  %v12624_v2 = vld [vmem:[#allocation19_spill] sm:$0xff] }
 0x47c   :  { %6511 = vmatprep.subr.bf16.mxu1 %v12622_v19  ;;  %v11501_v23 = vpop.eup %8119  ;;  %v11503_v21 = vpop.f32.mrf.mxu1  ;;  %8145 = vrcp.f32 %v5923_v40  ;;  %v5924_v32 = vadd.f32 1.0, %v8118_v51  ;;  %v5166_v29 = vsub.f32 0.0, %v4813_v60  ;;  %v4817_v43 = vadd.f32 %v4816_v4, %v4144_v25  ;;  %v12626_v60 = vld [vmem:[#allocation37_spill] sm:$0xff] }
 0x47d   :  { %12623 = vst [vmem:[#allocation73_spill] sm:$0xff] %v11503_v21  ;;  %v8122_v10 = vpop.eup %8121  ;;  %v4148_v27 = vadd.f32 %v12624_v2, %v2197_v5  ;;  %8147 = vpow2.f32 %v5609_v30  ;;  %v5611_v22 = vmul.f32 1.442695, %v5165_v55  ;;  %v4818_v52 = vpop.f32.mrf.mxu0  ;;  %v12625_v40 = vpack.c.bf16 %v11124_v16, %v11107_v8 }
 0x47e   :  { %v11508_v54 = vpop.eup %8123  ;;  %8149 = vrcp.f32 %v5924_v32  ;;  %v5925_v56 = vadd.f32 1.0, %v8122_v10  ;;  %v5613_v50 = vmul.f32 1.442695, %v5166_v29  ;;  %v5167_v34 = vsub.f32 0.0, %v4817_v43  ;;  %v11516_v2 = vpop.f32.mrf.mxu1 }
 0x47f   :  { %6512 = vmatpush1.bf16.msra.mxu1 %v12625_v40  ;;  %v8126_v25 = vpop.eup %8125  ;;  %v4150_v51 = vadd.f32 %v12626_v60, %v2197_v5  ;;  %8151 = vpow2.f32 %v5611_v22  ;;  %v4819_v30 = vadd.f32 %v4818_v52, %v4146_v35  ;;  %v4820_v55 = vpop.f32.mrf.mxu0  ;;  %12627 = vst [vmem:[#allocation74_spill] sm:$0xff] %v11516_v2  ;;  %v12628_v35 = vld [vmem:[#allocation27_spill] sm:$0xff] }
 0x480   :  { %v8128_v4 = vpop.eup %8127  ;;  %8153 = vrcp.f32 %v5925_v56  ;;  %v5926_v32 = vadd.f32 1.0, %v8126_v25  ;;  %v5615_v29 = vmul.f32 1.442695, %v5167_v34  ;;  %v4821_v43 = vadd.f32 %v4820_v55, %v4148_v27  ;;  %v12629_v56 = vld [vmem:[#allocation56_spill] sm:$0xff] }
 0x481   :  { %v11518_v10 = vpop.eup %8129  ;;  %v5927_v8 = vadd.f32 1.0, %v8128_v4  ;;  %8155 = vpow2.f32 %v5613_v50  ;;  %v5168_v16 = vsub.f32 0.0, %v4819_v30  ;;  %v4822_v40 = vpop.f32.mrf.mxu0  ;;  %v4154_v22 = vadd.f32 %v12628_v35, %v11455_v31 }
 0x482   :  { %v8132_v5 = vpop.eup %8131  ;;  %8157 = vrcp.f32 %v5926_v32  ;;  %v5169_v52 = vsub.f32 0.0, %v4821_v43  ;;  %v4823_v60 = vadd.f32 %v4822_v40, %v4150_v51  ;;  %v4156_v25 = vadd.f32 %v12629_v56, %v11455_v31  ;;  %v11526_v50 = vpop.f32.mrf.mxu1  ;;  %v12631_v51 = vld [vmem:[#allocation24_spill] sm:$0xff] }
 0x483   :  { %v11522_v39 = vpop.eup %8133  ;;  %8159 = vrcp.f32 %v5927_v8  ;;  %v5928_v27 = vadd.f32 1.0, %v8132_v5  ;;  %v5617_v34 = vmul.f32 1.442695, %v5168_v16  ;;  %v4826_v55 = vpop.f32.mrf.mxu0  ;;  %12630 = vst [vmem:[#allocation22_spill] sm:$0xff] %v11526_v50  ;;  %v4158_v32 = vadd.f32 %v12631_v51, %v11475_v57 }
 0x484   :  { %v8136_v4 = vpop.eup %8135  ;;  %8161 = vpow2.f32 %v5615_v29  ;;  %v5619_v30 = vmul.f32 1.442695, %v5169_v52  ;;  %v5170_v53 = vsub.f32 0.0, %v4823_v60  ;;  %v4827_v0 = vadd.f32 %v4826_v55, %v4154_v22  ;;  %v12632_v29 = vld [vmem:[#allocation25_spill] sm:$0xff] }
 0x485   :  { %v11528_v35 = vpop.eup %8137  ;;  %8163 = vrcp.f32 %v5928_v27  ;;  %v5929_v43 = vadd.f32 1.0, %v8136_v4  ;;  %v4828_v40 = vpop.f32.mrf.mxu0  ;;  %v4160_v52 = vadd.f32 %v12632_v29, %v11475_v57 }
 0x486   :  { %v8140_v31 = vpop.eup %8139  ;;  %8165 = vpow2.f32 %v5617_v34  ;;  %v5621_v8 = vmul.f32 1.442695, %v5170_v53  ;;  %v5171_v16 = vsub.f32 0.0, %v4827_v0  ;;  %v4829_v5 = vadd.f32 %v4828_v40, %v4156_v25  ;;  %v11538_v27 = vpop.f32.mrf.mxu1  ;;  %v12634_v25 = vld [vmem:[#allocation53_spill] sm:$0xff] }
 0x487   :  { %v11532_v56 = vpop.eup %8141  ;;  %8167 = vrcp.f32 %v5929_v43  ;;  %v5930_v22 = vadd.f32 1.0, %v8140_v31  ;;  %v4830_v60 = vpop.f32.mrf.mxu0  ;;  %12633 = vst [vmem:[#allocation36_spill] sm:$0xff] %v11538_v27  ;;  %v4164_v40 = vadd.f32 %v12634_v25, %v11423_v58 }
 0x488   :  { %v8144_v51 = vpop.eup %8143  ;;  %8169 = vpow2.f32 %v5619_v30  ;;  %v5623_v4 = vmul.f32 1.442695, %v5171_v16  ;;  %v5172_v34 = vsub.f32 0.0, %v4829_v5  ;;  %v4831_v53 = vadd.f32 %v4830_v60, %v4158_v32  ;;  %v12635_v32 = vld [vmem:[#allocation30_spill] sm:$0xff] }
 0x489   :  { %v11540_v0 = vpop.eup %8145  ;;  %8171 = vrcp.f32 %v5930_v22  ;;  %v5931_v57 = vadd.f32 1.0, %v8144_v51  ;;  %v4832_v43 = vpop.f32.mrf.mxu0  ;;  %v4166_v16 = vadd.f32 %v12635_v32, %v11423_v58 }
 0x48a   :  { %v8148_v29 = vpop.eup %8147  ;;  %8173 = vpow2.f32 %v5621_v8  ;;  %v5625_v7 = vmul.f32 1.442695, %v5172_v34  ;;  %v5173_v19 = vsub.f32 0.0, %v4831_v53  ;;  %v4833_v55 = vadd.f32 %v4832_v43, %v4160_v52  ;;  %v11550_v22 = vpop.f32.mrf.mxu1  ;;  %v12637_v8 = vld [vmem:[#allocation29_spill] sm:$0xff] }
 0x48b   :  { %v11546_v30 = vpop.eup %8149  ;;  %8175 = vrcp.f32 %v5931_v57  ;;  %v5932_v5 = vadd.f32 1.0, %v8148_v29  ;;  %v4836_v60 = vpop.f32.mrf.mxu0  ;;  %12636 = vst [vmem:[#allocation9_spill] sm:$0xff] %v11550_v22  ;;  %v4168_v52 = vadd.f32 %v12637_v8, %v11443_v41 }
 0x48c   :  { %v8152_v25 = vpop.eup %8151  ;;  %8177 = vpow2.f32 %v5623_v4  ;;  %v5627_v51 = vmul.f32 1.442695, %v5173_v19  ;;  %v5174_v27 = vsub.f32 0.0, %v4833_v55  ;;  %v4837_v31 = vadd.f32 %v4836_v60, %v4164_v40  ;;  %v11556_v58 = vpop.permute.xlu0 %2341 }
 0x48d   :  { %v11552_v50 = vpop.eup %8153  ;;  %8179 = vrcp.f32 %v5932_v5  ;;  %v5933_v34 = vadd.f32 1.0, %v8152_v25  ;;  %v4838_v53 = vpop.f32.mrf.mxu0  ;;  %12638 = vst [vmem:[#allocation76_spill] sm:$0xff] %v11556_v58 }
 0x48e   :  { %v8156_v43 = vpop.eup %8155  ;;  %8181 = vpow2.f32 %v5625_v7  ;;  %v5629_v57 = vmul.f32 1.442695, %v5174_v27  ;;  %v5175_v29 = vsub.f32 0.0, %v4837_v31  ;;  %v4839_v32 = vadd.f32 %v4838_v53, %v4166_v16  ;;  %v11564_v5 = vpop.permute.xlu1 %2346  ;;  %v12641_v16 = vld [vmem:[#allocation34_spill] sm:$0xff] }
 0x48f   :  { %v11558_v22 = vpop.eup %8157  ;;  %8183 = vrcp.f32 %v5933_v34  ;;  %v5934_v19 = vadd.f32 1.0, %v8156_v43  ;;  %v4840_v55 = vpop.f32.mrf.mxu0  ;;  %12639 = vst [vmem:[#allocation13_spill] sm:$0xff] %v11564_v5  ;;  %v4170_v8 = vadd.f32 %v12641_v16, %v11443_v41  ;;  %v12642_v34 = vld [vmem:[#allocation38_spill] sm:$0xff] }
 0x490   :  { %v11562_v40 = vpop.eup %8159  ;;  %v11566_v60 = vpop.f32.mrf.mxu1  ;;  %8185 = vpow2.f32 %v5627_v51  ;;  %v5631_v25 = vmul.f32 1.442695, %v5175_v29  ;;  %v5176_v7 = vsub.f32 0.0, %v4839_v32  ;;  %v4841_v27 = vadd.f32 %v4840_v55, %v4168_v52  ;;  %v12643_v52 = vld [vmem:[#allocation39_spill] sm:$0xff] }
 0x491   :  { %12640 = vst [vmem:[#allocation31_spill] sm:$0xff] %v11566_v60  ;;  %v8162_v31 = vpop.eup %8161  ;;  %v4174_v53 = vadd.f32 %v12642_v34, %v11392_v3  ;;  %8187 = vrcp.f32 %v5934_v19  ;;  %v4842_v43 = vpop.f32.mrf.mxu0  ;;  %v4176_v55 = vadd.f32 %v12643_v52, %v11392_v3 }
 0x492   :  { %v11574_v58 = vpop.eup %8163  ;;  %v5935_v5 = vadd.f32 1.0, %v8162_v31  ;;  %8189 = vpow2.f32 %v5629_v57  ;;  %v5633_v51 = vmul.f32 1.442695, %v5176_v7  ;;  %v5177_v29 = vsub.f32 0.0, %v4841_v27  ;;  %v11580_v19 = vpop.permute.xlu0 %2331  ;;  %v12646_v7 = vld [vmem:[#allocation60_spill] sm:$0xff] }
 0x493   :  { %v8166_v32 = vpop.eup %8165  ;;  %8191 = vpow2.f32 %v5631_v25  ;;  %v4843_v41 = vadd.f32 %v4842_v43, %v4170_v8  ;;  %v4846_v16 = vpop.f32.mrf.mxu0  ;;  %12644 = vst [vmem:[#allocation43_spill] sm:$0xff] %v11580_v19  ;;  %v4178_v27 = vadd.f32 %v12646_v7, %v11411_v24 }
 0x494   :  { %v11578_v60 = vpop.eup %8167  ;;  %v11582_v34 = vpop.f32.mrf.mxu1  ;;  %8193 = vrcp.f32 %v5935_v5  ;;  %v5936_v4 = vadd.f32 1.0, %v8166_v32  ;;  %v5635_v2 = vmul.f32 1.442695, %v5177_v29  ;;  %v4847_v31 = vadd.f32 %v4846_v16, %v4174_v53  ;;  %v12648_v53 = vld [vmem:[#allocation61_spill] sm:$0xff] }
 0x495   :  { %12645 = vst [vmem:[#allocation28_spill] sm:$0xff] %v11582_v34  ;;  %v8170_v57 = vpop.eup %8169  ;;  %8195 = vpow2.f32 %v5633_v51  ;;  %v5178_v21 = vsub.f32 0.0, %v4843_v41  ;;  %v4848_v3 = vpop.f32.mrf.mxu0  ;;  %v4180_v16 = vadd.f32 %v12648_v53, %v11411_v24 }
 0x496   :  { %v11588_v8 = vpop.eup %8171  ;;  %v11590_v43 = vpop.permute.xlu1 %2336  ;;  %8197 = vrcp.f32 %v5936_v4  ;;  %v5937_v52 = vadd.f32 1.0, %v8170_v57  ;;  %v5179_v5 = vsub.f32 0.0, %v4847_v31  ;;  %v4849_v32 = vadd.f32 %v4848_v3, %v4176_v55  ;;  %v12650_v55 = vld [vmem:[#allocation62_spill] sm:$0xff] }
 0x497   :  { %12647 = vst [vmem:[#allocation15_spill] sm:$0xff] %v11590_v43  ;;  %v8174_v29 = vpop.eup %8173  ;;  %8199 = vpow2.f32 %v5635_v2  ;;  %v5637_v7 = vmul.f32 1.442695, %v5178_v21  ;;  %v4850_v51 = vpop.f32.mrf.mxu0  ;;  %v4184_v3 = vadd.f32 %v12650_v55, %v11368_v18 }
 0x498   :  { %v11596_v19 = vpop.eup %8175  ;;  %v11598_v25 = vpop.f32.mrf.mxu1  ;;  %8201 = vrcp.f32 %v5937_v52  ;;  %v5938_v43 = vadd.f32 1.0, %v8174_v29  ;;  %v5639_v4 = vmul.f32 1.442695, %v5179_v5  ;;  %v5180_v57 = vsub.f32 0.0, %v4849_v32  ;;  %v12651_v52 = vld [vmem:[#allocation63_spill] sm:$0xff] }
 0x499   :  { %12649 = vst [vmem:[#allocation33_spill] sm:$0xff] %v11598_v25  ;;  %v8178_v31 = vpop.eup %8177  ;;  %8203 = vpow2.f32 %v5637_v7  ;;  %v4851_v24 = vadd.f32 %v4850_v51, %v4178_v27  ;;  %v4852_v2 = vpop.f32.mrf.mxu0  ;;  %v4186_v29 = vadd.f32 %v12651_v52, %v11368_v18 }
 0x49a   :  { %v8180_v21 = vpop.eup %8179  ;;  %v11602_v53 = vpop.permute.xlu0 %2321  ;;  %8205 = vrcp.f32 %v5938_v43  ;;  %v5939_v41 = vadd.f32 1.0, %v8178_v31  ;;  %v5641_v34 = vmul.f32 1.442695, %v5180_v57  ;;  %v4853_v12 = vadd.f32 %v4852_v2, %v4180_v16 }
 0x49b   :  { %v8182_v33 = vpop.eup %8181  ;;  %8207 = vpow2.f32 %v5639_v4  ;;  %v5181_v5 = vsub.f32 0.0, %v4851_v24  ;;  %v4856_v32 = vpop.f32.mrf.mxu0  ;;  %v4188_v16 = vadd.f32 %v11105_v13, %v11382_v9 }
 0x49c   :  { %v8184_v25 = vpop.eup %8183  ;;  %v11606_v61 = vpop.permute.xlu1 %2326  ;;  %8209 = vrcp.f32 %v5939_v41  ;;  %v5940_v27 = vadd.f32 1.0, %v8182_v33  ;;  %v5182_v51 = vsub.f32 0.0, %v4853_v12  ;;  %v4857_v55 = vadd.f32 %v4856_v32, %v4184_v3 }
 0x49d   :  { %12652 = vst [vmem:[#allocation23_spill] sm:$0xff] %v11606_v61  ;;  %v11608_v7 = vpop.f32.mrf.mxu1  ;;  %v8186_v43 = vpop.eup %8185  ;;  %8211 = vpow2.f32 %v5641_v34  ;;  %v5643_v57 = vmul.f32 1.442695, %v5181_v5  ;;  %v6353_v18 = vpack.c.bf16 %v8184_v25, %v11596_v19  ;;  %v4190_v33 = vadd.f32 %v11113_v48, %v11382_v9 }
 0x49e   :  { %v4858_v31 = vpop.f32.mrf.mxu0  ;;  %v8188_v4 = vpop.eup %8187  ;;  %8213 = vrcp.f32 %v5940_v27  ;;  %v5941_v24 = vadd.f32 1.0, %v8186_v43  ;;  %v5645_v2 = vmul.f32 1.442695, %v5182_v51  ;;  %v5183_v52 = vsub.f32 0.0, %v4857_v55 }
 0x49f   :  { %v8190_v61 = vpop.eup %8189  ;;  %8215 = vpow2.f32 %v5643_v57  ;;  %v4859_v12 = vadd.f32 %v4858_v31, %v4186_v29  ;;  %v6354_v3 = vpack.c.bf16 %v8188_v4, %v8180_v21  ;;  %v11615_v13 = vpop.permute.xlu0 %2311  ;;  %v12654_v21 = vld [vmem:[#allocation51_spill] sm:$0xff] }
 0x4a0   :  { %v4860_v41 = vpop.f32.mrf.mxu0  ;;  %v8192_v32 = vpop.eup %8191  ;;  %8217 = vrcp.f32 %v5941_v24  ;;  %v5942_v19 = vadd.f32 1.0, %v8190_v61  ;;  %v5647_v25 = vmul.f32 1.442695, %v5183_v52  ;;  %v4194_v43 = vadd.f32 %v12654_v21, %v11355_v47 }
 0x4a1   :  { %v11617_v34 = vpop.f32.mrf.mxu1  ;;  %v4861_v5 = vadd.f32 %v4860_v41, %v4188_v16  ;;  %v11619_v27 = vpop.eup %8193  ;;  %v5943_v51 = vadd.f32 1.0, %v8192_v32  ;;  %8219 = vpow2.f32 %v5645_v2  ;;  %v5184_v55 = vsub.f32 0.0, %v4859_v12  ;;  %6513 = vmatprep.subr.bf16.mxu1 %v6354_v3  ;;  %v12655_v16 = vld [vmem:[#allocation52_spill] sm:$0xff] }
 0x4a2   :  { %12653 = vst [vmem:[#allocation16_spill] sm:$0xff] %v11619_v27  ;;  %v4862_v48 = vpop.f32.mrf.mxu0  ;;  %v8196_v9 = vpop.eup %8195  ;;  %8221 = vrcp.f32 %v5942_v19  ;;  %6514 = vmatpush2.bf16.msra.mxu1 %v6353_v18  ;;  %v4196_v4 = vadd.f32 %v12655_v16, %v11355_v47  ;;  %v12656_v52 = vpack.c.bf16 %v11588_v8, %v11574_v58 }
 0x4a3   :  { %v11621_v29 = vpop.permute.xlu1 %2316  ;;  %v5185_v57 = vsub.f32 0.0, %v4861_v5  ;;  %v4863_v31 = vadd.f32 %v4862_v48, %v4190_v33  ;;  %v11625_v61 = vpop.eup %8197  ;;  %8223 = vrcp.f32 %v5943_v51  ;;  %v5944_v24 = vadd.f32 1.0, %v8196_v9  ;;  %v12657_v5 = vld [vmem:[#allocation64_spill] sm:$0xff] }
 0x4a4   :  { %v5649_v2 = vmul.f32 1.442695, %v5184_v55  ;;  %6515 = vmatprep.subr.bf16.mxu1 %v12656_v52  ;;  %v4866_v12 = vpop.f32.mrf.mxu0  ;;  %v8200_v41 = vpop.eup %8199  ;;  %8225 = vpow2.f32 %v5647_v25  ;;  %v4198_v47 = vadd.f32 %v12657_v5, %v11364_v42  ;;  %v12658_v25 = vpack.c.bf16 %v11578_v60, %v11562_v40  ;;  %v12662_v5 = vld [vmem:[#allocation65_spill] sm:$0xff] }
 0x4a5   :  { %v11632_v3 = vpop.f32.mrf.mxu1  ;;  %v5651_v32 = vmul.f32 1.442695, %v5185_v57  ;;  %v5186_v33 = vsub.f32 0.0, %v4863_v31  ;;  %v4867_v18 = vadd.f32 %v4866_v12, %v4194_v43  ;;  %v11634_v19 = vpop.eup %8201  ;;  %8227 = vrcp.f32 %v5944_v24  ;;  %v12659_v57 = vld [vmem:[#allocation49_spill] sm:$0xff] }
 0x4a6   :  { %v5945_v51 = vadd.f32 1.0, %v8200_v41  ;;  %v4868_v55 = vpop.f32.mrf.mxu0  ;;  %v8204_v48 = vpop.eup %8203  ;;  %8229 = vpow2.f32 %v5649_v2  ;;  %6516 = vmatpush2.bf16.msra.mxu1 %v12658_v25  ;;  %v4200_v31 = vadd.f32 %v12659_v57, %v11364_v42  ;;  %v12660_v24 = vpack.c.bf16 %v11558_v22, %v11546_v30 }
 0x4a7   :  { %v11638_v9 = vpop.permute.xlu0 %2301  ;;  %v5653_v58 = vmul.f32 1.442695, %v5186_v33  ;;  %v5187_v8 = vsub.f32 0.0, %v4867_v18  ;;  %v4869_v21 = vadd.f32 %v4868_v55, %v4196_v4  ;;  %v11643_v43 = vpop.eup %8205  ;;  %v5946_v16 = vadd.f32 1.0, %v8204_v48  ;;  %v12661_v18 = vld [vmem:[#allocation69_spill] sm:$0xff] }
 0x4a8   :  { %8231 = vrcp.f32 %v5945_v51  ;;  %6517 = vmatprep.subr.bf16.mxu1 %v12660_v24  ;;  %v4870_v52 = vpop.f32.mrf.mxu0  ;;  %v8208_v4 = vpop.eup %8207  ;;  %v4204_v51 = vadd.f32 %v12662_v5, %v12661_v18 }
 0x4a9   :  { %v11652_v12 = vpop.permute.xlu1 %2306  ;;  %v11654_v40 = vpop.f32.mrf.mxu1  ;;  %8233 = vpow2.f32 %v5651_v32  ;;  %v5655_v60 = vmul.f32 1.442695, %v5187_v8  ;;  %v5188_v41 = vsub.f32 0.0, %v4869_v21  ;;  %v4871_v33 = vadd.f32 %v4870_v52, %v4198_v47  ;;  %v12664_v8 = vld [vmem:[#allocation50_spill] sm:$0xff] }
 0x4aa   :  { %v11656_v42 = vpop.eup %8209  ;;  %8235 = vrcp.f32 %v5946_v16  ;;  %v5947_v30 = vadd.f32 1.0, %v8208_v4  ;;  %v4872_v22 = vpop.f32.mrf.mxu0  ;;  %v12663_v32 = vpack.c.bf16 %v11552_v50, %v11540_v0  ;;  %v4206_v21 = vadd.f32 %v12664_v8, %v12661_v18  ;;  %v12667_v18 = vld [vmem:[#allocation44_spill] sm:$0xff] }
 0x4ab   :  { %v8212_v48 = vpop.eup %8211  ;;  %8237 = vpow2.f32 %v5653_v58  ;;  %v5657_v25 = vmul.f32 1.442695, %v5188_v41  ;;  %v5189_v57 = vsub.f32 0.0, %v4871_v33  ;;  %v4873_v24 = vadd.f32 %v4872_v22, %v4200_v31  ;;  %v11672_v41 = vpop.permute.xlu0 %2291  ;;  %v12666_v22 = vld [vmem:[#allocation10_spill] sm:$0xff] }
 0x4ac   :  { %6518 = vmatpush2.bf16.msra.mxu1 %v12663_v32  ;;  %v11665_v47 = vpop.eup %8213  ;;  %8239 = vrcp.f32 %v5947_v30  ;;  %v5948_v16 = vadd.f32 1.0, %v8212_v48  ;;  %v12665_v52 = vpack.c.bf16 %v11532_v56, %v11522_v39  ;;  %v4876_v4 = vpop.f32.mrf.mxu0  ;;  %v4208_v30 = vadd.f32 %v12667_v18, %v12666_v22 }
 0x4ad   :  { %v8216_v58 = vpop.eup %8215  ;;  %v11674_v31 = vpop.f32.mrf.mxu1  ;;  %8241 = vpow2.f32 %v5655_v60  ;;  %v5659_v50 = vmul.f32 1.442695, %v5189_v57  ;;  %v5190_v0 = vsub.f32 0.0, %v4873_v24  ;;  %v4877_v33 = vadd.f32 %v4876_v4, %v4204_v51 }
 0x4ae   :  { %6519 = vmatprep.subr.bf16.mxu1 %v12665_v52  ;;  %v11676_v5 = vpop.eup %8217  ;;  %8243 = vrcp.f32 %v5948_v16  ;;  %v5949_v48 = vadd.f32 1.0, %v8216_v58  ;;  %v4878_v32 = vpop.f32.mrf.mxu0  ;;  %v12668_v60 = vpack.c.bf16 %v11528_v35, %v11518_v10  ;;  %v12669_v24 = vpack.c.bf16 %v11508_v54, %v11492_v6 }
 0x4af   :  { %v8220_v39 = vpop.eup %8219  ;;  %v11680_v56 = vpop.permute.xlu1 %2296  ;;  %8245 = vpow2.f32 %v5657_v25  ;;  %v5661_v8 = vmul.f32 1.442695, %v5190_v0  ;;  %v5191_v52 = vsub.f32 0.0, %v4877_v33  ;;  %v4879_v2 = vadd.f32 %v4878_v32, %v4206_v21  ;;  %v12670_v33 = vld [vmem:[#allocation11_spill] sm:$0xff]  ;;  %v12672_v32 = vld [vmem:[#allocation66_spill] sm:$0xff] }
 0x4b0   :  { %6520 = vmatpush2.bf16.msra.mxu1 %v12668_v60  ;;  %v11685_v51 = vpop.eup %8221  ;;  %8247 = vrcp.f32 %v5949_v48  ;;  %v5950_v57 = vadd.f32 1.0, %v8220_v39  ;;  %v4880_v16 = vpop.f32.mrf.mxu0  ;;  %v4210_v18 = vadd.f32 %v12670_v33, %v12666_v22  ;;  %v12671_v48 = vld [vmem:[#allocation68_spill] sm:$0xff] }
 0x4b1   :  { %6521 = vmatprep.subr.bf16.mxu1 %v12669_v24  ;;  %v11692_v25 = vpop.eup %8223  ;;  %v11694_v58 = vpop.f32.mrf.mxu1  ;;  %8249 = vpow2.f32 %v5659_v50  ;;  %v5663_v21 = vmul.f32 1.442695, %v5191_v52  ;;  %v5192_v10 = vsub.f32 0.0, %v4879_v2  ;;  %v4881_v35 = vadd.f32 %v4880_v16, %v4208_v30  ;;  %v12674_v16 = vld [vmem:[#allocation47_spill] sm:$0xff] }
 0x4b2   :  { %v8226_v0 = vpop.eup %8225  ;;  %v4214_v6 = vadd.f32 %v12672_v32, %v12671_v48  ;;  %8251 = vrcp.f32 %v5950_v57  ;;  %v4882_v54 = vpop.f32.mrf.mxu0  ;;  %v12673_v52 = vpack.c.bf16 %v11501_v23, %v11487_v28  ;;  %v4216_v57 = vadd.f32 %v12674_v16, %v12671_v48  ;;  %v12677_v48 = vld [vmem:[#allocation32_spill] sm:$0xff] }
 0x4b3   :  { %v11702_v60 = vpop.eup %8227  ;;  %v11704_v24 = vpop.permute.xlu0 %2281  ;;  %v5951_v50 = vadd.f32 1.0, %v8226_v0  ;;  %8253 = vpow2.f32 %v5661_v8  ;;  %v5665_v2 = vmul.f32 1.442695, %v5192_v10  ;;  %v5193_v30 = vsub.f32 0.0, %v4881_v35 }
 0x4b4   :  { %6522 = vmatpush2.bf16.msra.mxu1 %v12673_v52  ;;  %v8230_v22 = vpop.eup %8229  ;;  %8255 = vpow2.f32 %v5663_v21  ;;  %v4883_v33 = vadd.f32 %v4882_v54, %v4210_v18  ;;  %v12675_v32 = vpack.c.bf16 %v11473_v38, %v11453_v59  ;;  %v4886_v55 = vpop.f32.mrf.mxu0  ;;  %v12676_v52 = vld [vmem:[#allocation21_spill] sm:$0xff] }
 0x4b5   :  { %v11714_v4 = vpop.eup %8231  ;;  %v11716_v8 = vpop.permute.xlu1 %2286  ;;  %8257 = vrcp.f32 %v5951_v50  ;;  %v5952_v28 = vadd.f32 1.0, %v8230_v22  ;;  %v5667_v23 = vmul.f32 1.442695, %v5193_v30  ;;  %v4887_v35 = vadd.f32 %v4886_v55, %v4214_v6  ;;  %v12679_v6 = vld [vmem:[#allocation12_spill] sm:$0xff] }
 0x4b6   :  { %6523 = vmatprep.subr.bf16.mxu1 %v12675_v32  ;;  %v11718_v10 = vpop.f32.mrf.mxu1  ;;  %v8234_v0 = vpop.eup %8233  ;;  %v4218_v21 = vadd.f32 %v12677_v48, %v12676_v52  ;;  %8259 = vpow2.f32 %v5665_v2  ;;  %v5194_v18 = vsub.f32 0.0, %v4883_v33  ;;  %v12678_v50 = vpack.c.bf16 %v11465_v36, %v11441_v11 }
 0x4b7   :  { %v4888_v54 = vpop.f32.mrf.mxu0  ;;  %v11724_v38 = vpop.eup %8235  ;;  %8261 = vrcp.f32 %v5952_v28  ;;  %v5953_v16 = vadd.f32 1.0, %v8234_v0  ;;  %v5195_v32 = vsub.f32 0.0, %v4887_v35  ;;  %v4220_v30 = vadd.f32 %v12679_v6, %v12676_v52 }
 0x4b8   :  { %v4889_v39 = vadd.f32 %v4888_v54, %v4216_v57  ;;  %6524 = vmatpush2.bf16.msra.mxu1 %v12678_v50  ;;  %v8238_v55 = vpop.eup %8237  ;;  %8263 = vpow2.f32 %v5667_v23  ;;  %v5669_v2 = vmul.f32 1.442695, %v5194_v18  ;;  %v12680_v22 = vpack.c.bf16 %v11434_v45, %v11416_v62  ;;  %v2272_v57 = vpop.permute.xlu0 %2271  ;;  %v12681_v23 = vld [vmem:[#allocation67_spill] sm:$0xff] }
 0x4b9   :  { %v4890_v33 = vpop.f32.mrf.mxu0  ;;  %v11736_v35 = vpop.eup %8239  ;;  %8265 = vrcp.f32 %v5953_v16  ;;  %v5954_v36 = vadd.f32 1.0, %v8238_v55  ;;  %v5671_v11 = vmul.f32 1.442695, %v5195_v32  ;;  %v4224_v18 = vadd.f32 %v12681_v23, %v2272_v57  ;;  %v12684_v32 = vld [vmem:[#allocation35_spill] sm:$0xff]  ;;  %v12685_v23 = vld [vmem:[#allocation48_spill] sm:$0xff] }
 0x4ba   :  { %6525 = vmatprep.subr.bf16.mxu1 %v12680_v22  ;;  %v11738_v0 = vpop.f32.mrf.mxu1  ;;  %v5196_v48 = vsub.f32 0.0, %v4889_v39  ;;  %v8242_v52 = vpop.eup %8241  ;;  %8267 = vpow2.f32 %v5669_v2  ;;  %v4891_v54 = vadd.f32 %v4890_v33, %v4218_v21  ;;  %v12682_v28 = vpack.c.bf16 %v11427_v15, %v11405_v26 }
 0x4bb   :  { %v4892_v62 = vpop.f32.mrf.mxu0  ;;  %v11741_v45 = vpop.eup %8243  ;;  %8269 = vrcp.f32 %v5954_v36  ;;  %v5955_v6 = vadd.f32 1.0, %v8242_v52  ;;  %v4226_v55 = vadd.f32 %v12684_v32, %v2272_v57  ;;  %v12686_v33 = vpack.c.bf16 %v11397_v37, %v11378_v49 }
 0x4bc   :  { %v2277_v50 = vpop.permute.xlu1 %2276  ;;  %v5673_v22 = vmul.f32 1.442695, %v5196_v48  ;;  %v4893_v59 = vadd.f32 %v4892_v62, %v4220_v30  ;;  %6526 = vmatpush2.bf16.msra.mxu1 %v12682_v28  ;;  %v11746_v16 = vpop.f32.mrf.mxu1  ;;  %8271 = vpow2.f32 %v5671_v11  ;;  %v5197_v21 = vsub.f32 0.0, %v4891_v54  ;;  %v8440_v11 = vld [vmem:[%s12001_s5 + $0x10] sm:$0xff] }
 0x4bd   :  { %12683 = vst [vmem:[#allocation40_spill] sm:$0xff] %v11746_v16  ;;  %v8246_v39 = vpop.eup %8245  ;;  %v4228_v2 = vadd.f32 %v12685_v23, %v2277_v50  ;;  %6527 = vmatprep.subr.bf16.mxu1 %v12686_v33  ;;  %v4896_v36 = vpop.f32.mrf.mxu0  ;;  %8273 = vrcp.f32 %v5955_v6  ;;  %v6947_v54 = vcombine.low %v8440_v11, %v8440_v11 }
 0x4be   :  { %v11753_v48 = vpop.eup %8247  ;;  %v5956_v30 = vadd.f32 1.0, %v8246_v39  ;;  %v5198_v26 = vsub.f32 0.0, %v4893_v59  ;;  %v4897_v15 = vadd.f32 %v4896_v36, %v4224_v18  ;;  %v11755_v28 = vpop.f32.mrf.mxu1  ;;  %8275 = vpow2.f32 %v5673_v22  ;;  %v11770_v22 = vld [vmem:[%s12001_s5 + $0x18] sm:$0xff]  ;;  %s8490_s5 = smov [#allocation6]  }
 0x4bf   :  { %12687 = vst [vmem:[#allocation17_spill] sm:$0xff] %v11755_v28  ;;  %v8250_v52 = vpop.eup %8249  ;;  %v5675_v57 = vmul.f32 1.442695, %v5197_v21  ;;  %v4898_v62 = vpop.f32.mrf.mxu0  ;;  %v12688_v39 = vpack.c.bf16 %v11386_v14, %v11372_v46  ;;  %12689 = vst [vmem:[#allocation57_spill] sm:$0xff] %v11770_v22  ;;  %v12690_v21 = vld [vmem:[#allocation14_spill] sm:$0xff]  ;;  %s6630_s2 = sshll.u32 %s8490_s5, 4  ;;  %s6631_s2 = int_to_ptr.vmem [resolvable:$true] %s6630_s2 }
 0x4c0   :  { %v11762_v37 = vpop.eup %8251  ;;  %8277 = vrcp.f32 %v5956_v30  ;;  %v5957_v6 = vadd.f32 1.0, %v8250_v52  ;;  %v5677_v59 = vmul.f32 1.442695, %v5198_v26  ;;  %v5199_v18 = vsub.f32 0.0, %v4897_v15  ;;  %v6453_v32 = vpop.f32.mrf.mxu1  ;;  %s8461_s18 = scalar_lea.vmem %s6631_s2, 32  ;;  %p8466_p6 = scmp.lt.s32.totalorder %s6631_s2, %s6631_s2 }
 0x4c1   :  { %6528 = vmatpush2.bf16.msra.mxu1 %v12688_v39  ;;  %v8254_v23 = vpop.eup %8253  ;;  %v4230_v33 = vadd.f32 %v12690_v21, %v2277_v50  ;;  %8279 = vpow2.f32 %v5675_v57  ;;  %v4899_v36 = vadd.f32 %v4898_v62, %v4226_v55  ;;  %v4900_v11 = vpop.f32.mrf.mxu0  ;;  %v6950_v50 = vcombine.high %v11770_v22, %v11770_v22  ;;  %v12691_v57 = vld [vmem:[#allocation75_spill] sm:$0xff]  ;;  %p8462_p5 = scmp.ne.s32.totalorder %s6631_s2, %s8461_s18  ;;  %p8467_p7 = scmp.lt.s32.totalorder %s8461_s18, %s8461_s18 }
 0x4c2   :  { %v8256_v26 = vpop.eup %8255  ;;  %8281 = vrcp.f32 %v5957_v6  ;;  %v5958_v15 = vadd.f32 1.0, %v8254_v23  ;;  %v5679_v46 = vmul.f32 1.442695, %v5199_v18  ;;  %v4901_v14 = vadd.f32 %v4900_v11, %v4228_v2  ;;  %v6454_v52 = vpop.f32.mrf.mxu1  ;;  %v12692_v2 = vld [vmem:[#allocation45_spill] sm:$0xff] }
 0x4c3   :  { %v11775_v39 = vpop.eup %8257  ;;  %v5959_v49 = vadd.f32 1.0, %v8256_v26  ;;  %8283 = vpow2.f32 %v5677_v59  ;;  %v5200_v32 = vsub.f32 0.0, %v4899_v36  ;;  %v4902_v28 = vpop.f32.mrf.mxu0  ;;  %v4234_v62 = vadd.f32 %v12691_v57, %v11704_v24  ;;  %p8468_p8 = por %p8467_p7, %p8466_p6 }
 0x4c4   :  { %6530 = vmatmul.mubr.bf16.vlgmr.msra.gmra.mxu1 %v6947_v54  ;;  %v8260_v55 = vpop.eup %8259  ;;  %8285 = vrcp.f32 %v5958_v15  ;;  %v5201_v6 = vsub.f32 0.0, %v4901_v14  ;;  %v4903_v23 = vadd.f32 %v4902_v28, %v4230_v33  ;;  %v4236_v21 = vadd.f32 %v12692_v2, %v11704_v24  ;;  %v12693_v15 = vld [vmem:[#allocation46_spill] sm:$0xff] }
 0x4c5   :  { %v11781_v18 = vpop.eup %8261  ;;  %8287 = vrcp.f32 %v5959_v49  ;;  %v5960_v59 = vadd.f32 1.0, %v8260_v55  ;;  %v5681_v36 = vmul.f32 1.442695, %v5200_v32  ;;  %v4906_v11 = vpop.f32.mrf.mxu0  ;;  %6570 = vmatprep.mubr.bf16.mxu1 %v6950_v50  ;;  %v4238_v28 = vadd.f32 %v12693_v15, %v11716_v8  ;;  %p8469_p9 = pnand %p8468_p8, %p8462_p5 }
 0x4c6   :  { %v8264_v54 = vpop.eup %8263  ;;  %8289 = vpow2.f32 %v5679_v46  ;;  %v5683_v26 = vmul.f32 1.442695, %v5201_v6  ;;  %v5202_v52 = vsub.f32 0.0, %v4903_v23  ;;  %v4907_v30 = vadd.f32 %v4906_v11, %v4234_v62  ;;  %v12694_v46 = vld [vmem:[#allocation70_spill] sm:$0xff] }
 0x4c7   :  { %v11785_v16 = vpop.eup %8265  ;;  %8291 = vrcp.f32 %v5960_v59  ;;  %v5961_v33 = vadd.f32 1.0, %v8264_v54  ;;  %v4908_v14 = vpop.f32.mrf.mxu0  ;;  %v4240_v50 = vadd.f32 %v12694_v46, %v11716_v8  ;;  %v12696_v8 = vld [vmem:[#allocation71_spill] sm:$0xff] }
 0x4c8   :  { %v8268_v57 = vpop.eup %8267  ;;  %8293 = vpow2.f32 %v5681_v36  ;;  %v5685_v24 = vmul.f32 1.442695, %v5202_v52  ;;  %v5203_v49 = vsub.f32 0.0, %v4907_v30  ;;  %v4909_v32 = vadd.f32 %v4908_v14, %v4236_v21 }
 0x4c9   :  { %v11789_v55 = vpop.eup %8269  ;;  %8295 = vrcp.f32 %v5961_v33  ;;  %v5962_v62 = vadd.f32 1.0, %v8268_v57  ;;  %v4910_v6 = vpop.f32.mrf.mxu0  ;;  %v4244_v30 = vadd.f32 %v11359_v44, %v11672_v41 }
 0x4ca   :  { %v8272_v2 = vpop.eup %8271  ;;  %8297 = vpow2.f32 %v5683_v26  ;;  %v5687_v59 = vmul.f32 1.442695, %v5203_v49  ;;  %v5204_v11 = vsub.f32 0.0, %v4909_v32  ;;  %v4911_v54 = vadd.f32 %v4910_v6, %v4238_v28 }
 0x4cb   :  { %v11795_v36 = vpop.eup %8273  ;;  %8299 = vrcp.f32 %v5962_v62  ;;  %v5963_v21 = vadd.f32 1.0, %v8272_v2  ;;  %v4912_v52 = vpop.f32.mrf.mxu0  ;;  %v4246_v28 = vadd.f32 %v11370_v1, %v11672_v41 }
 0x4cc   :  { %v8276_v15 = vpop.eup %8275  ;;  %8301 = vpow2.f32 %v5685_v24  ;;  %v5689_v33 = vmul.f32 1.442695, %v5204_v11  ;;  %v5205_v14 = vsub.f32 0.0, %v4911_v54  ;;  %v4913_v57 = vadd.f32 %v4912_v52, %v4240_v50 }
 0x4cd   :  { %v11801_v26 = vpop.eup %8277  ;;  %8303 = vrcp.f32 %v5963_v21  ;;  %v5964_v49 = vadd.f32 1.0, %v8276_v15  ;;  %v4916_v32 = vpop.f32.mrf.mxu0  ;;  %v4248_v24 = vadd.f32 %v11384_v20, %v11680_v56 }
 0x4ce   :  { %v8280_v44 = vpop.eup %8279  ;;  %8305 = vpow2.f32 %v5687_v59  ;;  %v5691_v46 = vmul.f32 1.442695, %v5205_v14  ;;  %v5206_v62 = vsub.f32 0.0, %v4913_v57  ;;  %v4917_v6 = vadd.f32 %v4916_v32, %v4244_v30 }
 0x4cf   :  { %v11805_v2 = vpop.eup %8281  ;;  %8307 = vrcp.f32 %v5964_v49  ;;  %v5965_v50 = vadd.f32 1.0, %v8280_v44  ;;  %v4918_v11 = vpop.f32.mrf.mxu0 }
 0x4d0   :  { %v8284_v54 = vpop.eup %8283  ;;  %8309 = vpow2.f32 %v5689_v33  ;;  %v5693_v52 = vmul.f32 1.442695, %v5206_v62  ;;  %v5207_v1 = vsub.f32 0.0, %v4917_v6  ;;  %v4919_v41 = vadd.f32 %v4918_v11, %v4246_v28 }
 0x4d1   :  { %v11809_v21 = vpop.eup %8285  ;;  %8311 = vrcp.f32 %v5965_v50  ;;  %v5966_v59 = vadd.f32 1.0, %v8284_v54  ;;  %v4920_v15 = vpop.f32.mrf.mxu0  ;;  %v4250_v33 = vadd.f32 %v11403_v17, %v11680_v56  ;;  %v4254_v28 = vadd.f32 %v11425_v63, %v11638_v9 }
 0x4d2   :  { %v11813_v14 = vpop.eup %8287  ;;  %8313 = vpow2.f32 %v5691_v46  ;;  %v5695_v20 = vmul.f32 1.442695, %v5207_v1  ;;  %v5208_v57 = vsub.f32 0.0, %v4919_v41  ;;  %v4921_v49 = vadd.f32 %v4920_v15, %v4248_v24  ;;  %v12695_v24 = vld [vmem:[#allocation59_spill] sm:$0xff] }
 0x4d3   :  { %v8290_v32 = vpop.eup %8289  ;;  %8315 = vrcp.f32 %v5966_v59  ;;  %v4922_v44 = vpop.f32.mrf.mxu0  ;;  %v4256_v1 = vadd.f32 %v12695_v24, %v11638_v9 }
 0x4d4   :  { %v11821_v6 = vpop.eup %8291  ;;  %v5967_v50 = vadd.f32 1.0, %v8290_v32  ;;  %8317 = vpow2.f32 %v5693_v52  ;;  %v5697_v46 = vmul.f32 1.442695, %v5208_v57  ;;  %v5209_v11 = vsub.f32 0.0, %v4921_v49  ;;  %v12699_v49 = vld [vmem:[#allocation74_spill] sm:$0xff] }
 0x4d5   :  { %v8294_v54 = vpop.eup %8293  ;;  %8319 = vpow2.f32 %v5695_v20  ;;  %v4923_v17 = vadd.f32 %v4922_v44, %v4250_v33  ;;  %v4926_v56 = vpop.f32.mrf.mxu0  ;;  %v4258_v32 = vadd.f32 %v12696_v8, %v11652_v12  ;;  %v4266_v8 = vadd.f32 %v12699_v49, %v11615_v13 }
 0x4d6   :  { %v11825_v41 = vpop.eup %8295  ;;  %8321 = vrcp.f32 %v5967_v50  ;;  %v5968_v63 = vadd.f32 1.0, %v8294_v54  ;;  %v5699_v59 = vmul.f32 1.442695, %v5209_v11  ;;  %v4927_v15 = vadd.f32 %v4926_v56, %v4254_v28  ;;  %v12697_v11 = vld [vmem:[#allocation72_spill] sm:$0xff] }
 0x4d7   :  { %v8298_v23 = vpop.eup %8297  ;;  %8323 = vpow2.f32 %v5697_v46  ;;  %v5210_v52 = vsub.f32 0.0, %v4923_v17  ;;  %v4928_v57 = vpop.f32.mrf.mxu0  ;;  %v4260_v28 = vadd.f32 %v12697_v11, %v11652_v12 }
 0x4d8   :  { %v11831_v9 = vpop.eup %8299  ;;  %8325 = vrcp.f32 %v5968_v63  ;;  %v5969_v20 = vadd.f32 1.0, %v8298_v23  ;;  %v5211_v33 = vsub.f32 0.0, %v4927_v15  ;;  %v4929_v44 = vadd.f32 %v4928_v57, %v4256_v1  ;;  %v12698_v23 = vld [vmem:[#allocation73_spill] sm:$0xff] }
 0x4d9   :  { %v8302_v50 = vpop.eup %8301  ;;  %8327 = vpow2.f32 %v5699_v59  ;;  %v5701_v54 = vmul.f32 1.442695, %v5210_v52  ;;  %v4930_v24 = vpop.f32.mrf.mxu0  ;;  %v4264_v63 = vadd.f32 %v12698_v23, %v11615_v13 }
 0x4da   :  { %v8304_v46 = vpop.eup %8303  ;;  %8329 = vrcp.f32 %v5969_v20  ;;  %v5970_v17 = vadd.f32 1.0, %v8302_v50  ;;  %v5703_v56 = vmul.f32 1.442695, %v5211_v33  ;;  %v5212_v30 = vsub.f32 0.0, %v4929_v44 }
 0x4db   :  { %v8306_v62 = vpop.eup %8305  ;;  %8331 = vpow2.f32 %v5701_v54  ;;  %v4931_v1 = vadd.f32 %v4930_v24, %v4258_v32  ;;  %v4932_v15 = vpop.f32.mrf.mxu0  ;;  %v12700_v32 = vld [vmem:[#allocation22_spill] sm:$0xff] }
 0x4dc   :  { %v8308_v57 = vpop.eup %8307  ;;  %8333 = vrcp.f32 %v5970_v17  ;;  %v5971_v12 = vadd.f32 1.0, %v8306_v62  ;;  %v5705_v59 = vmul.f32 1.442695, %v5212_v30  ;;  %v4933_v52 = vadd.f32 %v4932_v15, %v4260_v28 }
 0x4dd   :  { %v8310_v11 = vpop.eup %8309  ;;  %8335 = vpow2.f32 %v5703_v56  ;;  %v5213_v20 = vsub.f32 0.0, %v4931_v1  ;;  %v4936_v33 = vpop.f32.mrf.mxu0  ;;  %v4268_v24 = vadd.f32 %v12700_v32, %v11621_v29  ;;  %v12701_v1 = vld [vmem:[#allocation36_spill] sm:$0xff] }
 0x4de   :  { %v8312_v44 = vpop.eup %8311  ;;  %8337 = vrcp.f32 %v5971_v12  ;;  %v5972_v50 = vadd.f32 1.0, %v8310_v11  ;;  %v5214_v22 = vsub.f32 0.0, %v4933_v52  ;;  %v4937_v23 = vadd.f32 %v4936_v33, %v4264_v63 }
 0x4df   :  { %v8314_v54 = vpop.eup %8313  ;;  %8339 = vpow2.f32 %v5705_v59  ;;  %v5707_v62 = vmul.f32 1.442695, %v5213_v20  ;;  %v4938_v30 = vpop.f32.mrf.mxu0  ;;  %v6369_v28 = vpack.c.bf16 %v8312_v44, %v8304_v46  ;;  %v4270_v12 = vadd.f32 %v12701_v1, %v11621_v29 }
 0x4e0   :  { %v8316_v17 = vpop.eup %8315  ;;  %8341 = vrcp.f32 %v5972_v50  ;;  %v5973_v15 = vadd.f32 1.0, %v8314_v54  ;;  %v5709_v13 = vmul.f32 1.442695, %v5214_v22  ;;  %v5215_v49 = vsub.f32 0.0, %v4937_v23  ;;  %v12702_v23 = vld [vmem:[#allocation9_spill] sm:$0xff] }
 0x4e1   :  { %v8318_v56 = vpop.eup %8317  ;;  %8343 = vpow2.f32 %v5707_v62  ;;  %v4939_v52 = vadd.f32 %v4938_v30, %v4266_v8  ;;  %v4940_v63 = vpop.f32.mrf.mxu0  ;;  %v6370_v11 = vpack.c.bf16 %v8316_v17, %v8308_v57  ;;  %v4274_v29 = vadd.f32 %v12702_v23, %v11602_v53  ;;  %v12703_v62 = vld [vmem:[#allocation31_spill] sm:$0xff] }
 0x4e2   :  { %v8320_v33 = vpop.eup %8319  ;;  %8345 = vrcp.f32 %v5973_v15  ;;  %v5974_v32 = vadd.f32 1.0, %v8318_v56  ;;  %v5711_v59 = vmul.f32 1.442695, %v5215_v49  ;;  %v4941_v20 = vadd.f32 %v4940_v63, %v4268_v24  ;;  %v12706_v63 = vld [vmem:[#allocation28_spill] sm:$0xff] }
 0x4e3   :  { %v11845_v27 = vpop.eup %8321  ;;  %v5975_v46 = vadd.f32 1.0, %v8320_v33  ;;  %8347 = vpow2.f32 %v5709_v13  ;;  %v5216_v44 = vsub.f32 0.0, %v4939_v52  ;;  %6538 = vmatprep.subr.bf16.mxu1 %v6370_v11  ;;  %v4942_v22 = vpop.f32.mrf.mxu0  ;;  %v4276_v24 = vadd.f32 %v12703_v62, %v11602_v53 }
 0x4e4   :  { %v8324_v50 = vpop.eup %8323  ;;  %8349 = vrcp.f32 %v5974_v32  ;;  %v5217_v8 = vsub.f32 0.0, %v4941_v20  ;;  %v4943_v54 = vadd.f32 %v4942_v22, %v4270_v12  ;;  %6539 = vmatpush1.bf16.msra.mxu1 %v6369_v28  ;;  %v12704_v15 = vpack.c.bf16 %v11831_v9, %v11821_v6  ;;  %v12705_v28 = vld [vmem:[#allocation23_spill] sm:$0xff] }
 0x4e5   :  { %v11849_v57 = vpop.eup %8325  ;;  %8351 = vrcp.f32 %v5975_v46  ;;  %v5976_v30 = vadd.f32 1.0, %v8324_v50  ;;  %v5713_v17 = vmul.f32 1.442695, %v5216_v44  ;;  %v4946_v13 = vpop.f32.mrf.mxu0  ;;  %v4278_v11 = vadd.f32 %v12706_v63, %v12705_v28  ;;  %v12708_v44 = vld [vmem:[#allocation33_spill] sm:$0xff] }
 0x4e6   :  { %6540 = vmatprep.subr.bf16.mxu1 %v12704_v15  ;;  %v8328_v49 = vpop.eup %8327  ;;  %8353 = vpow2.f32 %v5711_v59  ;;  %v5715_v56 = vmul.f32 1.442695, %v5217_v8  ;;  %v5218_v1 = vsub.f32 0.0, %v4943_v54  ;;  %v4947_v52 = vadd.f32 %v4946_v13, %v4274_v29 }
 0x4e7   :  { %v11856_v12 = vpop.eup %8329  ;;  %8355 = vrcp.f32 %v5976_v30  ;;  %v5977_v53 = vadd.f32 1.0, %v8328_v49  ;;  %v4948_v33 = vpop.f32.mrf.mxu0  ;;  %v12707_v9 = vpack.c.bf16 %v11825_v41, %v11813_v14  ;;  %v4280_v22 = vadd.f32 %v12708_v44, %v12705_v28  ;;  %v12710_v30 = vld [vmem:[#allocation43_spill] sm:$0xff] }
 0x4e8   :  { %v8332_v32 = vpop.eup %8331  ;;  %8357 = vpow2.f32 %v5713_v17  ;;  %v5717_v20 = vmul.f32 1.442695, %v5218_v1  ;;  %v5219_v46 = vsub.f32 0.0, %v4947_v52  ;;  %v4949_v6 = vadd.f32 %v4948_v33, %v4276_v24 }
 0x4e9   :  { %6541 = vmatpush1.bf16.msra.mxu1 %v12707_v9  ;;  %v11863_v59 = vpop.eup %8333  ;;  %8359 = vrcp.f32 %v5977_v53  ;;  %v5978_v50 = vadd.f32 1.0, %v8332_v32  ;;  %v12709_v23 = vpack.c.bf16 %v11809_v21, %v11801_v26  ;;  %v4950_v29 = vpop.f32.mrf.mxu0  ;;  %v6371_v8 = vpack.c.bf16 %v11856_v12, %v11845_v27 }
 0x4ea   :  { %v8336_v54 = vpop.eup %8335  ;;  %8361 = vpow2.f32 %v5715_v56  ;;  %v5719_v62 = vmul.f32 1.442695, %v5219_v46  ;;  %v5220_v14 = vsub.f32 0.0, %v4949_v6  ;;  %v4951_v41 = vadd.f32 %v4950_v29, %v4278_v11 }
 0x4eb   :  { %6542 = vmatprep.subr.bf16.mxu1 %v12709_v23  ;;  %v11872_v24 = vpop.eup %8337  ;;  %v4284_v17 = vadd.f32 %v11608_v7, %v12710_v30  ;;  %8363 = vrcp.f32 %v5978_v50  ;;  %v5979_v15 = vadd.f32 1.0, %v8336_v54  ;;  %v4952_v13 = vpop.f32.mrf.mxu0  ;;  %v6372_v26 = vpack.c.bf16 %v11863_v59, %v11849_v57 }
 0x4ec   :  { %v8340_v21 = vpop.eup %8339  ;;  %8365 = vpow2.f32 %v5717_v20  ;;  %v5721_v49 = vmul.f32 1.442695, %v5220_v14  ;;  %v5221_v1 = vsub.f32 0.0, %v4951_v41  ;;  %v4953_v52 = vadd.f32 %v4952_v13, %v4280_v22 }
 0x4ed   :  { %v12711_v56 = vpack.c.bf16 %v11805_v2, %v11795_v36  ;;  %v11881_v28 = vpop.eup %8341  ;;  %v4286_v7 = vadd.f32 %v11617_v34, %v12710_v30  ;;  %8367 = vrcp.f32 %v5979_v15  ;;  %v5980_v63 = vadd.f32 1.0, %v8340_v21  ;;  %v4956_v53 = vpop.f32.mrf.mxu0  ;;  %v12713_v36 = vld [vmem:[#allocation15_spill] sm:$0xff]  ;;  %v12716_v15 = vld [vmem:[#allocation76_spill] sm:$0xff] }
 0x4ee   :  { %v12712_v11 = vpack.c.bf16 %v11789_v55, %v11781_v18  ;;  %v8344_v33 = vpop.eup %8343  ;;  %8369 = vpow2.f32 %v5719_v62  ;;  %v5723_v32 = vmul.f32 1.442695, %v5221_v1  ;;  %v5222_v20 = vsub.f32 0.0, %v4953_v52 }
 0x4ef   :  { %6543 = vmatpush1.bf16.msra.mxu1 %v12711_v56  ;;  %v4957_v46 = vadd.f32 %v4956_v53, %v4284_v17  ;;  %v11888_v6 = vpop.eup %8345  ;;  %v4288_v2 = vadd.f32 %v11632_v3, %v12713_v36  ;;  %8371 = vrcp.f32 %v5980_v63  ;;  %v5981_v9 = vadd.f32 1.0, %v8344_v33  ;;  %v4958_v34 = vpop.f32.mrf.mxu0 }
 0x4f0   :  { %6544 = vmatprep.subr.bf16.mxu1 %v12712_v11  ;;  %v8348_v44 = vpop.eup %8347  ;;  %8373 = vpow2.f32 %v5721_v49  ;;  %v5725_v22 = vmul.f32 1.442695, %v5222_v20  ;;  %v4959_v18 = vadd.f32 %v4958_v34, %v4286_v7  ;;  %v12714_v55 = vpack.c.bf16 %v11785_v16, %v11775_v39 }
 0x4f1   :  { %v5223_v50 = vsub.f32 0.0, %v4957_v46  ;;  %v11895_v23 = vpop.eup %8349  ;;  %8375 = vrcp.f32 %v5981_v9  ;;  %v5982_v29 = vadd.f32 1.0, %v8348_v44  ;;  %v12715_v54 = vpack.c.bf16 %v11762_v37, %v11741_v45  ;;  %v4960_v3 = vpop.f32.mrf.mxu0 }
 0x4f2   :  { %v6373_v62 = vpack.c.bf16 %v11888_v6, %v11872_v24  ;;  %v11902_v14 = vpop.eup %8351  ;;  %8377 = vpow2.f32 %v5723_v32  ;;  %v5224_v30 = vsub.f32 0.0, %v4959_v18  ;;  %v4961_v17 = vadd.f32 %v4960_v3, %v4288_v2 }
 0x4f3   :  { %6545 = vmatpush1.bf16.msra.mxu1 %v12714_v55  ;;  %v5727_v41 = vmul.f32 1.442695, %v5223_v50  ;;  %v8354_v16 = vpop.eup %8353  ;;  %v4290_v39 = vadd.f32 %v11654_v40, %v12713_v36  ;;  %v4294_v13 = vadd.f32 %v11674_v31, %v12716_v15  ;;  %8379 = vrcp.f32 %v5982_v29  ;;  %v4962_v45 = vpop.f32.mrf.mxu0 }
 0x4f4   :  { %6546 = vmatprep.subr.bf16.mxu1 %v12715_v54  ;;  %v6374_v37 = vpack.c.bf16 %v11895_v23, %v11881_v28  ;;  %v11910_v21 = vpop.eup %8355  ;;  %v5983_v49 = vadd.f32 1.0, %v8354_v16  ;;  %8381 = vpow2.f32 %v5725_v22  ;;  %v5729_v1 = vmul.f32 1.442695, %v5224_v30 }
 0x4f5   :  { %v5225_v52 = vsub.f32 0.0, %v4961_v17  ;;  %v12717_v56 = vpack.c.bf16 %v11753_v48, %v11736_v35  ;;  %v8358_v7 = vpop.eup %8357  ;;  %v4296_v40 = vadd.f32 %v11694_v58, %v12716_v15  ;;  %8383 = vpow2.f32 %v5727_v41  ;;  %v4966_v11 = vpop.f32.mrf.mxu0  ;;  %v12719_v35 = vld [vmem:[#allocation13_spill] sm:$0xff] }
 0x4f6   :  { %v4963_v31 = vadd.f32 %v4962_v45, %v4290_v39  ;;  %v12718_v63 = vpack.c.bf16 %v11724_v38, %v11702_v60  ;;  %v11920_v53 = vpop.eup %8359  ;;  %8385 = vrcp.f32 %v5983_v49  ;;  %v5984_v33 = vadd.f32 1.0, %v8358_v7 }
 0x4f7   :  { %6547 = vmatpush1.bf16.msra.mxu1 %v12717_v56  ;;  %v5731_v32 = vmul.f32 1.442695, %v5225_v52  ;;  %v4967_v20 = vadd.f32 %v4966_v11, %v4294_v13  ;;  %v8362_v46 = vpop.eup %8361  ;;  %v4298_v48 = vadd.f32 %v11718_v10, %v12719_v35  ;;  %8387 = vpow2.f32 %v5729_v1  ;;  %v4968_v58 = vpop.f32.mrf.mxu0 }
 0x4f8   :  { %6548 = vmatprep.subr.bf16.mxu1 %v12718_v63  ;;  %v5226_v36 = vsub.f32 0.0, %v4963_v31  ;;  %v6375_v2 = vpack.c.bf16 %v11920_v53, %v11902_v14  ;;  %v11926_v9 = vpop.eup %8363  ;;  %8389 = vrcp.f32 %v5984_v33  ;;  %v5985_v60 = vadd.f32 1.0, %v8362_v46  ;;  %v12724_v63 = vld [vmem:[#allocation16_spill] sm:$0xff] }
 0x4f9   :  { %v5227_v38 = vsub.f32 0.0, %v4967_v20  ;;  %v4969_v34 = vadd.f32 %v4968_v58, %v4296_v40  ;;  %v12720_v44 = vpack.c.bf16 %v11714_v4, %v11692_v25  ;;  %v8366_v22 = vpop.eup %8365  ;;  %v4300_v10 = vadd.f32 %v11738_v0, %v12719_v35  ;;  %v4970_v55 = vpop.f32.mrf.mxu0  ;;  %v12727_v14 = vld [vmem:[#allocation40_spill] sm:$0xff] }
 0x4fa   :  { %8391 = vpow2.f32 %v5731_v32  ;;  %v5733_v50 = vmul.f32 1.442695, %v5226_v36  ;;  %v12721_v18 = vpack.c.bf16 %v11685_v51, %v11665_v47  ;;  %v6376_v29 = vpack.c.bf16 %v11926_v9, %v11910_v21  ;;  %v11938_v54 = vpop.eup %8367 }
 0x4fb   :  { %6549 = vmatpush1.bf16.msra.mxu1 %v12720_v44  ;;  %8393 = vrcp.f32 %v5985_v60  ;;  %v5986_v3 = vadd.f32 1.0, %v8366_v22  ;;  %v5735_v4 = vmul.f32 1.442695, %v5227_v38  ;;  %v5228_v25 = vsub.f32 0.0, %v4969_v34  ;;  %v8370_v41 = vpop.eup %8369  ;;  %v4972_v0 = vpop.f32.mrf.mxu0 }
 0x4fc   :  { %6550 = vmatprep.subr.bf16.mxu1 %v12721_v18  ;;  %8395 = vpow2.f32 %v5733_v50  ;;  %v4971_v30 = vadd.f32 %v4970_v55, %v4298_v48  ;;  %v11940_v17 = vpop.eup %8371  ;;  %v5987_v16 = vadd.f32 1.0, %v8370_v41  ;;  %v4973_v51 = vadd.f32 %v4972_v0, %v4300_v10 }
 0x4fd   :  { %8397 = vrcp.f32 %v5986_v3  ;;  %v5737_v47 = vmul.f32 1.442695, %v5228_v25  ;;  %v12722_v39 = vpack.c.bf16 %v11676_v5, %v11656_v42  ;;  %v8374_v15 = vpop.eup %8373  ;;  %v12723_v45 = vpack.c.bf16 %v11643_v43, %v11625_v61 }
 0x4fe   :  { %8399 = vpow2.f32 %v5735_v4  ;;  %v5229_v13 = vsub.f32 0.0, %v4971_v30  ;;  %v11948_v49 = vpop.eup %8375  ;;  %v5988_v1 = vadd.f32 1.0, %v8374_v15  ;;  %v5230_v52 = vsub.f32 0.0, %v4973_v51 }
 0x4ff   :  { %6551 = vmatpush1.bf16.msra.mxu1 %v12722_v39  ;;  %8401 = vrcp.f32 %v5987_v16  ;;  %v8378_v56 = vpop.eup %8377  ;;  %v6377_v40 = vpack.c.bf16 %v11948_v49, %v11938_v54  ;;  %v12725_v61 = vpack.c.bf16 %v11634_v19, %v12724_v63  ;;  %v12726_v54 = vld [vmem:[#allocation57_spill] sm:$0xff] }
 0x500   :  { %6552 = vmatprep.subr.bf16.mxu1 %v12723_v45  ;;  %8403 = vpow2.f32 %v5737_v47  ;;  %v5739_v7 = vmul.f32 1.442695, %v5229_v13  ;;  %v11952_v42 = vpop.eup %8379  ;;  %v5989_v5 = vadd.f32 1.0, %v8378_v56  ;;  %v5741_v31 = vmul.f32 1.442695, %v5230_v52  ;;  %v11959_v46 = vpop.f32.mrf.mxu1 }
 0x501   :  { %8405 = vrcp.f32 %v5988_v1  ;;  %v8382_v43 = vpop.eup %8381  ;;  %v6378_v11 = vpack.c.bf16 %v11952_v42, %v11940_v17  ;;  %v6949_v21 = vcombine.low %v12726_v54, %v12726_v54  ;;  %v6491_v28 = vadd.f32 %v11959_v46, %v12727_v14 }
 0x502   :  { %8407 = vpow2.f32 %v5739_v7  ;;  %v8384_v33 = vpop.eup %8383  ;;  %v5990_v32 = vadd.f32 1.0, %v8382_v43  ;;  %v11961_v58 = vpop.f32.mrf.mxu1 }
 0x503   :  { %6553 = vmatpush1.bf16.msra.mxu1 %v12725_v61  ;;  %8409 = vrcp.f32 %v5989_v5  ;;  %v8386_v20 = vpop.eup %8385  ;;  %v5991_v48 = vadd.f32 1.0, %v8384_v33 }
 0x504   :  { %8411 = vpow2.f32 %v5741_v31  ;;  %v8388_v35 = vpop.eup %8387  ;;  %v6494_v44 = vpop.f32.mrf.mxu1 }
 0x505   :  { %8413 = vrcp.f32 %v5990_v32  ;;  %v8390_v36 = vpop.eup %8389  ;;  %v5992_v60 = vadd.f32 1.0, %v8388_v35 }
 0x506   :  { %8415 = vrcp.f32 %v5991_v48  ;;  %v6495_v55 = vpop.f32.mrf.mxu1 }
 0x507   :  { %v8392_v19 = vpop.eup %8391 }
 0x508   :  { %v8394_v38 = vpop.eup %8393  ;;  %v5993_v34 = vadd.f32 1.0, %v8392_v19 }
 0x509   :  { %v8396_v22 = vpop.eup %8395  ;;  %v6379_v10 = vpack.c.bf16 %v8394_v38, %v8386_v20 }
 0x50a   :  { %v8398_v50 = vpop.eup %8397  ;;  %8417 = vrcp.f32 %v5993_v34  ;;  %v5994_v18 = vadd.f32 1.0, %v8396_v22 }
 0x50b   :  { %v8400_v3 = vpop.eup %8399  ;;  %8419 = vrcp.f32 %v5992_v60  ;;  %v6380_v4 = vpack.c.bf16 %v8398_v50, %v8390_v36 }
 0x50c   :  { %v8402_v25 = vpop.eup %8401  ;;  %8421 = vrcp.f32 %v5994_v18  ;;  %v5995_v30 = vadd.f32 1.0, %v8400_v3 }
 0x50d   :  { %v8404_v41 = vpop.eup %8403 }
 0x50e   :  { %v8406_v0 = vpop.eup %8405  ;;  %v5996_v47 = vadd.f32 1.0, %v8404_v41  ;;  %8423 = vrcp.f32 %v5995_v30 }
 0x50f   :  { %v8408_v16 = vpop.eup %8407 }
 0x510   :  { %v8410_v51 = vpop.eup %8409  ;;  %v5997_v39 = vadd.f32 1.0, %v8408_v16 }
 0x511   :  { %v8412_v15 = vpop.eup %8411  ;;  %v6381_v13 = vpack.c.bf16 %v8410_v51, %v8402_v25 }
 0x512   :  { %v8414_v45 = vpop.eup %8413  ;;  %8425 = vrcp.f32 %v5997_v39  ;;  %v5998_v1 = vadd.f32 1.0, %v8412_v15 }
 0x513   :  { %8427 = vrcp.f32 %v5996_v47  ;;  %v6382_v52 = vpack.c.bf16 %v8414_v45, %v8406_v0  ;;  %v8416_v56 = vpop.eup %8415 }
 0x514   :  { %8429 = vrcp.f32 %v5998_v1 }
 0x517   :  { %v8418_v7 = vpop.eup %8417 }
 0x518   :  { %v8420_v5 = vpop.eup %8419  ;;  %v6383_v31 = vpack.c.bf16 %v8418_v7, %v8416_v56 }
 0x519   :  { %v8422_v63 = vpop.eup %8421 }
 0x51a   :  { %v6384_v61 = vpack.c.bf16 %v8422_v63, %v8420_v5 }
 0x51b   :  { %v8424_v43 = vpop.eup %8423 }
 0x51f   :  { %v8426_v33 = vpop.eup %8425 }
 0x520   :  { %v8428_v32 = vpop.eup %8427  ;;  %v6385_v20 = vpack.c.bf16 %v8426_v33, %v8424_v43 }
 0x521   :  { %v8430_v35 = vpop.eup %8429 }
 0x522   :  { %v6386_v48 = vpack.c.bf16 %v8430_v35, %v8428_v32 }
 0x524   :  { %6554 = vmatprep.subr.bf16.mxu1 %v6386_v48 }
 0x525   :  { %6555 = vmatpush2.bf16.msra.mxu1 %v6385_v20 }
 0x526   :  { %6556 = vmatprep.subr.bf16.mxu1 %v6384_v61 }
 0x529   :  { %6557 = vmatpush2.bf16.msra.mxu1 %v6383_v31 }
 0x52a   :  { %6558 = vmatprep.subr.bf16.mxu1 %v6382_v52 }
 0x52d   :  { %6559 = vmatpush2.bf16.msra.mxu1 %v6381_v13 }
 0x52e   :  { %6560 = vmatprep.subr.bf16.mxu1 %v6380_v4 }
 0x531   :  { %6561 = vmatpush2.bf16.msra.mxu1 %v6379_v10  ;;  %v8489_v10 = vmov 1966171168  }
 0x532   :  { %6562 = vmatprep.subr.bf16.mxu1 %v6378_v11  ;;  %v6605_v50 = vunpack.c.l.s4 %v8489_v10 }
 0x534   :  { %v6606_v18 = vunpack.c.0.s8 %v6605_v50 }
 0x535   :  { %6563 = vmatpush2.bf16.msra.mxu1 %v6377_v40 }
 0x536   :  { %6564 = vmatprep.subr.bf16.mxu1 %v6376_v29  ;;  %v6583_v29 = vpop.permute.xlu0 %6582 }
 0x539   :  { %6565 = vmatpush2.bf16.msra.mxu1 %v6375_v2 }
 0x53a   :  { %6566 = vmatprep.subr.bf16.mxu1 %v6374_v37  ;;  %v12728_v37 = vld [vmem:[#allocation17_spill] sm:$0xff] }
 0x53b   :  { %v6493_v24 = vadd.f32 %v11961_v58, %v12728_v37 }
 0x53d   :  { %6567 = vmatpush2.bf16.msra.mxu1 %v6373_v62 }
 0x53e   :  { %6568 = vmatprep.subr.bf16.mxu1 %v6372_v26  ;;  %v6585_v26 = vlaneseq }
 0x540   :  { %v6586_v2 = vshrl.u32 %v6585_v26, 7  ;;  %vm6621_vm0 = vcmp.lt.s32.totalorder %v6585_v26, 256 }
 0x541   :  { %6569 = vmatpush2.bf16.msra.mxu1 %v6371_v8 }
 0x542   :  { %v6587_v9 = vsub.s32 0, %v6586_v2  ;;  %v6609_v3 = vsub.s32 %v6606_v18, %v6586_v2 }
 0x544   :  { %6571 = vmatmul.mubr.bf16.vlgmr.msra.gmra.mxu1 %v6949_v21  ;;  %v6588_v27 = vrot.slane %v6583_v29, %v6587_v9 }
 0x584   :  { %v6531_v23 = vpop.f32.mrf.mxu1 }
 0x585   :  { %v6532_v6 = vadd.f32 %v6531_v23, %v6491_v28 }
 0x586   :  { %v6533_v62 = vpop.f32.mrf.mxu1 }
 0x587   :  { %v6534_v53 = vadd.f32 %v6533_v62, %v6493_v24 }
 0x588   :  { %v6535_v57 = vpop.f32.mrf.mxu1 }
 0x58a   :  { %v6536_v59 = vpop.f32.mrf.mxu1 }
 0x604   :  { %v6572_v17 = vpop.f32.mrf.mxu1 }
 0x605   :  { %v6573_v12 = vadd.f32 %v6572_v17, %v6532_v6 }
 0x606   :  { %v6574_v8 = vpop.f32.mrf.mxu1 }
 0x607   :  { %v6589_v49 = vadd.f32 %v6588_v27, %v6573_v12  ;;  %v6575_v40 = vadd.f32 %v6574_v8, %v6534_v53 }
 0x608   :  { %v6576_v42 = vpop.f32.mrf.mxu1 }
 0x609   :  { %v6591_v11 = vsub.f32 0.0, %v6589_v49  ;;  %v6590_v46 = vadd.f32 %v6588_v27, %v6575_v40 }
 0x60a   :  { %v6577_v36 = vpop.f32.mrf.mxu1 }
 0x60b   :  { %v6593_v58 = vmul.f32 1.442695, %v6591_v11  ;;  %v6592_v19 = vsub.f32 0.0, %v6590_v46 }
 0x60d   :  { %8431 = vpow2.f32 %v6593_v58  ;;  %v6595_v60 = vmul.f32 1.442695, %v6592_v19 }
 0x60f   :  { %8433 = vpow2.f32 %v6595_v60 }
 0x61a   :  { %v8432_v38 = vpop.eup %8431 }
 0x61b   :  { %v6597_v34 = vadd.f32 1.0, %v8432_v38 }
 0x61c   :  { %v8434_v44 = vpop.eup %8433 }
 0x61d   :  { %v6598_v22 = vadd.f32 1.0, %v8434_v44  ;;  %8435 = vrcp.f32 %v6597_v34 }
 0x61f   :  { %8437 = vrcp.f32 %v6598_v22 }
 0x62a   :  { %v8436_v55 = vpop.eup %8435 }
 0x62c   :  { %v8438_v4 = vpop.eup %8437 }
 0x62d   :  { %v6603_v25 = vcombine.low %v8436_v55, %v8438_v4 }
 0x62f   :  { %v6610_v41 = vrot.slane %v6603_v25, %v6609_v3 }
 0x631   :  { %v6617_v30 = vrot.slane %v6610_v41, %v6609_v3 }
 0x633   :  { %6623 = vst.msk [vmem:[#allocation6] sm:$0x3] %vm6621_vm0, %v6617_v30 }
 0x634   :  { %8472 = shalt.err (!%p8469_p9)
}
 0x635   :  { %6633 = dma.vmem_to_hbm [thread:$0]  %s6631_s2, 32, %s12003_s7, [#allocation5]  }
 0x636   :  { %8483 = dma.done.wait [#allocation5], 32  }
 0x637   :  { %8484 = vsyncadd [#allocation5], 4294967264 }
 0x638   :  { %6637 = vsyncpa [#allocation4], 1 }
 0x639   :  { %6638 = vsyncpa [#allocation5], 1 }

</bundles_post_ra>
